<compile_context>
chip_gen: v7x
topology: tpu7x:2x2x1
jax: 0.10.0
libtpu: 0.0.40
codegen_flags: <defaults>
</compile_context>

<pallas_src>
from functools import lru_cache

import numpy as np
import jax
import jax.numpy as jnp
from jax.experimental import pallas as pl
from jax.experimental.pallas import tpu as pltpu


# ----------------------------------------------------------------------------
# Tiling helper
# ----------------------------------------------------------------------------
def _pick_tile(m, cap=512):
    """Row-tile size: large (amortize ~0.35us/grid-step), multiple of 8 (masked tail OK),
    and always >=2 grid steps so dual-TensorCore chips (v7x) use both cores."""
    if m <= 8:
        return int(m)
    half = -(-m // 2)            # ceil(m/2)  -> >= 2 steps
    half = -(-half // 8) * 8     # round up to multiple of 8
    return int(min(cap, half))


# ----------------------------------------------------------------------------
# Kernel 1: FFT high-pass filter (the reference `dct()`), rank-2 factored and
#           DC-frequency specialized.
#   out = | ifft2( fft2(X) with freqs {0,H-1} x {0,W-1} zeroed ) | = | X - Q |
#   Q = sum_{i,j} U_A[:,i] (V_A[i] . X . U_B[:,j]) V_B[j]
#   with i=j=0 the DC terms (all-real constants 1, 1/H, 1, 1/W).
# ----------------------------------------------------------------------------
@lru_cache(maxsize=None)
def _dct_rank2_operators(H, W):
    # Only the non-trivial complex frequency (H-1 / W-1) is stored; the DC frequency is
    # folded into constants inside the kernel.  Valid for even H, W (fftshift center 2x2).
    assert H % 2 == 0 and W % 2 == 0, "dct high-pass specialization assumes even H, W"
    n = np.arange(H)
    va1 = np.exp(+2j * np.pi * n / H)          # V_A[1][a]  = exp(-2pi i (H-1) a / H)
    ua1 = np.exp(-2j * np.pi * n / H) / H      # U_A[n, 1]
    m = np.arange(W)
    ub1 = np.exp(+2j * np.pi * m / W)          # U_B[b, 1]
    vb1 = np.exp(-2j * np.pi * m / W) / W      # V_B[1][m]
    aops = np.stack([va1.real, va1.imag, ua1.real, ua1.imag],
                    axis=-1).astype(np.float32).reshape(1, H, 4)
    bops = np.stack([ub1.real, ub1.imag, vb1.real, vb1.imag],
                    axis=0).astype(np.float32).reshape(1, 4, W)
    return aops, bops


def _make_dct_kernel(H, W):
    inv_h = 1.0 / H
    inv_w = 1.0 / W

    def kernel(x_ref, a_ref, b_ref, o_ref):
        x = x_ref[...]                                   # (CB, H, W) f32
        va1_re = a_ref[:, :, 0:1]                        # (1, H, 1)
        va1_im = a_ref[:, :, 1:2]
        ua1_re = a_ref[:, :, 2:3]
        ua1_im = a_ref[:, :, 3:4]
        ub1_re = b_ref[:, 0:1, :]                        # (1, 1, W)
        ub1_im = b_ref[:, 1:2, :]
        vb1_re = b_ref[:, 2:3, :]
        vb1_im = b_ref[:, 3:4, :]

        # Row-frequency projections (reduce over H / sublane axis).
        # DC row (freq 0): V_A[0] == 1 -> plain column sum, purely real.
        t0 = jnp.sum(x, axis=1, keepdims=True)                     # (CB, 1, W)
        t1_re = jnp.sum(x * va1_re, axis=1, keepdims=True)
        t1_im = jnp.sum(x * va1_im, axis=1, keepdims=True)

        # Column-frequency projections (reduce over W / lane axis).
        # DC col (freq 0): U_B[:,0] == 1 -> plain row sum.
        s00 = jnp.sum(t0, axis=2, keepdims=True)                   # (CB, 1, 1)
        s01_re = jnp.sum(t0 * ub1_re, axis=2, keepdims=True)
        s01_im = jnp.sum(t0 * ub1_im, axis=2, keepdims=True)
        s10_re = jnp.sum(t1_re, axis=2, keepdims=True)
        s10_im = jnp.sum(t1_im, axis=2, keepdims=True)
        s11_re = jnp.sum(t1_re * ub1_re - t1_im * ub1_im, axis=2, keepdims=True)
        s11_im = jnp.sum(t1_re * ub1_im + t1_im * ub1_re, axis=2, keepdims=True)

        # Expand back along W with V_B (V_B[0] == 1/W, real).
        r0_re = s00 * inv_w + s01_re * vb1_re - s01_im * vb1_im    # (CB, 1, W)
        r0_im = s01_re * vb1_im + s01_im * vb1_re
        r1_re = s10_re * inv_w + s11_re * vb1_re - s11_im * vb1_im
        r1_im = s10_im * inv_w + s11_re * vb1_im + s11_im * vb1_re

        # Expand back along H with U_A (U_A[:,0] == 1/H, real).
        q_re = inv_h * r0_re + ua1_re * r1_re - ua1_im * r1_im     # (CB, H, W)
        q_im = inv_h * r0_im + ua1_re * r1_im + ua1_im * r1_re
        d_re = x - q_re
        o_ref[...] = jnp.sqrt(d_re * d_re + q_im * q_im).astype(o_ref.dtype)

    return kernel


def dct_highpass(x):
    """Pallas equivalent of the reference `dct()` (per-channel FFT high-pass).
    Internal math in f32; result stored as bf16 (downstream consumers are bf16)."""
    B, C, H, W = x.shape
    BC = B * C
    aops_np, bops_np = _dct_rank2_operators(H, W)
    aops = jnp.asarray(aops_np)
    bops = jnp.asarray(bops_np)
    # Double-buffered f32 input + bf16 output blocks: 12 bytes/elem of block budget.
    # Keep blocks within ~12 MiB (headroom for reduction temporaries under the 32 MiB
    # limit) and expose >=2 blocks for dual-TC chips.
    budget = 12 << 20
    max_cb = max(1, budget // (12 * H * W))
    cb = BC if BC < 2 else -(-BC // 2)
    cb = int(min(cb, max_cb))
    nb = int(pl.cdiv(BC, cb))
    xf = x.reshape(BC, H, W).astype(jnp.float32)
    out = pl.pallas_call(
        _make_dct_kernel(H, W),
        out_shape=jax.ShapeDtypeStruct((BC, H, W), jnp.bfloat16),
        grid=(nb,),
        in_specs=[
            pl.BlockSpec((cb, H, W), lambda i: (i, 0, 0)),
            pl.BlockSpec((1, H, 4), lambda i: (0, 0, 0)),
            pl.BlockSpec((1, 4, W), lambda i: (0, 0, 0)),
        ],
        out_specs=pl.BlockSpec((cb, H, W), lambda i: (i, 0, 0)),
        compiler_params=pltpu.CompilerParams(
            dimension_semantics=("parallel",),
            vmem_limit_bytes=32 << 20),
    )(xf, aops, bops)
    return out.reshape(B, C, H, W)


# ----------------------------------------------------------------------------
# Kernel 2: dual-source patch-embed: one row-tile -> [rgb@Wr || dct@Wd] + b, lane-dense
# ----------------------------------------------------------------------------
def _patch_embed_kernel(xr_ref, xd_ref, wr_ref, wd_ref, b_ref, o_ref):
    yr = jnp.dot(xr_ref[...], wr_ref[...], preferred_element_type=jnp.float32)
    yd = jnp.dot(xd_ref[...], wd_ref[...], preferred_element_type=jnp.float32)
    y = jnp.concatenate([yr, yd], axis=1) + b_ref[...]
    o_ref[...] = y.astype(o_ref.dtype)


def _extract_patches(x, p):
    # [B, C, H, W] -> [B, N, C*p*p]   (non-overlapping p x p patches, conv-stride-p style)
    B, C, H, W = x.shape
    x = x.reshape(B, C, H // p, p, W // p, p)
    x = jnp.transpose(x, (0, 2, 4, 1, 3, 5))
    return x.reshape(B, (H // p) * (W // p), C * p * p)


def fused_patch_embed(x_rgb, x_dct, p, sp):
    """One pallas_call per scale handling BOTH backbones; returns the (B, N, 2*Dout)
    feature slab [rgb || dct] — this *is* the torch.cat the fuse head consumes."""
    B = x_rgb.shape[0]
    pr = _extract_patches(x_rgb, p)
    pd = _extract_patches(x_dct, p)
    N, Din = pr.shape[1], pr.shape[2]
    Dout = sp["w_rgb"].shape[1]
    M = B * N
    xr = pr.reshape(M, Din)
    xd = pd.reshape(M, Din)
    tm = _pick_tile(M)
    out = pl.pallas_call(
        _patch_embed_kernel,
        out_shape=jax.ShapeDtypeStruct((M, 2 * Dout), jnp.bfloat16),
        grid=(pl.cdiv(M, tm),),
        in_specs=[
            pl.BlockSpec((tm, Din), lambda i: (i, 0)),
            pl.BlockSpec((tm, Din), lambda i: (i, 0)),
            pl.BlockSpec((Din, Dout), lambda i: (0, 0)),
            pl.BlockSpec((Din, Dout), lambda i: (0, 0)),
            pl.BlockSpec((1, 2 * Dout), lambda i: (0, 0)),
        ],
        out_specs=pl.BlockSpec((tm, 2 * Dout), lambda i: (i, 0)),
        compiler_params=pltpu.CompilerParams(dimension_semantics=("parallel",)),
    )(xr, xd, sp["w_rgb"], sp["w_dct"], sp["b_cat"])
    return out.reshape(B, N, 2 * Dout)


# ----------------------------------------------------------------------------
# Kernel 3: concatFuse / concatFuse2 head on the [rgb || dct] slab:
#           Linear(2D, D) -> GELU -> Linear(D, D)
# ----------------------------------------------------------------------------
def _fuse_mlp_kernel(x_ref, w1_ref, b1_ref, w2_ref, b2_ref, o_ref):
    h = jnp.dot(x_ref[...], w1_ref[...], preferred_element_type=jnp.float32) + b1_ref[...]
    # tanh-approx GELU routes through the EUP slot; differs from torch's exact erf GELU
    # by <~1e-3 in activation value.
    h = jax.nn.gelu(h, approximate=True).astype(jnp.bfloat16)
    y = jnp.dot(h, w2_ref[...], preferred_element_type=jnp.float32) + b2_ref[...]
    o_ref[...] = y.astype(o_ref.dtype)


def concat_fuse(slab, fp):
    # slab: (B, N, 2D) bf16 feature slab == torch.cat([rgb_fea, dct_fea], dim=2)
    B, N, D2 = slab.shape
    Dh = fp["w1"].shape[1]
    Dout = fp["w2"].shape[1]
    M = B * N
    x2 = slab.reshape(M, D2)
    tm = _pick_tile(M)
    out = pl.pallas_call(
        _fuse_mlp_kernel,
        out_shape=jax.ShapeDtypeStruct((M, Dout), jnp.bfloat16),
        grid=(pl.cdiv(M, tm),),
        in_specs=[
            pl.BlockSpec((tm, D2), lambda i: (i, 0)),
            pl.BlockSpec((D2, Dh), lambda i: (0, 0)),
            pl.BlockSpec((1, Dh), lambda i: (0, 0)),
            pl.BlockSpec((Dh, Dout), lambda i: (0, 0)),
            pl.BlockSpec((1, Dout), lambda i: (0, 0)),
        ],
        out_specs=pl.BlockSpec((tm, Dout), lambda i: (i, 0)),
        compiler_params=pltpu.CompilerParams(dimension_semantics=("parallel",)),
    )(x2, fp["w1"], fp["b1"], fp["w2"], fp["b2"])
    return out.reshape(B, N, Dout)


# ----------------------------------------------------------------------------
# Parameter init (deterministic, PyTorch nn.Linear-style uniform); MXU weights in bf16
# ----------------------------------------------------------------------------
_SCALES = ((16, 384), (8, 64), (4, 64))   # (patch size, embed dim) for 1/16, 1/8, 1/4


def _init_linear(key, din, dout):
    k1, k2 = jax.random.split(key)
    lim = 1.0 / np.sqrt(din)
    w = jax.random.uniform(k1, (din, dout), jnp.float32, -lim, lim)
    b = jax.random.uniform(k2, (dout,), jnp.float32, -lim, lim)
    return w, b


def init_params(key):
    keys = jax.random.split(key, 10)
    # TODO(synk): T2t_vit_t_14 backbone source not provided; deterministic patch-embed
    # stand-ins producing the 1/16 (384-d), 1/8 (64-d), 1/4 (64-d) token features.
    embed = []
    for si, (p, dout) in enumerate(_SCALES):
        din = 3 * p * p
        wr, br = _init_linear(keys[2 * si], din, dout)
        wd, bd = _init_linear(keys[2 * si + 1], din, dout)
        embed.append({
            "w_rgb": wr.astype(jnp.bfloat16),
            "w_dct": wd.astype(jnp.bfloat16),
            "b_cat": jnp.concatenate([br, bd]).reshape(1, 2 * dout),   # f32
        })
    params = {"embed": embed}

    def fuse_params(k_pair, d):
        w1, b1 = _init_linear(k_pair[0], 2 * d, d)
        w2, b2 = _init_linear(k_pair[1], d, d)
        return {
            "w1": w1.astype(jnp.bfloat16),
            "b1": b1.reshape(1, d),
            "w2": w2.astype(jnp.bfloat16),
            "b2": b2.reshape(1, d),
        }

    params["concatFuse"] = fuse_params(keys[6:8], 384)   # Linear(768,384)->GELU->Linear(384,384)
    params["concatFuse2"] = fuse_params(keys[8:10], 64)  # Linear(128,64)->GELU->Linear(64,64)
    return params


# ----------------------------------------------------------------------------
# Forward pass
# ----------------------------------------------------------------------------
def image_depth_net2_forward(image_input, params):
    # dct() preprocessing (exact FFT high-pass semantics, rank-2 factored, in Pallas)
    dct_input = dct_highpass(image_input)

    rgb_bf = image_input.astype(jnp.bfloat16)
    slab16, slab8, slab4 = [
        fused_patch_embed(rgb_bf, dct_input, p, sp)
        for (p, _), sp in zip(_SCALES, params["embed"])
    ]

    fea_1_16 = concat_fuse(slab16, params["concatFuse"])
    # TODO(synk): Transformer(embed_dim=384, depth=4, num_heads=6) source not provided; pass-through.
    # TODO(synk): token_Transformer source not provided; saliency/contour token branches omitted.

    # concatFuse2 shares weights between the 1/8 and 1/4 scales: two calls, same weight
    # arrays — no jnp.concatenate materialization of the merged token tensor.
    fea_1_8 = concat_fuse(slab8, params["concatFuse2"])
    fea_1_4 = concat_fuse(slab4, params["concatFuse2"])
    # TODO(synk): Decoder source not provided; returning the fused multi-scale token features.
    return fea_1_16, fea_1_8, fea_1_4


# ----------------------------------------------------------------------------
if __name__ == "__main__":
    B, C, IMG = 2, 3, 64   # tokens: 1/16 -> 16, 1/8 -> 64, 1/4 -> 256

    key = jax.random.PRNGKey(0)
    k_img, k_par = jax.random.split(key)
    image_input = jax.random.uniform(k_img, (B, C, IMG, IMG), jnp.float32)
    params = init_params(k_par)

    fwd = jax.jit(image_depth_net2_forward)
    outs = jax.block_until_ready(fwd(image_input, params))

    assert outs[0].shape == (B, (IMG // 16) ** 2, 384)
    assert outs[1].shape == (B, (IMG // 8) ** 2, 64)
    assert outs[2].shape == (B, (IMG // 4) ** 2, 64)
    assert all(bool(jnp.all(jnp.isfinite(o.astype(jnp.float32)))) for o in outs)
    print("KERNEL_OK")
</pallas_src>

<mosaic_0001>
module attributes {stable_mosaic.version = 11 : i64} {
  func.func @kernel(%arg0: i32, %arg1: memref<3x64x64xf32, #tpu.memory_space<vmem>>, %arg2: memref<1x64x4xf32, #tpu.memory_space<vmem>>, %arg3: memref<1x4x64xf32, #tpu.memory_space<vmem>>, %arg4: memref<3x64x64xbf16, #tpu.memory_space<vmem>>) attributes {dimension_semantics = [#tpu.dimension_semantics<parallel>], iteration_bounds = array<i64: 2>, scalar_prefetch = 0 : i64, scratch_operands = 0 : i64, tpu.core_type = #tpu.core_type<tc>, window_params = [{transform_indices = @transform_0, window_bounds = array<i64: 3, 64, 64>}, {pipeline_mode = #tpu.pipeline_mode<synchronous>, transform_indices = @transform_1, window_bounds = array<i64: 1, 64, 4>}, {pipeline_mode = #tpu.pipeline_mode<synchronous>, transform_indices = @transform_2, window_bounds = array<i64: 1, 4, 64>}, {transform_indices = @transform_3, window_bounds = array<i64: 3, 64, 64>}]} {
    %c0 = arith.constant 0 : index
    %c0_0 = arith.constant 0 : index
    %c0_1 = arith.constant 0 : index
    %0 = vector.load %arg1[%c0, %c0_0, %c0_1] : memref<3x64x64xf32, #tpu.memory_space<vmem>>, vector<3x64x64xf32>
    %c0_2 = arith.constant 0 : index
    %c0_3 = arith.constant 0 : index
    %c0_4 = arith.constant 0 : index
    %1 = vector.load %arg2[%c0_2, %c0_3, %c0_4] : memref<1x64x4xf32, #tpu.memory_space<vmem>>, vector<1x64x1xf32>
    %c0_5 = arith.constant 0 : index
    %c0_6 = arith.constant 0 : index
    %c1 = arith.constant 1 : index
    %2 = vector.load %arg2[%c0_5, %c0_6, %c1] : memref<1x64x4xf32, #tpu.memory_space<vmem>>, vector<1x64x1xf32>
    %c0_7 = arith.constant 0 : index
    %c0_8 = arith.constant 0 : index
    %c2 = arith.constant 2 : index
    %3 = vector.load %arg2[%c0_7, %c0_8, %c2] : memref<1x64x4xf32, #tpu.memory_space<vmem>>, vector<1x64x1xf32>
    %c0_9 = arith.constant 0 : index
    %c0_10 = arith.constant 0 : index
    %c3 = arith.constant 3 : index
    %4 = vector.load %arg2[%c0_9, %c0_10, %c3] : memref<1x64x4xf32, #tpu.memory_space<vmem>>, vector<1x64x1xf32>
    %c0_11 = arith.constant 0 : index
    %c0_12 = arith.constant 0 : index
    %c0_13 = arith.constant 0 : index
    %5 = vector.load %arg3[%c0_11, %c0_12, %c0_13] : memref<1x4x64xf32, #tpu.memory_space<vmem>>, vector<1x1x64xf32>
    %c0_14 = arith.constant 0 : index
    %c1_15 = arith.constant 1 : index
    %c0_16 = arith.constant 0 : index
    %6 = vector.load %arg3[%c0_14, %c1_15, %c0_16] : memref<1x4x64xf32, #tpu.memory_space<vmem>>, vector<1x1x64xf32>
    %c0_17 = arith.constant 0 : index
    %c2_18 = arith.constant 2 : index
    %c0_19 = arith.constant 0 : index
    %7 = vector.load %arg3[%c0_17, %c2_18, %c0_19] : memref<1x4x64xf32, #tpu.memory_space<vmem>>, vector<1x1x64xf32>
    %c0_20 = arith.constant 0 : index
    %c3_21 = arith.constant 3 : index
    %c0_22 = arith.constant 0 : index
    %8 = vector.load %arg3[%c0_20, %c3_21, %c0_22] : memref<1x4x64xf32, #tpu.memory_space<vmem>>, vector<1x1x64xf32>
    %cst = arith.constant dense<0.000000e+00> : vector<3x64xf32>
    %9 = vector.multi_reduction <add>, %0, %cst [1] : vector<3x64x64xf32> to vector<3x64xf32>
    %10 = vector.shape_cast %9 : vector<3x64xf32> to vector<3x1x64xf32>
    %11 = vector.broadcast %1 : vector<1x64x1xf32> to vector<3x64x64xf32>
    %12 = arith.mulf %0, %11 : vector<3x64x64xf32>
    %cst_23 = arith.constant dense<0.000000e+00> : vector<3x64xf32>
    %13 = vector.multi_reduction <add>, %12, %cst_23 [1] : vector<3x64x64xf32> to vector<3x64xf32>
    %14 = vector.shape_cast %13 : vector<3x64xf32> to vector<3x1x64xf32>
    %15 = vector.broadcast %2 : vector<1x64x1xf32> to vector<3x64x64xf32>
    %16 = arith.mulf %0, %15 : vector<3x64x64xf32>
    %cst_24 = arith.constant dense<0.000000e+00> : vector<3x64xf32>
    %17 = vector.multi_reduction <add>, %16, %cst_24 [1] : vector<3x64x64xf32> to vector<3x64xf32>
    %18 = vector.shape_cast %17 : vector<3x64xf32> to vector<3x1x64xf32>
    %cst_25 = arith.constant dense<0.000000e+00> : vector<3x1xf32>
    %19 = vector.multi_reduction <add>, %10, %cst_25 [2] : vector<3x1x64xf32> to vector<3x1xf32>
    %20 = vector.shape_cast %19 : vector<3x1xf32> to vector<3x1x1xf32>
    %21 = vector.broadcast %5 : vector<1x1x64xf32> to vector<3x1x64xf32>
    %22 = arith.mulf %10, %21 : vector<3x1x64xf32>
    %cst_26 = arith.constant dense<0.000000e+00> : vector<3x1xf32>
    %23 = vector.multi_reduction <add>, %22, %cst_26 [2] : vector<3x1x64xf32> to vector<3x1xf32>
    %24 = vector.shape_cast %23 : vector<3x1xf32> to vector<3x1x1xf32>
    %25 = vector.broadcast %6 : vector<1x1x64xf32> to vector<3x1x64xf32>
    %26 = arith.mulf %10, %25 : vector<3x1x64xf32>
    %cst_27 = arith.constant dense<0.000000e+00> : vector<3x1xf32>
    %27 = vector.multi_reduction <add>, %26, %cst_27 [2] : vector<3x1x64xf32> to vector<3x1xf32>
    %28 = vector.shape_cast %27 : vector<3x1xf32> to vector<3x1x1xf32>
    %cst_28 = arith.constant dense<0.000000e+00> : vector<3x1xf32>
    %29 = vector.multi_reduction <add>, %14, %cst_28 [2] : vector<3x1x64xf32> to vector<3x1xf32>
    %30 = vector.shape_cast %29 : vector<3x1xf32> to vector<3x1x1xf32>
    %cst_29 = arith.constant dense<0.000000e+00> : vector<3x1xf32>
    %31 = vector.multi_reduction <add>, %18, %cst_29 [2] : vector<3x1x64xf32> to vector<3x1xf32>
    %32 = vector.shape_cast %31 : vector<3x1xf32> to vector<3x1x1xf32>
    %33 = vector.broadcast %5 : vector<1x1x64xf32> to vector<3x1x64xf32>
    %34 = arith.mulf %14, %33 : vector<3x1x64xf32>
    %35 = vector.broadcast %6 : vector<1x1x64xf32> to vector<3x1x64xf32>
    %36 = arith.mulf %18, %35 : vector<3x1x64xf32>
    %37 = arith.subf %34, %36 : vector<3x1x64xf32>
    %cst_30 = arith.constant dense<0.000000e+00> : vector<3x1xf32>
    %38 = vector.multi_reduction <add>, %37, %cst_30 [2] : vector<3x1x64xf32> to vector<3x1xf32>
    %39 = vector.shape_cast %38 : vector<3x1xf32> to vector<3x1x1xf32>
    %40 = vector.broadcast %6 : vector<1x1x64xf32> to vector<3x1x64xf32>
    %41 = arith.mulf %14, %40 : vector<3x1x64xf32>
    %42 = vector.broadcast %5 : vector<1x1x64xf32> to vector<3x1x64xf32>
    %43 = arith.mulf %18, %42 : vector<3x1x64xf32>
    %44 = arith.addf %41, %43 : vector<3x1x64xf32>
    %cst_31 = arith.constant dense<0.000000e+00> : vector<3x1xf32>
    %45 = vector.multi_reduction <add>, %44, %cst_31 [2] : vector<3x1x64xf32> to vector<3x1xf32>
    %46 = vector.shape_cast %45 : vector<3x1xf32> to vector<3x1x1xf32>
    %cst_32 = arith.constant 1.562500e-02 : f32
    %47 = vector.broadcast %cst_32 : f32 to vector<3x1x1xf32>
    %48 = arith.mulf %20, %47 : vector<3x1x1xf32>
    %49 = vector.broadcast %24 : vector<3x1x1xf32> to vector<3x1x64xf32>
    %50 = vector.broadcast %7 : vector<1x1x64xf32> to vector<3x1x64xf32>
    %51 = arith.mulf %49, %50 : vector<3x1x64xf32>
    %52 = vector.broadcast %48 : vector<3x1x1xf32> to vector<3x1x64xf32>
    %53 = arith.addf %52, %51 : vector<3x1x64xf32>
    %54 = vector.broadcast %28 : vector<3x1x1xf32> to vector<3x1x64xf32>
    %55 = vector.broadcast %8 : vector<1x1x64xf32> to vector<3x1x64xf32>
    %56 = arith.mulf %54, %55 : vector<3x1x64xf32>
    %57 = arith.subf %53, %56 : vector<3x1x64xf32>
    %58 = vector.broadcast %24 : vector<3x1x1xf32> to vector<3x1x64xf32>
    %59 = vector.broadcast %8 : vector<1x1x64xf32> to vector<3x1x64xf32>
    %60 = arith.mulf %58, %59 : vector<3x1x64xf32>
    %61 = vector.broadcast %28 : vector<3x1x1xf32> to vector<3x1x64xf32>
    %62 = vector.broadcast %7 : vector<1x1x64xf32> to vector<3x1x64xf32>
    %63 = arith.mulf %61, %62 : vector<3x1x64xf32>
    %64 = arith.addf %60, %63 : vector<3x1x64xf32>
    %cst_33 = arith.constant 1.562500e-02 : f32
    %65 = vector.broadcast %cst_33 : f32 to vector<3x1x1xf32>
    %66 = arith.mulf %30, %65 : vector<3x1x1xf32>
    %67 = vector.broadcast %39 : vector<3x1x1xf32> to vector<3x1x64xf32>
    %68 = vector.broadcast %7 : vector<1x1x64xf32> to vector<3x1x64xf32>
    %69 = arith.mulf %67, %68 : vector<3x1x64xf32>
    %70 = vector.broadcast %66 : vector<3x1x1xf32> to vector<3x1x64xf32>
    %71 = arith.addf %70, %69 : vector<3x1x64xf32>
    %72 = vector.broadcast %46 : vector<3x1x1xf32> to vector<3x1x64xf32>
    %73 = vector.broadcast %8 : vector<1x1x64xf32> to vector<3x1x64xf32>
    %74 = arith.mulf %72, %73 : vector<3x1x64xf32>
    %75 = arith.subf %71, %74 : vector<3x1x64xf32>
    %cst_34 = arith.constant 1.562500e-02 : f32
    %76 = vector.broadcast %cst_34 : f32 to vector<3x1x1xf32>
    %77 = arith.mulf %32, %76 : vector<3x1x1xf32>
    %78 = vector.broadcast %39 : vector<3x1x1xf32> to vector<3x1x64xf32>
    %79 = vector.broadcast %8 : vector<1x1x64xf32> to vector<3x1x64xf32>
    %80 = arith.mulf %78, %79 : vector<3x1x64xf32>
    %81 = vector.broadcast %77 : vector<3x1x1xf32> to vector<3x1x64xf32>
    %82 = arith.addf %81, %80 : vector<3x1x64xf32>
    %83 = vector.broadcast %46 : vector<3x1x1xf32> to vector<3x1x64xf32>
    %84 = vector.broadcast %7 : vector<1x1x64xf32> to vector<3x1x64xf32>
    %85 = arith.mulf %83, %84 : vector<3x1x64xf32>
    %86 = arith.addf %82, %85 : vector<3x1x64xf32>
    %cst_35 = arith.constant 1.562500e-02 : f32
    %87 = vector.broadcast %cst_35 : f32 to vector<3x1x64xf32>
    %88 = arith.mulf %87, %57 : vector<3x1x64xf32>
    %89 = vector.broadcast %3 : vector<1x64x1xf32> to vector<3x64x64xf32>
    %90 = vector.broadcast %75 : vector<3x1x64xf32> to vector<3x64x64xf32>
    %91 = arith.mulf %89, %90 : vector<3x64x64xf32>
    %92 = vector.broadcast %88 : vector<3x1x64xf32> to vector<3x64x64xf32>
    %93 = arith.addf %92, %91 : vector<3x64x64xf32>
    %94 = vector.broadcast %4 : vector<1x64x1xf32> to vector<3x64x64xf32>
    %95 = vector.broadcast %86 : vector<3x1x64xf32> to vector<3x64x64xf32>
    %96 = arith.mulf %94, %95 : vector<3x64x64xf32>
    %97 = arith.subf %93, %96 : vector<3x64x64xf32>
    %cst_36 = arith.constant 1.562500e-02 : f32
    %98 = vector.broadcast %cst_36 : f32 to vector<3x1x64xf32>
    %99 = arith.mulf %98, %64 : vector<3x1x64xf32>
    %100 = vector.broadcast %3 : vector<1x64x1xf32> to vector<3x64x64xf32>
    %101 = vector.broadcast %86 : vector<3x1x64xf32> to vector<3x64x64xf32>
    %102 = arith.mulf %100, %101 : vector<3x64x64xf32>
    %103 = vector.broadcast %99 : vector<3x1x64xf32> to vector<3x64x64xf32>
    %104 = arith.addf %103, %102 : vector<3x64x64xf32>
    %105 = vector.broadcast %4 : vector<1x64x1xf32> to vector<3x64x64xf32>
    %106 = vector.broadcast %75 : vector<3x1x64xf32> to vector<3x64x64xf32>
    %107 = arith.mulf %105, %106 : vector<3x64x64xf32>
    %108 = arith.addf %104, %107 : vector<3x64x64xf32>
    %109 = arith.subf %0, %97 : vector<3x64x64xf32>
    %110 = arith.mulf %109, %109 : vector<3x64x64xf32>
    %111 = arith.mulf %108, %108 : vector<3x64x64xf32>
    %112 = arith.addf %110, %111 : vector<3x64x64xf32>
    %113 = math.sqrt %112 : vector<3x64x64xf32>
    %114 = arith.truncf %113 : vector<3x64x64xf32> to vector<3x64x64xbf16>
    %c0_37 = arith.constant 0 : index
    %c0_38 = arith.constant 0 : index
    %c0_39 = arith.constant 0 : index
    %115 = vector.load %arg4[%c0_37, %c0_38, %c0_39] : memref<3x64x64xbf16, #tpu.memory_space<vmem>>, vector<3x64x64xbf16>
    tpu.vector_store %arg4[%c0_37, %c0_38, %c0_39], %114 {strides = array<i32>} : memref<3x64x64xbf16, #tpu.memory_space<vmem>>, vector<3x64x64xbf16>,
    return
  }
  func.func @transform_0(%arg0: i32) -> (i32, i32, i32) {
    %c0_i32 = arith.constant 0 : i32
    %c0_i32_0 = arith.constant 0 : i32
    %c0_i32_1 = arith.constant 0 : i32
    return %arg0, %c0_i32, %c0_i32_0 : i32, i32, i32
  }
  func.func @transform_1(%arg0: i32) -> (i32, i32, i32) {
    %c0_i32 = arith.constant 0 : i32
    %c0_i32_0 = arith.constant 0 : i32
    %c0_i32_1 = arith.constant 0 : i32
    %c0_i32_2 = arith.constant 0 : i32
    return %c0_i32, %c0_i32_0, %c0_i32_1 : i32, i32, i32
  }
  func.func @transform_2(%arg0: i32) -> (i32, i32, i32) {
    %c0_i32 = arith.constant 0 : i32
    %c0_i32_0 = arith.constant 0 : i32
    %c0_i32_1 = arith.constant 0 : i32
    %c0_i32_2 = arith.constant 0 : i32
    return %c0_i32, %c0_i32_0, %c0_i32_1 : i32, i32, i32
  }
  func.func @transform_3(%arg0: i32) -> (i32, i32, i32) {
    %c0_i32 = arith.constant 0 : i32
    %c0_i32_0 = arith.constant 0 : i32
    %c0_i32_1 = arith.constant 0 : i32
    return %arg0, %c0_i32, %c0_i32_0 : i32, i32, i32
  }
}

module attributes {stable_mosaic.version = 11 : i64} {
  func.func @_patch_embed_kernel(%arg0: i32, %arg1: memref<16x768xbf16, #tpu.memory_space<vmem>>, %arg2: memref<16x768xbf16, #tpu.memory_space<vmem>>, %arg3: memref<768x384xbf16, #tpu.memory_space<vmem>>, %arg4: memref<768x384xbf16, #tpu.memory_space<vmem>>, %arg5: memref<1x768xf32, #tpu.memory_space<vmem>>, %arg6: memref<16x768xbf16, #tpu.memory_space<vmem>>) attributes {dimension_semantics = [#tpu.dimension_semantics<parallel>], iteration_bounds = array<i64: 2>, scalar_prefetch = 0 : i64, scratch_operands = 0 : i64, tpu.core_type = #tpu.core_type<tc>, window_params = [{transform_indices = @transform_0, window_bounds = array<i64: 16, 768>}, {transform_indices = @transform_1, window_bounds = array<i64: 16, 768>}, {pipeline_mode = #tpu.pipeline_mode<synchronous>, transform_indices = @transform_2, window_bounds = array<i64: 768, 384>}, {pipeline_mode = #tpu.pipeline_mode<synchronous>, transform_indices = @transform_3, window_bounds = array<i64: 768, 384>}, {pipeline_mode = #tpu.pipeline_mode<synchronous>, transform_indices = @transform_4, window_bounds = array<i64: 1, 768>}, {transform_indices = @transform_5, window_bounds = array<i64: 16, 768>}]} {
    %c0 = arith.constant 0 : index
    %c0_0 = arith.constant 0 : index
    %0 = vector.load %arg1[%c0, %c0_0] : memref<16x768xbf16, #tpu.memory_space<vmem>>, vector<16x768xbf16>
    %c0_1 = arith.constant 0 : index
    %c0_2 = arith.constant 0 : index
    %1 = vector.load %arg3[%c0_1, %c0_2] : memref<768x384xbf16, #tpu.memory_space<vmem>>, vector<768x384xbf16>
    %cst = arith.constant dense<0.000000e+00> : vector<16x384xf32>
    %2 = tpu.matmul %0, %1, %cst {dimension_numbers = #tpu.dot_dimension_numbers<[1], [0], [0], [1], [0, 0, 1, 1], [], []>} : vector<16x768xbf16>, vector<768x384xbf16>, vector<16x384xf32> -> vector<16x384xf32>
    %c0_3 = arith.constant 0 : index
    %c0_4 = arith.constant 0 : index
    %3 = vector.load %arg2[%c0_3, %c0_4] : memref<16x768xbf16, #tpu.memory_space<vmem>>, vector<16x768xbf16>
    %c0_5 = arith.constant 0 : index
    %c0_6 = arith.constant 0 : index
    %4 = vector.load %arg4[%c0_5, %c0_6] : memref<768x384xbf16, #tpu.memory_space<vmem>>, vector<768x384xbf16>
    %cst_7 = arith.constant dense<0.000000e+00> : vector<16x384xf32>
    %5 = tpu.matmul %3, %4, %cst_7 {dimension_numbers = #tpu.dot_dimension_numbers<[1], [0], [0], [1], [0, 0, 1, 1], [], []>} : vector<16x768xbf16>, vector<768x384xbf16>, vector<16x384xf32> -> vector<16x384xf32>
    %6 = tpu.concatenate %2, %5 in 1 : vector<16x384xf32>, vector<16x384xf32> -> vector<16x768xf32>
    %c0_8 = arith.constant 0 : index
    %c0_9 = arith.constant 0 : index
    %7 = vector.load %arg5[%c0_8, %c0_9] : memref<1x768xf32, #tpu.memory_space<vmem>>, vector<1x768xf32>
    %8 = vector.broadcast %7 : vector<1x768xf32> to vector<16x768xf32>
    %9 = arith.addf %6, %8 : vector<16x768xf32>
    %10 = arith.truncf %9 : vector<16x768xf32> to vector<16x768xbf16>
    %c0_10 = arith.constant 0 : index
    %c0_11 = arith.constant 0 : index
    %11 = vector.load %arg6[%c0_10, %c0_11] : memref<16x768xbf16, #tpu.memory_space<vmem>>, vector<16x768xbf16>
    tpu.vector_store %arg6[%c0_10, %c0_11], %10 {strides = array<i32>} : memref<16x768xbf16, #tpu.memory_space<vmem>>, vector<16x768xbf16>,
    return
  }
  func.func @transform_0(%arg0: i32) -> (i32, i32) {
    %c0_i32 = arith.constant 0 : i32
    %c0_i32_0 = arith.constant 0 : i32
    return %arg0, %c0_i32 : i32, i32
  }
  func.func @transform_1(%arg0: i32) -> (i32, i32) {
    %c0_i32 = arith.constant 0 : i32
    %c0_i32_0 = arith.constant 0 : i32
    return %arg0, %c0_i32 : i32, i32
  }
  func.func @transform_2(%arg0: i32) -> (i32, i32) {
    %c0_i32 = arith.constant 0 : i32
    %c0_i32_0 = arith.constant 0 : i32
    %c0_i32_1 = arith.constant 0 : i32
    return %c0_i32, %c0_i32_0 : i32, i32
  }
  func.func @transform_3(%arg0: i32) -> (i32, i32) {
    %c0_i32 = arith.constant 0 : i32
    %c0_i32_0 = arith.constant 0 : i32
    %c0_i32_1 = arith.constant 0 : i32
    return %c0_i32, %c0_i32_0 : i32, i32
  }
  func.func @transform_4(%arg0: i32) -> (i32, i32) {
    %c0_i32 = arith.constant 0 : i32
    %c0_i32_0 = arith.constant 0 : i32
    %c0_i32_1 = arith.constant 0 : i32
    return %c0_i32, %c0_i32_0 : i32, i32
  }
  func.func @transform_5(%arg0: i32) -> (i32, i32) {
    %c0_i32 = arith.constant 0 : i32
    %c0_i32_0 = arith.constant 0 : i32
    return %arg0, %c0_i32 : i32, i32
  }
}

module attributes {stable_mosaic.version = 11 : i64} {
  func.func @_fuse_mlp_kernel(%arg0: i32, %arg1: memref<16x768xbf16, #tpu.memory_space<vmem>>, %arg2: memref<768x384xbf16, #tpu.memory_space<vmem>>, %arg3: memref<1x384xf32, #tpu.memory_space<vmem>>, %arg4: memref<384x384xbf16, #tpu.memory_space<vmem>>, %arg5: memref<1x384xf32, #tpu.memory_space<vmem>>, %arg6: memref<16x384xbf16, #tpu.memory_space<vmem>>) attributes {dimension_semantics = [#tpu.dimension_semantics<parallel>], iteration_bounds = array<i64: 2>, scalar_prefetch = 0 : i64, scratch_operands = 0 : i64, tpu.core_type = #tpu.core_type<tc>, window_params = [{transform_indices = @transform_0, window_bounds = array<i64: 16, 768>}, {pipeline_mode = #tpu.pipeline_mode<synchronous>, transform_indices = @transform_1, window_bounds = array<i64: 768, 384>}, {pipeline_mode = #tpu.pipeline_mode<synchronous>, transform_indices = @transform_2, window_bounds = array<i64: 1, 384>}, {pipeline_mode = #tpu.pipeline_mode<synchronous>, transform_indices = @transform_3, window_bounds = array<i64: 384, 384>}, {pipeline_mode = #tpu.pipeline_mode<synchronous>, transform_indices = @transform_4, window_bounds = array<i64: 1, 384>}, {transform_indices = @transform_5, window_bounds = array<i64: 16, 384>}]} {
    %c0 = arith.constant 0 : index
    %c0_0 = arith.constant 0 : index
    %0 = vector.load %arg1[%c0, %c0_0] : memref<16x768xbf16, #tpu.memory_space<vmem>>, vector<16x768xbf16>
    %c0_1 = arith.constant 0 : index
    %c0_2 = arith.constant 0 : index
    %1 = vector.load %arg2[%c0_1, %c0_2] : memref<768x384xbf16, #tpu.memory_space<vmem>>, vector<768x384xbf16>
    %cst = arith.constant dense<0.000000e+00> : vector<16x384xf32>
    %2 = tpu.matmul %0, %1, %cst {dimension_numbers = #tpu.dot_dimension_numbers<[1], [0], [0], [1], [0, 0, 1, 1], [], []>} : vector<16x768xbf16>, vector<768x384xbf16>, vector<16x384xf32> -> vector<16x384xf32>
    %c0_3 = arith.constant 0 : index
    %c0_4 = arith.constant 0 : index
    %3 = vector.load %arg3[%c0_3, %c0_4] : memref<1x384xf32, #tpu.memory_space<vmem>>, vector<1x384xf32>
    %4 = vector.broadcast %3 : vector<1x384xf32> to vector<16x384xf32>
    %5 = arith.addf %2, %4 : vector<16x384xf32>
    %6 = arith.mulf %5, %5 : vector<16x384xf32>
    %7 = arith.mulf %5, %6 : vector<16x384xf32>
    %cst_5 = arith.constant 4.471500e-02 : f32
    %8 = vector.broadcast %cst_5 : f32 to vector<16x384xf32>
    %9 = arith.mulf %8, %7 : vector<16x384xf32>
    %10 = arith.addf %5, %9 : vector<16x384xf32>
    %cst_6 = arith.constant 0.797884583 : f32
    %11 = vector.broadcast %cst_6 : f32 to vector<16x384xf32>
    %12 = arith.mulf %11, %10 : vector<16x384xf32>
    %13 = math.tanh %12 : vector<16x384xf32>
    %cst_7 = arith.constant 1.000000e+00 : f32
    %14 = vector.broadcast %cst_7 : f32 to vector<16x384xf32>
    %15 = arith.addf %14, %13 : vector<16x384xf32>
    %cst_8 = arith.constant 5.000000e-01 : f32
    %16 = vector.broadcast %cst_8 : f32 to vector<16x384xf32>
    %17 = arith.mulf %16, %15 : vector<16x384xf32>
    %18 = arith.mulf %5, %17 : vector<16x384xf32>
    %19 = arith.truncf %18 : vector<16x384xf32> to vector<16x384xbf16>
    %c0_9 = arith.constant 0 : index
    %c0_10 = arith.constant 0 : index
    %20 = vector.load %arg4[%c0_9, %c0_10] : memref<384x384xbf16, #tpu.memory_space<vmem>>, vector<384x384xbf16>
    %cst_11 = arith.constant dense<0.000000e+00> : vector<16x384xf32>
    %21 = tpu.matmul %19, %20, %cst_11 {dimension_numbers = #tpu.dot_dimension_numbers<[1], [0], [0], [1], [0, 0, 1, 1], [], []>} : vector<16x384xbf16>, vector<384x384xbf16>, vector<16x384xf32> -> vector<16x384xf32>
    %c0_12 = arith.constant 0 : index
    %c0_13 = arith.constant 0 : index
    %22 = vector.load %arg5[%c0_12, %c0_13] : memref<1x384xf32, #tpu.memory_space<vmem>>, vector<1x384xf32>
    %23 = vector.broadcast %22 : vector<1x384xf32> to vector<16x384xf32>
    %24 = arith.addf %21, %23 : vector<16x384xf32>
    %25 = arith.truncf %24 : vector<16x384xf32> to vector<16x384xbf16>
    %c0_14 = arith.constant 0 : index
    %c0_15 = arith.constant 0 : index
    %26 = vector.load %arg6[%c0_14, %c0_15] : memref<16x384xbf16, #tpu.memory_space<vmem>>, vector<16x384xbf16>
    tpu.vector_store %arg6[%c0_14, %c0_15], %25 {strides = array<i32>} : memref<16x384xbf16, #tpu.memory_space<vmem>>, vector<16x384xbf16>,
    return
  }
  func.func @transform_0(%arg0: i32) -> (i32, i32) {
    %c0_i32 = arith.constant 0 : i32
    %c0_i32_0 = arith.constant 0 : i32
    return %arg0, %c0_i32 : i32, i32
  }
  func.func @transform_1(%arg0: i32) -> (i32, i32) {
    %c0_i32 = arith.constant 0 : i32
    %c0_i32_0 = arith.constant 0 : i32
    %c0_i32_1 = arith.constant 0 : i32
    return %c0_i32, %c0_i32_0 : i32, i32
  }
  func.func @transform_2(%arg0: i32) -> (i32, i32) {
    %c0_i32 = arith.constant 0 : i32
    %c0_i32_0 = arith.constant 0 : i32
    %c0_i32_1 = arith.constant 0 : i32
    return %c0_i32, %c0_i32_0 : i32, i32
  }
  func.func @transform_3(%arg0: i32) -> (i32, i32) {
    %c0_i32 = arith.constant 0 : i32
    %c0_i32_0 = arith.constant 0 : i32
    %c0_i32_1 = arith.constant 0 : i32
    return %c0_i32, %c0_i32_0 : i32, i32
  }
  func.func @transform_4(%arg0: i32) -> (i32, i32) {
    %c0_i32 = arith.constant 0 : i32
    %c0_i32_0 = arith.constant 0 : i32
    %c0_i32_1 = arith.constant 0 : i32
    return %c0_i32, %c0_i32_0 : i32, i32
  }
  func.func @transform_5(%arg0: i32) -> (i32, i32) {
    %c0_i32 = arith.constant 0 : i32
    %c0_i32_0 = arith.constant 0 : i32
    return %arg0, %c0_i32 : i32, i32
  }
}

module attributes {stable_mosaic.version = 11 : i64} {
  func.func @_patch_embed_kernel(%arg0: i32, %arg1: memref<64x192xbf16, #tpu.memory_space<vmem>>, %arg2: memref<64x192xbf16, #tpu.memory_space<vmem>>, %arg3: memref<192x64xbf16, #tpu.memory_space<vmem>>, %arg4: memref<192x64xbf16, #tpu.memory_space<vmem>>, %arg5: memref<1x128xf32, #tpu.memory_space<vmem>>, %arg6: memref<64x128xbf16, #tpu.memory_space<vmem>>) attributes {dimension_semantics = [#tpu.dimension_semantics<parallel>], iteration_bounds = array<i64: 2>, scalar_prefetch = 0 : i64, scratch_operands = 0 : i64, tpu.core_type = #tpu.core_type<tc>, window_params = [{transform_indices = @transform_0, window_bounds = array<i64: 64, 192>}, {transform_indices = @transform_1, window_bounds = array<i64: 64, 192>}, {pipeline_mode = #tpu.pipeline_mode<synchronous>, transform_indices = @transform_2, window_bounds = array<i64: 192, 64>}, {pipeline_mode = #tpu.pipeline_mode<synchronous>, transform_indices = @transform_3, window_bounds = array<i64: 192, 64>}, {pipeline_mode = #tpu.pipeline_mode<synchronous>, transform_indices = @transform_4, window_bounds = array<i64: 1, 128>}, {transform_indices = @transform_5, window_bounds = array<i64: 64, 128>}]} {
    %c0 = arith.constant 0 : index
    %c0_0 = arith.constant 0 : index
    %0 = vector.load %arg1[%c0, %c0_0] : memref<64x192xbf16, #tpu.memory_space<vmem>>, vector<64x192xbf16>
    %c0_1 = arith.constant 0 : index
    %c0_2 = arith.constant 0 : index
    %1 = vector.load %arg3[%c0_1, %c0_2] : memref<192x64xbf16, #tpu.memory_space<vmem>>, vector<192x64xbf16>
    %cst = arith.constant dense<0.000000e+00> : vector<64x64xf32>
    %2 = tpu.matmul %0, %1, %cst {dimension_numbers = #tpu.dot_dimension_numbers<[1], [0], [0], [1], [0, 0, 1, 1], [], []>} : vector<64x192xbf16>, vector<192x64xbf16>, vector<64x64xf32> -> vector<64x64xf32>
    %c0_3 = arith.constant 0 : index
    %c0_4 = arith.constant 0 : index
    %3 = vector.load %arg2[%c0_3, %c0_4] : memref<64x192xbf16, #tpu.memory_space<vmem>>, vector<64x192xbf16>
    %c0_5 = arith.constant 0 : index
    %c0_6 = arith.constant 0 : index
    %4 = vector.load %arg4[%c0_5, %c0_6] : memref<192x64xbf16, #tpu.memory_space<vmem>>, vector<192x64xbf16>
    %cst_7 = arith.constant dense<0.000000e+00> : vector<64x64xf32>
    %5 = tpu.matmul %3, %4, %cst_7 {dimension_numbers = #tpu.dot_dimension_numbers<[1], [0], [0], [1], [0, 0, 1, 1], [], []>} : vector<64x192xbf16>, vector<192x64xbf16>, vector<64x64xf32> -> vector<64x64xf32>
    %6 = tpu.concatenate %2, %5 in 1 : vector<64x64xf32>, vector<64x64xf32> -> vector<64x128xf32>
    %c0_8 = arith.constant 0 : index
    %c0_9 = arith.constant 0 : index
    %7 = vector.load %arg5[%c0_8, %c0_9] : memref<1x128xf32, #tpu.memory_space<vmem>>, vector<1x128xf32>
    %8 = vector.broadcast %7 : vector<1x128xf32> to vector<64x128xf32>
    %9 = arith.addf %6, %8 : vector<64x128xf32>
    %10 = arith.truncf %9 : vector<64x128xf32> to vector<64x128xbf16>
    %c0_10 = arith.constant 0 : index
    %c0_11 = arith.constant 0 : index
    %11 = vector.load %arg6[%c0_10, %c0_11] : memref<64x128xbf16, #tpu.memory_space<vmem>>, vector<64x128xbf16>
    tpu.vector_store %arg6[%c0_10, %c0_11], %10 {strides = array<i32>} : memref<64x128xbf16, #tpu.memory_space<vmem>>, vector<64x128xbf16>,
    return
  }
  func.func @transform_0(%arg0: i32) -> (i32, i32) {
    %c0_i32 = arith.constant 0 : i32
    %c0_i32_0 = arith.constant 0 : i32
    return %arg0, %c0_i32 : i32, i32
  }
  func.func @transform_1(%arg0: i32) -> (i32, i32) {
    %c0_i32 = arith.constant 0 : i32
    %c0_i32_0 = arith.constant 0 : i32
    return %arg0, %c0_i32 : i32, i32
  }
  func.func @transform_2(%arg0: i32) -> (i32, i32) {
    %c0_i32 = arith.constant 0 : i32
    %c0_i32_0 = arith.constant 0 : i32
    %c0_i32_1 = arith.constant 0 : i32
    return %c0_i32, %c0_i32_0 : i32, i32
  }
  func.func @transform_3(%arg0: i32) -> (i32, i32) {
    %c0_i32 = arith.constant 0 : i32
    %c0_i32_0 = arith.constant 0 : i32
    %c0_i32_1 = arith.constant 0 : i32
    return %c0_i32, %c0_i32_0 : i32, i32
  }
  func.func @transform_4(%arg0: i32) -> (i32, i32) {
    %c0_i32 = arith.constant 0 : i32
    %c0_i32_0 = arith.constant 0 : i32
    %c0_i32_1 = arith.constant 0 : i32
    return %c0_i32, %c0_i32_0 : i32, i32
  }
  func.func @transform_5(%arg0: i32) -> (i32, i32) {
    %c0_i32 = arith.constant 0 : i32
    %c0_i32_0 = arith.constant 0 : i32
    return %arg0, %c0_i32 : i32, i32
  }
}

module attributes {stable_mosaic.version = 11 : i64} {
  func.func @_fuse_mlp_kernel(%arg0: i32, %arg1: memref<64x128xbf16, #tpu.memory_space<vmem>>, %arg2: memref<128x64xbf16, #tpu.memory_space<vmem>>, %arg3: memref<1x64xf32, #tpu.memory_space<vmem>>, %arg4: memref<64x64xbf16, #tpu.memory_space<vmem>>, %arg5: memref<1x64xf32, #tpu.memory_space<vmem>>, %arg6: memref<64x64xbf16, #tpu.memory_space<vmem>>) attributes {dimension_semantics = [#tpu.dimension_semantics<parallel>], iteration_bounds = array<i64: 2>, scalar_prefetch = 0 : i64, scratch_operands = 0 : i64, tpu.core_type = #tpu.core_type<tc>, window_params = [{transform_indices = @transform_0, window_bounds = array<i64: 64, 128>}, {pipeline_mode = #tpu.pipeline_mode<synchronous>, transform_indices = @transform_1, window_bounds = array<i64: 128, 64>}, {pipeline_mode = #tpu.pipeline_mode<synchronous>, transform_indices = @transform_2, window_bounds = array<i64: 1, 64>}, {pipeline_mode = #tpu.pipeline_mode<synchronous>, transform_indices = @transform_3, window_bounds = array<i64: 64, 64>}, {pipeline_mode = #tpu.pipeline_mode<synchronous>, transform_indices = @transform_4, window_bounds = array<i64: 1, 64>}, {transform_indices = @transform_5, window_bounds = array<i64: 64, 64>}]} {
    %c0 = arith.constant 0 : index
    %c0_0 = arith.constant 0 : index
    %0 = vector.load %arg1[%c0, %c0_0] : memref<64x128xbf16, #tpu.memory_space<vmem>>, vector<64x128xbf16>
    %c0_1 = arith.constant 0 : index
    %c0_2 = arith.constant 0 : index
    %1 = vector.load %arg2[%c0_1, %c0_2] : memref<128x64xbf16, #tpu.memory_space<vmem>>, vector<128x64xbf16>
    %cst = arith.constant dense<0.000000e+00> : vector<64x64xf32>
    %2 = tpu.matmul %0, %1, %cst {dimension_numbers = #tpu.dot_dimension_numbers<[1], [0], [0], [1], [0, 0, 1, 1], [], []>} : vector<64x128xbf16>, vector<128x64xbf16>, vector<64x64xf32> -> vector<64x64xf32>
    %c0_3 = arith.constant 0 : index
    %c0_4 = arith.constant 0 : index
    %3 = vector.load %arg3[%c0_3, %c0_4] : memref<1x64xf32, #tpu.memory_space<vmem>>, vector<1x64xf32>
    %4 = vector.broadcast %3 : vector<1x64xf32> to vector<64x64xf32>
    %5 = arith.addf %2, %4 : vector<64x64xf32>
    %6 = arith.mulf %5, %5 : vector<64x64xf32>
    %7 = arith.mulf %5, %6 : vector<64x64xf32>
    %cst_5 = arith.constant 4.471500e-02 : f32
    %8 = vector.broadcast %cst_5 : f32 to vector<64x64xf32>
    %9 = arith.mulf %8, %7 : vector<64x64xf32>
    %10 = arith.addf %5, %9 : vector<64x64xf32>
    %cst_6 = arith.constant 0.797884583 : f32
    %11 = vector.broadcast %cst_6 : f32 to vector<64x64xf32>
    %12 = arith.mulf %11, %10 : vector<64x64xf32>
    %13 = math.tanh %12 : vector<64x64xf32>
    %cst_7 = arith.constant 1.000000e+00 : f32
    %14 = vector.broadcast %cst_7 : f32 to vector<64x64xf32>
    %15 = arith.addf %14, %13 : vector<64x64xf32>
    %cst_8 = arith.constant 5.000000e-01 : f32
    %16 = vector.broadcast %cst_8 : f32 to vector<64x64xf32>
    %17 = arith.mulf %16, %15 : vector<64x64xf32>
    %18 = arith.mulf %5, %17 : vector<64x64xf32>
    %19 = arith.truncf %18 : vector<64x64xf32> to vector<64x64xbf16>
    %c0_9 = arith.constant 0 : index
    %c0_10 = arith.constant 0 : index
    %20 = vector.load %arg4[%c0_9, %c0_10] : memref<64x64xbf16, #tpu.memory_space<vmem>>, vector<64x64xbf16>
    %cst_11 = arith.constant dense<0.000000e+00> : vector<64x64xf32>
    %21 = tpu.matmul %19, %20, %cst_11 {dimension_numbers = #tpu.dot_dimension_numbers<[1], [0], [0], [1], [0, 0, 1, 1], [], []>} : vector<64x64xbf16>, vector<64x64xbf16>, vector<64x64xf32> -> vector<64x64xf32>
    %c0_12 = arith.constant 0 : index
    %c0_13 = arith.constant 0 : index
    %22 = vector.load %arg5[%c0_12, %c0_13] : memref<1x64xf32, #tpu.memory_space<vmem>>, vector<1x64xf32>
    %23 = vector.broadcast %22 : vector<1x64xf32> to vector<64x64xf32>
    %24 = arith.addf %21, %23 : vector<64x64xf32>
    %25 = arith.truncf %24 : vector<64x64xf32> to vector<64x64xbf16>
    %c0_14 = arith.constant 0 : index
    %c0_15 = arith.constant 0 : index
    %26 = vector.load %arg6[%c0_14, %c0_15] : memref<64x64xbf16, #tpu.memory_space<vmem>>, vector<64x64xbf16>
    tpu.vector_store %arg6[%c0_14, %c0_15], %25 {strides = array<i32>} : memref<64x64xbf16, #tpu.memory_space<vmem>>, vector<64x64xbf16>,
    return
  }
  func.func @transform_0(%arg0: i32) -> (i32, i32) {
    %c0_i32 = arith.constant 0 : i32
    %c0_i32_0 = arith.constant 0 : i32
    return %arg0, %c0_i32 : i32, i32
  }
  func.func @transform_1(%arg0: i32) -> (i32, i32) {
    %c0_i32 = arith.constant 0 : i32
    %c0_i32_0 = arith.constant 0 : i32
    %c0_i32_1 = arith.constant 0 : i32
    return %c0_i32, %c0_i32_0 : i32, i32
  }
  func.func @transform_2(%arg0: i32) -> (i32, i32) {
    %c0_i32 = arith.constant 0 : i32
    %c0_i32_0 = arith.constant 0 : i32
    %c0_i32_1 = arith.constant 0 : i32
    return %c0_i32, %c0_i32_0 : i32, i32
  }
  func.func @transform_3(%arg0: i32) -> (i32, i32) {
    %c0_i32 = arith.constant 0 : i32
    %c0_i32_0 = arith.constant 0 : i32
    %c0_i32_1 = arith.constant 0 : i32
    return %c0_i32, %c0_i32_0 : i32, i32
  }
  func.func @transform_4(%arg0: i32) -> (i32, i32) {
    %c0_i32 = arith.constant 0 : i32
    %c0_i32_0 = arith.constant 0 : i32
    %c0_i32_1 = arith.constant 0 : i32
    return %c0_i32, %c0_i32_0 : i32, i32
  }
  func.func @transform_5(%arg0: i32) -> (i32, i32) {
    %c0_i32 = arith.constant 0 : i32
    %c0_i32_0 = arith.constant 0 : i32
    return %arg0, %c0_i32 : i32, i32
  }
}

module attributes {stable_mosaic.version = 11 : i64} {
  func.func @_patch_embed_kernel(%arg0: i32, %arg1: memref<256x48xbf16, #tpu.memory_space<vmem>>, %arg2: memref<256x48xbf16, #tpu.memory_space<vmem>>, %arg3: memref<48x64xbf16, #tpu.memory_space<vmem>>, %arg4: memref<48x64xbf16, #tpu.memory_space<vmem>>, %arg5: memref<1x128xf32, #tpu.memory_space<vmem>>, %arg6: memref<256x128xbf16, #tpu.memory_space<vmem>>) attributes {dimension_semantics = [#tpu.dimension_semantics<parallel>], iteration_bounds = array<i64: 2>, scalar_prefetch = 0 : i64, scratch_operands = 0 : i64, tpu.core_type = #tpu.core_type<tc>, window_params = [{transform_indices = @transform_0, window_bounds = array<i64: 256, 48>}, {transform_indices = @transform_1, window_bounds = array<i64: 256, 48>}, {pipeline_mode = #tpu.pipeline_mode<synchronous>, transform_indices = @transform_2, window_bounds = array<i64: 48, 64>}, {pipeline_mode = #tpu.pipeline_mode<synchronous>, transform_indices = @transform_3, window_bounds = array<i64: 48, 64>}, {pipeline_mode = #tpu.pipeline_mode<synchronous>, transform_indices = @transform_4, window_bounds = array<i64: 1, 128>}, {transform_indices = @transform_5, window_bounds = array<i64: 256, 128>}]} {
    %c0 = arith.constant 0 : index
    %c0_0 = arith.constant 0 : index
    %0 = vector.load %arg1[%c0, %c0_0] : memref<256x48xbf16, #tpu.memory_space<vmem>>, vector<256x48xbf16>
    %c0_1 = arith.constant 0 : index
    %c0_2 = arith.constant 0 : index
    %1 = vector.load %arg3[%c0_1, %c0_2] : memref<48x64xbf16, #tpu.memory_space<vmem>>, vector<48x64xbf16>
    %cst = arith.constant dense<0.000000e+00> : vector<256x64xf32>
    %2 = tpu.matmul %0, %1, %cst {dimension_numbers = #tpu.dot_dimension_numbers<[1], [0], [0], [1], [0, 0, 1, 1], [], []>} : vector<256x48xbf16>, vector<48x64xbf16>, vector<256x64xf32> -> vector<256x64xf32>
    %c0_3 = arith.constant 0 : index
    %c0_4 = arith.constant 0 : index
    %3 = vector.load %arg2[%c0_3, %c0_4] : memref<256x48xbf16, #tpu.memory_space<vmem>>, vector<256x48xbf16>
    %c0_5 = arith.constant 0 : index
    %c0_6 = arith.constant 0 : index
    %4 = vector.load %arg4[%c0_5, %c0_6] : memref<48x64xbf16, #tpu.memory_space<vmem>>, vector<48x64xbf16>
    %cst_7 = arith.constant dense<0.000000e+00> : vector<256x64xf32>
    %5 = tpu.matmul %3, %4, %cst_7 {dimension_numbers = #tpu.dot_dimension_numbers<[1], [0], [0], [1], [0, 0, 1, 1], [], []>} : vector<256x48xbf16>, vector<48x64xbf16>, vector<256x64xf32> -> vector<256x64xf32>
    %6 = tpu.concatenate %2, %5 in 1 : vector<256x64xf32>, vector<256x64xf32> -> vector<256x128xf32>
    %c0_8 = arith.constant 0 : index
    %c0_9 = arith.constant 0 : index
    %7 = vector.load %arg5[%c0_8, %c0_9] : memref<1x128xf32, #tpu.memory_space<vmem>>, vector<1x128xf32>
    %8 = vector.broadcast %7 : vector<1x128xf32> to vector<256x128xf32>
    %9 = arith.addf %6, %8 : vector<256x128xf32>
    %10 = arith.truncf %9 : vector<256x128xf32> to vector<256x128xbf16>
    %c0_10 = arith.constant 0 : index
    %c0_11 = arith.constant 0 : index
    %11 = vector.load %arg6[%c0_10, %c0_11] : memref<256x128xbf16, #tpu.memory_space<vmem>>, vector<256x128xbf16>
    tpu.vector_store %arg6[%c0_10, %c0_11], %10 {strides = array<i32>} : memref<256x128xbf16, #tpu.memory_space<vmem>>, vector<256x128xbf16>,
    return
  }
  func.func @transform_0(%arg0: i32) -> (i32, i32) {
    %c0_i32 = arith.constant 0 : i32
    %c0_i32_0 = arith.constant 0 : i32
    return %arg0, %c0_i32 : i32, i32
  }
  func.func @transform_1(%arg0: i32) -> (i32, i32) {
    %c0_i32 = arith.constant 0 : i32
    %c0_i32_0 = arith.constant 0 : i32
    return %arg0, %c0_i32 : i32, i32
  }
  func.func @transform_2(%arg0: i32) -> (i32, i32) {
    %c0_i32 = arith.constant 0 : i32
    %c0_i32_0 = arith.constant 0 : i32
    %c0_i32_1 = arith.constant 0 : i32
    return %c0_i32, %c0_i32_0 : i32, i32
  }
  func.func @transform_3(%arg0: i32) -> (i32, i32) {
    %c0_i32 = arith.constant 0 : i32
    %c0_i32_0 = arith.constant 0 : i32
    %c0_i32_1 = arith.constant 0 : i32
    return %c0_i32, %c0_i32_0 : i32, i32
  }
  func.func @transform_4(%arg0: i32) -> (i32, i32) {
    %c0_i32 = arith.constant 0 : i32
    %c0_i32_0 = arith.constant 0 : i32
    %c0_i32_1 = arith.constant 0 : i32
    return %c0_i32, %c0_i32_0 : i32, i32
  }
  func.func @transform_5(%arg0: i32) -> (i32, i32) {
    %c0_i32 = arith.constant 0 : i32
    %c0_i32_0 = arith.constant 0 : i32
    return %arg0, %c0_i32 : i32, i32
  }
}

module attributes {stable_mosaic.version = 11 : i64} {
  func.func @_fuse_mlp_kernel(%arg0: i32, %arg1: memref<256x128xbf16, #tpu.memory_space<vmem>>, %arg2: memref<128x64xbf16, #tpu.memory_space<vmem>>, %arg3: memref<1x64xf32, #tpu.memory_space<vmem>>, %arg4: memref<64x64xbf16, #tpu.memory_space<vmem>>, %arg5: memref<1x64xf32, #tpu.memory_space<vmem>>, %arg6: memref<256x64xbf16, #tpu.memory_space<vmem>>) attributes {dimension_semantics = [#tpu.dimension_semantics<parallel>], iteration_bounds = array<i64: 2>, scalar_prefetch = 0 : i64, scratch_operands = 0 : i64, tpu.core_type = #tpu.core_type<tc>, window_params = [{transform_indices = @transform_0, window_bounds = array<i64: 256, 128>}, {pipeline_mode = #tpu.pipeline_mode<synchronous>, transform_indices = @transform_1, window_bounds = array<i64: 128, 64>}, {pipeline_mode = #tpu.pipeline_mode<synchronous>, transform_indices = @transform_2, window_bounds = array<i64: 1, 64>}, {pipeline_mode = #tpu.pipeline_mode<synchronous>, transform_indices = @transform_3, window_bounds = array<i64: 64, 64>}, {pipeline_mode = #tpu.pipeline_mode<synchronous>, transform_indices = @transform_4, window_bounds = array<i64: 1, 64>}, {transform_indices = @transform_5, window_bounds = array<i64: 256, 64>}]} {
    %c0 = arith.constant 0 : index
    %c0_0 = arith.constant 0 : index
    %0 = vector.load %arg1[%c0, %c0_0] : memref<256x128xbf16, #tpu.memory_space<vmem>>, vector<256x128xbf16>
    %c0_1 = arith.constant 0 : index
    %c0_2 = arith.constant 0 : index
    %1 = vector.load %arg2[%c0_1, %c0_2] : memref<128x64xbf16, #tpu.memory_space<vmem>>, vector<128x64xbf16>
    %cst = arith.constant dense<0.000000e+00> : vector<256x64xf32>
    %2 = tpu.matmul %0, %1, %cst {dimension_numbers = #tpu.dot_dimension_numbers<[1], [0], [0], [1], [0, 0, 1, 1], [], []>} : vector<256x128xbf16>, vector<128x64xbf16>, vector<256x64xf32> -> vector<256x64xf32>
    %c0_3 = arith.constant 0 : index
    %c0_4 = arith.constant 0 : index
    %3 = vector.load %arg3[%c0_3, %c0_4] : memref<1x64xf32, #tpu.memory_space<vmem>>, vector<1x64xf32>
    %4 = vector.broadcast %3 : vector<1x64xf32> to vector<256x64xf32>
    %5 = arith.addf %2, %4 : vector<256x64xf32>
    %6 = arith.mulf %5, %5 : vector<256x64xf32>
    %7 = arith.mulf %5, %6 : vector<256x64xf32>
    %cst_5 = arith.constant 4.471500e-02 : f32
    %8 = vector.broadcast %cst_5 : f32 to vector<256x64xf32>
    %9 = arith.mulf %8, %7 : vector<256x64xf32>
    %10 = arith.addf %5, %9 : vector<256x64xf32>
    %cst_6 = arith.constant 0.797884583 : f32
    %11 = vector.broadcast %cst_6 : f32 to vector<256x64xf32>
    %12 = arith.mulf %11, %10 : vector<256x64xf32>
    %13 = math.tanh %12 : vector<256x64xf32>
    %cst_7 = arith.constant 1.000000e+00 : f32
    %14 = vector.broadcast %cst_7 : f32 to vector<256x64xf32>
    %15 = arith.addf %14, %13 : vector<256x64xf32>
    %cst_8 = arith.constant 5.000000e-01 : f32
    %16 = vector.broadcast %cst_8 : f32 to vector<256x64xf32>
    %17 = arith.mulf %16, %15 : vector<256x64xf32>
    %18 = arith.mulf %5, %17 : vector<256x64xf32>
    %19 = arith.truncf %18 : vector<256x64xf32> to vector<256x64xbf16>
    %c0_9 = arith.constant 0 : index
    %c0_10 = arith.constant 0 : index
    %20 = vector.load %arg4[%c0_9, %c0_10] : memref<64x64xbf16, #tpu.memory_space<vmem>>, vector<64x64xbf16>
    %cst_11 = arith.constant dense<0.000000e+00> : vector<256x64xf32>
    %21 = tpu.matmul %19, %20, %cst_11 {dimension_numbers = #tpu.dot_dimension_numbers<[1], [0], [0], [1], [0, 0, 1, 1], [], []>} : vector<256x64xbf16>, vector<64x64xbf16>, vector<256x64xf32> -> vector<256x64xf32>
    %c0_12 = arith.constant 0 : index
    %c0_13 = arith.constant 0 : index
    %22 = vector.load %arg5[%c0_12, %c0_13] : memref<1x64xf32, #tpu.memory_space<vmem>>, vector<1x64xf32>
    %23 = vector.broadcast %22 : vector<1x64xf32> to vector<256x64xf32>
    %24 = arith.addf %21, %23 : vector<256x64xf32>
    %25 = arith.truncf %24 : vector<256x64xf32> to vector<256x64xbf16>
    %c0_14 = arith.constant 0 : index
    %c0_15 = arith.constant 0 : index
    %26 = vector.load %arg6[%c0_14, %c0_15] : memref<256x64xbf16, #tpu.memory_space<vmem>>, vector<256x64xbf16>
    tpu.vector_store %arg6[%c0_14, %c0_15], %25 {strides = array<i32>} : memref<256x64xbf16, #tpu.memory_space<vmem>>, vector<256x64xbf16>,
    return
  }
  func.func @transform_0(%arg0: i32) -> (i32, i32) {
    %c0_i32 = arith.constant 0 : i32
    %c0_i32_0 = arith.constant 0 : i32
    return %arg0, %c0_i32 : i32, i32
  }
  func.func @transform_1(%arg0: i32) -> (i32, i32) {
    %c0_i32 = arith.constant 0 : i32
    %c0_i32_0 = arith.constant 0 : i32
    %c0_i32_1 = arith.constant 0 : i32
    return %c0_i32, %c0_i32_0 : i32, i32
  }
  func.func @transform_2(%arg0: i32) -> (i32, i32) {
    %c0_i32 = arith.constant 0 : i32
    %c0_i32_0 = arith.constant 0 : i32
    %c0_i32_1 = arith.constant 0 : i32
    return %c0_i32, %c0_i32_0 : i32, i32
  }
  func.func @transform_3(%arg0: i32) -> (i32, i32) {
    %c0_i32 = arith.constant 0 : i32
    %c0_i32_0 = arith.constant 0 : i32
    %c0_i32_1 = arith.constant 0 : i32
    return %c0_i32, %c0_i32_0 : i32, i32
  }
  func.func @transform_4(%arg0: i32) -> (i32, i32) {
    %c0_i32 = arith.constant 0 : i32
    %c0_i32_0 = arith.constant 0 : i32
    %c0_i32_1 = arith.constant 0 : i32
    return %c0_i32, %c0_i32_0 : i32, i32
  }
  func.func @transform_5(%arg0: i32) -> (i32, i32) {
    %c0_i32 = arith.constant 0 : i32
    %c0_i32_0 = arith.constant 0 : i32
    return %arg0, %c0_i32 : i32, i32
  }
}

</mosaic_0001>

<bundles_post_ra>
// kernel: image_depth_net2_forward.7
= control target key start
LH: loop header
LB: loop body
LE: loop exit
PB: predicated region body
PF: predicated region fallthrough
CT: control target
= control target key end

     0   :  { %8 = vsyncpa [#allocation3], 0  ;;  %s3164_s0 = inlined_call_operand.hbm [shape: f32[6,64,64], index: 0, kind: input, shape index: {}]   ;;  %s3165_s1 = inlined_call_operand.hbm [shape: f32[1,64,4], index: 1, kind: input, shape index: {}]   ;;  %s3166_s2 = inlined_call_operand.hbm [shape: f32[1,4,64], index: 2, kind: input, shape index: {}]   ;;  %s3167_s3 = inlined_call_operand.vmem [shape: bf16[6,64,64], index: 3, kind: output, shape index: {}]  }
   0x1   :  { %10 = vsyncpa [#allocation3 + $0x1], 0 }
   0x2   :  { %11 = vsyncpa [#allocation5], 0  ;;  %s1860_s12 = smov 0   ;;  %s1862_s13 = smov 0  }
   0x3   :  { %s1864_s14 = smov 0   ;;  %s1866_s15 = smov 0  }
   0x4 LB: > { %s1494_s16 = sadd.s32 4294967295, %s1829_s15   ;;  %p37_p0 = scmp.ne.s32.totalorder %s1821_s13, %s1817_s12  ;;  %s1829_s15 = sphi %s1866_s15, %s3208_s15   ;;  %s1825_s14 = sphi %s1864_s14, %s3207_s14   ;;  %s1821_s13 = sphi %s1862_s13, %s3206_s13   ;;  %s1817_s12 = sphi %s1860_s12, %s3205_s12  }
   0x5   : > { %p1882_p1 = scmp.eq.s32.totalorder %s1494_s16, 0  ;;  %p1496_p2 = scmp.ge.s32.totalorder %s1829_s15, 1 }
   0x6   : > { %p116_p3 = scmp.lt.s32.totalorder %s1829_s15, 3  ;;  %s1831_s20 = smov [#allocation4]  }
   0x7   : > { %s3182_s17 = scalar_select %p1882_p1, 1, 0 }
   0x8   : > { %p1890_p4 = por %p1882_p1, %p37_p0  ;;  %p1894_p5 = pnand %p1496_p2, %p116_p3 }
   0x9   : > { %s128_s21 = sshll.u32 %s1831_s20, 4  ;;  %s1832_s23 = smov [#allocation6]   ;;  %s129_s21 = int_to_ptr.vmem [resolvable:$true] %s128_s21 }
   0xa   : > { %s3183_s18 = scalar_select %p1890_p4, 1, 0 }
   0xb   : > { %s3184_s19 = scalar_select %p1894_p5, 1, 0 }
   0xc   : > { %p1573_p6 = pneg %p1894_p5  ;;  %s142_s24 = sshll.u32 %s1832_s23, 4  ;;  %s1906_s24 = int_to_ptr.vmem [resolvable:$true] %s142_s24 }
   0xd   : > { %s1705_s27 = scalar_lea.hbm %s3165_s1, 1024 }
   0xe   : > { %p1902_p7 = pnand %p1573_p6, %p1882_p1  ;;  %p1706_p8 = scmp.ne.s32.totalorder %s3165_s1, %s1705_s27 }
   0xf   : > { %p1712_p12 = scmp.lt.u32.totalorder %s1705_s27, %s3165_s1 }
  0x10   : > { %p1707_p9 = pneg %p1902_p7 }
  0x12   : > { %p1708_p10 = pnand %p1707_p9, %p1706_p8 }
  0x14   : > { %p1709_p11 = pneg %p1708_p10 }
  0x16   : > { %p1714_p13 = pnand %p1712_p12, %p1709_p11 }
  0x18   : > { %1717 = shalt.err (!%p1714_p13)
}
  0x19   : > { %s1718_s5 = scalar_lea.vmem %s129_s21, 1024  ;;  %p1726_p6 = scmp.lt.s32.totalorder %s129_s21, %s129_s21 }
  0x1a   : > { %p1719_p0 = scmp.ne.s32.totalorder %s129_s21, %s1718_s5  ;;  %p1727_p1 = scmp.lt.s32.totalorder %s1718_s5, %s1718_s5 }
  0x1c   : > { %p1721_p2 = pnand %p1719_p0, %p1707_p9  ;;  %p1728_p4 = por %p1727_p1, %p1726_p6 }
  0x1e   : > { %p1722_p3 = pneg %p1721_p2 }
  0x20   : > { %p1729_p5 = pnand %p1728_p4, %p1722_p3 }
  0x22   : > { %1732 = shalt.err (!%p1729_p5)
}
  0x23   : > { %s1833_s6 = smov 128   ;;  %s1834_s7 = smov 8  }
  0x24   : > { %1576 = dma.hbm_to_vmem [thread:$0]  (!%p1902_p7), %s3165_s1, 1024, %s129_s21, [#allocation5], %s1833_s6, %s1833_s6, %s1834_s7  }
  0x25   : > { %s1733_s12 = scalar_lea.hbm %s3166_s2, 64 }
  0x26   : > { %p1734_p1 = scmp.ne.s32.totalorder %s3166_s2, %s1733_s12  ;;  %p1740_p8 = scmp.lt.u32.totalorder %s1733_s12, %s3166_s2 }
  0x28   : > { %p1736_p4 = pnand %p1734_p1, %p1707_p9 }
  0x2a   : > { %p1737_p5 = pneg %p1736_p4 }
  0x2c   : > { %p1742_p10 = pnand %p1740_p8, %p1737_p5 }
  0x2e   : > { %1745 = shalt.err (!%p1742_p10)
}
  0x2f   : > { %s1746_s21 = scalar_lea.vmem %s1906_s24, 64  ;;  %p1754_p0 = scmp.lt.s32.totalorder %s1906_s24, %s1906_s24 }
  0x30   : > { %p1747_p11 = scmp.ne.s32.totalorder %s1906_s24, %s1746_s21  ;;  %p1755_p2 = scmp.lt.s32.totalorder %s1746_s21, %s1746_s21 }
  0x32   : > { %p1749_p12 = pnand %p1747_p11, %p1707_p9  ;;  %p1756_p3 = por %p1755_p2, %p1754_p0 }
  0x34   : > { %p1750_p13 = pneg %p1749_p12 }
  0x36   : > { %p1757_p6 = pnand %p1756_p3, %p1750_p13 }
  0x38   : > { %1760 = shalt.err (!%p1757_p6)
}
  0x39   : > { %1579 = dma.hbm_to_vmem [thread:$0]  (!%p1902_p7), %s3166_s2, 64, %s1906_s24, [#allocation5]  }
  0x3a   : > { %s1959_s29 = sadd.s32 1, %s1829_s15   ;;  %s24_s30 = sadd.s32 1, %s1825_s14 }
  0x3b   : > { %s21_s22 = ssub.s32 %s1829_s15, %s1959_s29  ;;  %p31_p9 = scmp.ne.s32.totalorder %s1825_s14, %s1821_s13 }
  0x3c   : > { %p22_p1 = scmp.eq.s32.totalorder %s21_s22, 0  ;;  %p32_p4 = scmp.eq.s32.totalorder %s1829_s15, 0 }
  0x3d   : > { %p1586_p5 = scmp.lt.s32.totalorder %s1829_s15, 2  ;;  %s153_s4 = sand.u32 1, %s1825_s14  }
  0x3e   : > { %s1970_s5 = scalar_select %p22_p1, %s1825_s14, %s24_s30  }
  0x3f   : > { %p33_p8 = por %p32_p4, %p31_p9  ;;  %s1561_s8 = smul.u32 192, %s153_s4 }
  0x40   : > { %s1560_s9 = smul.u32 3072, %s1829_s15  ;;  %s1984_s25 = scalar_lea.sflag [#allocation3], %s153_s4 }
  0x41   : > { %p1973_p10 = pnand %p1586_p5, %p33_p8  ;;  %s157_s20 = scalar_lea.vmem [#allocation2], %s1561_s8 }
  0x42   : > { %s1980_s12 = scalar_lea.hbm %s3164_s0, %s1560_s9  ;;  %s165_s23 = sshll.u32 %s157_s20, 4  ;;  %s1982_s23 = int_to_ptr.vmem [resolvable:$true] %s165_s23 }
  0x43   : > { %s1761_s26 = scalar_lea.hbm %s1980_s12, 3072  ;;  %p1763_p11 = pneg %p1973_p10 }
  0x44   : > { %p1762_p7 = scmp.ne.s32.totalorder %s1980_s12, %s1761_s26  ;;  %s1766_s28 = scalar_lea.hbm %s3164_s0, 6144 }
  0x45   : > { %p1767_p0 = scmp.lt.u32.totalorder %s1980_s12, %s3164_s0  ;;  %p1768_p2 = scmp.lt.u32.totalorder %s1766_s28, %s1761_s26 }
  0x46   : > { %p1764_p12 = pnand %p1763_p11, %p1762_p7  ;;  %p1770_p6 = scmp.lt.u32.totalorder %s1761_s26, %s1980_s12 }
  0x47   : > { %p1769_p3 = por %p1768_p2, %p1767_p0 }
  0x48   : > { %p1765_p13 = pneg %p1764_p12 }
  0x49   : > { %p1771_p9 = por %p1770_p6, %p1769_p3 }
  0x4b   : > { %p1772_p1 = pnand %p1771_p9, %p1765_p13 }
  0x4d   : > { %1775 = shalt.err (!%p1772_p1)
}
  0x4e   : > { %s1776_s4 = scalar_lea.vmem %s1982_s23, 3072  ;;  %s1835_s8 = smov [#allocation2]  }
  0x4f   : > { %p1777_p4 = scmp.ne.s32.totalorder %s1982_s23, %s1776_s4  ;;  %s1781_s9 = sshll.u32 %s1835_s8, 4  ;;  %s1782_s9 = int_to_ptr.vmem [resolvable:$false] %s1781_s9 }
  0x50   : > { %s1783_s24 = scalar_lea.vmem %s1782_s9, 6144  ;;  %p1784_p7 = scmp.lt.s32.totalorder %s1982_s23, %s1782_s9 }
  0x51   : > { %p1779_p5 = pnand %p1777_p4, %p1763_p11  ;;  %p1785_p12 = scmp.lt.s32.totalorder %s1783_s24, %s1776_s4 }
  0x53   : > { %p1780_p8 = pneg %p1779_p5  ;;  %p1786_p0 = por %p1785_p12, %p1784_p7 }
  0x55   : > { %p1787_p2 = pnand %p1786_p0, %p1780_p8 }
  0x57   : > { %1790 = shalt.err (!%p1787_p2)
}
  0x58   : > { %1583 = dma.hbm_to_vmem [thread:$0]  (!%p1973_p10), %s1980_s12, 3072, %s1982_s23, %s1984_s25, %s1833_s6, %s1833_s6, %s1834_s7  }
  0x59   : > { %p3187_p11 = scmp.ne.s32.totalorder %s3184_s19, 0 }
  0x5b   : > { %177 = sbr.rel (%p3187_p11) target bundleno = 588 (0x24c), region = 32 }
  0x62   : > { %s179_s11 = sand.u32 1, %s1821_s13   ;;  %p3188_p13 = scmp.ne.s32.totalorder %s3183_s18, 0 }
  0x63   : > { %s1562_s20 = smul.u32 192, %s179_s11  ;;  %s180_s26 = scalar_lea.sflag [#allocation3], %s179_s11 }
  0x65   : > { %s2018_s21 = scalar_lea.vmem [#allocation2], %s1562_s20 }
  0x66   : > { %1808 = dma.done.wait (%p3188_p13), %s180_s26, 3072  }
  0x67   : > { %1810 = vsyncadd (%p3188_p13), %s180_s26, 4294964224  ;;  %p3189_p3 = scmp.ne.s32.totalorder %s3182_s17, 0 }
  0x69   : > { %1812 = dma.done.wait (%p3189_p3), [#allocation5], 1088  }
  0x6a   : > { %1814 = vsyncadd (%p3189_p3), [#allocation5], 4294966208  ;;  %v1836_v0 = vmov 1   ;;  %v1837_v1 = vmov 0   ;;  %v2028_v2 = vld [vmem:[#allocation4] sm:$0xff]  ;;  %vm259_vm0 = vcmask 523264  }
  0x6b   : > { %1630 = vset.pattern.permute.xlu1 %v1836_v0  ;;  %1629 = vset.pattern.permute.xlu0 %v1837_v1  ;;  %v2032_v3 = vld [vmem:[#allocation4 + $0x8] sm:$0xff]  ;;  %v2035_v4 = vld [vmem:[%s2018_s21] sm:$0xff]  ;;  %v2041_v6 = vld [vmem:[%s2018_s21 + $0x10] sm:$0xff]  ;;  %vm581_vm1 = vcmask 516096   ;;  %s2512_s17 = smul.u32 3, %s1494_s16  ;;  %vm1381_vm5 = vcmask 519168  }
  0x6c   : > { %451 = vperm.xlu1 %1630, %v2028_v2   ;;  %325 = vperm.xlu0 %1629, %v2028_v2   ;;  %v2038_v5 = vld [vmem:[%s2018_s21 + $0x8] sm:$0xff]  ;;  %v260_v7 = vsel %vm259_vm0, %v2035_v4, 0.0  ;;  %v2050_v10 = vld [vmem:[%s2018_s21 + $0x80] sm:$0xff]  ;;  %v2055_v12 = vld [vmem:[#allocation4 + $0x10] sm:$0xff]  ;;  %v263_v13 = vsel %vm259_vm0, %v2041_v6, 0.0 }
  0x6d   : > { %v261_v8 = vsel %vm259_vm0, %v2038_v5, 0.0  ;;  %v2053_v11 = vld [vmem:[%s2018_s21 + $0x88] sm:$0xff]  ;;  %v302_v14 = vsel %vm259_vm0, %v2050_v10, 0.0  ;;  %v2064_v16 = vld [vmem:[%s2018_s21 + $0x18] sm:$0xff]  ;;  %v2067_v17 = vld [vmem:[%s2018_s21 + $0x90] sm:$0xff]  ;;  %p217_p10 = scmp.lt.s32.totalorder %s2512_s17, 5 }
  0x6e   : > { %v262_v9 = vadd.f32 %v261_v8, %v260_v7  ;;  %v303_v15 = vsel %vm259_vm0, %v2053_v11, 0.0  ;;  %v2070_v18 = vld [vmem:[%s2018_s21 + $0x40] sm:$0xff]  ;;  %v2073_v19 = vld [vmem:[%s2018_s21 + $0x48] sm:$0xff]  ;;  %v2078_v22 = vld [vmem:[%s2018_s21 + $0x50] sm:$0xff]  ;;  %v265_v26 = vsel %vm259_vm0, %v2064_v16, 0.0  ;;  %v305_v27 = vsel %vm259_vm0, %v2067_v17, 0.0 }
  0x6f   : > { %v304_v21 = vadd.f32 %v303_v15, %v302_v14  ;;  %v281_v23 = vsel %vm259_vm0, %v2070_v18, 0.0  ;;  %v282_v24 = vsel %vm259_vm0, %v2073_v19, 0.0  ;;  %v2084_v25 = vld [vmem:[#allocation4 + $0x18] sm:$0xff]  ;;  %v2091_v29 = vld [vmem:[%s2018_s21 + $0x20] sm:$0xff]  ;;  %v284_v31 = vsel %vm259_vm0, %v2078_v22, 0.0  ;;  %v2110_v39 = vld [vmem:[%s2018_s21 + $0x28] sm:$0xff] }
  0x70   : > { %455 = vperm.xlu1 %1630, %v2032_v3   ;;  %330 = vperm.xlu0 %1629, %v2032_v3   ;;  %v264_v20 = vadd.f32 %v263_v13, %v262_v9  ;;  %v283_v28 = vadd.f32 %v282_v24, %v281_v23  ;;  %v2094_v30 = vld [vmem:[%s2018_s21 + $0x98] sm:$0xff]  ;;  %v2103_v35 = vld [vmem:[#allocation4 + $0x20] sm:$0xff]  ;;  %v267_v36 = vsel %vm259_vm0, %v2091_v29, 0.0  ;;  %v2122_v45 = vld [vmem:[#allocation4 + $0x28] sm:$0xff]  ;;  %v269_v46 = vsel %vm259_vm0, %v2110_v39, 0.0  ;;  %s3210_s17 = smov (!%p217_p10, %s2512_s17), 5 }
  0x71   : > { %v2099_v32 = vld [vmem:[%s2018_s21 + $0x58] sm:$0xff]  ;;  %v306_v34 = vadd.f32 %v305_v27, %v304_v21  ;;  %v307_v37 = vsel %vm259_vm0, %v2094_v30, 0.0  ;;  %v2113_v40 = vld [vmem:[%s2018_s21 + $0xa0] sm:$0xff]  ;;  %v2129_v49 = vld [vmem:[%s2018_s21 + $0x30] sm:$0xff]  ;;  %s1535_s15 = sshll.u32 %s3210_s17, 5 }
  0x72   : > { %v266_v33 = vadd.f32 %v265_v26, %v264_v20  ;;  %v285_v38 = vadd.f32 %v284_v31, %v283_v28  ;;  %v286_v41 = vsel %vm259_vm0, %v2099_v32, 0.0  ;;  %v2118_v42 = vld [vmem:[%s2018_s21 + $0x60] sm:$0xff]  ;;  %v309_v47 = vsel %vm259_vm0, %v2113_v40, 0.0  ;;  %v2132_v50 = vld [vmem:[%s2018_s21 + $0xa8] sm:$0xff]  ;;  %v2141_v55 = vld [vmem:[#allocation4 + $0x30] sm:$0xff]  ;;  %s2649_s19 = scalar_lea.vmem %s3167_s3, %s1535_s15 }
  0x73   : > { %v308_v44 = vadd.f32 %v307_v37, %v306_v34  ;;  %v288_v51 = vsel %vm259_vm0, %v2118_v42, 0.0  ;;  %v2137_v52 = vld [vmem:[%s2018_s21 + $0x68] sm:$0xff]  ;;  %v271_v56 = vsel %vm259_vm0, %v2129_v49, 0.0  ;;  %v311_v57 = vsel %vm259_vm0, %v2132_v50, 0.0  ;;  %v2148_v59 = vld [vmem:[%s2018_s21 + $0x38] sm:$0xff]  ;;  %v2151_v60 = vld [vmem:[%s2018_s21 + $0xb0] sm:$0xff] }
  0x74   : > { %459 = vperm.xlu1 %1630, %v2055_v12   ;;  %335 = vperm.xlu0 %1629, %v2055_v12   ;;  %v268_v43 = vadd.f32 %v267_v36, %v266_v33  ;;  %v287_v48 = vadd.f32 %v286_v41, %v285_v38  ;;  %v290_v61 = vsel %vm259_vm0, %v2137_v52, 0.0  ;;  %v2156_v62 = vld [vmem:[%s2018_s21 + $0x70] sm:$0xff]  ;;  %v2160_v1 = vld [vmem:[#allocation4 + $0x38] sm:$0xff]  ;;  %v273_v7 = vsel %vm259_vm0, %v2148_v59, 0.0 }
  0x75   : > { %v310_v54 = vadd.f32 %v309_v47, %v308_v44  ;;  %v313_v8 = vsel %vm259_vm0, %v2151_v60, 0.0  ;;  %v2167_v13 = vld [vmem:[%s2018_s21 + $0xb8] sm:$0xff]  ;;  %v292_v14 = vsel %vm259_vm0, %v2156_v62, 0.0  ;;  %v1838_v31 = vmov 2  }
  0x76   : > { %v270_v53 = vadd.f32 %v269_v46, %v268_v43  ;;  %v289_v58 = vadd.f32 %v288_v51, %v287_v48  ;;  %v2172_v15 = vld [vmem:[%s2018_s21 + $0x78] sm:$0xff]  ;;  %v315_v23 = vsel %vm259_vm0, %v2167_v13, 0.0 }
  0x77   : > { %v312_v0 = vadd.f32 %v311_v57, %v310_v54  ;;  %v294_v26 = vsel %vm259_vm0, %v2172_v15, 0.0 }
  0x78   : > { %463 = vperm.xlu1 %1630, %v2084_v25   ;;  %340 = vperm.xlu0 %1629, %v2084_v25   ;;  %v272_v63 = vadd.f32 %v271_v56, %v270_v53  ;;  %v291_v9 = vadd.f32 %v290_v61, %v289_v58 }
  0x79   : > { %v314_v21 = vadd.f32 %v313_v8, %v312_v0  ;;  %v2181_v0 = vld [vmem:[#allocation6] sm:$0x1] }
  0x7a   : > { %v274_v20 = vadd.f32 %v273_v7, %v272_v63  ;;  %v293_v24 = vadd.f32 %v292_v14, %v291_v9 }
  0x7b   : > { %v316_v28 = vadd.f32 %v315_v23, %v314_v21 }
  0x7c   : > { %467 = vperm.xlu1 %1630, %v2103_v35   ;;  %345 = vperm.xlu0 %1629, %v2103_v35   ;;  %v275_v27 = vrot.slane %v274_v20, 4  ;;  %v295_v33 = vadd.f32 %v294_v26, %v293_v24 }
  0x7d   : > { %v317_v36 = vrot.slane %v316_v28, 4 }
  0x7e   : > { %v276_v34 = vadd.f32 %v275_v27, %v274_v20  ;;  %v296_v37 = vrot.slane %v295_v33, 4  ;;  %v2187_v20 = vld [vmem:[#allocation6 + $0x1] sm:$0x1] }
  0x7f   : > { %v318_v41 = vadd.f32 %v317_v36, %v316_v28 }
  0x80   : > { %471 = vperm.xlu1 %1630, %v2122_v45   ;;  %350 = vperm.xlu0 %1629, %v2122_v45   ;;  %v277_v38 = vrot.slane %v276_v34, 2  ;;  %v297_v43 = vadd.f32 %v296_v37, %v295_v33  ;;  %v1839_v37 = vmov 3  }
  0x81   : > { %v319_v46 = vrot.slane %v318_v41, 2 }
  0x82   : > { %v278_v44 = vadd.f32 %v277_v38, %v276_v34  ;;  %v298_v47 = vrot.slane %v297_v43, 2 }
  0x83   : > { %v320_v51 = vadd.f32 %v319_v46, %v318_v41 }
  0x84   : > { %475 = vperm.xlu1 %1630, %v2141_v55   ;;  %355 = vperm.xlu0 %1629, %v2141_v55   ;;  %v279_v48 = vrot.slane %v278_v44, 1  ;;  %v299_v53 = vadd.f32 %v298_v47, %v297_v43 }
  0x85   : > { %v321_v56 = vrot.slane %v320_v51, 1 }
  0x86   : > { %v280_v54 = vadd.f32 %v279_v48, %v278_v44  ;;  %v300_v57 = vrot.slane %v299_v53, 1 }
  0x87   : > { %v322_v61 = vadd.f32 %v321_v56, %v320_v51 }
  0x88   : > { %479 = vperm.xlu1 %1630, %v2160_v1   ;;  %360 = vperm.xlu0 %1629, %v2160_v1   ;;  %v569_v58 = vsel %vm259_vm0, %v280_v54, 0.0  ;;  %v301_v63 = vadd.f32 %v300_v57, %v299_v53  ;;  %v578_v8 = vmul.f32 %v280_v54, %v2181_v0  ;;  %v591_v26 = vmul.f32 %v280_v54, %v2187_v20 }
  0x89   : > { %v575_v7 = vsel %vm259_vm0, %v322_v61, 0.0  ;;  %v580_v23 = vmul.f32 %v322_v61, %v2181_v0  ;;  %v593_v33 = vmul.f32 %v322_v61, %v2187_v20 }
  0x8a   : > { %v572_v9 = vsel %vm259_vm0, %v301_v63, 0.0  ;;  %v579_v14 = vmul.f32 %v301_v63, %v2181_v0  ;;  %v582_v21 = vsel %vm581_vm1, %v578_v8, 0.0  ;;  %v592_v28 = vmul.f32 %v301_v63, %v2187_v20 }
  0x8b   : > { %v588_v27 = vsel %vm581_vm1, %v580_v23, 0.0  ;;  %v600_v36 = vsel %vm581_vm1, %v593_v33, 0.0 }
  0x8c   : > { %1632 = vset.pattern.permute.xlu1 %v1838_v31  ;;  %1631 = vset.pattern.permute.xlu0 %v1838_v31  ;;  %v585_v24 = vsel %vm581_vm1, %v579_v14, 0.0  ;;  %v594_v31 = vsel %vm581_vm1, %v591_v26, 0.0  ;;  %v597_v34 = vsel %vm581_vm1, %v592_v28, 0.0 }
  0xa7   : > { %570 = vadd.xlane.f32.xlu0 %v569_v58 }
  0xab   : > { %576 = vadd.xlane.f32.xlu0 %v575_v7 }
  0xac   : > { %573 = vadd.xlane.f32.xlu1 %v572_v9 }
  0xaf   : > { %583 = vadd.xlane.f32.xlu0 %v582_v21 }
  0xb0   : > { %586 = vadd.xlane.f32.xlu1 %v585_v24 }
  0xb3   : > { %589 = vadd.xlane.f32.xlu0 %v588_v27 }
  0xb4   : > { %595 = vadd.xlane.f32.xlu1 %v594_v31 }
  0xb7   : > { %598 = vadd.xlane.f32.xlu0 %v597_v34 }
  0xb8   : > { %601 = vadd.xlane.f32.xlu1 %v600_v36 }
  0xc9   : > { %719 = vperm.xlu1 %1632, %v2032_v3  }
  0xcd   : > { %723 = vperm.xlu1 %1632, %v2055_v12   ;;  %715 = vperm.xlu0 %1631, %v2028_v2  }
  0xd1   : > { %727 = vperm.xlu1 %1632, %v2084_v25   ;;  %1634 = vset.pattern.permute.xlu0 %v1839_v37 }
  0xd2   : > { %823 = vperm.xlu0 %1634, %v2032_v3  }
  0xd5   : > { %731 = vperm.xlu1 %1632, %v2103_v35  }
  0xd6   : > { %835 = vperm.xlu0 %1634, %v2103_v35  }
  0xd9   : > { %735 = vperm.xlu1 %1632, %v2122_v45  }
  0xdd   : > { %739 = vperm.xlu1 %1632, %v2141_v55  }
  0xe1   : > { %743 = vperm.xlu1 %1632, %v2160_v1  }
  0xe5   : > { %1633 = vset.pattern.permute.xlu1 %v1839_v37 }
  0xe6   : > { %819 = vperm.xlu1 %1633, %v2028_v2  }
  0xea   : > { %827 = vperm.xlu1 %1633, %v2055_v12  }
  0xeb   : > { %v452_v38 = vpop.permute.xlu1 %451  ;;  %v326_v41 = vpop.permute.xlu0 %325 }
  0xec   : > { %v482_v43 = vmul.f32 %v452_v38, %v2035_v4  ;;  %v490_v3 = vmul.f32 %v452_v38, %v2070_v18  ;;  %v498_v44 = vmul.f32 %v452_v38, %v2050_v10  ;;  %v363_v35 = vmul.f32 %v326_v41, %v2035_v4 }
  0xed   : > { %v371_v46 = vmul.f32 %v326_v41, %v2070_v18  ;;  %v379_v47 = vmul.f32 %v326_v41, %v2050_v10 }
  0xee   : > { %831 = vperm.xlu1 %1633, %v2084_v25   ;;  %v506_v56 = vsel %vm259_vm0, %v482_v43, 0.0  ;;  %v527_v4 = vsel %vm259_vm0, %v490_v3, 0.0  ;;  %v548_v10 = vsel %vm259_vm0, %v498_v44, 0.0  ;;  %v387_v57 = vsel %vm259_vm0, %v363_v35, 0.0 }
  0xef   : > { %v456_v48 = vpop.permute.xlu1 %455  ;;  %v331_v2 = vpop.permute.xlu0 %330  ;;  %v429_v63 = vsel %vm259_vm0, %v379_v47, 0.0 }
  0xf0   : > { %v483_v12 = vmul.f32 %v456_v48, %v2038_v5  ;;  %v491_v51 = vmul.f32 %v456_v48, %v2073_v19  ;;  %v499_v53 = vmul.f32 %v456_v48, %v2053_v11  ;;  %v364_v54 = vmul.f32 %v331_v2, %v2038_v5 }
  0xf1   : > { %v372_v25 = vmul.f32 %v331_v2, %v2073_v19  ;;  %v380_v18 = vmul.f32 %v331_v2, %v2053_v11  ;;  %v408_v5 = vsel %vm259_vm0, %v371_v46, 0.0 }
  0xf2   : > { %v507_v58 = vsel %vm259_vm0, %v483_v12, 0.0  ;;  %v528_v61 = vsel %vm259_vm0, %v491_v51, 0.0  ;;  %839 = vperm.xlu1 %1633, %v2122_v45   ;;  %v549_v7 = vsel %vm259_vm0, %v499_v53, 0.0  ;;  %v388_v19 = vsel %vm259_vm0, %v364_v54, 0.0 }
  0xf3   : > { %v460_v8 = vpop.permute.xlu1 %459  ;;  %v336_v11 = vpop.permute.xlu0 %335  ;;  %v409_v9 = vsel %vm259_vm0, %v372_v25, 0.0  ;;  %v430_v14 = vsel %vm259_vm0, %v380_v18, 0.0  ;;  %v508_v24 = vadd.f32 %v507_v58, %v506_v56  ;;  %v529_v45 = vadd.f32 %v528_v61, %v527_v4 }
  0xf4   : > { %v484_v21 = vmul.f32 %v460_v8, %v2041_v6  ;;  %v492_v23 = vmul.f32 %v460_v8, %v2078_v22  ;;  %v500_v26 = vmul.f32 %v460_v8, %v2067_v17  ;;  %v365_v27 = vmul.f32 %v336_v11, %v2041_v6 }
  0xf5   : > { %v373_v33 = vmul.f32 %v336_v11, %v2078_v22  ;;  %v381_v34 = vmul.f32 %v336_v11, %v2067_v17  ;;  %v550_v36 = vadd.f32 %v549_v7, %v548_v10  ;;  %v389_v37 = vadd.f32 %v388_v19, %v387_v57 }
  0xf6   : > { %v509_v28 = vsel %vm259_vm0, %v484_v21, 0.0  ;;  %v530_v31 = vsel %vm259_vm0, %v492_v23, 0.0  ;;  %v410_v38 = vadd.f32 %v409_v9, %v408_v5  ;;  %v431_v41 = vadd.f32 %v430_v14, %v429_v63 }
  0xf7   : > { %v464_v43 = vpop.permute.xlu1 %463  ;;  %v341_v3 = vpop.permute.xlu0 %340  ;;  %v510_v44 = vadd.f32 %v509_v28, %v508_v24  ;;  %v531_v35 = vadd.f32 %v530_v31, %v529_v45  ;;  %v551_v46 = vsel %vm259_vm0, %v500_v26, 0.0  ;;  %v390_v6 = vsel %vm259_vm0, %v365_v27, 0.0 }
  0xf8   : > { %v411_v47 = vsel %vm259_vm0, %v373_v33, 0.0  ;;  %v432_v48 = vsel %vm259_vm0, %v381_v34, 0.0  ;;  %v485_v22 = vmul.f32 %v464_v43, %v2064_v16  ;;  %v493_v17 = vmul.f32 %v464_v43, %v2099_v32 }
  0xf9   : > { %v501_v2 = vmul.f32 %v464_v43, %v2094_v30  ;;  %v366_v12 = vmul.f32 %v341_v3, %v2064_v16  ;;  %v374_v51 = vmul.f32 %v341_v3, %v2099_v32  ;;  %v382_v53 = vmul.f32 %v341_v3, %v2094_v30 }
  0xfa   : > { %v552_v54 = vadd.f32 %v551_v46, %v550_v36  ;;  %v391_v56 = vadd.f32 %v390_v6, %v389_v37  ;;  %v511_v4 = vsel %vm259_vm0, %v485_v22, 0.0  ;;  %v532_v25 = vsel %vm259_vm0, %v493_v17, 0.0 }
  0xfb   : > { %v468_v18 = vpop.permute.xlu1 %467  ;;  %v346_v10 = vpop.permute.xlu0 %345  ;;  %v412_v57 = vadd.f32 %v411_v47, %v410_v38  ;;  %v433_v58 = vadd.f32 %v432_v48, %v431_v41  ;;  %v553_v61 = vsel %vm259_vm0, %v501_v2, 0.0  ;;  %v392_v5 = vsel %vm259_vm0, %v366_v12, 0.0 }
  0xfc   : > { %v512_v63 = vadd.f32 %v511_v4, %v510_v44  ;;  %v533_v16 = vadd.f32 %v532_v25, %v531_v35  ;;  %v554_v7 = vadd.f32 %v553_v61, %v552_v54  ;;  %v393_v32 = vadd.f32 %v392_v5, %v391_v56 }
  0xfd   : > { %v413_v30 = vsel %vm259_vm0, %v374_v51, 0.0  ;;  %v434_v19 = vsel %vm259_vm0, %v382_v53, 0.0  ;;  %v486_v8 = vmul.f32 %v468_v18, %v2091_v29  ;;  %v494_v11 = vmul.f32 %v468_v18, %v2118_v42 }
  0xfe   : > { %v502_v9 = vmul.f32 %v468_v18, %v2113_v40  ;;  %v367_v14 = vmul.f32 %v346_v10, %v2091_v29  ;;  %v375_v21 = vmul.f32 %v346_v10, %v2118_v42  ;;  %v383_v23 = vmul.f32 %v346_v10, %v2113_v40 }
  0xff   : > { %v472_v24 = vpop.permute.xlu1 %471  ;;  %v351_v45 = vpop.permute.xlu0 %350  ;;  %v513_v26 = vsel %vm259_vm0, %v486_v8, 0.0  ;;  %v534_v27 = vsel %vm259_vm0, %v494_v11, 0.0  ;;  %v414_v33 = vadd.f32 %v413_v30, %v412_v57  ;;  %v435_v34 = vadd.f32 %v434_v19, %v433_v58 }
 0x100   : > { %v487_v28 = vmul.f32 %v472_v24, %v2110_v39  ;;  %v495_v31 = vmul.f32 %v472_v24, %v2137_v52  ;;  %v555_v36 = vsel %vm259_vm0, %v502_v9, 0.0  ;;  %v394_v37 = vsel %vm259_vm0, %v367_v14, 0.0 }
 0x101   : > { %v514_v38 = vadd.f32 %v513_v26, %v512_v63  ;;  %v535_v42 = vadd.f32 %v534_v27, %v533_v16  ;;  %v415_v40 = vsel %vm259_vm0, %v375_v21, 0.0  ;;  %v436_v41 = vsel %vm259_vm0, %v383_v23, 0.0 }
 0x102   : > { %v556_v43 = vadd.f32 %v555_v36, %v554_v7  ;;  %v395_v3 = vadd.f32 %v394_v37, %v393_v32  ;;  %v503_v44 = vmul.f32 %v472_v24, %v2132_v50  ;;  %v515_v35 = vsel %vm259_vm0, %v487_v28, 0.0 }
 0x103   : > { %v476_v46 = vpop.permute.xlu1 %475  ;;  %v356_v6 = vpop.permute.xlu0 %355  ;;  %v416_v47 = vadd.f32 %v415_v40, %v414_v33  ;;  %v536_v48 = vsel %vm259_vm0, %v495_v31, 0.0  ;;  %v368_v22 = vmul.f32 %v351_v45, %v2110_v39  ;;  %v376_v17 = vmul.f32 %v351_v45, %v2137_v52 }
 0x104   : > { %v437_v2 = vadd.f32 %v436_v41, %v435_v34  ;;  %v557_v12 = vsel %vm259_vm0, %v503_v44, 0.0  ;;  %v384_v51 = vmul.f32 %v351_v45, %v2132_v50  ;;  %v488_v53 = vmul.f32 %v476_v46, %v2129_v49 }
 0x105   : > { %v516_v54 = vadd.f32 %v515_v35, %v514_v38  ;;  %v396_v56 = vsel %vm259_vm0, %v368_v22, 0.0  ;;  %v417_v4 = vsel %vm259_vm0, %v376_v17, 0.0  ;;  %v496_v25 = vmul.f32 %v476_v46, %v2156_v62 }
 0x106   : > { %v537_v18 = vadd.f32 %v536_v48, %v535_v42  ;;  %v558_v10 = vadd.f32 %v557_v12, %v556_v43  ;;  %v438_v57 = vsel %vm259_vm0, %v384_v51, 0.0  ;;  %v504_v52 = vmul.f32 %v476_v46, %v2151_v60 }
 0x107   : > { %v480_v58 = vpop.permute.xlu1 %479  ;;  %v397_v61 = vadd.f32 %v396_v56, %v395_v3  ;;  %v517_v5 = vsel %vm259_vm0, %v488_v53, 0.0  ;;  %v538_v50 = vsel %vm259_vm0, %v496_v25, 0.0  ;;  %v369_v63 = vmul.f32 %v356_v6, %v2129_v49  ;;  %v361_v19 = vpop.permute.xlu0 %360 }
 0x108   : > { %v418_v16 = vadd.f32 %v417_v4, %v416_v47  ;;  %v439_v7 = vadd.f32 %v438_v57, %v437_v2  ;;  %v559_v32 = vsel %vm259_vm0, %v504_v52, 0.0  ;;  %v377_v30 = vmul.f32 %v356_v6, %v2156_v62 }
 0x109   : > { %v518_v8 = vadd.f32 %v517_v5, %v516_v54  ;;  %v385_v11 = vmul.f32 %v356_v6, %v2151_v60  ;;  %v398_v9 = vsel %vm259_vm0, %v369_v63, 0.0  ;;  %v489_v14 = vmul.f32 %v480_v58, %v2148_v59 }
 0x10a   : > { %v539_v21 = vadd.f32 %v538_v50, %v537_v18  ;;  %v560_v23 = vadd.f32 %v559_v32, %v558_v10  ;;  %v497_v24 = vmul.f32 %v480_v58, %v2172_v15  ;;  %v505_v49 = vmul.f32 %v480_v58, %v2167_v13 }
 0x10b   : > { %v419_v45 = vsel %vm259_vm0, %v377_v30, 0.0  ;;  %v440_v26 = vsel %vm259_vm0, %v385_v11, 0.0  ;;  %v519_v62 = vsel %vm259_vm0, %v489_v14, 0.0  ;;  %v370_v27 = vmul.f32 %v361_v19, %v2148_v59 }
 0x10c   : > { %v399_v28 = vadd.f32 %v398_v9, %v397_v61  ;;  %v520_v60 = vadd.f32 %v519_v62, %v518_v8  ;;  %v540_v31 = vsel %vm259_vm0, %v497_v24, 0.0  ;;  %v561_v33 = vsel %vm259_vm0, %v505_v49, 0.0 }
 0x10d   : > { %v541_v34 = vadd.f32 %v540_v31, %v539_v21  ;;  %v562_v36 = vadd.f32 %v561_v33, %v560_v23  ;;  %v378_v37 = vmul.f32 %v361_v19, %v2172_v15  ;;  %v386_v38 = vmul.f32 %v361_v19, %v2167_v13 }
 0x10e   : > { %v420_v42 = vadd.f32 %v419_v45, %v418_v16  ;;  %v441_v40 = vadd.f32 %v440_v26, %v439_v7  ;;  %v521_v41 = vrot.slane %v520_v60, 4  ;;  %v400_v43 = vsel %vm259_vm0, %v370_v27, 0.0 }
 0x10f   : > { %v542_v3 = vrot.slane %v541_v34, 4  ;;  %v563_v44 = vrot.slane %v562_v36, 4  ;;  %v401_v59 = vadd.f32 %v400_v43, %v399_v28  ;;  %v421_v35 = vsel %vm259_vm0, %v378_v37, 0.0 }
 0x110   : > { %v522_v46 = vadd.f32 %v521_v41, %v520_v60  ;;  %v422_v6 = vadd.f32 %v421_v35, %v420_v42  ;;  %v442_v47 = vsel %vm259_vm0, %v386_v38, 0.0 }
 0x111   : > { %v543_v48 = vadd.f32 %v542_v3, %v541_v34  ;;  %v402_v22 = vrot.slane %v401_v59, 4  ;;  %v443_v17 = vadd.f32 %v442_v47, %v441_v40  ;;  %v564_v15 = vadd.f32 %v563_v44, %v562_v36 }
 0x112   : > { %v423_v2 = vrot.slane %v422_v6, 4  ;;  %v523_v13 = vrot.slane %v522_v46, 2 }
 0x113   : > { %v403_v12 = vadd.f32 %v402_v22, %v401_v59  ;;  %v444_v51 = vrot.slane %v443_v17, 4  ;;  %v544_v53 = vrot.slane %v543_v48, 2  ;;  %v565_v57 = vrot.slane %v564_v15, 2 }
 0x114   : > { %v424_v54 = vadd.f32 %v423_v2, %v422_v6  ;;  %v524_v10 = vadd.f32 %v523_v13, %v522_v46 }
 0x115   : > { %v445_v56 = vadd.f32 %v444_v51, %v443_v17  ;;  %v404_v4 = vrot.slane %v403_v12, 2  ;;  %v545_v25 = vadd.f32 %v544_v53, %v543_v48  ;;  %v566_v32 = vadd.f32 %v565_v57, %v564_v15  ;;  %v2333_v51 = vld [vmem:[#allocation6 + $0x2] sm:$0x1] }
 0x116   : > { %v425_v18 = vrot.slane %v424_v54, 2  ;;  %v525_v7 = vrot.slane %v524_v10, 1 }
 0x117   : > { %v405_v52 = vadd.f32 %v404_v4, %v403_v12  ;;  %v446_v58 = vrot.slane %v445_v56, 2  ;;  %v546_v63 = vrot.slane %v545_v25, 1  ;;  %v567_v24 = vrot.slane %v566_v32, 1 }
 0x118   : > { %v426_v61 = vadd.f32 %v425_v18, %v424_v54  ;;  %v526_v23 = vadd.f32 %v525_v7, %v524_v10 }
 0x119   : > { %v406_v5 = vrot.slane %v405_v52, 1  ;;  %v447_v50 = vadd.f32 %v446_v58, %v445_v56  ;;  %v547_v14 = vadd.f32 %v546_v63, %v545_v25  ;;  %v568_v27 = vadd.f32 %v567_v24, %v566_v32 }
 0x11a   : > { %v427_v16 = vrot.slane %v426_v61, 1  ;;  %v612_v62 = vsel %vm259_vm0, %v526_v23, 0.0  ;;  %v624_v60 = vmul.f32 %v526_v23, %v2187_v20  ;;  %v642_v36 = vmul.f32 %v526_v23, %v2181_v0 }
 0x11b   : > { %v407_v30 = vadd.f32 %v406_v5, %v405_v52  ;;  %v448_v19 = vrot.slane %v447_v50, 1  ;;  %v625_v26 = vmul.f32 %v547_v14, %v2187_v20  ;;  %v615_v31 = vsel %vm259_vm0, %v547_v14, 0.0  ;;  %v2339_v52 = vld [vmem:[#allocation6 + $0x3] sm:$0x1] }
 0x11c   : > { %v428_v8 = vadd.f32 %v427_v16, %v426_v61  ;;  %v618_v37 = vsel %vm259_vm0, %v568_v27, 0.0  ;;  %v626_v40 = vmul.f32 %v568_v27, %v2187_v20  ;;  %v644_v44 = vmul.f32 %v568_v27, %v2181_v0 }
 0x11d   : > { %v603_v11 = vsel %vm259_vm0, %v407_v30, 0.0  ;;  %v449_v9 = vadd.f32 %v448_v19, %v447_v50  ;;  %v621_v28 = vmul.f32 %v407_v30, %v2181_v0  ;;  %v639_v34 = vmul.f32 %v407_v30, %v2187_v20 }
 0x11e   : > { %604 = vadd.xlane.f32.xlu1 %v603_v11  ;;  %v606_v21 = vsel %vm259_vm0, %v428_v8, 0.0  ;;  %v622_v45 = vmul.f32 %v428_v8, %v2181_v0  ;;  %v640_v46 = vmul.f32 %v428_v8, %v2187_v20  ;;  %v643_v6 = vmul.f32 %v547_v14, %v2181_v0 }
 0x11f   : > { %607 = vadd.xlane.f32.xlu0 %v606_v21  ;;  %v609_v49 = vsel %vm259_vm0, %v449_v9, 0.0  ;;  %v627_v38 = vsub.f32 %v621_v28, %v624_v60  ;;  %v623_v42 = vmul.f32 %v449_v9, %v2181_v0  ;;  %v645_v43 = vadd.f32 %v642_v36, %v639_v34 }
 0x120   : > { %v628_v33 = vsub.f32 %v622_v45, %v625_v26  ;;  %v641_v3 = vmul.f32 %v449_v9, %v2187_v20  ;;  %v646_v17 = vadd.f32 %v643_v6, %v640_v46 }
 0x121   : > { %v630_v59 = vsel %vm581_vm1, %v627_v38, 0.0  ;;  %v629_v35 = vsub.f32 %v623_v42, %v626_v40  ;;  %v648_v47 = vsel %vm581_vm1, %v645_v43, 0.0  ;;  %v746_v40 = vlaneseq }
 0x122   : > { %610 = vadd.xlane.f32.xlu1 %v609_v49  ;;  %v633_v41 = vsel %vm581_vm1, %v628_v33, 0.0  ;;  %v647_v48 = vadd.f32 %v644_v44, %v641_v3  ;;  %v651_v2 = vsel %vm581_vm1, %v646_v17, 0.0 }
 0x123   : > { %613 = vadd.xlane.f32.xlu0 %v612_v62  ;;  %v636_v22 = vsel %vm581_vm1, %v629_v35, 0.0  ;;  %v747_v46 = vshrl.u32 %v746_v40, 7 }
 0x124   : > { %v654_v15 = vsel %vm581_vm1, %v647_v48, 0.0 }
 0x126   : > { %616 = vadd.xlane.f32.xlu1 %v615_v31 }
 0x127   : > { %619 = vadd.xlane.f32.xlu0 %v618_v37 }
 0x12a   : > { %634 = vadd.xlane.f32.xlu1 %v633_v41 }
 0x12b   : > { %631 = vadd.xlane.f32.xlu0 %v630_v59 }
 0x12e   : > { %649 = vadd.xlane.f32.xlu1 %v648_v47 }
 0x12f   : > { %637 = vadd.xlane.f32.xlu0 %v636_v22 }
 0x132   : > { %655 = vadd.xlane.f32.xlu1 %v654_v15 }
 0x133   : > { %652 = vadd.xlane.f32.xlu0 %v651_v2 }
 0x134   : > { %v571_v13 = vpop.xlane.xlu0 %570 }
 0x135   : > { %v657_v36 = vmul.f32 0.015625, %v571_v13 }
 0x138   : > { %v577_v12 = vpop.xlane.xlu0 %576 }
 0x139   : > { %v574_v20 = vpop.xlane.xlu1 %573  ;;  %v659_v4 = vmul.f32 0.015625, %v577_v12 }
 0x13a   : > { %v658_v0 = vmul.f32 0.015625, %v574_v20 }
 0x13c   : > { %v584_v53 = vpop.xlane.xlu0 %583 }
 0x13d   : > { %v587_v54 = vpop.xlane.xlu1 %586  ;;  %v660_v37 = vmul.f32 %v584_v53, %v2333_v51  ;;  %v672_v43 = vmul.f32 %v584_v53, %v2339_v52 }
 0x13e   : > { %v661_v56 = vmul.f32 %v587_v54, %v2333_v51  ;;  %v673_v50 = vmul.f32 %v587_v54, %v2339_v52 }
 0x13f   : > { %v663_v41 = vadd.f32 %v660_v37, %v657_v36 }
 0x140   : > { %v2336_v25 = vadd.f32 %v661_v56, %v658_v0  ;;  %v590_v18 = vpop.xlane.xlu0 %589 }
 0x141   : > { %v662_v10 = vmul.f32 %v590_v18, %v2333_v51  ;;  %v596_v57 = vpop.xlane.xlu1 %595  ;;  %v674_v61 = vmul.f32 %v590_v18, %v2339_v52 }
 0x142   : > { %v666_v3 = vmul.f32 %v596_v57, %v2339_v52  ;;  %v675_v44 = vmul.f32 %v596_v57, %v2333_v51 }
 0x143   : > { %v2341_v58 = vadd.f32 %v662_v10, %v659_v4  ;;  %847 = vperm.xlu1 %1633, %v2160_v1   ;;  %v2403_v4 = vsub.s32 0, %v747_v46 }
 0x144   : > { %v599_v5 = vpop.xlane.xlu0 %598  ;;  %v669_v6 = vsub.f32 %v663_v41, %v666_v3  ;;  %v678_v47 = vadd.f32 %v675_v44, %v672_v43 }
 0x145   : > { %v2347_v63 = vmul.f32 %v599_v5, %v2339_v52  ;;  %v676_v16 = vmul.f32 %v599_v5, %v2333_v51  ;;  %v602_v7 = vpop.xlane.xlu1 %601 }
 0x146   : > { %v2351_v32 = vmul.f32 %v602_v7, %v2339_v52  ;;  %v677_v30 = vmul.f32 %v602_v7, %v2333_v51  ;;  %v711_v18 = vmul.f32 0.015625, %v669_v6  ;;  %v910_v10 = vmul.f32 0.015625, %v678_v47 }
 0x147   : > { %v2356_v1 = vadd.f32 %v676_v16, %v673_v50 }
 0x148   : > { %v671_v8 = vsub.f32 %v2341_v58, %v2351_v32  ;;  %v2360_v11 = vadd.f32 %v677_v30, %v674_v61  ;;  %v2408_v30 = vrot.slane %v711_v18, %v2403_v4 }
 0x149   : > { %843 = vperm.xlu0 %1634, %v2141_v55   ;;  %v2363_v9 = vpop.permute.xlu1 %719 }
 0x14a   : > { %3193 = vst [vmem:[#allocation12_spill] sm:$0xff] %v2408_v30  ;;  %v2415_v36 = vmul.f32 0.015625, %v671_v8 }
 0x14c   : > { %v2381_v27 = vpop.permute.xlu0 %715 }
 0x14d   : > { %v2365_v14 = vpop.permute.xlu1 %723 }
 0x151   : > { %v2367_v21 = vpop.permute.xlu1 %727  ;;  %v2385_v28 = vpop.permute.xlu0 %823 }
 0x155   : > { %v2369_v23 = vpop.permute.xlu1 %731  ;;  %v2389_v31 = vpop.permute.xlu0 %835 }
 0x159   : > { %v2371_v24 = vpop.permute.xlu1 %735 }
 0x15d   : > { %v2373_v49 = vpop.permute.xlu1 %739 }
 0x15e   : > { %3190 = vst [vmem:[#allocation9_spill] sm:$0xff] %v2373_v49  ;;  %v1685_v49 = vld [vmem:[%s2018_s21 + $0x10] sm:$0xff] }
 0x161   : > { %v2375_v45 = vpop.permute.xlu1 %743 }
 0x162   : > { %3191 = vst [vmem:[#allocation10_spill] sm:$0xff] %v2375_v45 }
 0x165   : > { %v2377_v26 = vpop.permute.xlu1 %819 }
 0x169   : > { %v2379_v62 = vpop.permute.xlu1 %827 }
 0x16d   : > { %v2383_v55 = vpop.permute.xlu1 %831 }
 0x171   : > { %v2387_v60 = vpop.permute.xlu1 %839 }
 0x1ab   : > { %v605_v33 = vpop.xlane.xlu1 %604 }
 0x1ac   : > { %v608_v34 = vpop.xlane.xlu0 %607  ;;  %v681_v0 = vmul.f32 0.015625, %v605_v33  ;;  %v2411_v33 = vrot.slane %v910_v10, %v2403_v4 }
 0x1ad   : > { %v682_v22 = vmul.f32 0.015625, %v608_v34 }
 0x1ae   : > { %3194 = vst [vmem:[#allocation13_spill] sm:$0xff] %v2411_v33 }
 0x1af   : > { %v611_v38 = vpop.xlane.xlu1 %610 }
 0x1b0   : > { %v614_v42 = vpop.xlane.xlu0 %613  ;;  %v2417_v37 = vmul.f32 0.015625, %v611_v38 }
 0x1b1   : > { %v696_v53 = vmul.f32 0.015625, %v614_v42 }
 0x1b3   : > { %v617_v59 = vpop.xlane.xlu1 %616 }
 0x1b4   : > { %v620_v35 = vpop.xlane.xlu0 %619  ;;  %v697_v17 = vmul.f32 0.015625, %v617_v59 }
 0x1b5   : > { %v2425_v41 = vmul.f32 0.015625, %v620_v35 }
 0x1b7   : > { %v635_v48 = vpop.xlane.xlu1 %634 }
 0x1b8   : > { %v685_v15 = vmul.f32 %v635_v48, %v2333_v51  ;;  %v700_v2 = vmul.f32 %v635_v48, %v2339_v52  ;;  %v632_v13 = vpop.xlane.xlu0 %631 }
 0x1b9   : > { %v684_v12 = vmul.f32 %v632_v13, %v2333_v51  ;;  %v699_v20 = vmul.f32 %v632_v13, %v2339_v52 }
 0x1ba   : > { %v2399_v54 = vadd.f32 %v685_v15, %v682_v22  ;;  %v2401_v56 = vadd.f32 %v700_v2, %v697_v17 }
 0x1bb   : > { %v650_v57 = vpop.xlane.xlu1 %649  ;;  %v687_v58 = vadd.f32 %v684_v12, %v681_v0  ;;  %v702_v61 = vadd.f32 %v699_v20, %v696_v53 }
 0x1bc   : > { %3192 = vst [vmem:[#allocation11_spill] sm:$0xff] %v2401_v56  ;;  %v690_v5 = vmul.f32 %v650_v57, %v2339_v52  ;;  %v705_v50 = vmul.f32 %v650_v57, %v2333_v51  ;;  %v638_v32 = vpop.xlane.xlu0 %637 }
 0x1bd   : > { %v2428_v43 = vmul.f32 %v638_v32, %v2333_v51  ;;  %v2431_v3 = vmul.f32 %v638_v32, %v2339_v52 }
 0x1be   : > { %v693_v16 = vsub.f32 %v687_v58, %v690_v5  ;;  %v708_v7 = vadd.f32 %v705_v50, %v702_v61 }
 0x1bf   : > { %v2413_v34 = vpop.xlane.xlu1 %655 }
 0x1c0   : > { %v2420_v42 = vrot.slane %v693_v16, %v2403_v4  ;;  %v2423_v40 = vrot.slane %v708_v7, %v2403_v4  ;;  %v2435_v8 = vmul.f32 %v2413_v34, %v2339_v52 }
 0x1c2   : > { %3195 = vst [vmem:[#allocation14_spill] sm:$0xff] %v2420_v42  ;;  %3196 = vst [vmem:[#allocation15_spill] sm:$0xff] %v2423_v40  ;;  %v758_v38 = vmul.f32 %v2420_v42, %v2381_v27  ;;  %v759_v44 = vmul.f32 %v2420_v42, %v2363_v9  ;;  %v760_v59 = vmul.f32 %v2420_v42, %v2365_v14 }
 0x1c3   : > { %v761_v35 = vmul.f32 %v2420_v42, %v2367_v21  ;;  %v762_v46 = vmul.f32 %v2420_v42, %v2369_v23  ;;  %v763_v6 = vmul.f32 %v2420_v42, %v2371_v24  ;;  %v862_v47 = vmul.f32 %v2423_v40, %v2377_v26 }
 0x1c4   : > { %v863_v48 = vmul.f32 %v2423_v40, %v2385_v28  ;;  %v794_v22 = vadd.f32 %v2408_v30, %v758_v38  ;;  %v795_v17 = vadd.f32 %v2408_v30, %v759_v44  ;;  %v796_v15 = vadd.f32 %v2408_v30, %v760_v59 }
 0x1c5   : > { %v797_v2 = vadd.f32 %v2408_v30, %v761_v35  ;;  %v798_v13 = vadd.f32 %v2408_v30, %v762_v46  ;;  %v799_v12 = vadd.f32 %v2408_v30, %v763_v6  ;;  %v864_v20 = vmul.f32 %v2423_v40, %v2379_v62  ;;  %v1686_v30 = vld [vmem:[%s2018_s21 + $0x18] sm:$0xff] }
 0x1c6   : > { %v865_v0 = vmul.f32 %v2423_v40, %v2383_v55  ;;  %v866_v53 = vmul.f32 %v2423_v40, %v2389_v31  ;;  %v867_v18 = vmul.f32 %v2423_v40, %v2387_v60  ;;  %v886_v10 = vsub.f32 %v794_v22, %v862_v47 }
 0x1c7   : > { %v887_v57 = vsub.f32 %v795_v17, %v863_v48  ;;  %v888_v58 = vsub.f32 %v796_v15, %v864_v20  ;;  %v913_v5 = vmul.f32 %v2423_v40, %v2381_v27  ;;  %v914_v50 = vmul.f32 %v2423_v40, %v2363_v9 }
 0x1c8   : > { %v889_v61 = vsub.f32 %v797_v2, %v865_v0  ;;  %v890_v16 = vsub.f32 %v798_v13, %v866_v53  ;;  %v891_v7 = vsub.f32 %v799_v12, %v867_v18  ;;  %v915_v32 = vmul.f32 %v2423_v40, %v2365_v14 }
 0x1c9   : > { %v916_v38 = vmul.f32 %v2423_v40, %v2367_v21  ;;  %v917_v44 = vmul.f32 %v2423_v40, %v2369_v23  ;;  %v918_v59 = vmul.f32 %v2423_v40, %v2371_v24  ;;  %v949_v35 = vadd.f32 %v2411_v33, %v913_v5 }
 0x1ca   : > { %v950_v46 = vadd.f32 %v2411_v33, %v914_v50  ;;  %v951_v6 = vadd.f32 %v2411_v33, %v915_v32  ;;  %v973_v48 = vmul.f32 %v2377_v26, %v2420_v42  ;;  %v974_v22 = vmul.f32 %v2385_v28, %v2420_v42  ;;  %v1683_v50 = vld [vmem:[%s2018_s21] sm:$0xff] }
 0x1cb   : > { %v952_v47 = vadd.f32 %v2411_v33, %v916_v38  ;;  %v953_v17 = vadd.f32 %v2411_v33, %v917_v44  ;;  %v954_v15 = vadd.f32 %v2411_v33, %v918_v59  ;;  %v975_v2 = vmul.f32 %v2379_v62, %v2420_v42  ;;  %v1684_v38 = vld [vmem:[%s2018_s21 + $0x8] sm:$0xff] }
 0x1cc   : > { %v976_v13 = vmul.f32 %v2383_v55, %v2420_v42  ;;  %v977_v12 = vmul.f32 %v2389_v31, %v2420_v42  ;;  %v978_v20 = vmul.f32 %v2387_v60, %v2420_v42  ;;  %v997_v0 = vadd.f32 %v973_v48, %v949_v35 }
 0x1cd   : > { %v998_v53 = vadd.f32 %v974_v22, %v950_v46  ;;  %v999_v18 = vadd.f32 %v975_v2, %v951_v6  ;;  %v1021_v32 = vsub.f32 %v1683_v50, %v886_v10  ;;  %v1022_v44 = vsub.f32 %v1684_v38, %v887_v57 }
 0x1ce   : > { %v1000_v5 = vadd.f32 %v976_v13, %v952_v47  ;;  %v1001_v59 = vadd.f32 %v977_v12, %v953_v17  ;;  %v1002_v19 = vadd.f32 %v978_v20, %v954_v15  ;;  %v1023_v33 = vsub.f32 %v1685_v49, %v888_v58 }
 0x1cf   : > { %v1024_v40 = vsub.f32 %v1686_v30, %v889_v61  ;;  %v1025_v45 = vsub.f32 %v2091_v29, %v890_v16  ;;  %v1026_v56 = vsub.f32 %v2110_v39, %v891_v7  ;;  %v1045_v42 = vmul.f32 %v1021_v32, %v1021_v32 }
 0x1d0   : > { %v1046_v35 = vmul.f32 %v1022_v44, %v1022_v44  ;;  %v1047_v46 = vmul.f32 %v1023_v33, %v1023_v33  ;;  %v1069_v47 = vmul.f32 %v997_v0, %v997_v0  ;;  %v1070_v48 = vmul.f32 %v998_v53, %v998_v53 }
 0x1d1   : > { %v1048_v6 = vmul.f32 %v1024_v40, %v1024_v40  ;;  %v1049_v10 = vmul.f32 %v1025_v45, %v1025_v45  ;;  %v1050_v22 = vmul.f32 %v1026_v56, %v1026_v56  ;;  %v1071_v57 = vmul.f32 %v999_v18, %v999_v18 }
 0x1d2   : > { %v1072_v17 = vmul.f32 %v1000_v5, %v1000_v5  ;;  %v1073_v15 = vmul.f32 %v1001_v59, %v1001_v59  ;;  %v2503_v2 = vadd.f32 %v1069_v47, %v1045_v42  ;;  %v2505_v49 = vadd.f32 %v1070_v48, %v1046_v35 }
 0x1d3   : > { %v707_v29 = vmul.f32 %v2413_v34, %v2333_v51  ;;  %v912_v39 = vmul.f32 0.015625, %v2360_v11  ;;  %v1074_v30 = vmul.f32 %v1002_v19, %v1002_v19  ;;  %v2514_v33 = vadd.f32 %v1071_v57, %v1047_v46  ;;  %v653_v19 = vpop.xlane.xlu0 %652 }
 0x1d4   : > { %v2516_v45 = vadd.f32 %v1072_v17, %v1048_v6  ;;  %v2518_v56 = vadd.f32 %v1073_v15, %v1049_v10  ;;  %1635 = vrsqrt.f32 %v2503_v2  ;;  %v689_v42 = vadd.f32 %v2428_v43, %v2417_v37 }
 0x1d5   : > { %v704_v34 = vadd.f32 %v2431_v3, %v2425_v41  ;;  %v2525_v11 = vadd.f32 %v1074_v30, %v1050_v22  ;;  %1637 = vrsqrt.f32 %v2505_v49  ;;  %v3197_v61 = vsub.f32 %v2336_v25, %v2347_v63 }
 0x1d6   : > { %1639 = vrsqrt.f32 %v2514_v33  ;;  %v695_v40 = vsub.f32 %v689_v42, %v2435_v8  ;;  %v2537_v37 = vrot.slane %v2415_v36, %v2403_v4  ;;  %v2540_v41 = vrot.slane %v912_v39, %v2403_v4 }
 0x1d7   : > { %v710_v58 = vadd.f32 %v707_v29, %v704_v34  ;;  %v2533_v16 = vmul.f32 0.015625, %v3197_v61  ;;  %1641 = vrsqrt.f32 %v2516_v45  ;;  %vm1119_vm2 = vcmp.eq.f32.partialorder %v2503_v2, inf }
 0x1d8   : > { %1643 = vrsqrt.f32 %v2518_v56  ;;  %v2547_v25 = vmul.f32 %v653_v19, %v2339_v52  ;;  %v2550_v63 = vmul.f32 %v653_v19, %v2333_v51  ;;  %vm1121_vm3 = vcmp.eq.f32.partialorder %v2503_v2, 0.0 }
 0x1d9   : > { %v1122_v36 = vand.u32 2147483648, %v2503_v2  ;;  %vm1126_vm4 = vcmp.eq.f32.partialorder %v2505_v49, inf  ;;  %v1129_v43 = vand.u32 2147483648, %v2505_v49  ;;  %1645 = vrsqrt.f32 %v2525_v11 }
 0x1da   : > { %vm1128_vm6 = vcmp.eq.f32.partialorder %v2505_v49, 0.0  ;;  %vm1133_vm7 = vcmp.eq.f32.partialorder %v2514_v33, inf  ;;  %v1136_v52 = vand.u32 2147483648, %v2514_v33  ;;  %v2561_v51 = vrot.slane %v695_v40, %v2403_v4 }
 0x1db   : > { %v2564_v3 = vrot.slane %v710_v58, %v2403_v4  ;;  %vm1135_vm8 = vcmp.eq.f32.partialorder %v2514_v33, 0.0  ;;  %vm1140_vm9 = vcmp.eq.f32.partialorder %v2516_v45, inf  ;;  %v1143_v8 = vand.u32 2147483648, %v2516_v45 }
 0x1dc   : > { %v1150_v7 = vand.u32 2147483648, %v2518_v56  ;;  %v1157_v13 = vand.u32 2147483648, %v2525_v11  ;;  %vm1142_vm10 = vcmp.eq.f32.partialorder %v2516_v45, 0.0  ;;  %vm1147_vm11 = vcmp.eq.f32.partialorder %v2518_v56, inf }
 0x1dd   : > { %v774_v12 = vmul.f32 %v2561_v51, %v2381_v27  ;;  %v775_v20 = vmul.f32 %v2561_v51, %v2363_v9  ;;  %v776_v0 = vmul.f32 %v2561_v51, %v2365_v14  ;;  %v777_v53 = vmul.f32 %v2561_v51, %v2367_v21 }
 0x1de   : > { %vm1149_vm12 = vcmp.eq.f32.partialorder %v2518_v56, 0.0  ;;  %vm1154_vm13 = vcmp.eq.f32.partialorder %v2525_v11, inf  ;;  %v778_v18 = vmul.f32 %v2561_v51, %v2369_v23  ;;  %v779_v5 = vmul.f32 %v2561_v51, %v2371_v24  ;;  %v1636_v38 = vpop.eup %1635 }
 0x1df   : > { %v2594_v50 = vmul.f32 %v2564_v3, %v2377_v26  ;;  %v2598_v32 = vmul.f32 %v2564_v3, %v2385_v28  ;;  %vm1156_vm14 = vcmp.eq.f32.partialorder %v2525_v11, 0.0  ;;  %v2602_v44 = vadd.f32 %v2537_v37, %v774_v12  ;;  %v1638_v6 = vpop.eup %1637 }
 0x1e0   : > { %v2605_v59 = vadd.f32 %v2537_v37, %v775_v20  ;;  %v2608_v35 = vadd.f32 %v2537_v37, %v776_v0  ;;  %v2611_v46 = vadd.f32 %v2537_v37, %v777_v53  ;;  %v1118_v47 = vmul.f32 %v1636_v38, %v2503_v2  ;;  %v1640_v57 = vpop.eup %1639 }
 0x1e1   : > { %v2616_v48 = vadd.f32 %v2537_v37, %v778_v18  ;;  %v2619_v10 = vadd.f32 %v2537_v37, %v779_v5  ;;  %v2623_v22 = vmul.f32 %v2564_v3, %v2379_v62  ;;  %v1125_v17 = vmul.f32 %v1638_v6, %v2505_v49  ;;  %v1642_v30 = vpop.eup %1641 }
 0x1e2   : > { %v2628_v15 = vmul.f32 %v2564_v3, %v2383_v55  ;;  %v2632_v29 = vmul.f32 %v2564_v3, %v2389_v31  ;;  %v2636_v39 = vmul.f32 %v2564_v3, %v2387_v60  ;;  %v1120_v42 = vsel %vm1119_vm2, %v2503_v2, %v1118_v47  ;;  %v1644_v58 = vpop.eup %1643 }
 0x1e3   : > { %v1132_v34 = vmul.f32 %v1640_v57, %v2514_v33  ;;  %v902_v19 = vsub.f32 %v2602_v44, %v2594_v50  ;;  %v903_v40 = vsub.f32 %v2605_v59, %v2598_v32  ;;  %v1123_v61 = vsel %vm1121_vm3, %v1122_v36, %v1120_v42  ;;  %v1646_v53 = vpop.eup %1645 }
 0x1e4   : > { %v1127_v12 = vsel %vm1126_vm4, %v2505_v49, %v1125_v17  ;;  %v1139_v20 = vmul.f32 %v1642_v30, %v2516_v45  ;;  %v904_v0 = vsub.f32 %v2608_v35, %v2623_v22  ;;  %v1146_v36 = vmul.f32 %v1644_v58, %v2518_v56 }
 0x1e5   : > { %v1130_v18 = vsel %vm1128_vm6, %v1129_v43, %v1127_v12  ;;  %v1134_v2 = vsel %vm1133_vm7, %v2514_v33, %v1132_v34  ;;  %v1536_v5 = vpack.c.bf16 %v1123_v61, %v1123_v61  ;;  %v1153_v38 = vmul.f32 %v1646_v53, %v2525_v11 }
 0x1e6   : > { %v1137_v50 = vsel %vm1135_vm8, %v1136_v52, %v1134_v2  ;;  %v1141_v32 = vsel %vm1140_vm9, %v2516_v45, %v1139_v20  ;;  %v1537_v49 = vpack.c.bf16 %v1130_v18, %v1130_v18  ;;  %v1148_v44 = vsel %vm1147_vm11, %v2518_v56, %v1146_v36 }
 0x1e7   : > { %v1144_v43 = vsel %vm1142_vm10, %v1143_v8, %v1141_v32  ;;  %v1538_v59 = vpack.c.bf16 %v1137_v50, %v1137_v50  ;;  %1382 = vst.msk [vmem:[%s2649_s19] sm:$0xf] %vm1381_vm5, %v1536_v5  ;;  %v905_v33 = vsub.f32 %v2611_v46, %v2628_v15  ;;  %v1151_v52 = vsel %vm1149_vm12, %v1150_v7, %v1148_v44  ;;  %v1687_v5 = vld [vmem:[%s2018_s21 + $0x80] sm:$0xff]  ;;  %v1688_v32 = vld [vmem:[%s2018_s21 + $0x88] sm:$0xff]  ;;  %v1689_v44 = vld [vmem:[%s2018_s21 + $0x90] sm:$0xff] }
 0x1e8   : > { %v1155_v45 = vsel %vm1154_vm13, %v2525_v11, %v1153_v38  ;;  %v1539_v8 = vpack.c.bf16 %v1144_v43, %v1144_v43  ;;  %1383 = vst.msk [vmem:[%s2649_s19 + $0x4] sm:$0xf] %vm1381_vm5, %v1537_v49  ;;  %v906_v35 = vsub.f32 %v2616_v48, %v2632_v29  ;;  %v1540_v47 = vpack.c.bf16 %v1151_v52, %v1151_v52  ;;  %v1690_v52 = vld [vmem:[%s2018_s21 + $0x98] sm:$0xff] }
 0x1e9   : > { %v1158_v6 = vsel %vm1156_vm14, %v1157_v13, %v1155_v45  ;;  %1384 = vst.msk [vmem:[%s2649_s19 + $0x8] sm:$0xf] %vm1381_vm5, %v1538_v59  ;;  %v907_v56 = vsub.f32 %v2619_v10, %v2636_v39  ;;  %v929_v7 = vmul.f32 %v2564_v3, %v2381_v27  ;;  %v930_v22 = vmul.f32 %v2564_v3, %v2363_v9 }
 0x1ea   : > { %v1541_v46 = vpack.c.bf16 %v1158_v6, %v1158_v6  ;;  %1385 = vst.msk [vmem:[%s2649_s19 + $0xc] sm:$0xf] %vm1381_vm5, %v1539_v8  ;;  %v931_v11 = vmul.f32 %v2564_v3, %v2365_v14  ;;  %v932_v13 = vmul.f32 %v2564_v3, %v2367_v21  ;;  %1386 = vst.msk [vmem:[%s2649_s19 + $0x10] sm:$0xf] %vm1381_vm5, %v1540_v47  ;;  %v1691_v8 = vld [vmem:[%s2018_s21 + $0xa0] sm:$0xff]  ;;  %v1692_v47 = vld [vmem:[%s2018_s21 + $0xa8] sm:$0xff] }
 0x1eb   : > { %v933_v48 = vmul.f32 %v2564_v3, %v2369_v23  ;;  %v934_v10 = vmul.f32 %v2564_v3, %v2371_v24  ;;  %v965_v57 = vadd.f32 %v2540_v41, %v929_v7  ;;  %v989_v17 = vmul.f32 %v2377_v26, %v2561_v51 }
 0x1ec   : > { %1387 = vst.msk [vmem:[%s2649_s19 + $0x14] sm:$0xf] %vm1381_vm5, %v1541_v46  ;;  %v966_v15 = vadd.f32 %v2540_v41, %v930_v22  ;;  %v967_v29 = vadd.f32 %v2540_v41, %v931_v11  ;;  %v968_v39 = vadd.f32 %v2540_v41, %v932_v13  ;;  %v990_v30 = vmul.f32 %v2385_v28, %v2561_v51 }
 0x1ed   : > { %v969_v42 = vadd.f32 %v2540_v41, %v933_v48  ;;  %v970_v34 = vadd.f32 %v2540_v41, %v934_v10  ;;  %v991_v58 = vmul.f32 %v2379_v62, %v2561_v51  ;;  %v992_v61 = vmul.f32 %v2383_v55, %v2561_v51 }
 0x1ee   : > { %v993_v12 = vmul.f32 %v2389_v31, %v2561_v51  ;;  %v994_v20 = vmul.f32 %v2387_v60, %v2561_v51  ;;  %v1013_v53 = vadd.f32 %v989_v17, %v965_v57  ;;  %v1014_v18 = vadd.f32 %v990_v30, %v966_v15 }
 0x1ef   : > { %v1015_v2 = vadd.f32 %v991_v58, %v967_v29  ;;  %v1016_v36 = vadd.f32 %v992_v61, %v968_v39  ;;  %v1037_v50 = vsub.f32 %v1687_v5, %v902_v19  ;;  %v1038_v38 = vsub.f32 %v1688_v32, %v903_v40 }
 0x1f0   : > { %v1017_v49 = vadd.f32 %v993_v12, %v969_v42  ;;  %v1018_v43 = vadd.f32 %v994_v20, %v970_v34  ;;  %v1039_v59 = vsub.f32 %v1689_v44, %v904_v0  ;;  %v1040_v45 = vsub.f32 %v1690_v52, %v905_v33  ;;  %v3198_v34 = vld [vmem:[#allocation11_spill] sm:$0xff] }
 0x1f1   : > { %v1041_v6 = vsub.f32 %v1691_v8, %v906_v35  ;;  %v1042_v7 = vsub.f32 %v1692_v47, %v907_v56  ;;  %v1061_v46 = vmul.f32 %v1037_v50, %v1037_v50  ;;  %v1062_v22 = vmul.f32 %v1038_v38, %v1038_v38 }
 0x1f2   : > { %v1063_v11 = vmul.f32 %v1039_v59, %v1039_v59  ;;  %v1064_v13 = vmul.f32 %v1040_v45, %v1040_v45  ;;  %v1085_v48 = vmul.f32 %v1013_v53, %v1013_v53  ;;  %v1086_v10 = vmul.f32 %v1014_v18, %v1014_v18 }
 0x1f3   : > { %v1065_v57 = vmul.f32 %v1041_v6, %v1041_v6  ;;  %v1066_v19 = vmul.f32 %v1042_v7, %v1042_v7  ;;  %v1087_v17 = vmul.f32 %v1015_v2, %v1015_v2  ;;  %v1088_v40 = vmul.f32 %v1016_v36, %v1016_v36 }
 0x1f4   : > { %v1089_v15 = vmul.f32 %v1017_v49, %v1017_v49  ;;  %v2737_v29 = vadd.f32 %v1085_v48, %v1061_v46  ;;  %v2739_v0 = vadd.f32 %v1086_v10, %v1062_v22  ;;  %v694_v33 = vsub.f32 %v2399_v54, %v2547_v25 }
 0x1f5   : > { %v911_v35 = vmul.f32 0.015625, %v2356_v1  ;;  %v1090_v56 = vmul.f32 %v1018_v43, %v1018_v43  ;;  %v2744_v39 = vadd.f32 %v1087_v17, %v1063_v11  ;;  %v2746_v30 = vadd.f32 %v1088_v40, %v1064_v13 }
 0x1f6   : > { %v2748_v42 = vadd.f32 %v1089_v15, %v1065_v57  ;;  %1647 = vrsqrt.f32 %v2737_v29  ;;  %v709_v58 = vadd.f32 %v2550_v63, %v3198_v34  ;;  %v2758_v1 = vrot.slane %v694_v33, %v2403_v4 }
 0x1f7   : > { %v2753_v61 = vadd.f32 %v1090_v56, %v1066_v19  ;;  %1649 = vrsqrt.f32 %v2739_v0  ;;  %v2762_v54 = vrot.slane %v2533_v16, %v2403_v4  ;;  %v2765_v25 = vrot.slane %v911_v35, %v2403_v4 }
 0x1f8   : > { %1651 = vrsqrt.f32 %v2744_v39  ;;  %vm1231_vm15 = vcmp.eq.f32.partialorder %v2737_v29, inf  ;;  %v1234_v63 = vand.u32 2147483648, %v2737_v29  ;;  %v2772_v12 = vrot.slane %v709_v58, %v2403_v4 }
 0x1f9   : > { %1653 = vrsqrt.f32 %v2746_v30  ;;  %vm1233_vm0 = vcmp.eq.f32.partialorder %v2737_v29, 0.0  ;;  %vm1238_vm1 = vcmp.eq.f32.partialorder %v2739_v0, inf  ;;  %v1241_v16 = vand.u32 2147483648, %v2739_v0 }
 0x1fa   : > { %1655 = vrsqrt.f32 %v2748_v42  ;;  %v1248_v20 = vand.u32 2147483648, %v2744_v39  ;;  %v1255_v53 = vand.u32 2147483648, %v2746_v30  ;;  %vm1240_vm2 = vcmp.eq.f32.partialorder %v2739_v0, 0.0 }
 0x1fb   : > { %1657 = vrsqrt.f32 %v2753_v61  ;;  %vm1245_vm3 = vcmp.eq.f32.partialorder %v2744_v39, inf  ;;  %v1262_v18 = vand.u32 2147483648, %v2748_v42  ;;  %v1269_v4 = vand.u32 2147483648, %v2753_v61 }
 0x1fc   : > { %v766_v2 = vmul.f32 %v2758_v1, %v2381_v27  ;;  %v767_v36 = vmul.f32 %v2758_v1, %v2363_v9  ;;  %vm1247_vm4 = vcmp.eq.f32.partialorder %v2744_v39, 0.0  ;;  %vm1252_vm6 = vcmp.eq.f32.partialorder %v2746_v30, inf }
 0x1fd   : > { %v768_v5 = vmul.f32 %v2758_v1, %v2365_v14  ;;  %v769_v50 = vmul.f32 %v2758_v1, %v2367_v21  ;;  %v770_v32 = vmul.f32 %v2758_v1, %v2369_v23  ;;  %v771_v38 = vmul.f32 %v2758_v1, %v2371_v24 }
 0x1fe   : > { %vm1254_vm7 = vcmp.eq.f32.partialorder %v2746_v30, 0.0  ;;  %vm1259_vm8 = vcmp.eq.f32.partialorder %v2748_v42, inf  ;;  %v2801_v49 = vadd.f32 %v2762_v54, %v766_v2  ;;  %v2804_v43 = vadd.f32 %v2762_v54, %v767_v36 }
 0x1ff   : > { %v2808_v44 = vmul.f32 %v2772_v12, %v2377_v26  ;;  %v2812_v59 = vmul.f32 %v2772_v12, %v2385_v28  ;;  %vm1261_vm9 = vcmp.eq.f32.partialorder %v2748_v42, 0.0  ;;  %vm1266_vm10 = vcmp.eq.f32.partialorder %v2753_v61, inf }
 0x200   : > { %v2817_v52 = vadd.f32 %v2762_v54, %v768_v5  ;;  %v2820_v45 = vadd.f32 %v2762_v54, %v769_v50  ;;  %v2823_v8 = vadd.f32 %v2762_v54, %v770_v32  ;;  %v2826_v6 = vadd.f32 %v2762_v54, %v771_v38  ;;  %v1648_v47 = vpop.eup %1647 }
 0x201   : > { %vm1268_vm11 = vcmp.eq.f32.partialorder %v2753_v61, 0.0  ;;  %v2831_v7 = vmul.f32 %v2772_v12, %v2379_v62  ;;  %v2835_v46 = vmul.f32 %v2772_v12, %v2383_v55  ;;  %v2839_v22 = vmul.f32 %v2772_v12, %v2389_v31  ;;  %v1650_v13 = vpop.eup %1649 }
 0x202   : > { %v2843_v11 = vmul.f32 %v2772_v12, %v2387_v60  ;;  %v1230_v48 = vmul.f32 %v1648_v47, %v2737_v29  ;;  %v894_v10 = vsub.f32 %v2801_v49, %v2808_v44  ;;  %v895_v57 = vsub.f32 %v2804_v43, %v2812_v59  ;;  %v1652_v17 = vpop.eup %1651 }
 0x203   : > { %v921_v19 = vmul.f32 %v2772_v12, %v2381_v27  ;;  %v1237_v40 = vmul.f32 %v1650_v13, %v2739_v0  ;;  %v896_v15 = vsub.f32 %v2817_v52, %v2831_v7  ;;  %v897_v33 = vsub.f32 %v2820_v45, %v2835_v46  ;;  %v1654_v56 = vpop.eup %1653 }
 0x204   : > { %v898_v35 = vsub.f32 %v2823_v8, %v2839_v22  ;;  %v1232_v34 = vsel %vm1231_vm15, %v2737_v29, %v1230_v48  ;;  %v1244_v58 = vmul.f32 %v1652_v17, %v2744_v39  ;;  %v899_v27 = vsub.f32 %v2826_v6, %v2843_v11  ;;  %v1656_v36 = vpop.eup %1655 }
 0x205   : > { %v922_v2 = vmul.f32 %v2772_v12, %v2363_v9  ;;  %v1235_v5 = vsel %vm1233_vm0, %v1234_v63, %v1232_v34  ;;  %v1239_v50 = vsel %vm1238_vm1, %v2739_v0, %v1237_v40  ;;  %v1251_v32 = vmul.f32 %v1654_v56, %v2746_v30  ;;  %v1658_v49 = vpop.eup %1657 }
 0x206   : > { %v923_v38 = vmul.f32 %v2772_v12, %v2365_v14  ;;  %v1242_v43 = vsel %vm1240_vm2, %v1241_v16, %v1239_v50  ;;  %v1246_v9 = vsel %vm1245_vm3, %v2744_v39, %v1244_v58  ;;  %v1258_v29 = vmul.f32 %v1656_v36, %v2748_v42  ;;  %v1693_v50 = vld [vmem:[%s2018_s21 + $0x40] sm:$0xff] }
 0x207   : > { %v1552_v63 = vpack.c.bf16 %v1235_v5, %v1235_v5  ;;  %v1249_v44 = vsel %vm1247_vm4, %v1248_v20, %v1246_v9  ;;  %v1253_v14 = vsel %vm1252_vm6, %v2746_v30, %v1251_v32  ;;  %v1265_v59 = vmul.f32 %v1658_v49, %v2753_v61 }
 0x208   : > { %v1553_v0 = vpack.c.bf16 %v1242_v43, %v1242_v43  ;;  %v1256_v16 = vsel %vm1254_vm7, %v1255_v53, %v1253_v14  ;;  %v1260_v47 = vsel %vm1259_vm8, %v2748_v42, %v1258_v29  ;;  %v1554_v13 = vpack.c.bf16 %v1249_v44, %v1249_v44  ;;  %v1697_v44 = vld [vmem:[%s2018_s21 + $0x60] sm:$0xff] }
 0x209   : > { %1398 = vst.msk [vmem:[%s2649_s19 + $0x40] sm:$0xf] %vm1381_vm5, %v1552_v63  ;;  %v924_v39 = vmul.f32 %v2772_v12, %v2367_v21  ;;  %v1263_v20 = vsel %vm1261_vm9, %v1262_v18, %v1260_v47  ;;  %v1267_v30 = vsel %vm1266_vm10, %v2753_v61, %v1265_v59  ;;  %v1555_v53 = vpack.c.bf16 %v1256_v16, %v1256_v16  ;;  %v1695_v63 = vld [vmem:[%s2018_s21 + $0x50] sm:$0xff] }
 0x20a   : > { %1399 = vst.msk [vmem:[%s2649_s19 + $0x44] sm:$0xf] %vm1381_vm5, %v1553_v0  ;;  %v925_v48 = vmul.f32 %v2772_v12, %v2369_v23  ;;  %v1270_v21 = vsel %vm1268_vm11, %v1269_v4, %v1267_v30  ;;  %v1556_v17 = vpack.c.bf16 %v1263_v20, %v1263_v20  ;;  %1400 = vst.msk [vmem:[%s2649_s19 + $0x48] sm:$0xf] %vm1381_vm5, %v1554_v13  ;;  %v3199_v30 = vld [vmem:[#allocation10_spill] sm:$0xff] }
 0x20b   : > { %v926_v42 = vmul.f32 %v2772_v12, %v2371_v24  ;;  %v957_v18 = vadd.f32 %v2765_v25, %v921_v19  ;;  %v1557_v40 = vpack.c.bf16 %v1270_v21, %v1270_v21  ;;  %1401 = vst.msk [vmem:[%s2649_s19 + $0x4c] sm:$0xf] %vm1381_vm5, %v1555_v53  ;;  %v958_v23 = vadd.f32 %v2765_v25, %v922_v2  ;;  %v3200_v53 = vld [vmem:[#allocation14_spill] sm:$0xff] }
 0x20c   : > { %v959_v56 = vadd.f32 %v2765_v25, %v923_v38  ;;  %v960_v61 = vadd.f32 %v2765_v25, %v924_v39  ;;  %1402 = vst.msk [vmem:[%s2649_s19 + $0x50] sm:$0xf] %vm1381_vm5, %v1556_v17  ;;  %v961_v4 = vadd.f32 %v2765_v25, %v925_v48  ;;  %v981_v24 = vmul.f32 %v2377_v26, %v2758_v1  ;;  %v1694_v38 = vld [vmem:[%s2018_s21 + $0x48] sm:$0xff] }
 0x20d   : > { %v962_v34 = vadd.f32 %v2765_v25, %v926_v42  ;;  %v982_v19 = vmul.f32 %v2385_v28, %v2758_v1  ;;  %1403 = vst.msk [vmem:[%s2649_s19 + $0x54] sm:$0xf] %vm1381_vm5, %v1557_v40  ;;  %v983_v58 = vmul.f32 %v2379_v62, %v2758_v1  ;;  %v984_v2 = vmul.f32 %v2383_v55, %v2758_v1  ;;  %v3201_v42 = vld [vmem:[#allocation15_spill] sm:$0xff] }
 0x20e   : > { %v985_v36 = vmul.f32 %v2389_v31, %v2758_v1  ;;  %v986_v26 = vmul.f32 %v2387_v60, %v2758_v1  ;;  %v1005_v5 = vadd.f32 %v981_v24, %v957_v18  ;;  %v1029_v32 = vsub.f32 %v1693_v50, %v894_v10  ;;  %v1696_v31 = vld [vmem:[%s2018_s21 + $0x58] sm:$0xff] }
 0x20f   : > { %v1006_v28 = vadd.f32 %v982_v19, %v958_v23  ;;  %v1030_v49 = vsub.f32 %v1694_v38, %v895_v57  ;;  %v1007_v43 = vadd.f32 %v983_v58, %v959_v56  ;;  %v1008_v62 = vadd.f32 %v984_v2, %v960_v61  ;;  %v1698_v57 = vld [vmem:[%s2018_s21 + $0x68] sm:$0xff]  ;;  %v3202_v24 = vld [vmem:[#allocation12_spill] sm:$0xff] }
 0x210   : > { %v1009_v9 = vadd.f32 %v985_v36, %v961_v4  ;;  %v1010_v29 = vadd.f32 %v986_v26, %v962_v34  ;;  %v1031_v55 = vsub.f32 %v1695_v63, %v896_v15  ;;  %v1032_v60 = vsub.f32 %v1696_v31, %v897_v33 }
 0x211   : > { %v1033_v10 = vsub.f32 %v1697_v44, %v898_v35  ;;  %v1034_v14 = vsub.f32 %v1698_v57, %v899_v27  ;;  %v1053_v59 = vmul.f32 %v1029_v32, %v1029_v32  ;;  %v1054_v0 = vmul.f32 %v1030_v49, %v1030_v49  ;;  %v848_v27 = vpop.permute.xlu1 %847  ;;  %v1699_v44 = vld [vmem:[%s2018_s21 + $0x38] sm:$0xff] }
 0x212   : > { %v1077_v16 = vmul.f32 %v1005_v5, %v1005_v5  ;;  %v1078_v52 = vmul.f32 %v1006_v28, %v1006_v28  ;;  %v1055_v7 = vmul.f32 %v1031_v55, %v1031_v55  ;;  %v1056_v15 = vmul.f32 %v1032_v60, %v1032_v60  ;;  %v1700_v57 = vld [vmem:[%s2018_s21 + $0x78] sm:$0xff] }
 0x213   : > { %v1057_v47 = vmul.f32 %v1033_v10, %v1033_v10  ;;  %v1058_v13 = vmul.f32 %v1034_v14, %v1034_v14  ;;  %v1079_v45 = vmul.f32 %v1007_v43, %v1007_v43  ;;  %v1080_v46 = vmul.f32 %v1008_v62, %v1008_v62 }
 0x214   : > { %v1081_v33 = vmul.f32 %v1009_v9, %v1009_v9  ;;  %v1082_v39 = vmul.f32 %v1010_v29, %v1010_v29  ;;  %v2957_v20 = vadd.f32 %v1077_v16, %v1053_v59  ;;  %v2959_v8 = vadd.f32 %v1078_v52, %v1054_v0  ;;  %v3203_v9 = vld [vmem:[#allocation13_spill] sm:$0xff] }
 0x215   : > { %v2961_v22 = vadd.f32 %v1079_v45, %v1055_v7  ;;  %v2963_v6 = vadd.f32 %v1080_v46, %v1056_v15  ;;  %v765_v48 = vmul.f32 %v3200_v53, %v3199_v30  ;;  %v773_v21 = vmul.f32 %v2758_v1, %v3199_v30  ;;  %v3204_v59 = vld [vmem:[#allocation9_spill] sm:$0xff] }
 0x216   : > { %v2965_v11 = vadd.f32 %v1081_v33, %v1057_v47  ;;  %v2967_v35 = vadd.f32 %v1082_v39, %v1058_v13  ;;  %1659 = vrsqrt.f32 %v2957_v20  ;;  %v781_v17 = vmul.f32 %v2561_v51, %v3199_v30  ;;  %v1701_v47 = vld [vmem:[%s2018_s21 + $0xb8] sm:$0xff] }
 0x217   : > { %1661 = vrsqrt.f32 %v2959_v8  ;;  %v869_v18 = vmul.f32 %v3201_v42, %v848_v27  ;;  %vm1175_vm12 = vcmp.eq.f32.partialorder %v2957_v20, inf  ;;  %v1178_v40 = vand.u32 2147483648, %v2957_v20 }
 0x218   : > { %1663 = vrsqrt.f32 %v2961_v22  ;;  %v1185_v23 = vand.u32 2147483648, %v2959_v8  ;;  %v1192_v56 = vand.u32 2147483648, %v2961_v22  ;;  %vm1177_vm13 = vcmp.eq.f32.partialorder %v2957_v20, 0.0 }
 0x219   : > { %1665 = vrsqrt.f32 %v2963_v6  ;;  %vm1182_vm14 = vcmp.eq.f32.partialorder %v2959_v8, inf  ;;  %v1199_v61 = vand.u32 2147483648, %v2963_v6  ;;  %v1206_v4 = vand.u32 2147483648, %v2965_v11 }
 0x21a   : > { %1667 = vrsqrt.f32 %v2965_v11  ;;  %v1213_v34 = vand.u32 2147483648, %v2967_v35  ;;  %vm1184_vm15 = vcmp.eq.f32.partialorder %v2959_v8, 0.0  ;;  %vm1189_vm0 = vcmp.eq.f32.partialorder %v2961_v22, inf }
 0x21b   : > { %1669 = vrsqrt.f32 %v2967_v35  ;;  %v801_v19 = vadd.f32 %v3202_v24, %v765_v48  ;;  %v809_v58 = vadd.f32 %v2762_v54, %v773_v21  ;;  %v817_v2 = vadd.f32 %v2537_v37, %v781_v17 }
 0x21c   : > { %v877_v36 = vmul.f32 %v2772_v12, %v848_v27  ;;  %vm1191_vm1 = vcmp.eq.f32.partialorder %v2961_v22, 0.0  ;;  %vm1196_vm2 = vcmp.eq.f32.partialorder %v2963_v6, inf  ;;  %v885_v26 = vmul.f32 %v2564_v3, %v848_v27 }
 0x21d   : > { %v920_v5 = vmul.f32 %v3201_v42, %v3199_v30  ;;  %v928_v28 = vmul.f32 %v2772_v12, %v3199_v30  ;;  %v936_v50 = vmul.f32 %v2564_v3, %v3199_v30  ;;  %vm1198_vm3 = vcmp.eq.f32.partialorder %v2963_v6, 0.0 }
 0x21e   : > { %vm1203_vm4 = vcmp.eq.f32.partialorder %v2965_v11, inf  ;;  %v893_v32 = vsub.f32 %v801_v19, %v869_v18  ;;  %v901_v38 = vsub.f32 %v809_v58, %v877_v36  ;;  %v980_v49 = vmul.f32 %v848_v27, %v3200_v53 }
 0x21f   : > { %v988_v43 = vmul.f32 %v848_v27, %v2758_v1  ;;  %vm1205_vm6 = vcmp.eq.f32.partialorder %v2965_v11, 0.0  ;;  %vm1210_vm7 = vcmp.eq.f32.partialorder %v2967_v35, inf  ;;  %v909_v62 = vsub.f32 %v817_v2, %v885_v26 }
 0x220   : > { %v956_v29 = vadd.f32 %v3203_v9, %v920_v5  ;;  %v964_v63 = vadd.f32 %v2765_v25, %v928_v28  ;;  %v972_v55 = vadd.f32 %v2540_v41, %v936_v50  ;;  %v1660_v31 = vpop.eup %1659  ;;  %vm1212_vm8 = vcmp.eq.f32.partialorder %v2967_v35, 0.0 }
 0x221   : > { %v996_v60 = vmul.f32 %v848_v27, %v2561_v51  ;;  %v1028_v10 = vsub.f32 %v1699_v44, %v893_v32  ;;  %v1036_v14 = vsub.f32 %v1700_v57, %v901_v38  ;;  %v764_v0 = vmul.f32 %v3200_v53, %v3204_v59  ;;  %v1662_v16 = vpop.eup %1661 }
 0x222   : > { %v1174_v52 = vmul.f32 %v1660_v31, %v2957_v20  ;;  %v1004_v7 = vadd.f32 %v980_v49, %v956_v29  ;;  %v1012_v15 = vadd.f32 %v988_v43, %v964_v63  ;;  %v1044_v13 = vsub.f32 %v1701_v47, %v909_v62  ;;  %v1664_v45 = vpop.eup %1663 }
 0x223   : > { %v1181_v46 = vmul.f32 %v1662_v16, %v2959_v8  ;;  %v1020_v33 = vadd.f32 %v996_v60, %v972_v55  ;;  %v1052_v39 = vmul.f32 %v1028_v10, %v1028_v10  ;;  %v1060_v27 = vmul.f32 %v1036_v14, %v1036_v14  ;;  %v1666_v30 = vpop.eup %1665  ;;  %v844_v60 = vpop.permute.xlu0 %843 }
 0x224   : > { %v1176_v48 = vsel %vm1175_vm12, %v2957_v20, %v1174_v52  ;;  %v1188_v21 = vmul.f32 %v1664_v45, %v2961_v22  ;;  %v1068_v17 = vmul.f32 %v1044_v13, %v1044_v13  ;;  %v1076_v18 = vmul.f32 %v1004_v7, %v1004_v7  ;;  %v1668_v19 = vpop.eup %1667 }
 0x225   : > { %v1179_v58 = vsel %vm1177_vm13, %v1178_v40, %v1176_v48  ;;  %v1183_v2 = vsel %vm1182_vm14, %v2959_v8, %v1181_v46  ;;  %v1195_v36 = vmul.f32 %v1666_v30, %v2963_v6  ;;  %v1084_v26 = vmul.f32 %v1012_v15, %v1012_v15  ;;  %v1670_v5 = vpop.eup %1669 }
 0x226   : > { %v1186_v28 = vsel %vm1184_vm15, %v1185_v23, %v1183_v2  ;;  %v1190_v20 = vsel %vm1189_vm0, %v2961_v22, %v1188_v21  ;;  %v1202_v40 = vmul.f32 %v1668_v19, %v2965_v11  ;;  %v1544_v50 = vpack.c.bf16 %v1179_v58, %v1179_v58 }
 0x227   : > { %v1193_v32 = vsel %vm1191_vm1, %v1192_v56, %v1190_v20  ;;  %v1197_v38 = vsel %vm1196_vm2, %v2963_v6, %v1195_v36  ;;  %v1209_v8 = vmul.f32 %v1670_v5, %v2967_v35  ;;  %v1545_v23 = vpack.c.bf16 %v1186_v28, %v1186_v28 }
 0x228   : > { %v1200_v49 = vsel %vm1198_vm3, %v1199_v61, %v1197_v38  ;;  %v1204_v43 = vsel %vm1203_vm4, %v2965_v11, %v1202_v40  ;;  %v1546_v22 = vpack.c.bf16 %v1193_v32, %v1193_v32  ;;  %1390 = vst.msk [vmem:[%s2649_s19 + $0x20] sm:$0xf] %vm1381_vm5, %v1544_v50  ;;  %v1092_v56 = vmul.f32 %v1020_v33, %v1020_v33 }
 0x229   : > { %v1207_v62 = vsel %vm1205_vm6, %v1206_v4, %v1204_v43  ;;  %v1211_v6 = vsel %vm1210_vm7, %v2967_v35, %v1209_v8  ;;  %v1547_v61 = vpack.c.bf16 %v1200_v49, %v1200_v49  ;;  %1391 = vst.msk [vmem:[%s2649_s19 + $0x24] sm:$0xf] %vm1381_vm5, %v1545_v23  ;;  %v3068_v29 = vadd.f32 %v1076_v18, %v1052_v39  ;;  %v1703_v39 = vld [vmem:[%s2018_s21 + $0x70] sm:$0xff] }
 0x22a   : > { %v1214_v63 = vsel %vm1212_vm8, %v1213_v34, %v1211_v6  ;;  %v1548_v55 = vpack.c.bf16 %v1207_v62, %v1207_v62  ;;  %1392 = vst.msk [vmem:[%s2649_s19 + $0x28] sm:$0xf] %vm1381_vm5, %v1546_v22  ;;  %v3076_v11 = vadd.f32 %v1084_v26, %v1060_v27  ;;  %v3078_v4 = vadd.f32 %v1092_v56, %v1068_v17 }
 0x22b   : > { %v1549_v31 = vpack.c.bf16 %v1214_v63, %v1214_v63  ;;  %1393 = vst.msk [vmem:[%s2649_s19 + $0x2c] sm:$0xf] %vm1381_vm5, %v1547_v61  ;;  %1671 = vrsqrt.f32 %v3068_v29  ;;  %v1171_v35 = vand.u32 2147483648, %v3068_v29  ;;  %v772_v34 = vmul.f32 %v2758_v1, %v3204_v59 }
 0x22c   : > { %1394 = vst.msk [vmem:[%s2649_s19 + $0x30] sm:$0xf] %vm1381_vm5, %v1548_v55  ;;  %1673 = vrsqrt.f32 %v3076_v11  ;;  %v780_v44 = vmul.f32 %v2561_v51, %v3204_v59  ;;  %v800_v10 = vadd.f32 %v3202_v24, %v764_v0  ;;  %vm1168_vm9 = vcmp.eq.f32.partialorder %v3068_v29, inf }
 0x22d   : > { %1395 = vst.msk [vmem:[%s2649_s19 + $0x34] sm:$0xf] %vm1381_vm5, %v1549_v31  ;;  %1675 = vrsqrt.f32 %v3078_v4  ;;  %v919_v57 = vmul.f32 %v3201_v42, %v3204_v59  ;;  %v927_v14 = vmul.f32 %v2772_v12, %v3204_v59  ;;  %v935_v16 = vmul.f32 %v2564_v3, %v3204_v59 }
 0x22e   : > { %v868_v52 = vmul.f32 %v3201_v42, %v844_v60  ;;  %vm1170_vm10 = vcmp.eq.f32.partialorder %v3068_v29, 0.0  ;;  %v808_v7 = vadd.f32 %v2762_v54, %v772_v34  ;;  %v816_v24 = vadd.f32 %v2537_v37, %v780_v44 }
 0x22f   : > { %v876_v0 = vmul.f32 %v2772_v12, %v844_v60  ;;  %v884_v15 = vmul.f32 %v2564_v3, %v844_v60  ;;  %v955_v47 = vadd.f32 %v3203_v9, %v919_v57  ;;  %v963_v13 = vadd.f32 %v2765_v25, %v927_v14  ;;  %v1702_v3 = vld [vmem:[%s2018_s21 + $0x30] sm:$0xff] }
 0x230   : > { %v971_v59 = vadd.f32 %v2540_v41, %v935_v16  ;;  %v892_v42 = vsub.f32 %v800_v10, %v868_v52  ;;  %v979_v33 = vmul.f32 %v844_v60, %v3200_v53  ;;  %v987_v54 = vmul.f32 %v844_v60, %v2758_v1  ;;  %v1704_v41 = vld [vmem:[%s2018_s21 + $0xb0] sm:$0xff] }
 0x231   : > { %v900_v45 = vsub.f32 %v808_v7, %v876_v0  ;;  %v908_v46 = vsub.f32 %v816_v24, %v884_v15  ;;  %vm1224_vm11 = vcmp.eq.f32.partialorder %v3076_v11, inf  ;;  %vm1226_vm12 = vcmp.eq.f32.partialorder %v3076_v11, 0.0 }
 0x232   : > { %v995_v37 = vmul.f32 %v844_v60, %v2561_v51  ;;  %v1027_v12 = vsub.f32 %v1702_v3, %v892_v42  ;;  %v1003_v9 = vadd.f32 %v979_v33, %v955_v47  ;;  %v1011_v25 = vadd.f32 %v987_v54, %v963_v13 }
 0x233   : > { %v1035_v27 = vsub.f32 %v1703_v39, %v900_v45  ;;  %v1043_v30 = vsub.f32 %v1704_v41, %v908_v46  ;;  %v1227_v21 = vand.u32 2147483648, %v3076_v11  ;;  %vm1280_vm13 = vcmp.eq.f32.partialorder %v3078_v4, inf }
 0x234   : > { %v1019_v1 = vadd.f32 %v995_v37, %v971_v59  ;;  %v1051_v53 = vmul.f32 %v1027_v12, %v1027_v12  ;;  %v1075_v58 = vmul.f32 %v1003_v9, %v1003_v9  ;;  %vm1282_vm14 = vcmp.eq.f32.partialorder %v3078_v4, 0.0 }
 0x235   : > { %v1672_v48 = vpop.eup %1671  ;;  %v1059_v19 = vmul.f32 %v1035_v27, %v1035_v27  ;;  %v1067_v51 = vmul.f32 %v1043_v30, %v1043_v30  ;;  %v1083_v26 = vmul.f32 %v1011_v25, %v1011_v25  ;;  %v1283_v40 = vand.u32 2147483648, %v3078_v4 }
 0x236   : > { %v1674_v17 = vpop.eup %1673  ;;  %v1167_v18 = vmul.f32 %v1672_v48, %v3068_v29  ;;  %v1091_v5 = vmul.f32 %v1019_v1, %v1019_v1  ;;  %v1099_v50 = vadd.f32 %v1075_v58, %v1051_v53 }
 0x237   : > { %v1676_v2 = vpop.eup %1675  ;;  %v1223_v36 = vmul.f32 %v1674_v17, %v3076_v11  ;;  %v1107_v8 = vadd.f32 %v1083_v26, %v1059_v19 }
 0x238   : > { %v1169_v28 = vsel %vm1168_vm9, %v3068_v29, %v1167_v18  ;;  %v1279_v20 = vmul.f32 %v1676_v2, %v3078_v4  ;;  %v1115_v23 = vadd.f32 %v1091_v5, %v1067_v51  ;;  %1677 = vrsqrt.f32 %v1099_v50 }
 0x239   : > { %v1172_v32 = vsel %vm1170_vm10, %v1171_v35, %v1169_v28  ;;  %v1225_v38 = vsel %vm1224_vm11, %v3076_v11, %v1223_v36  ;;  %1679 = vrsqrt.f32 %v1107_v8  ;;  %vm1161_vm15 = vcmp.eq.f32.partialorder %v1099_v50, inf }
 0x23a   : > { %v1228_v49 = vsel %vm1226_vm12, %v1227_v21, %v1225_v38  ;;  %v1281_v43 = vsel %vm1280_vm13, %v3078_v4, %v1279_v20  ;;  %v1543_v22 = vpack.c.bf16 %v1172_v32, %v1172_v32  ;;  %1681 = vrsqrt.f32 %v1115_v23 }
 0x23b   : > { %v1284_v56 = vsel %vm1282_vm14, %v1283_v40, %v1281_v43  ;;  %v1551_v62 = vpack.c.bf16 %v1228_v49, %v1228_v49  ;;  %v1164_v55 = vand.u32 2147483648, %v1099_v50  ;;  %vm1163_vm0 = vcmp.eq.f32.partialorder %v1099_v50, 0.0 }
 0x23c   : > { %v1559_v6 = vpack.c.bf16 %v1284_v56, %v1284_v56  ;;  %1389 = vst.msk [vmem:[%s2649_s19 + $0x1c] sm:$0xf] %vm1381_vm5, %v1543_v22  ;;  %vm1217_vm1 = vcmp.eq.f32.partialorder %v1107_v8, inf  ;;  %vm1219_vm2 = vcmp.eq.f32.partialorder %v1107_v8, 0.0  ;;  %v1220_v35 = vand.u32 2147483648, %v1107_v8 }
 0x23d   : > { %1397 = vst.msk [vmem:[%s2649_s19 + $0x3c] sm:$0xf] %vm1381_vm5, %v1551_v62  ;;  %vm1273_vm3 = vcmp.eq.f32.partialorder %v1115_v23, inf  ;;  %v1276_v10 = vand.u32 2147483648, %v1115_v23  ;;  %vm1275_vm4 = vcmp.eq.f32.partialorder %v1115_v23, 0.0 }
 0x23e   : > { %1405 = vst.msk [vmem:[%s2649_s19 + $0x5c] sm:$0xf] %vm1381_vm5, %v1559_v6 }
 0x242   : > { %v1678_v61 = vpop.eup %1677 }
 0x243   : > { %v1160_v29 = vmul.f32 %v1678_v61, %v1099_v50  ;;  %v1680_v63 = vpop.eup %1679 }
 0x244   : > { %v1682_v11 = vpop.eup %1681  ;;  %v1216_v31 = vmul.f32 %v1680_v63, %v1107_v8 }
 0x245   : > { %v1162_v4 = vsel %vm1161_vm15, %v1099_v50, %v1160_v29  ;;  %v1272_v34 = vmul.f32 %v1682_v11, %v1115_v23 }
 0x246   : > { %v1165_v60 = vsel %vm1163_vm0, %v1164_v55, %v1162_v4  ;;  %v1218_v44 = vsel %vm1217_vm1, %v1107_v8, %v1216_v31 }
 0x247   : > { %v1542_v57 = vpack.c.bf16 %v1165_v60, %v1165_v60  ;;  %v1221_v14 = vsel %vm1219_vm2, %v1220_v35, %v1218_v44  ;;  %v1274_v16 = vsel %vm1273_vm3, %v1115_v23, %v1272_v34 }
 0x248   : > { %v1277_v52 = vsel %vm1275_vm4, %v1276_v10, %v1274_v16  ;;  %v1550_v7 = vpack.c.bf16 %v1221_v14, %v1221_v14 }
 0x249   : > { %1388 = vst.msk [vmem:[%s2649_s19 + $0x18] sm:$0xf] %vm1381_vm5, %v1542_v57  ;;  %v1558_v24 = vpack.c.bf16 %v1277_v52, %v1277_v52 }
 0x24a   : > { %1396 = vst.msk [vmem:[%s2649_s19 + $0x38] sm:$0xf] %vm1381_vm5, %v1550_v7 }
 0x24b   : > { %1404 = vst.msk [vmem:[%s2649_s19 + $0x58] sm:$0xf] %vm1381_vm5, %v1558_v24 }
 0x24c PF: > { %p14_p6 = scmp.ge.s32.totalorder %s1959_s29, 4   ;;  %s3205_s12 = smov %s1821_s13 }
 0x24d   : > { %s3206_s13 = smov %s1825_s14  ;;  %s3207_s14 = smov %s1970_s5 }
 0x24e   : > { %s3208_s15 = smov %s1959_s29  ;;  %16 = sbr.rel (!%p14_p6) target bundleno = 4 (0x4), region = 80 }
 0x255   :  { %1430 = vsyncpa [#allocation3], 1 }
 0x256   :  { %1432 = vsyncpa [#allocation3 + $0x1], 1 }
 0x257   :  { %1433 = vsyncpa [#allocation5], 1 }

// kernel: image_depth_net2_forward.8
= control target key start
LH: loop header
LB: loop body
LE: loop exit
PB: predicated region body
PF: predicated region fallthrough
CT: control target
= control target key end

     0   :  { %s3833_s18 = smov 0   ;;  %s4791_s0 = inlined_call_operand.vmem [shape: bf16[32,768], index: 0, kind: input, shape index: {}]   ;;  %s4792_s1 = inlined_call_operand.vmem [shape: bf16[32,768], index: 1, kind: input, shape index: {}]   ;;  %s4793_s2 = inlined_call_operand.vmem [shape: bf16[768,384], index: 2, kind: input, shape index: {}]   ;;  %s4794_s3 = inlined_call_operand.vmem [shape: bf16[768,384], index: 3, kind: input, shape index: {}]   ;;  %s4795_s4 = inlined_call_operand.vmem [shape: f32[1,768], index: 4, kind: input, shape index: {}]   ;;  %s4796_s5 = inlined_call_operand.vmem [shape: bf16[32,768], index: 5, kind: output, shape index: {}]  }
   0x1 LB: > { %s2911_s19 = sadd.s32 4294967295, %s3801_s18   ;;  %p2915_p0 = scmp.ge.s32.totalorder %s3801_s18, 1  ;;  %s3801_s18 = sphi %s3833_s18, %s15_s18  }
   0x2   : > { %p201_p1 = scmp.lt.s32.totalorder %s3801_s18, 3 }
   0x4   : > { %p202_p2 = pnand %p2915_p0, %p201_p1 }
   0x5   : > { %v3393_v0 = vld [vmem:[%s4793_s2 + $0x4] ss:$12 sps:$4 sm:$0xff] (!%p202_p2)   ;;  %v3395_v1 = vld [vmem:[%s4793_s2 + $0xc8] ss:$12 sps:$4 sm:$0xff] (!%p202_p2)   ;;  %v3396_v2 = vld [vmem:[%s4793_s2] ss:$12 sps:$4 sm:$0xff] (!%p202_p2)  }
   0x6   : > { %205 = sbr.rel (%p202_p2) target bundleno = 518 (0x206), region = 40  ;;  %1255 = vmatprep.subr.bf16.mxu0 (!%p202_p2), %v3393_v0  ;;  %3236 = vmatprep.subr.bf16.mxu1 (!%p202_p2), %v3395_v1  ;;  %v3397_v3 = vld [vmem:[%s4793_s2 + $0x8] ss:$12 sps:$4 sm:$0xff] (!%p202_p2)   ;;  %v3400_v5 = vld [vmem:[%s4793_s2 + $0xe0] ss:$12 sps:$4 sm:$0xff] (!%p202_p2)   ;;  %s2916_s13 = sshll.u32 (!%p202_p2), %s2911_s19, 1 }
   0x7   : > { %1256 = vmatpush1.bf16.msra.mxu0 (!%p202_p2), %v3396_v2  ;;  %v3398_v4 = vld [vmem:[%s4793_s2 + $0x1c] ss:$12 sps:$4 sm:$0xff] (!%p202_p2)   ;;  %3237 = vmatpush3.bf16.msra.mxu1 (!%p202_p2), %v3397_v3  ;;  %v3401_v6 = vld [vmem:[%s4793_s2 + $0x18] ss:$12 sps:$4 sm:$0xff] (!%p202_p2)   ;;  %v3402_v7 = vld [vmem:[%s4793_s2 + $0x20] ss:$12 sps:$4 sm:$0xff] (!%p202_p2)  }
   0x8   : > { %1257 = vmatprep.subr.bf16.mxu0 (!%p202_p2), %v3398_v4  ;;  %3238 = vmatprep.subr.bf16.mxu1 (!%p202_p2), %v3400_v5  ;;  %v3403_v8 = vld [vmem:[%s4793_s2 + $0x34] ss:$12 sps:$4 sm:$0xff] (!%p202_p2)   ;;  %v3405_v9 = vld [vmem:[%s4793_s2 + $0xf8] ss:$12 sps:$4 sm:$0xff] (!%p202_p2)   ;;  %v3406_v10 = vld [vmem:[%s4793_s2 + $0x30] ss:$12 sps:$4 sm:$0xff] (!%p202_p2)  }
   0x9   : > { %v3407_v11 = vld [vmem:[%s4793_s2 + $0x38] ss:$12 sps:$4 sm:$0xff] (!%p202_p2)   ;;  %p238_p3 = scmp.lt.s32.totalorder (!%p202_p2), %s2916_s13, 3  ;;  %v3410_v13 = vld [vmem:[%s4793_s2 + $0x110] ss:$12 sps:$4 sm:$0xff] (!%p202_p2)  }
   0xa   : > { %v3408_v12 = vld [vmem:[%s4793_s2 + $0x4c] ss:$12 sps:$4 sm:$0xff] (!%p202_p2)   ;;  %v3411_v14 = vld [vmem:[%s4793_s2 + $0x48] ss:$12 sps:$4 sm:$0xff] (!%p202_p2)   ;;  %v3412_v15 = vld [vmem:[%s4793_s2 + $0x50] ss:$12 sps:$4 sm:$0xff] (!%p202_p2)  }
   0xb   : > { %1258 = vmatpush1.bf16.msra.mxu0 (!%p202_p2), %v3401_v6  ;;  %3239 = vmatpush3.bf16.msra.mxu1 (!%p202_p2), %v3402_v7  ;;  %v3413_v16 = vld [vmem:[%s4793_s2 + $0x64] ss:$12 sps:$4 sm:$0xff] (!%p202_p2)   ;;  %v3415_v17 = vld [vmem:[%s4793_s2 + $0x128] ss:$12 sps:$4 sm:$0xff] (!%p202_p2)   ;;  %v3416_v18 = vld [vmem:[%s4793_s2 + $0x60] ss:$12 sps:$4 sm:$0xff] (!%p202_p2)  }
   0xc   : > { %1259 = vmatprep.subr.bf16.mxu0 (!%p202_p2), %v3403_v8  ;;  %3240 = vmatprep.subr.bf16.mxu1 (!%p202_p2), %v3405_v9  ;;  %v3417_v19 = vld [vmem:[%s4793_s2 + $0x68] ss:$12 sps:$4 sm:$0xff] (!%p202_p2)   ;;  %v3420_v21 = vld [vmem:[%s4793_s2 + $0x140] ss:$12 sps:$4 sm:$0xff] (!%p202_p2)   ;;  %v3421_v22 = vld [vmem:[%s4793_s2 + $0x78] ss:$12 sps:$4 sm:$0xff] (!%p202_p2)  }
   0xd   : > { %s4798_s13 = smov (!%p238_p3, %s2916_s13), 3  ;;  %v3418_v20 = vld [vmem:[%s4793_s2 + $0x7c] ss:$12 sps:$4 sm:$0xff]   ;;  %v3422_v23 = vld [vmem:[%s4793_s2 + $0x80] ss:$12 sps:$4 sm:$0xff]  }
   0xe   : > { %s3913_s23 = smul.u32 24, %s4798_s13  ;;  %v3423_v24 = vld [vmem:[%s4793_s2 + $0x94] ss:$12 sps:$4 sm:$0xff]   ;;  %v3425_v25 = vld [vmem:[%s4793_s2 + $0x158] ss:$12 sps:$4 sm:$0xff]  }
   0xf   : > { %1260 = vmatpush1.bf16.msra.mxu0 %v3406_v10  ;;  %3241 = vmatpush3.bf16.msra.mxu1 %v3407_v11  ;;  %v3426_v26 = vld [vmem:[%s4793_s2 + $0x90] ss:$12 sps:$4 sm:$0xff]   ;;  %v3427_v27 = vld [vmem:[%s4793_s2 + $0x98] ss:$12 sps:$4 sm:$0xff]   ;;  %v3431_v30 = vld [vmem:[%s4793_s2 + $0xa8] ss:$12 sps:$4 sm:$0xff]  }
  0x10   : > { %1261 = vmatprep.subr.bf16.mxu0 %v3408_v12  ;;  %3242 = vmatprep.subr.bf16.mxu1 %v3410_v13  ;;  %v3428_v28 = vld [vmem:[%s4793_s2 + $0xac] ss:$12 sps:$4 sm:$0xff]   ;;  %s3934_s9 = scalar_lea.vmem %s4791_s0, %s3913_s23  ;;  %v3430_v29 = vld [vmem:[%s4793_s2 + $0x170] ss:$12 sps:$4 sm:$0xff]   ;;  %v3438_v34 = vld [vmem:[%s4793_s2 + $0x248] ss:$12 sps:$4 sm:$0xff]   ;;  %s4262_s14 = scalar_lea.vmem %s4792_s1, %s3913_s23 }
  0x11   : > { %v3432_v31 = vld [vmem:[%s4793_s2 + $0xb0] ss:$12 sps:$4 sm:$0xff]   ;;  %v3953_v35 = vld [vmem:[%s3934_s9] ss:$24 sps:$4 sm:$0xff]   ;;  %v3440_v37 = vld [vmem:[%s4793_s2 + $0x188] ss:$12 sps:$4 sm:$0xff]   ;;  %s4780_s27 = scalar_lea.vmem %s4796_s5, %s3913_s23 }
  0x12   : > { %v3437_v32 = vld [vmem:[%s3934_s9 + $0x4] ss:$24 sps:$4 sm:$0xff]   ;;  %v3439_v36 = vld [vmem:[%s4793_s2 + $0xc0] ss:$12 sps:$4 sm:$0xff]   ;;  %v3454_v48 = vld [vmem:[%s4793_s2 + $0x108] ss:$12 sps:$4 sm:$0xff]  }
  0x13   : > { %1262 = vmatpush1.bf16.msra.mxu0 %v3411_v14  ;;  %3243 = vmatpush3.bf16.msra.mxu1 %v3412_v15  ;;  %v3433_v33 = vld [vmem:[%s4793_s2 + $0xc4] ss:$12 sps:$4 sm:$0xff]   ;;  %v3441_v38 = vld [vmem:[%s4793_s2 + $0xdc] ss:$12 sps:$4 sm:$0xff]   ;;  %v3443_v39 = vld [vmem:[%s4793_s2 + $0x260] ss:$12 sps:$4 sm:$0xff]  }
  0x14   : > { %1263 = vmatprep.subr.bf16.mxu0 %v3413_v16  ;;  %3244 = vmatprep.subr.bf16.mxu1 %v3415_v17  ;;  %v3444_v40 = vld [vmem:[%s4793_s2 + $0xd8] ss:$12 sps:$4 sm:$0xff]   ;;  %v3445_v41 = vld [vmem:[%s4793_s2 + $0x1a0] ss:$12 sps:$4 sm:$0xff]   ;;  %v3449_v44 = vld [vmem:[%s4793_s2 + $0xf0] ss:$12 sps:$4 sm:$0xff]  }
  0x15   : > { %1416 = vmatprep.mubr.bf16.mxu1 %v3437_v32  ;;  %1287 = vmatprep.mubr.bf16.mxu0 %v3437_v32  ;;  %v3446_v42 = vld [vmem:[%s4793_s2 + $0xf4] ss:$12 sps:$4 sm:$0xff]   ;;  %v3448_v43 = vld [vmem:[%s4793_s2 + $0x278] ss:$12 sps:$4 sm:$0xff]   ;;  %v3453_v47 = vld [vmem:[%s4793_s2 + $0x290] ss:$12 sps:$4 sm:$0xff]  }
  0x16   : > { %v3450_v45 = vld [vmem:[%s4793_s2 + $0x1b8] ss:$12 sps:$4 sm:$0xff]   ;;  %v3455_v49 = vld [vmem:[%s4793_s2 + $0x1d0] ss:$12 sps:$4 sm:$0xff]   ;;  %v3458_v51 = vld [vmem:[%s4793_s2 + $0x2a8] ss:$12 sps:$4 sm:$0xff]  }
  0x17   : > { %1264 = vmatpush1.bf16.msra.mxu0 %v3416_v18  ;;  %3245 = vmatpush3.bf16.msra.mxu1 %v3417_v19  ;;  %v3451_v46 = vld [vmem:[%s4793_s2 + $0x10c] ss:$12 sps:$4 sm:$0xff]   ;;  %v3456_v50 = vld [vmem:[%s4793_s2 + $0x124] ss:$12 sps:$4 sm:$0xff]   ;;  %v3460_v53 = vld [vmem:[%s4793_s2 + $0x1e8] ss:$12 sps:$4 sm:$0xff]  }
  0x18   : > { %1265 = vmatprep.subr.bf16.mxu0 %v3418_v20  ;;  %3246 = vmatprep.subr.bf16.mxu1 %v3420_v21  ;;  %v3459_v52 = vld [vmem:[%s4793_s2 + $0x120] ss:$12 sps:$4 sm:$0xff]   ;;  %v3461_v54 = vld [vmem:[%s4793_s2 + $0x13c] ss:$12 sps:$4 sm:$0xff]   ;;  %v3464_v56 = vld [vmem:[%s4793_s2 + $0x138] ss:$12 sps:$4 sm:$0xff]  }
  0x19   : > { %v3463_v55 = vld [vmem:[%s4793_s2 + $0x2c0] ss:$12 sps:$4 sm:$0xff]   ;;  %v3468_v59 = vld [vmem:[%s4793_s2 + $0x2d8] ss:$12 sps:$4 sm:$0xff]   ;;  %v3469_v60 = vld [vmem:[%s4793_s2 + $0x150] ss:$12 sps:$4 sm:$0xff]  }
  0x1a   : > { %v3465_v57 = vld [vmem:[%s4793_s2 + $0x200] ss:$12 sps:$4 sm:$0xff]   ;;  %v3470_v62 = vld [vmem:[%s4793_s2 + $0x218] ss:$12 sps:$4 sm:$0xff]   ;;  %v3473_v0 = vld [vmem:[%s4793_s2 + $0x2f0] ss:$12 sps:$4 sm:$0xff]  }
  0x1b   : > { %1266 = vmatpush1.bf16.msra.mxu0 %v3421_v22  ;;  %3247 = vmatpush3.bf16.msra.mxu1 %v3422_v23  ;;  %v3466_v58 = vld [vmem:[%s4793_s2 + $0x154] ss:$12 sps:$4 sm:$0xff]   ;;  %v3478_v61 = vld [vmem:[%s3934_s9 + $0xc] ss:$24 sps:$4 sm:$0xff]   ;;  %v3475_v2 = vld [vmem:[%s4793_s2 + $0x230] ss:$12 sps:$4 sm:$0xff]  }
  0x1c   : > { %1267 = vmatprep.subr.bf16.mxu0 %v3423_v24  ;;  %3248 = vmatprep.subr.bf16.mxu1 %v3425_v25  ;;  %v3471_v63 = vld [vmem:[%s4793_s2 + $0x16c] ss:$12 sps:$4 sm:$0xff]   ;;  %v3474_v1 = vld [vmem:[%s4793_s2 + $0x168] ss:$12 sps:$4 sm:$0xff]   ;;  %v3481_v3 = vld [vmem:[%s4793_s2 + $0x184] ss:$12 sps:$4 sm:$0xff]  }
  0x1d   : > { %v3482_v4 = vld [vmem:[%s4793_s2 + $0x3c8] ss:$12 sps:$4 sm:$0xff]   ;;  %v3479_v6 = vld [vmem:[%s4793_s2 + $0x180] ss:$12 sps:$4 sm:$0xff]   ;;  %v3484_v10 = vld [vmem:[%s4793_s2 + $0x198] ss:$12 sps:$4 sm:$0xff]  }
  0x1e   : > { %v4054_v5 = vld [vmem:[%s3934_s9 + $0x8] ss:$24 sps:$4 sm:$0xff]   ;;  %v3492_v13 = vld [vmem:[%s4793_s2 + $0x3f8] ss:$12 sps:$4 sm:$0xff]   ;;  %v3489_v14 = vld [vmem:[%s4793_s2 + $0x1b0] ss:$12 sps:$4 sm:$0xff]  }
  0x1f   : > { %1268 = vmatpush1.bf16.msra.mxu0 %v3426_v26  ;;  %3249 = vmatpush3.bf16.msra.mxu1 %v3427_v27  ;;  %v3483_v7 = vld [vmem:[%s4793_s2 + $0x308] ss:$12 sps:$4 sm:$0xff]   ;;  %v3487_v9 = vld [vmem:[%s4793_s2 + $0x3e0] ss:$12 sps:$4 sm:$0xff]   ;;  %v3493_v15 = vld [vmem:[%s4793_s2 + $0x338] ss:$12 sps:$4 sm:$0xff]  }
  0x20   : > { %1269 = vmatprep.subr.bf16.mxu0 %v3428_v28  ;;  %3250 = vmatprep.subr.bf16.mxu1 %v3430_v29  ;;  %v3486_v8 = vld [vmem:[%s4793_s2 + $0x19c] ss:$12 sps:$4 sm:$0xff]   ;;  %v3488_v11 = vld [vmem:[%s4793_s2 + $0x320] ss:$12 sps:$4 sm:$0xff]   ;;  %v3501_v20 = vld [vmem:[%s4793_s2 + $0x1e4] ss:$12 sps:$4 sm:$0xff]  }
  0x21   : > { %v3491_v12 = vld [vmem:[%s4793_s2 + $0x1b4] ss:$12 sps:$4 sm:$0xff]   ;;  %v3496_v16 = vld [vmem:[%s4793_s2 + $0x1cc] ss:$12 sps:$4 sm:$0xff]   ;;  %v3497_v17 = vld [vmem:[%s4793_s2 + $0x410] ss:$12 sps:$4 sm:$0xff]  }
  0x22   : > { %v3494_v18 = vld [vmem:[%s4793_s2 + $0x1c8] ss:$12 sps:$4 sm:$0xff]   ;;  %v3498_v19 = vld [vmem:[%s4793_s2 + $0x350] ss:$12 sps:$4 sm:$0xff]   ;;  %v3499_v22 = vld [vmem:[%s4793_s2 + $0x1e0] ss:$12 sps:$4 sm:$0xff]  }
  0x23   : > { %1270 = vmatpush1.bf16.msra.mxu0 %v3431_v30  ;;  %3251 = vmatpush3.bf16.msra.mxu1 %v3432_v31  ;;  %v3502_v21 = vld [vmem:[%s4793_s2 + $0x428] ss:$12 sps:$4 sm:$0xff]   ;;  %v3507_v25 = vld [vmem:[%s4793_s2 + $0x440] ss:$12 sps:$4 sm:$0xff]   ;;  %v3504_v26 = vld [vmem:[%s4793_s2 + $0x1f8] ss:$12 sps:$4 sm:$0xff]  }
  0x24   : > { %1271 = vmatprep.subr.bf16.mxu0 %v3433_v33  ;;  %3258 = vmatprep.subr.bf16.mxu1 %v3438_v34  ;;  %v3503_v23 = vld [vmem:[%s4793_s2 + $0x368] ss:$12 sps:$4 sm:$0xff]   ;;  %v3508_v28 = vld [vmem:[%s4793_s2 + $0x380] ss:$12 sps:$4 sm:$0xff]   ;;  %v3512_v30 = vld [vmem:[%s4793_s2 + $0x458] ss:$12 sps:$4 sm:$0xff]  }
  0x25   : > { %v3506_v24 = vld [vmem:[%s4793_s2 + $0x1fc] ss:$12 sps:$4 sm:$0xff]   ;;  %v4122_v27 = vld [vmem:[%s3934_s9 + $0x14] ss:$24 sps:$4 sm:$0xff]   ;;  %v3513_v32 = vld [vmem:[%s4793_s2 + $0x398] ss:$12 sps:$4 sm:$0xff]  }
  0x26   : > { %1417 = vmatmul.mubr.bf16.vlgmr.msra.gmra.mrb[0].mxu1 %v3953_v35  ;;  %v3511_v29 = vld [vmem:[%s4793_s2 + $0x214] ss:$12 sps:$4 sm:$0xff]   ;;  %v3509_v31 = vld [vmem:[%s4793_s2 + $0x210] ss:$12 sps:$4 sm:$0xff]   ;;  %v3516_v33 = vld [vmem:[%s4793_s2 + $0x22c] ss:$12 sps:$4 sm:$0xff]  }
  0x27   : > { %1272 = vmatpush1.bf16.msra.mxu0 %v3439_v36  ;;  %3259 = vmatpush3.bf16.msra.mxu1 %v3440_v37  ;;  %v3517_v34 = vld [vmem:[%s4793_s2 + $0x470] ss:$12 sps:$4 sm:$0xff]  }
  0x28   : > { %1273 = vmatprep.subr.bf16.mxu0 %v3441_v38  ;;  %3260 = vmatprep.subr.bf16.mxu1 %v3443_v39  ;;  %v3518_v36 = vld [vmem:[%s4793_s2 + $0x3b0] ss:$12 sps:$4 sm:$0xff]  }
  0x29   : > { %1457 = vmatprep.mubr.bf16.mxu1 %v3478_v61  ;;  %v3524_v37 = vld [vmem:[%s4793_s2 + $0x244] ss:$12 sps:$4 sm:$0xff]  }
  0x2a   : > { %v3527_v38 = vld [vmem:[%s4794_s3 + $0x4] ss:$12 sps:$4 sm:$0xff]  }
  0x2b   : > { %1274 = vmatpush1.bf16.msra.mxu0 %v3444_v40  ;;  %3261 = vmatpush3.bf16.msra.mxu1 %v3445_v41  ;;  %v4159_v39 = vld [vmem:[%s3934_s9 + $0x10] ss:$24 sps:$4 sm:$0xff]   ;;  %v3522_v40 = vld [vmem:[%s4793_s2 + $0x240] ss:$12 sps:$4 sm:$0xff]  }
  0x2c   : > { %1275 = vmatprep.subr.bf16.mxu0 %v3446_v42  ;;  %3262 = vmatprep.subr.bf16.mxu1 %v3448_v43  ;;  %v3525_v41 = vld [vmem:[%s4794_s3] ss:$12 sps:$4 sm:$0xff]   ;;  %v3530_v42 = vld [vmem:[%s4793_s2 + $0x25c] ss:$12 sps:$4 sm:$0xff]  }
  0x2d   : > { %v3533_v43 = vld [vmem:[%s4794_s3 + $0x1c] ss:$12 sps:$4 sm:$0xff]  }
  0x2f   : > { %1276 = vmatpush1.bf16.msra.mxu0 %v3449_v44  ;;  %3263 = vmatpush3.bf16.msra.mxu1 %v3450_v45  ;;  %v3528_v44 = vld [vmem:[%s4793_s2 + $0x258] ss:$12 sps:$4 sm:$0xff]  }
  0x30   : > { %1277 = vmatprep.subr.bf16.mxu0 %v3451_v46  ;;  %3264 = vmatprep.subr.bf16.mxu1 %v3453_v47  ;;  %v3531_v45 = vld [vmem:[%s4794_s3 + $0x18] ss:$12 sps:$4 sm:$0xff]   ;;  %v3536_v46 = vld [vmem:[%s4793_s2 + $0x274] ss:$12 sps:$4 sm:$0xff]  }
  0x31   : > { %v3539_v47 = vld [vmem:[%s4794_s3 + $0x34] ss:$12 sps:$4 sm:$0xff]  }
  0x33   : > { %1278 = vmatpush1.bf16.msra.mxu0 %v3454_v48  ;;  %3265 = vmatpush3.bf16.msra.mxu1 %v3455_v49  ;;  %v3534_v48 = vld [vmem:[%s4793_s2 + $0x270] ss:$12 sps:$4 sm:$0xff]  }
  0x34   : > { %1279 = vmatprep.subr.bf16.mxu0 %v3456_v50  ;;  %3266 = vmatprep.subr.bf16.mxu1 %v3458_v51  ;;  %v3537_v49 = vld [vmem:[%s4794_s3 + $0x30] ss:$12 sps:$4 sm:$0xff]   ;;  %v3542_v50 = vld [vmem:[%s4793_s2 + $0x28c] ss:$12 sps:$4 sm:$0xff]  }
  0x35   : > { %v3545_v51 = vld [vmem:[%s4794_s3 + $0x4c] ss:$12 sps:$4 sm:$0xff]  }
  0x37   : > { %1280 = vmatpush1.bf16.msra.mxu0 %v3459_v52  ;;  %3267 = vmatpush3.bf16.msra.mxu1 %v3460_v53  ;;  %v3540_v52 = vld [vmem:[%s4793_s2 + $0x288] ss:$12 sps:$4 sm:$0xff]  }
  0x38   : > { %1281 = vmatprep.subr.bf16.mxu0 %v3461_v54  ;;  %3268 = vmatprep.subr.bf16.mxu1 %v3463_v55  ;;  %v3543_v53 = vld [vmem:[%s4794_s3 + $0x48] ss:$12 sps:$4 sm:$0xff]   ;;  %v3548_v54 = vld [vmem:[%s4793_s2 + $0x2a4] ss:$12 sps:$4 sm:$0xff]  }
  0x39   : > { %v3551_v55 = vld [vmem:[%s4794_s3 + $0x64] ss:$12 sps:$4 sm:$0xff]  }
  0x3b   : > { %1282 = vmatpush1.bf16.msra.mxu0 %v3464_v56  ;;  %3269 = vmatpush3.bf16.msra.mxu1 %v3465_v57  ;;  %v3546_v56 = vld [vmem:[%s4793_s2 + $0x2a0] ss:$12 sps:$4 sm:$0xff]  }
  0x3c   : > { %1283 = vmatprep.subr.bf16.mxu0 %v3466_v58  ;;  %3270 = vmatprep.subr.bf16.mxu1 %v3468_v59  ;;  %v3549_v57 = vld [vmem:[%s4794_s3 + $0x60] ss:$12 sps:$4 sm:$0xff]   ;;  %v3554_v58 = vld [vmem:[%s4793_s2 + $0x2bc] ss:$12 sps:$4 sm:$0xff]  }
  0x3d   : > { %v3557_v59 = vld [vmem:[%s4794_s3 + $0x7c] ss:$12 sps:$4 sm:$0xff]  }
  0x3f   : > { %1284 = vmatpush1.bf16.msra.mxu0 %v3469_v60  ;;  %3271 = vmatpush3.bf16.msra.mxu1 %v3470_v62  ;;  %v3552_v60 = vld [vmem:[%s4793_s2 + $0x2b8] ss:$12 sps:$4 sm:$0xff]   ;;  %v3560_v62 = vld [vmem:[%s4793_s2 + $0x2d4] ss:$12 sps:$4 sm:$0xff]  }
  0x40   : > { %1285 = vmatprep.subr.bf16.mxu0 %v3471_v63  ;;  %3272 = vmatprep.subr.bf16.mxu1 %v3473_v0  ;;  %v3563_v63 = vld [vmem:[%s4794_s3 + $0x94] ss:$12 sps:$4 sm:$0xff]   ;;  %v3558_v0 = vld [vmem:[%s4793_s2 + $0x2d0] ss:$12 sps:$4 sm:$0xff]  }
  0x43   : > { %1286 = vmatpush1.bf16.msra.mxu0 %v3474_v1  ;;  %3273 = vmatpush3.bf16.msra.mxu1 %v3475_v2  ;;  %v3561_v1 = vld [vmem:[%s4794_s3 + $0x90] ss:$12 sps:$4 sm:$0xff]   ;;  %v3566_v2 = vld [vmem:[%s4793_s2 + $0x2ec] ss:$12 sps:$4 sm:$0xff]  }
  0x44   : > { %1298 = vmatprep.subr.bf16.mxu0 %v3481_v3  ;;  %3280 = vmatprep.subr.bf16.mxu1 %v3482_v4  ;;  %v3569_v3 = vld [vmem:[%s4794_s3 + $0xac] ss:$12 sps:$4 sm:$0xff]   ;;  %v3564_v4 = vld [vmem:[%s4793_s2 + $0x2e8] ss:$12 sps:$4 sm:$0xff]  }
  0x46   : > { %1288 = vmatmul.mubr.bf16.vlgmr.msra.gmra.mrb[0].mxu0 %v3953_v35  ;;  %1458 = vmatmul.mubr.bf16.vlgmr.msra.gmra.mrb[4].mxu1 %v4054_v5  ;;  %v3514_v35 = vld [vmem:[%s4793_s2 + $0x228] ss:$12 sps:$4 sm:$0xff]  }
  0x47   : > { %1299 = vmatpush1.bf16.msra.mxu0 %v3479_v6  ;;  %3281 = vmatpush3.bf16.msra.mxu1 %v3483_v7  ;;  %v3567_v6 = vld [vmem:[%s4794_s3 + $0xa8] ss:$12 sps:$4 sm:$0xff]   ;;  %v3572_v7 = vld [vmem:[%s4793_s2 + $0x304] ss:$12 sps:$4 sm:$0xff]  }
  0x48   : > { %1300 = vmatprep.subr.bf16.mxu0 %v3486_v8  ;;  %3282 = vmatprep.subr.bf16.mxu1 %v3487_v9  ;;  %v3575_v8 = vld [vmem:[%s4794_s3 + $0xc4] ss:$12 sps:$4 sm:$0xff]   ;;  %v3570_v9 = vld [vmem:[%s4793_s2 + $0x300] ss:$12 sps:$4 sm:$0xff]  }
  0x49   : > { %1330 = vmatprep.mubr.bf16.mxu0 %v3478_v61  ;;  %1498 = vmatprep.mubr.bf16.mxu1 %v4122_v27  ;;  %v3555_v61 = vld [vmem:[%s4794_s3 + $0x78] ss:$12 sps:$4 sm:$0xff]  }
  0x4b   : > { %1301 = vmatpush1.bf16.msra.mxu0 %v3484_v10  ;;  %3283 = vmatpush3.bf16.msra.mxu1 %v3488_v11  ;;  %v3573_v10 = vld [vmem:[%s4794_s3 + $0xc0] ss:$12 sps:$4 sm:$0xff]   ;;  %v3578_v11 = vld [vmem:[%s4793_s2 + $0x31c] ss:$12 sps:$4 sm:$0xff]  }
  0x4c   : > { %1302 = vmatprep.subr.bf16.mxu0 %v3491_v12  ;;  %3284 = vmatprep.subr.bf16.mxu1 %v3492_v13  ;;  %v4274_v12 = vld [vmem:[%s4262_s14 + $0x4] ss:$24 sps:$4 sm:$0xff]  }
  0x4d   : > { %v3581_v13 = vld [vmem:[%s4794_s3 + $0xdc] ss:$12 sps:$4 sm:$0xff]  }
  0x4f   : > { %1303 = vmatpush1.bf16.msra.mxu0 %v3489_v14  ;;  %3285 = vmatpush3.bf16.msra.mxu1 %v3493_v15  ;;  %v3576_v14 = vld [vmem:[%s4793_s2 + $0x318] ss:$12 sps:$4 sm:$0xff]  }
  0x50   : > { %1304 = vmatprep.subr.bf16.mxu0 %v3496_v16  ;;  %3286 = vmatprep.subr.bf16.mxu1 %v3497_v17  ;;  %v3579_v15 = vld [vmem:[%s4794_s3 + $0xd8] ss:$12 sps:$4 sm:$0xff]   ;;  %v3584_v16 = vld [vmem:[%s4793_s2 + $0x334] ss:$12 sps:$4 sm:$0xff]   ;;  %v3582_v17 = vld [vmem:[%s4793_s2 + $0x330] ss:$12 sps:$4 sm:$0xff]  }
  0x53   : > { %1305 = vmatpush1.bf16.msra.mxu0 %v3494_v18  ;;  %3287 = vmatpush3.bf16.msra.mxu1 %v3498_v19  ;;  %v3585_v18 = vld [vmem:[%s4794_s3 + $0xf0] ss:$12 sps:$4 sm:$0xff]   ;;  %v3590_v19 = vld [vmem:[%s4793_s2 + $0x34c] ss:$12 sps:$4 sm:$0xff]  }
  0x54   : > { %1306 = vmatprep.subr.bf16.mxu0 %v3501_v20  ;;  %3288 = vmatprep.subr.bf16.mxu1 %v3502_v21  ;;  %v3593_v20 = vld [vmem:[%s4794_s3 + $0x10c] ss:$12 sps:$4 sm:$0xff]   ;;  %v3588_v21 = vld [vmem:[%s4793_s2 + $0x348] ss:$12 sps:$4 sm:$0xff]  }
  0x57   : > { %1307 = vmatpush1.bf16.msra.mxu0 %v3499_v22  ;;  %3289 = vmatpush3.bf16.msra.mxu1 %v3503_v23  ;;  %v3591_v22 = vld [vmem:[%s4794_s3 + $0x108] ss:$12 sps:$4 sm:$0xff]   ;;  %v3596_v23 = vld [vmem:[%s4793_s2 + $0x364] ss:$12 sps:$4 sm:$0xff]  }
  0x58   : > { %1308 = vmatprep.subr.bf16.mxu0 %v3506_v24  ;;  %3290 = vmatprep.subr.bf16.mxu1 %v3507_v25  ;;  %v3599_v24 = vld [vmem:[%s4794_s3 + $0x124] ss:$12 sps:$4 sm:$0xff]   ;;  %v3594_v25 = vld [vmem:[%s4793_s2 + $0x360] ss:$12 sps:$4 sm:$0xff]  }
  0x5b   : > { %1309 = vmatpush1.bf16.msra.mxu0 %v3504_v26  ;;  %3291 = vmatpush3.bf16.msra.mxu1 %v3508_v28  ;;  %v3597_v26 = vld [vmem:[%s4794_s3 + $0x120] ss:$12 sps:$4 sm:$0xff]   ;;  %v3605_v28 = vld [vmem:[%s4794_s3 + $0x13c] ss:$12 sps:$4 sm:$0xff]  }
  0x5c   : > { %1310 = vmatprep.subr.bf16.mxu0 %v3511_v29  ;;  %3292 = vmatprep.subr.bf16.mxu1 %v3512_v30  ;;  %v3600_v29 = vld [vmem:[%s4793_s2 + $0x378] ss:$12 sps:$4 sm:$0xff]  }
  0x5d   : > { %v3603_v30 = vld [vmem:[%s4794_s3 + $0x138] ss:$12 sps:$4 sm:$0xff]  }
  0x5f   : > { %1311 = vmatpush1.bf16.msra.mxu0 %v3509_v31  ;;  %3293 = vmatpush3.bf16.msra.mxu1 %v3513_v32  ;;  %v3608_v31 = vld [vmem:[%s4793_s2 + $0x394] ss:$12 sps:$4 sm:$0xff]  }
  0x60   : > { %1312 = vmatprep.subr.bf16.mxu0 %v3516_v33  ;;  %3294 = vmatprep.subr.bf16.mxu1 %v3517_v34  ;;  %v3611_v32 = vld [vmem:[%s4794_s3 + $0x154] ss:$12 sps:$4 sm:$0xff]   ;;  %v3606_v33 = vld [vmem:[%s4793_s2 + $0x390] ss:$12 sps:$4 sm:$0xff]  }
  0x61   : > { %v3609_v34 = vld [vmem:[%s4794_s3 + $0x150] ss:$12 sps:$4 sm:$0xff]  }
  0x63   : > { %1313 = vmatpush1.bf16.msra.mxu0 %v3514_v35  ;;  %3295 = vmatpush3.bf16.msra.mxu1 %v3518_v36  ;;  %v3614_v35 = vld [vmem:[%s4793_s2 + $0x3ac] ss:$12 sps:$4 sm:$0xff]  }
  0x64   : > { %1314 = vmatprep.subr.bf16.mxu0 %v3524_v37  ;;  %2503 = vmatprep.subr.bf16.mxu1 %v3527_v38  ;;  %v3617_v36 = vld [vmem:[%s4794_s3 + $0x16c] ss:$12 sps:$4 sm:$0xff]   ;;  %v3612_v37 = vld [vmem:[%s4793_s2 + $0x3a8] ss:$12 sps:$4 sm:$0xff]  }
  0x65   : > { %v3615_v38 = vld [vmem:[%s4794_s3 + $0x168] ss:$12 sps:$4 sm:$0xff]  }
  0x66   : > { %1499 = vmatmul.mubr.bf16.vlgmr.msra.gmra.mrb[8].mxu1 %v4159_v39 }
  0x67   : > { %1315 = vmatpush1.bf16.msra.mxu0 %v3522_v40  ;;  %2504 = vmatpush1.bf16.msra.mxu1 %v3525_v41  ;;  %v3620_v40 = vld [vmem:[%s4793_s2 + $0x3c4] ss:$12 sps:$4 sm:$0xff]  }
  0x68   : > { %1316 = vmatprep.subr.bf16.mxu0 %v3530_v42  ;;  %2505 = vmatprep.subr.bf16.mxu1 %v3533_v43  ;;  %v3626_v41 = vld [vmem:[%s4794_s3 + $0x184] ss:$12 sps:$4 sm:$0xff]   ;;  %v3618_v42 = vld [vmem:[%s4793_s2 + $0x3c0] ss:$12 sps:$4 sm:$0xff]  }
  0x69   : > { %2535 = vmatprep.mubr.bf16.mxu1 %v4274_v12  ;;  %v4370_v43 = vld [vmem:[%s4262_s14] ss:$24 sps:$4 sm:$0xff]  }
  0x6b   : > { %1317 = vmatpush1.bf16.msra.mxu0 %v3528_v44  ;;  %2506 = vmatpush1.bf16.msra.mxu1 %v3531_v45  ;;  %v3624_v44 = vld [vmem:[%s4794_s3 + $0x180] ss:$12 sps:$4 sm:$0xff]   ;;  %v3629_v45 = vld [vmem:[%s4793_s2 + $0x3dc] ss:$12 sps:$4 sm:$0xff]  }
  0x6c   : > { %1318 = vmatprep.subr.bf16.mxu0 %v3536_v46  ;;  %2507 = vmatprep.subr.bf16.mxu1 %v3539_v47  ;;  %v3632_v46 = vld [vmem:[%s4794_s3 + $0x19c] ss:$12 sps:$4 sm:$0xff]   ;;  %v3627_v47 = vld [vmem:[%s4793_s2 + $0x3d8] ss:$12 sps:$4 sm:$0xff]  }
  0x6f   : > { %1319 = vmatpush1.bf16.msra.mxu0 %v3534_v48  ;;  %2508 = vmatpush1.bf16.msra.mxu1 %v3537_v49  ;;  %v3630_v48 = vld [vmem:[%s4794_s3 + $0x198] ss:$12 sps:$4 sm:$0xff]   ;;  %v3635_v49 = vld [vmem:[%s4793_s2 + $0x3f4] ss:$12 sps:$4 sm:$0xff]  }
  0x70   : > { %1320 = vmatprep.subr.bf16.mxu0 %v3542_v50  ;;  %2509 = vmatprep.subr.bf16.mxu1 %v3545_v51  ;;  %v3638_v50 = vld [vmem:[%s4794_s3 + $0x1b4] ss:$12 sps:$4 sm:$0xff]   ;;  %v3633_v51 = vld [vmem:[%s4793_s2 + $0x3f0] ss:$12 sps:$4 sm:$0xff]  }
  0x73   : > { %1321 = vmatpush1.bf16.msra.mxu0 %v3540_v52  ;;  %2510 = vmatpush1.bf16.msra.mxu1 %v3543_v53  ;;  %v3636_v52 = vld [vmem:[%s4794_s3 + $0x1b0] ss:$12 sps:$4 sm:$0xff]   ;;  %v3641_v53 = vld [vmem:[%s4793_s2 + $0x40c] ss:$12 sps:$4 sm:$0xff]  }
  0x74   : > { %1322 = vmatprep.subr.bf16.mxu0 %v3548_v54  ;;  %2511 = vmatprep.subr.bf16.mxu1 %v3551_v55  ;;  %v3644_v54 = vld [vmem:[%s4794_s3 + $0x1cc] ss:$12 sps:$4 sm:$0xff]   ;;  %v3639_v55 = vld [vmem:[%s4793_s2 + $0x408] ss:$12 sps:$4 sm:$0xff]  }
  0x77   : > { %1323 = vmatpush1.bf16.msra.mxu0 %v3546_v56  ;;  %2512 = vmatpush1.bf16.msra.mxu1 %v3549_v57  ;;  %v3642_v56 = vld [vmem:[%s4794_s3 + $0x1c8] ss:$12 sps:$4 sm:$0xff]   ;;  %v3647_v57 = vld [vmem:[%s4793_s2 + $0x424] ss:$12 sps:$4 sm:$0xff]  }
  0x78   : > { %1324 = vmatprep.subr.bf16.mxu0 %v3554_v58  ;;  %2513 = vmatprep.subr.bf16.mxu1 %v3557_v59  ;;  %v3645_v58 = vld [vmem:[%s4793_s2 + $0x420] ss:$12 sps:$4 sm:$0xff]   ;;  %v3650_v59 = vld [vmem:[%s4794_s3 + $0x1e4] ss:$12 sps:$4 sm:$0xff]  }
  0x7b   : > { %1325 = vmatpush1.bf16.msra.mxu0 %v3552_v60  ;;  %2514 = vmatpush1.bf16.msra.mxu1 %v3555_v61  ;;  %v3648_v60 = vld [vmem:[%s4794_s3 + $0x1e0] ss:$12 sps:$4 sm:$0xff]   ;;  %v3653_v61 = vld [vmem:[%s4793_s2 + $0x43c] ss:$12 sps:$4 sm:$0xff]  }
  0x7c   : > { %1326 = vmatprep.subr.bf16.mxu0 %v3560_v62  ;;  %2515 = vmatprep.subr.bf16.mxu1 %v3563_v63  ;;  %v4428_v62 = vld [vmem:[%s4262_s14 + $0xc] ss:$24 sps:$4 sm:$0xff]   ;;  %v3656_v63 = vld [vmem:[%s4794_s3 + $0x1fc] ss:$12 sps:$4 sm:$0xff]  }
  0x7f   : > { %1327 = vmatpush1.bf16.msra.mxu0 %v3558_v0  ;;  %2516 = vmatpush1.bf16.msra.mxu1 %v3561_v1  ;;  %v3651_v0 = vld [vmem:[%s4793_s2 + $0x438] ss:$12 sps:$4 sm:$0xff]  }
  0x80   : > { %1328 = vmatprep.subr.bf16.mxu0 %v3566_v2  ;;  %2517 = vmatprep.subr.bf16.mxu1 %v3569_v3  ;;  %v3654_v1 = vld [vmem:[%s4794_s3 + $0x1f8] ss:$12 sps:$4 sm:$0xff]   ;;  %v3659_v2 = vld [vmem:[%s4793_s2 + $0x454] ss:$12 sps:$4 sm:$0xff]  }
  0x81   : > { %v3662_v3 = vld [vmem:[%s4794_s3 + $0x214] ss:$12 sps:$4 sm:$0xff]  }
  0x83   : > { %1329 = vmatpush1.bf16.msra.mxu0 %v3564_v4  ;;  %2518 = vmatpush1.bf16.msra.mxu1 %v3567_v6  ;;  %v3657_v4 = vld [vmem:[%s4793_s2 + $0x450] ss:$12 sps:$4 sm:$0xff]  }
  0x84   : > { %1341 = vmatprep.subr.bf16.mxu0 %v3572_v7  ;;  %2519 = vmatprep.subr.bf16.mxu1 %v3575_v8  ;;  %v3660_v6 = vld [vmem:[%s4794_s3 + $0x210] ss:$12 sps:$4 sm:$0xff]   ;;  %v3665_v7 = vld [vmem:[%s4793_s2 + $0x46c] ss:$12 sps:$4 sm:$0xff]  }
  0x85   : > { %v3668_v8 = vld [vmem:[%s4794_s3 + $0x22c] ss:$12 sps:$4 sm:$0xff]  }
  0x86   : > { %1331 = vmatmul.mubr.bf16.vlgmr.msra.gmra.mrb[0].mxu0 %v4054_v5  ;;  %v3587_v5 = vld [vmem:[%s4794_s3 + $0xf4] ss:$12 sps:$4 sm:$0xff]  }
  0x87   : > { %1342 = vmatpush1.bf16.msra.mxu0 %v3570_v9  ;;  %1373 = vmatprep.mubr.bf16.mxu0 %v4122_v27  ;;  %v3602_v27 = vld [vmem:[%s4793_s2 + $0x37c] ss:$12 sps:$4 sm:$0xff]  }
  0x88   : > { %2520 = vmatpush1.bf16.msra.mxu1 %v3573_v10  ;;  %1343 = vmatprep.subr.bf16.mxu0 %v3578_v11  ;;  %v3663_v9 = vld [vmem:[%s4793_s2 + $0x468] ss:$12 sps:$4 sm:$0xff]  }
  0x89   : > { %2521 = vmatprep.subr.bf16.mxu1 %v3581_v13  ;;  %v3666_v10 = vld [vmem:[%s4794_s3 + $0x228] ss:$12 sps:$4 sm:$0xff]   ;;  %v3671_v13 = vld [vmem:[%s4794_s3 + $0x244] ss:$12 sps:$4 sm:$0xff]  }
  0x8a   : > { %v3672_v11 = vld [vmem:[%s4794_s3 + $0xc8] ss:$12 sps:$4 sm:$0xff]  }
  0x8b   : > { %1344 = vmatpush1.bf16.msra.mxu0 %v3576_v14  ;;  %v3669_v14 = vld [vmem:[%s4794_s3 + $0x240] ss:$12 sps:$4 sm:$0xff]  }
  0x8c   : > { %2522 = vmatpush1.bf16.msra.mxu1 %v3579_v15  ;;  %1345 = vmatprep.subr.bf16.mxu0 %v3584_v16  ;;  %v3673_v15 = vld [vmem:[%s4794_s3 + $0x8] ss:$12 sps:$4 sm:$0xff]   ;;  %v3677_v16 = vld [vmem:[%s4794_s3 + $0xe0] ss:$12 sps:$4 sm:$0xff]  }
  0x8d   : > { %2523 = vmatprep.subr.bf16.mxu1 %v3587_v5  ;;  %v3676_v5 = vld [vmem:[%s4794_s3 + $0x25c] ss:$12 sps:$4 sm:$0xff]  }
  0x8f   : > { %1346 = vmatpush1.bf16.msra.mxu0 %v3582_v17  ;;  %v3674_v17 = vld [vmem:[%s4794_s3 + $0x258] ss:$12 sps:$4 sm:$0xff]  }
  0x90   : > { %2524 = vmatpush1.bf16.msra.mxu1 %v3585_v18  ;;  %1347 = vmatprep.subr.bf16.mxu0 %v3590_v19  ;;  %v3678_v18 = vld [vmem:[%s4794_s3 + $0x20] ss:$12 sps:$4 sm:$0xff]   ;;  %v3682_v19 = vld [vmem:[%s4794_s3 + $0xf8] ss:$12 sps:$4 sm:$0xff]  }
  0x91   : > { %2525 = vmatprep.subr.bf16.mxu1 %v3593_v20  ;;  %v3683_v20 = vld [vmem:[%s4794_s3 + $0x38] ss:$12 sps:$4 sm:$0xff]  }
  0x93   : > { %1348 = vmatpush1.bf16.msra.mxu0 %v3588_v21  ;;  %v3687_v21 = vld [vmem:[%s4794_s3 + $0x110] ss:$12 sps:$4 sm:$0xff]  }
  0x94   : > { %2526 = vmatpush1.bf16.msra.mxu1 %v3591_v22  ;;  %1349 = vmatprep.subr.bf16.mxu0 %v3596_v23  ;;  %v3686_v22 = vld [vmem:[%s4794_s3 + $0x28c] ss:$12 sps:$4 sm:$0xff]   ;;  %v3684_v23 = vld [vmem:[%s4794_s3 + $0x288] ss:$12 sps:$4 sm:$0xff]  }
  0x95   : > { %2527 = vmatprep.subr.bf16.mxu1 %v3599_v24  ;;  %v3688_v24 = vld [vmem:[%s4794_s3 + $0x50] ss:$12 sps:$4 sm:$0xff]  }
  0x97   : > { %1350 = vmatpush1.bf16.msra.mxu0 %v3594_v25  ;;  %v3692_v25 = vld [vmem:[%s4794_s3 + $0x128] ss:$12 sps:$4 sm:$0xff]  }
  0x98   : > { %2528 = vmatpush1.bf16.msra.mxu1 %v3597_v26  ;;  %1351 = vmatprep.subr.bf16.mxu0 %v3602_v27  ;;  %v3691_v26 = vld [vmem:[%s4794_s3 + $0x2a4] ss:$12 sps:$4 sm:$0xff]   ;;  %v3689_v27 = vld [vmem:[%s4794_s3 + $0x2a0] ss:$12 sps:$4 sm:$0xff]  }
  0x99   : > { %2529 = vmatprep.subr.bf16.mxu1 %v3605_v28  ;;  %v3693_v28 = vld [vmem:[%s4794_s3 + $0x68] ss:$12 sps:$4 sm:$0xff]  }
  0x9b   : > { %1352 = vmatpush1.bf16.msra.mxu0 %v3600_v29  ;;  %v3697_v29 = vld [vmem:[%s4794_s3 + $0x140] ss:$12 sps:$4 sm:$0xff]  }
  0x9c   : > { %2530 = vmatpush1.bf16.msra.mxu1 %v3603_v30  ;;  %1353 = vmatprep.subr.bf16.mxu0 %v3608_v31  ;;  %v3696_v30 = vld [vmem:[%s4794_s3 + $0x2bc] ss:$12 sps:$4 sm:$0xff]   ;;  %v3694_v31 = vld [vmem:[%s4794_s3 + $0x2b8] ss:$12 sps:$4 sm:$0xff]  }
  0x9d   : > { %2531 = vmatprep.subr.bf16.mxu1 %v3611_v32  ;;  %v3698_v32 = vld [vmem:[%s4794_s3 + $0x80] ss:$12 sps:$4 sm:$0xff]  }
  0x9f   : > { %1354 = vmatpush1.bf16.msra.mxu0 %v3606_v33  ;;  %v3702_v33 = vld [vmem:[%s4794_s3 + $0x158] ss:$12 sps:$4 sm:$0xff]  }
  0xa0   : > { %2532 = vmatpush1.bf16.msra.mxu1 %v3609_v34  ;;  %1355 = vmatprep.subr.bf16.mxu0 %v3614_v35  ;;  %v3701_v34 = vld [vmem:[%s4794_s3 + $0x2d4] ss:$12 sps:$4 sm:$0xff]   ;;  %v3699_v35 = vld [vmem:[%s4794_s3 + $0x2d0] ss:$12 sps:$4 sm:$0xff]  }
  0xa1   : > { %2533 = vmatprep.subr.bf16.mxu1 %v3617_v36  ;;  %v3703_v36 = vld [vmem:[%s4794_s3 + $0x98] ss:$12 sps:$4 sm:$0xff]  }
  0xa3   : > { %1356 = vmatpush1.bf16.msra.mxu0 %v3612_v37  ;;  %v3707_v37 = vld [vmem:[%s4794_s3 + $0x170] ss:$12 sps:$4 sm:$0xff]  }
  0xa4   : > { %2534 = vmatpush1.bf16.msra.mxu1 %v3615_v38  ;;  %1357 = vmatprep.subr.bf16.mxu0 %v3620_v40  ;;  %v3706_v38 = vld [vmem:[%s4794_s3 + $0x2ec] ss:$12 sps:$4 sm:$0xff]   ;;  %v3708_v40 = vld [vmem:[%s4794_s3 + $0xb0] ss:$12 sps:$4 sm:$0xff]  }
  0xa5   : > { %2546 = vmatprep.subr.bf16.mxu1 %v3626_v41  ;;  %v3704_v41 = vld [vmem:[%s4794_s3 + $0x2e8] ss:$12 sps:$4 sm:$0xff]  }
  0xa7   : > { %1358 = vmatpush1.bf16.msra.mxu0 %v3618_v42  ;;  %2536 = vmatmul.mubr.bf16.vlgmr.msra.gmra.mrb[12].mxu1 %v4370_v43  ;;  %v3715_v42 = vld [vmem:[%s4794_s3 + $0x248] ss:$12 sps:$4 sm:$0xff]  }
  0xa8   : > { %2547 = vmatpush1.bf16.msra.mxu1 %v3624_v44  ;;  %1359 = vmatprep.subr.bf16.mxu0 %v3629_v45  ;;  %v4566_v44 = vld [vmem:[%s4262_s14 + $0x8] ss:$24 sps:$4 sm:$0xff]   ;;  %v3714_v45 = vld [vmem:[%s4794_s3 + $0x304] ss:$12 sps:$4 sm:$0xff]  }
  0xa9   : > { %2548 = vmatprep.subr.bf16.mxu1 %v3632_v46  ;;  %2578 = vmatprep.mubr.bf16.mxu1 %v4428_v62  ;;  %v3712_v46 = vld [vmem:[%s4794_s3 + $0x300] ss:$12 sps:$4 sm:$0xff]  }
  0xab   : > { %1360 = vmatpush1.bf16.msra.mxu0 %v3627_v47  ;;  %v3716_v47 = vld [vmem:[%s4794_s3 + $0x188] ss:$12 sps:$4 sm:$0xff]  }
  0xac   : > { %2549 = vmatpush1.bf16.msra.mxu1 %v3630_v48  ;;  %1361 = vmatprep.subr.bf16.mxu0 %v3635_v49  ;;  %v3720_v48 = vld [vmem:[%s4794_s3 + $0x260] ss:$12 sps:$4 sm:$0xff]   ;;  %v3719_v49 = vld [vmem:[%s4794_s3 + $0x31c] ss:$12 sps:$4 sm:$0xff]  }
  0xad   : > { %2550 = vmatprep.subr.bf16.mxu1 %v3638_v50  ;;  %v3717_v50 = vld [vmem:[%s4794_s3 + $0x318] ss:$12 sps:$4 sm:$0xff]  }
  0xaf   : > { %1362 = vmatpush1.bf16.msra.mxu0 %v3633_v51  ;;  %v3721_v51 = vld [vmem:[%s4794_s3 + $0x1a0] ss:$12 sps:$4 sm:$0xff]  }
  0xb0   : > { %2551 = vmatpush1.bf16.msra.mxu1 %v3636_v52  ;;  %1363 = vmatprep.subr.bf16.mxu0 %v3641_v53  ;;  %v3725_v52 = vld [vmem:[%s4794_s3 + $0x278] ss:$12 sps:$4 sm:$0xff]   ;;  %v4599_v53 = vld [vmem:[%s4262_s14 + $0x14] ss:$24 sps:$4 sm:$0xff]  }
  0xb1   : > { %2552 = vmatprep.subr.bf16.mxu1 %v3644_v54  ;;  %v3726_v54 = vld [vmem:[%s4794_s3 + $0x1b8] ss:$12 sps:$4 sm:$0xff]  }
  0xb3   : > { %1364 = vmatpush1.bf16.msra.mxu0 %v3639_v55  ;;  %v3722_v55 = vld [vmem:[%s4794_s3 + $0x330] ss:$12 sps:$4 sm:$0xff]  }
  0xb4   : > { %2553 = vmatpush1.bf16.msra.mxu1 %v3642_v56  ;;  %1365 = vmatprep.subr.bf16.mxu0 %v3647_v57  ;;  %v3730_v56 = vld [vmem:[%s4794_s3 + $0x290] ss:$12 sps:$4 sm:$0xff]   ;;  %v3729_v57 = vld [vmem:[%s4794_s3 + $0x34c] ss:$12 sps:$4 sm:$0xff]  }
  0xb5   : > { %2554 = vmatprep.subr.bf16.mxu1 %v3650_v59  ;;  %v3727_v59 = vld [vmem:[%s4794_s3 + $0x348] ss:$12 sps:$4 sm:$0xff]  }
  0xb7   : > { %1366 = vmatpush1.bf16.msra.mxu0 %v3645_v58  ;;  %v3731_v58 = vld [vmem:[%s4794_s3 + $0x1d0] ss:$12 sps:$4 sm:$0xff]  }
  0xb8   : > { %2555 = vmatpush1.bf16.msra.mxu1 %v3648_v60  ;;  %1367 = vmatprep.subr.bf16.mxu0 %v3653_v61  ;;  %v3735_v60 = vld [vmem:[%s4794_s3 + $0x2a8] ss:$12 sps:$4 sm:$0xff]   ;;  %v3734_v61 = vld [vmem:[%s4794_s3 + $0x364] ss:$12 sps:$4 sm:$0xff]  }
  0xb9   : > { %2556 = vmatprep.subr.bf16.mxu1 %v3656_v63  ;;  %v3732_v63 = vld [vmem:[%s4794_s3 + $0x360] ss:$12 sps:$4 sm:$0xff]  }
  0xbb   : > { %1368 = vmatpush1.bf16.msra.mxu0 %v3651_v0  ;;  %v3740_v0 = vld [vmem:[%s4794_s3 + $0x2c0] ss:$12 sps:$4 sm:$0xff]  }
  0xbc   : > { %2557 = vmatpush1.bf16.msra.mxu1 %v3654_v1  ;;  %1369 = vmatprep.subr.bf16.mxu0 %v3659_v2  ;;  %v3739_v1 = vld [vmem:[%s4794_s3 + $0x37c] ss:$12 sps:$4 sm:$0xff]   ;;  %v3741_v2 = vld [vmem:[%s4794_s3 + $0x200] ss:$12 sps:$4 sm:$0xff]  }
  0xbd   : > { %2558 = vmatprep.subr.bf16.mxu1 %v3662_v3  ;;  %v3737_v3 = vld [vmem:[%s4794_s3 + $0x378] ss:$12 sps:$4 sm:$0xff]  }
  0xbf   : > { %1370 = vmatpush1.bf16.msra.mxu0 %v3657_v4  ;;  %v3745_v4 = vld [vmem:[%s4794_s3 + $0x2d8] ss:$12 sps:$4 sm:$0xff]  }
  0xc0   : > { %2559 = vmatpush1.bf16.msra.mxu1 %v3660_v6  ;;  %1371 = vmatprep.subr.bf16.mxu0 %v3665_v7  ;;  %v3744_v6 = vld [vmem:[%s4794_s3 + $0x394] ss:$12 sps:$4 sm:$0xff]  }
  0xc1   : > { %2560 = vmatprep.subr.bf16.mxu1 %v3668_v8 }
  0xc3   : > { %1372 = vmatpush1.bf16.msra.mxu0 %v3663_v9  ;;  %v3746_v9 = vld [vmem:[%s4794_s3 + $0x218] ss:$12 sps:$4 sm:$0xff]  }
  0xc4   : > { %2561 = vmatpush1.bf16.msra.mxu1 %v3666_v10  ;;  %3302 = vmatprep.subr.bf16.mxu0 %v3672_v11 }
  0xc5   : > { %2562 = vmatprep.subr.bf16.mxu1 %v3671_v13  ;;  %v3742_v13 = vld [vmem:[%s4794_s3 + $0x390] ss:$12 sps:$4 sm:$0xff]  }
  0xc6   : > { %1374 = vmatmul.mubr.bf16.vlgmr.msra.gmra.mrb[0].mxu0 %v4159_v39  ;;  %v3681_v39 = vld [vmem:[%s4794_s3 + $0x274] ss:$12 sps:$4 sm:$0xff]  }
  0xc7   : > { %3303 = vmatpush3.bf16.msra.mxu0 %v3673_v15  ;;  %2664 = vmatprep.mubr.bf16.mxu0 %v4274_v12  ;;  %v3679_v12 = vld [vmem:[%s4794_s3 + $0x270] ss:$12 sps:$4 sm:$0xff]  }
  0xc8   : > { %2563 = vmatpush1.bf16.msra.mxu1 %v3669_v14  ;;  %3304 = vmatprep.subr.bf16.mxu0 %v3677_v16  ;;  %v3750_v14 = vld [vmem:[%s4794_s3 + $0x2f0] ss:$12 sps:$4 sm:$0xff]   ;;  %v3749_v16 = vld [vmem:[%s4794_s3 + $0x3ac] ss:$12 sps:$4 sm:$0xff]  }
  0xc9   : > { %2564 = vmatprep.subr.bf16.mxu1 %v3676_v5 }
  0xcb   : > { %3305 = vmatpush3.bf16.msra.mxu0 %v3678_v18  ;;  %v3747_v18 = vld [vmem:[%s4794_s3 + $0x3a8] ss:$12 sps:$4 sm:$0xff]  }
  0xcc   : > { %2565 = vmatpush1.bf16.msra.mxu1 %v3674_v17  ;;  %3306 = vmatprep.subr.bf16.mxu0 %v3682_v19  ;;  %v3751_v17 = vld [vmem:[%s4794_s3 + $0x230] ss:$12 sps:$4 sm:$0xff]   ;;  %v3755_v19 = vld [vmem:[%s4794_s3 + $0x3c8] ss:$12 sps:$4 sm:$0xff]  }
  0xcd   : > { %2566 = vmatprep.subr.bf16.mxu1 %v3681_v39  ;;  %v3754_v39 = vld [vmem:[%s4794_s3 + $0x3c4] ss:$12 sps:$4 sm:$0xff]  }
  0xcf   : > { %3307 = vmatpush3.bf16.msra.mxu0 %v3683_v20  ;;  %v3756_v20 = vld [vmem:[%s4794_s3 + $0x308] ss:$12 sps:$4 sm:$0xff]  }
  0xd0   : > { %2567 = vmatpush1.bf16.msra.mxu1 %v3679_v12  ;;  %3308 = vmatprep.subr.bf16.mxu0 %v3687_v21  ;;  %v3752_v12 = vld [vmem:[%s4794_s3 + $0x3c0] ss:$12 sps:$4 sm:$0xff]  }
  0xd1   : > { %2568 = vmatprep.subr.bf16.mxu1 %v3686_v22  ;;  %v3760_v21 = vld [vmem:[%s4794_s3 + $0x3e0] ss:$12 sps:$4 sm:$0xff]   ;;  %v3759_v22 = vld [vmem:[%s4794_s3 + $0x3dc] ss:$12 sps:$4 sm:$0xff]  }
  0xd3   : > { %3309 = vmatpush3.bf16.msra.mxu0 %v3688_v24  ;;  %v3757_v24 = vld [vmem:[%s4794_s3 + $0x3d8] ss:$12 sps:$4 sm:$0xff]  }
  0xd4   : > { %2569 = vmatpush1.bf16.msra.mxu1 %v3684_v23  ;;  %3310 = vmatprep.subr.bf16.mxu0 %v3692_v25  ;;  %v3761_v23 = vld [vmem:[%s4794_s3 + $0x320] ss:$12 sps:$4 sm:$0xff]   ;;  %v3765_v25 = vld [vmem:[%s4794_s3 + $0x3f8] ss:$12 sps:$4 sm:$0xff]  }
  0xd5   : > { %2570 = vmatprep.subr.bf16.mxu1 %v3691_v26  ;;  %v3764_v26 = vld [vmem:[%s4794_s3 + $0x3f4] ss:$12 sps:$4 sm:$0xff]  }
  0xd7   : > { %3311 = vmatpush3.bf16.msra.mxu0 %v3693_v28  ;;  %v3762_v28 = vld [vmem:[%s4794_s3 + $0x3f0] ss:$12 sps:$4 sm:$0xff]  }
  0xd8   : > { %2571 = vmatpush1.bf16.msra.mxu1 %v3689_v27  ;;  %3312 = vmatprep.subr.bf16.mxu0 %v3697_v29  ;;  %v3766_v27 = vld [vmem:[%s4794_s3 + $0x338] ss:$12 sps:$4 sm:$0xff]   ;;  %v3770_v29 = vld [vmem:[%s4794_s3 + $0x410] ss:$12 sps:$4 sm:$0xff]  }
  0xd9   : > { %2572 = vmatprep.subr.bf16.mxu1 %v3696_v30  ;;  %v3769_v30 = vld [vmem:[%s4794_s3 + $0x40c] ss:$12 sps:$4 sm:$0xff]  }
  0xdb   : > { %3313 = vmatpush3.bf16.msra.mxu0 %v3698_v32  ;;  %v3767_v32 = vld [vmem:[%s4794_s3 + $0x408] ss:$12 sps:$4 sm:$0xff]  }
  0xdc   : > { %2573 = vmatpush1.bf16.msra.mxu1 %v3694_v31  ;;  %3314 = vmatprep.subr.bf16.mxu0 %v3702_v33  ;;  %v3771_v31 = vld [vmem:[%s4794_s3 + $0x350] ss:$12 sps:$4 sm:$0xff]   ;;  %v3775_v33 = vld [vmem:[%s4794_s3 + $0x428] ss:$12 sps:$4 sm:$0xff]  }
  0xdd   : > { %2574 = vmatprep.subr.bf16.mxu1 %v3701_v34  ;;  %v3774_v34 = vld [vmem:[%s4794_s3 + $0x424] ss:$12 sps:$4 sm:$0xff]  }
  0xdf   : > { %3315 = vmatpush3.bf16.msra.mxu0 %v3703_v36  ;;  %v3772_v36 = vld [vmem:[%s4794_s3 + $0x420] ss:$12 sps:$4 sm:$0xff]  }
  0xe0   : > { %2575 = vmatpush1.bf16.msra.mxu1 %v3699_v35  ;;  %3316 = vmatprep.subr.bf16.mxu0 %v3707_v37  ;;  %v3776_v35 = vld [vmem:[%s4794_s3 + $0x368] ss:$12 sps:$4 sm:$0xff]   ;;  %v3780_v37 = vld [vmem:[%s4794_s3 + $0x440] ss:$12 sps:$4 sm:$0xff]  }
  0xe1   : > { %2576 = vmatprep.subr.bf16.mxu1 %v3706_v38  ;;  %v3779_v38 = vld [vmem:[%s4794_s3 + $0x43c] ss:$12 sps:$4 sm:$0xff]  }
  0xe3   : > { %3317 = vmatpush3.bf16.msra.mxu0 %v3708_v40  ;;  %v3781_v40 = vld [vmem:[%s4794_s3 + $0x380] ss:$12 sps:$4 sm:$0xff]  }
  0xe4   : > { %2577 = vmatpush1.bf16.msra.mxu1 %v3704_v41  ;;  %3324 = vmatprep.subr.bf16.mxu0 %v3715_v42  ;;  %v3777_v41 = vld [vmem:[%s4794_s3 + $0x438] ss:$12 sps:$4 sm:$0xff]  }
  0xe5   : > { %2589 = vmatprep.subr.bf16.mxu1 %v3714_v45  ;;  %v3785_v42 = vld [vmem:[%s4794_s3 + $0x458] ss:$12 sps:$4 sm:$0xff]  }
  0xe6   : > { %2665 = vmatmul.mubr.bf16.vlgmr.msra.gmra.mrb[4].mxu0 %v4370_v43  ;;  %v3724_v43 = vld [vmem:[%s4794_s3 + $0x334] ss:$12 sps:$4 sm:$0xff]  }
  0xe7   : > { %2579 = vmatmul.mubr.bf16.vlgmr.msra.gmra.mrb[12].mxu1 %v4566_v44  ;;  %3325 = vmatpush3.bf16.msra.mxu0 %v3716_v47  ;;  %v3786_v47 = vld [vmem:[%s4794_s3 + $0x398] ss:$12 sps:$4 sm:$0xff]  }
  0xe8   : > { %2590 = vmatpush1.bf16.msra.mxu1 %v3712_v46  ;;  %3326 = vmatprep.subr.bf16.mxu0 %v3720_v48 }
  0xe9   : > { %2591 = vmatprep.subr.bf16.mxu1 %v3719_v49  ;;  %2705 = vmatprep.mubr.bf16.mxu0 %v4428_v62  ;;  %v3736_v62 = vld [vmem:[%s4794_s3 + $0x1e8] ss:$12 sps:$4 sm:$0xff]  }
  0xea   : > { %2621 = vmatprep.mubr.bf16.mxu1 %v4599_v53 }
  0xeb   : > { %3327 = vmatpush3.bf16.msra.mxu0 %v3721_v51  ;;  %v3790_v51 = vld [vmem:[%s4794_s3 + $0x470] ss:$12 sps:$4 sm:$0xff]  }
  0xec   : > { %2592 = vmatpush1.bf16.msra.mxu1 %v3717_v50  ;;  %3328 = vmatprep.subr.bf16.mxu0 %v3725_v52  ;;  %v3782_v50 = vld [vmem:[%s4794_s3 + $0x450] ss:$12 sps:$4 sm:$0xff]  }
  0xed   : > { %2593 = vmatprep.subr.bf16.mxu1 %v3724_v43  ;;  %v3789_v43 = vld [vmem:[%s4794_s3 + $0x46c] ss:$12 sps:$4 sm:$0xff]  }
  0xef   : > { %3329 = vmatpush3.bf16.msra.mxu0 %v3726_v54 }
  0xf0   : > { %2594 = vmatpush1.bf16.msra.mxu1 %v3722_v55  ;;  %3330 = vmatprep.subr.bf16.mxu0 %v3730_v56  ;;  %v3791_v55 = vld [vmem:[%s4794_s3 + $0x3b0] ss:$12 sps:$4 sm:$0xff]  }
  0xf1   : > { %2595 = vmatprep.subr.bf16.mxu1 %v3729_v57  ;;  %v3787_v57 = vld [vmem:[%s4794_s3 + $0x468] ss:$12 sps:$4 sm:$0xff]  }
  0xf3   : > { %3331 = vmatpush3.bf16.msra.mxu0 %v3731_v58  ;;  %v3792_v58 = vld [vmem:[%s4262_s14 + $0x10] ss:$24 sps:$4 sm:$0xff]  }
  0xf4   : > { %2596 = vmatpush1.bf16.msra.mxu1 %v3727_v59  ;;  %3332 = vmatprep.subr.bf16.mxu0 %v3735_v60 }
  0xf5   : > { %2597 = vmatprep.subr.bf16.mxu1 %v3734_v61 }
  0xf7   : > { %3333 = vmatpush3.bf16.msra.mxu0 %v3736_v62 }
  0xf8   : > { %2598 = vmatpush1.bf16.msra.mxu1 %v3732_v63  ;;  %3334 = vmatprep.subr.bf16.mxu0 %v3740_v0 }
  0xf9   : > { %2599 = vmatprep.subr.bf16.mxu1 %v3739_v1  ;;  %v3252_v7 = vpop.f32.mrb[0].mxu1 }
  0xfa   : > { %v3253_v8 = vpop.f32.mrb[1].mxu1 }
  0xfb   : > { %3335 = vmatpush3.bf16.msra.mxu0 %v3741_v2  ;;  %v4653_v10 = vadd.f32 %v3253_v8, %v3252_v7  ;;  %v3255_v11 = vpop.f32.mrb[2].mxu1  ;;  %v2755_v8 = vld [vmem:[%s4795_s4] sm:$0x3f] }
  0xfc   : > { %2600 = vmatpush1.bf16.msra.mxu1 %v3737_v3  ;;  %3336 = vmatprep.subr.bf16.mxu0 %v3745_v4  ;;  %v3256_v15 = vpop.f32.mrb[3].mxu1  ;;  %v2757_v3 = vlaneseq }
  0xfd   : > { %2601 = vmatprep.subr.bf16.mxu1 %v3744_v6  ;;  %v4664_v5 = vadd.f32 %v3256_v15, %v3255_v11 }
  0xfe   : > { %v2758_v4 = vshrl.u32 %v2757_v3, 7 }
  0xff   : > { %3337 = vmatpush3.bf16.msra.mxu0 %v3746_v9 }
 0x100   : > { %2602 = vmatpush1.bf16.msra.mxu1 %v3742_v13  ;;  %3338 = vmatprep.subr.bf16.mxu0 %v3750_v14  ;;  %v2759_v6 = vsub.s32 0, %v2758_v4  ;;  %v2763_v7 = vsub.s32 1, %v2758_v4 }
 0x101   : > { %2603 = vmatprep.subr.bf16.mxu1 %v3749_v16 }
 0x102   : > { %v2760_v9 = vrot.slane %v2755_v8, %v2759_v6 }
 0x103   : > { %3339 = vmatpush3.bf16.msra.mxu0 %v3751_v17 }
 0x104   : > { %2604 = vmatpush1.bf16.msra.mxu1 %v3747_v18  ;;  %3346 = vmatprep.subr.bf16.mxu0 %v3755_v19 }
 0x105   : > { %2605 = vmatprep.subr.bf16.mxu1 %v3754_v39 }
 0x106   : > { %2706 = vmatmul.mubr.bf16.vlgmr.msra.gmra.mrb[8].mxu0 %v4566_v44  ;;  %v3784_v44 = vld [vmem:[%s4794_s3 + $0x454] ss:$12 sps:$4 sm:$0xff]  }
 0x107   : > { %3347 = vmatpush3.bf16.msra.mxu0 %v3756_v20  ;;  %2746 = vmatprep.mubr.bf16.mxu0 %v4599_v53 }
 0x108   : > { %2606 = vmatpush1.bf16.msra.mxu1 %v3752_v12  ;;  %3348 = vmatprep.subr.bf16.mxu0 %v3760_v21 }
 0x109   : > { %2607 = vmatprep.subr.bf16.mxu1 %v3759_v22 }
 0x10b   : > { %3349 = vmatpush3.bf16.msra.mxu0 %v3761_v23 }
 0x10c   : > { %2608 = vmatpush1.bf16.msra.mxu1 %v3757_v24  ;;  %3350 = vmatprep.subr.bf16.mxu0 %v3765_v25 }
 0x10d   : > { %2609 = vmatprep.subr.bf16.mxu1 %v3764_v26 }
 0x10f   : > { %3351 = vmatpush3.bf16.msra.mxu0 %v3766_v27 }
 0x110   : > { %2610 = vmatpush1.bf16.msra.mxu1 %v3762_v28  ;;  %3352 = vmatprep.subr.bf16.mxu0 %v3770_v29 }
 0x111   : > { %2611 = vmatprep.subr.bf16.mxu1 %v3769_v30 }
 0x113   : > { %3353 = vmatpush3.bf16.msra.mxu0 %v3771_v31 }
 0x114   : > { %2612 = vmatpush1.bf16.msra.mxu1 %v3767_v32  ;;  %3354 = vmatprep.subr.bf16.mxu0 %v3775_v33  ;;  %v2767_v33 = vsub.s32 2, %v2758_v4 }
 0x115   : > { %2613 = vmatprep.subr.bf16.mxu1 %v3774_v34  ;;  %v2771_v34 = vsub.s32 3, %v2758_v4 }
 0x117   : > { %3355 = vmatpush3.bf16.msra.mxu0 %v3776_v35  ;;  %v2768_v35 = vrot.slane %v2755_v8, %v2767_v33 }
 0x118   : > { %2614 = vmatpush1.bf16.msra.mxu1 %v3772_v36  ;;  %3356 = vmatprep.subr.bf16.mxu0 %v3780_v37  ;;  %v2772_v36 = vrot.slane %v2755_v8, %v2771_v34  ;;  %v2775_v37 = vsub.s32 4, %v2758_v4 }
 0x119   : > { %2615 = vmatprep.subr.bf16.mxu1 %v3779_v38  ;;  %v3274_v45 = vpop.f32.mrb[4].mxu1  ;;  %v2779_v38 = vsub.s32 5, %v2758_v4 }
 0x11a   : > { %v3275_v46 = vpop.f32.mrb[5].mxu1 }
 0x11b   : > { %3357 = vmatpush3.bf16.msra.mxu0 %v3781_v40  ;;  %v3276_v48 = vadd.f32 %v3275_v46, %v3274_v45  ;;  %v3277_v49 = vpop.f32.mrb[6].mxu1 }
 0x11c   : > { %2616 = vmatpush1.bf16.msra.mxu1 %v3777_v41  ;;  %3358 = vmatprep.subr.bf16.mxu0 %v3785_v42  ;;  %v3278_v52 = vpop.f32.mrb[7].mxu1 }
 0x11d   : > { %2617 = vmatprep.subr.bf16.mxu1 %v3784_v44  ;;  %v1460_v53 = vadd.f32 %v3276_v48, %v4653_v10  ;;  %v3279_v54 = vadd.f32 %v3278_v52, %v3277_v49  ;;  %v2764_v10 = vrot.slane %v2755_v8, %v2763_v7  ;;  %v2780_v49 = vrot.slane %v2755_v8, %v2779_v38 }
 0x11f   : > { %3359 = vmatpush3.bf16.msra.mxu0 %v3786_v47  ;;  %v1463_v56 = vadd.f32 %v3279_v54, %v4664_v5  ;;  %v2776_v47 = vrot.slane %v2755_v8, %v2775_v37 }
 0x120   : > { %2618 = vmatpush1.bf16.msra.mxu1 %v3782_v50  ;;  %3360 = vmatprep.subr.bf16.mxu0 %v3790_v51 }
 0x121   : > { %2619 = vmatprep.subr.bf16.mxu1 %v3789_v43 }
 0x123   : > { %3361 = vmatpush3.bf16.msra.mxu0 %v3791_v55 }
 0x124   : > { %2620 = vmatpush1.bf16.msra.mxu1 %v3787_v57 }
 0x126   : > { %2747 = vmatmul.mubr.bf16.vlgmr.msra.gmra.mrb[12].mxu0 %v3792_v58 }
 0x127   : > { %2622 = vmatmul.mubr.bf16.vlgmr.msra.gmra.mrb[12].mxu1 %v3792_v58 }
 0x139   : > { %v3296_v59 = vpop.f32.mrb[8].mxu1 }
 0x13a   : > { %v3297_v60 = vpop.f32.mrb[9].mxu1 }
 0x13b   : > { %v3298_v61 = vadd.f32 %v3297_v60, %v3296_v59  ;;  %v3299_v62 = vpop.f32.mrb[10].mxu1 }
 0x13c   : > { %v3300_v63 = vpop.f32.mrb[11].mxu1 }
 0x13d   : > { %v1501_v0 = vadd.f32 %v3298_v61, %v1460_v53  ;;  %v3301_v1 = vadd.f32 %v3300_v63, %v3299_v62 }
 0x13f   : > { %v1504_v2 = vadd.f32 %v3301_v1, %v1463_v56  ;;  %v2789_v42 = vadd.f32 %v2768_v35, %v1501_v0 }
 0x141   : > { %v2795_v52 = vadd.f32 %v2768_v35, %v1504_v2 }
 0x199   : > { %v1375_v11 = vpop.f32.mrb[0].mxu0 }
 0x19a   : > { %v2787_v13 = vadd.f32 %v2760_v9, %v1375_v11  ;;  %v1377_v14 = vpop.f32.mrb[1].mxu0 }
 0x19b   : > { %v2788_v15 = vadd.f32 %v2764_v10, %v1377_v14  ;;  %v1379_v16 = vpop.f32.mrb[2].mxu0 }
 0x19c   : > { %v2793_v5 = vadd.f32 %v2760_v9, %v1379_v16  ;;  %v1381_v17 = vpop.f32.mrb[3].mxu0 }
 0x19d   : > { %v3230_v18 = vpack.c.bf16 %v2788_v15, %v2787_v13  ;;  %v2794_v19 = vadd.f32 %v2764_v10, %v1381_v17 }
 0x19f   : > { %2835 = vst [vmem:[%s4780_s27] sm:$0xff] %v3230_v18  ;;  %v3233_v39 = vpack.c.bf16 %v2794_v19, %v2793_v5 }
 0x1a1   : > { %2838 = vst [vmem:[%s4780_s27 + $0x18] sm:$0xff] %v3233_v39 }
 0x1b9   : > { %v3318_v20 = vpop.f32.mrb[4].mxu0 }
 0x1ba   : > { %v3319_v12 = vpop.f32.mrb[5].mxu0 }
 0x1bb   : > { %v3320_v21 = vadd.f32 %v3319_v12, %v3318_v20  ;;  %v3321_v22 = vpop.f32.mrb[6].mxu0 }
 0x1bc   : > { %v3322_v23 = vpop.f32.mrb[7].mxu0 }
 0x1bd   : > { %v3323_v24 = vadd.f32 %v3322_v23, %v3321_v22 }
 0x1d9   : > { %v3340_v25 = vpop.f32.mrb[8].mxu0 }
 0x1da   : > { %v3341_v26 = vpop.f32.mrb[9].mxu0 }
 0x1db   : > { %v3342_v27 = vadd.f32 %v3341_v26, %v3340_v25  ;;  %v3343_v28 = vpop.f32.mrb[10].mxu0 }
 0x1dc   : > { %v3344_v29 = vpop.f32.mrb[11].mxu0 }
 0x1dd   : > { %v2708_v30 = vadd.f32 %v3342_v27, %v3320_v21  ;;  %v3345_v31 = vadd.f32 %v3344_v29, %v3343_v28 }
 0x1df   : > { %v2711_v32 = vadd.f32 %v3345_v31, %v3323_v24 }
 0x1f9   : > { %v3362_v40 = vpop.f32.mrb[12].mxu0 }
 0x1fa   : > { %v2623_v41 = vpop.f32.mrb[12].mxu1  ;;  %v3363_v44 = vpop.f32.mrb[13].mxu0 }
 0x1fb   : > { %v2790_v45 = vadd.f32 %v2772_v36, %v2623_v41  ;;  %v2625_v46 = vpop.f32.mrb[13].mxu1  ;;  %v3364_v48 = vadd.f32 %v3363_v44, %v3362_v40  ;;  %v3365_v50 = vpop.f32.mrb[14].mxu0 }
 0x1fc   : > { %v2627_v51 = vpop.f32.mrb[14].mxu1  ;;  %v3366_v43 = vpop.f32.mrb[15].mxu0  ;;  %v2791_v58 = vadd.f32 %v2776_v47, %v2625_v46 }
 0x1fd   : > { %v3231_v53 = vpack.c.bf16 %v2790_v45, %v2789_v42  ;;  %v2749_v54 = vadd.f32 %v3364_v48, %v2708_v30  ;;  %v2796_v55 = vadd.f32 %v2772_v36, %v2627_v51  ;;  %v2629_v56 = vpop.f32.mrb[15].mxu1  ;;  %v3367_v57 = vadd.f32 %v3366_v43, %v3365_v50 }
 0x1fe   : > { %v2797_v63 = vadd.f32 %v2776_v47, %v2629_v56 }
 0x1ff   : > { %2836 = vst [vmem:[%s4780_s27 + $0x8] sm:$0xff] %v3231_v53  ;;  %v2792_v59 = vadd.f32 %v2780_v49, %v2749_v54  ;;  %v3234_v60 = vpack.c.bf16 %v2796_v55, %v2795_v52  ;;  %v2752_v61 = vadd.f32 %v3367_v57, %v2711_v32 }
 0x201   : > { %v3232_v62 = vpack.c.bf16 %v2792_v59, %v2791_v58  ;;  %2839 = vst [vmem:[%s4780_s27 + $0x20] sm:$0xff] %v3234_v60  ;;  %v2798_v0 = vadd.f32 %v2780_v49, %v2752_v61 }
 0x203   : > { %2837 = vst [vmem:[%s4780_s27 + $0x10] sm:$0xff] %v3232_v62  ;;  %v3235_v1 = vpack.c.bf16 %v2798_v0, %v2797_v63 }
 0x205   : > { %2840 = vst [vmem:[%s4780_s27 + $0x28] sm:$0xff] %v3235_v1 }
 0x206 PF: > { %s15_s18 = sadd.s32 1, %s3801_s18  }
 0x207   : > { %p12_p4 = scmp.ge.s32.totalorder %s15_s18, 4  }
 0x209   :  { %14 = sbr.rel (!%p12_p4) target bundleno = 1 (0x1), region = 73 }

// kernel: image_depth_net2_forward.11
= control target key start
LH: loop header
LB: loop body
LE: loop exit
PB: predicated region body
PF: predicated region fallthrough
CT: control target
= control target key end

     0   :  { %10 = vsyncpa [#allocation3], 0  ;;  %s3960_s0 = inlined_call_operand.vmem [shape: bf16[32,768], index: 0, kind: input, shape index: {}]   ;;  %s3961_s1 = inlined_call_operand.vmem [shape: bf16[768,384], index: 1, kind: input, shape index: {}]   ;;  %s3962_s2 = inlined_call_operand.vmem [shape: f32[1,384], index: 2, kind: input, shape index: {}]   ;;  %s3963_s3 = inlined_call_operand.vmem [shape: bf16[384,384], index: 3, kind: input, shape index: {}]   ;;  %s3964_s4 = inlined_call_operand.vmem [shape: f32[1,384], index: 4, kind: input, shape index: {}]   ;;  %s3965_s5 = inlined_call_operand.hbm [shape: bf16[32,384], index: 5, kind: output, shape index: {}]  }
   0x1   :  { %12 = vsyncpa [#allocation3 + $0x1], 0  ;;  %s3152_s18 = smov 0   ;;  %s3154_s19 = smov 0  }
   0x2   :  { %s3156_s20 = smov 0   ;;  %s3158_s21 = smov 0  }
   0x3 LB: > { %s3173_s22 = sadd.s32 4294967295, %s3114_s21   ;;  %s2318_s23 = sadd.s32 4294967294, %s3114_s21   ;;  %s3114_s21 = sphi %s3158_s21, %s3972_s21   ;;  %s3110_s20 = sphi %s3156_s20, %s3971_s20   ;;  %s3106_s19 = sphi %s3154_s19, %s3970_s19   ;;  %s3102_s18 = sphi %s3152_s18, %s3969_s18  }
   0x4   : > { %s3177_s24 = sadd.s32 1, %s3114_s21   ;;  %s135_s25 = sadd.s32 1, %s3110_s20 }
   0x5   : > { %s132_s26 = ssub.s32 %s3114_s21, %s3177_s24  ;;  %p145_p0 = scmp.ne.s32.totalorder %s3110_s20, %s3106_s19 }
   0x6   : > { %p133_p1 = scmp.eq.s32.totalorder %s132_s26, 0  ;;  %p146_p2 = scmp.eq.s32.totalorder %s3173_s22, 1 }
   0x7   : > { %p151_p3 = scmp.ne.s32.totalorder %s3106_s19, %s3102_s18  ;;  %p152_p4 = scmp.eq.s32.totalorder %s2318_s23, 1 }
   0x8   : > { %s3188_s27 = scalar_select %p133_p1, %s3110_s20, %s135_s25  }
   0x9   : > { %p3190_p5 = por %p146_p2, %p145_p0  ;;  %p3194_p6 = por %p152_p4, %p151_p3 }
   0xa   : > { %p2321_p7 = scmp.ge.s32.totalorder %s3114_s21, 1  ;;  %p192_p8 = scmp.lt.s32.totalorder %s3114_s21, 3 }
   0xc   : > { %p193_p9 = pnand %p2321_p7, %p192_p8 }
   0xd   : > { %v2743_v0 = vld [vmem:[%s3961_s1 + $0x4] ss:$12 sps:$4 sm:$0xff] (!%p193_p9)   ;;  %v2745_v1 = vld [vmem:[%s3961_s1] ss:$12 sps:$4 sm:$0xff] (!%p193_p9)   ;;  %v2746_v2 = vld [vmem:[%s3961_s1 + $0x1c] ss:$12 sps:$4 sm:$0xff] (!%p193_p9)  }
   0xe   : > { %196 = sbr.rel (%p193_p9) target bundleno = 750 (0x2ee), region = 40  ;;  %1243 = vmatprep.subr.bf16.mxu0 (!%p193_p9), %v2743_v0  ;;  %v2748_v3 = vld [vmem:[%s3961_s1 + $0x18] ss:$12 sps:$4 sm:$0xff] (!%p193_p9)   ;;  %v2749_v4 = vld [vmem:[%s3961_s1 + $0x34] ss:$12 sps:$4 sm:$0xff] (!%p193_p9)   ;;  %s2322_s7 = sshll.u32 (!%p193_p9), %s3173_s22, 1 }
   0xf   : > { %1244 = vmatpush1.bf16.msra.mxu0 (!%p193_p9), %v2745_v1  ;;  %v2751_v5 = vld [vmem:[%s3961_s1 + $0x30] ss:$12 sps:$4 sm:$0xff] (!%p193_p9)   ;;  %v2752_v6 = vld [vmem:[%s3961_s1 + $0x4c] ss:$12 sps:$4 sm:$0xff] (!%p193_p9)   ;;  %v2754_v7 = vld [vmem:[%s3961_s1 + $0x48] ss:$12 sps:$4 sm:$0xff] (!%p193_p9)  }
  0x10   : > { %1245 = vmatprep.subr.bf16.mxu0 (!%p193_p9), %v2746_v2  ;;  %v2755_v8 = vld [vmem:[%s3961_s1 + $0x64] ss:$12 sps:$4 sm:$0xff] (!%p193_p9)   ;;  %v2757_v9 = vld [vmem:[%s3961_s1 + $0x60] ss:$12 sps:$4 sm:$0xff] (!%p193_p9)   ;;  %v2758_v10 = vld [vmem:[%s3961_s1 + $0x7c] ss:$12 sps:$4 sm:$0xff] (!%p193_p9)  }
  0x11   : > { %v2775_v11 = vld [vmem:[%s3961_s1 + $0xc8] ss:$12 sps:$4 sm:$0xff] (!%p193_p9)   ;;  %p3240_p10 = scmp.lt.s32.totalorder (!%p193_p9), %s2322_s7, 3  ;;  %v2760_v13 = vld [vmem:[%s3961_s1 + $0x78] ss:$12 sps:$4 sm:$0xff] (!%p193_p9)   ;;  %vm3118_vm0 = vmmov (!%p193_p9), 0  }
  0x12   : > { %v2777_v12 = vld [vmem:[%s3961_s1 + $0x8] ss:$12 sps:$4 sm:$0xff] (!%p193_p9)   ;;  %2559 = vmatprep.subr.bf16.mxu1 (!%p193_p9), %v2775_v11  ;;  %v2780_v14 = vld [vmem:[%s3961_s1 + $0xe0] ss:$12 sps:$4 sm:$0xff] (!%p193_p9)   ;;  %v2785_v17 = vld [vmem:[%s3961_s1 + $0xf8] ss:$12 sps:$4 sm:$0xff] (!%p193_p9)  }
  0x13   : > { %1246 = vmatpush1.bf16.msra.mxu0 (!%p193_p9), %v2748_v3  ;;  %2560 = vmatpush3.bf16.msra.mxu1 (!%p193_p9), %v2777_v12  ;;  %v2782_v15 = vld [vmem:[%s3961_s1 + $0x20] ss:$12 sps:$4 sm:$0xff] (!%p193_p9)   ;;  %v2763_v18 = vld [vmem:[%s3961_s1 + $0x90] ss:$12 sps:$4 sm:$0xff] (!%p193_p9)   ;;  %v2787_v19 = vld [vmem:[%s3961_s1 + $0x38] ss:$12 sps:$4 sm:$0xff] (!%p193_p9)  }
  0x14   : > { %1247 = vmatprep.subr.bf16.mxu0 (!%p193_p9), %v2749_v4  ;;  %v2761_v16 = vld [vmem:[%s3961_s1 + $0x94] ss:$12 sps:$4 sm:$0xff] (!%p193_p9)   ;;  %2561 = vmatprep.subr.bf16.mxu1 (!%p193_p9), %v2780_v14  ;;  %v2764_v20 = vld [vmem:[%s3961_s1 + $0xac] ss:$12 sps:$4 sm:$0xff] (!%p193_p9)   ;;  %v2790_v21 = vld [vmem:[%s3961_s1 + $0x110] ss:$12 sps:$4 sm:$0xff] (!%p193_p9)  }
  0x15   : > { %s3974_s7 = smov (!%p3240_p10, %s2322_s7), 3  ;;  %v2792_v22 = vld [vmem:[%s3961_s1 + $0x50] ss:$12 sps:$4 sm:$0xff]   ;;  %v2766_v23 = vld [vmem:[%s3961_s1 + $0xa8] ss:$12 sps:$4 sm:$0xff]   ;;  %s218_s12 = sand.u32 1, %s3106_s19  }
  0x16   : > { %s2697_s16 = smul.u32 24, %s3974_s7  ;;  %v2767_v24 = vld [vmem:[%s3961_s1 + $0xc4] ss:$12 sps:$4 sm:$0xff]   ;;  %v2795_v25 = vld [vmem:[%s3961_s1 + $0x128] ss:$12 sps:$4 sm:$0xff]   ;;  %s3119_s25 = smov [#allocation2]  }
  0x17   : > { %1248 = vmatpush1.bf16.msra.mxu0 %v2751_v5  ;;  %2562 = vmatpush3.bf16.msra.mxu1 %v2782_v15  ;;  %v2769_v26 = vld [vmem:[%s3961_s1 + $0xc0] ss:$12 sps:$4 sm:$0xff]   ;;  %v2797_v27 = vld [vmem:[%s3961_s1 + $0x68] ss:$12 sps:$4 sm:$0xff]   ;;  %v2772_v32 = vld [vmem:[%s3961_s1 + $0xd8] ss:$12 sps:$4 sm:$0xff]  }
  0x18   : > { %1249 = vmatprep.subr.bf16.mxu0 %v2752_v6  ;;  %2563 = vmatprep.subr.bf16.mxu1 %v2785_v17  ;;  %v2800_v28 = vld [vmem:[%s3961_s1 + $0x140] ss:$12 sps:$4 sm:$0xff]   ;;  %s3297_s6 = scalar_lea.vmem %s3960_s0, %s2697_s16  ;;  %v2770_v29 = vld [vmem:[%s3961_s1 + $0xdc] ss:$12 sps:$4 sm:$0xff]   ;;  %v2809_v34 = vld [vmem:[%s3961_s1 + $0x158] ss:$12 sps:$4 sm:$0xff]  }
  0x19   : > { %v2802_v30 = vld [vmem:[%s3961_s1 + $0x80] ss:$12 sps:$4 sm:$0xff]   ;;  %v2805_v31 = vld [vmem:[%s3297_s6 + $0x4] ss:$24 sps:$4 sm:$0xff]   ;;  %v2781_v39 = vld [vmem:[%s3961_s1 + $0x108] ss:$12 sps:$4 sm:$0xff]  }
  0x1a   : > { %v2773_v33 = vld [vmem:[%s3961_s1 + $0xf4] ss:$12 sps:$4 sm:$0xff]   ;;  %1275 = vmatprep.mubr.bf16.mxu0 %v2805_v31  ;;  %v2776_v35 = vld [vmem:[%s3961_s1 + $0xf0] ss:$12 sps:$4 sm:$0xff]   ;;  %1404 = vmatprep.mubr.bf16.mxu1 %v2805_v31  ;;  %v2810_v36 = vld [vmem:[%s3961_s1 + $0x98] ss:$12 sps:$4 sm:$0xff]  }
  0x1b   : > { %1250 = vmatpush1.bf16.msra.mxu0 %v2754_v7  ;;  %2564 = vmatpush3.bf16.msra.mxu1 %v2787_v19  ;;  %v2778_v37 = vld [vmem:[%s3961_s1 + $0x10c] ss:$12 sps:$4 sm:$0xff]   ;;  %v2814_v38 = vld [vmem:[%s3961_s1 + $0x170] ss:$12 sps:$4 sm:$0xff]   ;;  %v2819_v41 = vld [vmem:[%s3961_s1 + $0x248] ss:$12 sps:$4 sm:$0xff]  }
  0x1c   : > { %1251 = vmatprep.subr.bf16.mxu0 %v2755_v8  ;;  %2565 = vmatprep.subr.bf16.mxu1 %v2790_v21  ;;  %v2815_v40 = vld [vmem:[%s3961_s1 + $0xb0] ss:$12 sps:$4 sm:$0xff]   ;;  %v2786_v43 = vld [vmem:[%s3961_s1 + $0x120] ss:$12 sps:$4 sm:$0xff]   ;;  %v2820_v45 = vld [vmem:[%s3961_s1 + $0x188] ss:$12 sps:$4 sm:$0xff]  }
  0x1d   : > { %v2783_v42 = vld [vmem:[%s3961_s1 + $0x124] ss:$12 sps:$4 sm:$0xff]   ;;  %v2803_v44 = vld [vmem:[%s3297_s6] ss:$24 sps:$4 sm:$0xff]   ;;  %v2788_v47 = vld [vmem:[%s3961_s1 + $0x13c] ss:$12 sps:$4 sm:$0xff]  }
  0x1e   : > { %v2824_v46 = vld [vmem:[%s3961_s1 + $0x260] ss:$12 sps:$4 sm:$0xff]   ;;  %v2791_v48 = vld [vmem:[%s3961_s1 + $0x138] ss:$12 sps:$4 sm:$0xff]   ;;  %v2796_v53 = vld [vmem:[%s3961_s1 + $0x150] ss:$12 sps:$4 sm:$0xff]  }
  0x1f   : > { %1252 = vmatpush1.bf16.msra.mxu0 %v2757_v9  ;;  %2566 = vmatpush3.bf16.msra.mxu1 %v2792_v22  ;;  %v2825_v49 = vld [vmem:[%s3961_s1 + $0x1a0] ss:$12 sps:$4 sm:$0xff]   ;;  %v2829_v50 = vld [vmem:[%s3961_s1 + $0x278] ss:$12 sps:$4 sm:$0xff]   ;;  %v2834_v54 = vld [vmem:[%s3961_s1 + $0x290] ss:$12 sps:$4 sm:$0xff]  }
  0x20   : > { %1253 = vmatprep.subr.bf16.mxu0 %v2758_v10  ;;  %2567 = vmatprep.subr.bf16.mxu1 %v2795_v25  ;;  %v2793_v51 = vld [vmem:[%s3961_s1 + $0x154] ss:$12 sps:$4 sm:$0xff]   ;;  %v2830_v52 = vld [vmem:[%s3961_s1 + $0x1b8] ss:$12 sps:$4 sm:$0xff]   ;;  %v2835_v57 = vld [vmem:[%s3961_s1 + $0x1d0] ss:$12 sps:$4 sm:$0xff]  }
  0x21   : > { %v2798_v55 = vld [vmem:[%s3961_s1 + $0x16c] ss:$12 sps:$4 sm:$0xff]   ;;  %v2801_v56 = vld [vmem:[%s3961_s1 + $0x168] ss:$12 sps:$4 sm:$0xff]   ;;  %v2808_v59 = vld [vmem:[%s3961_s1 + $0x184] ss:$12 sps:$4 sm:$0xff]  }
  0x22   : > { %v2839_v58 = vld [vmem:[%s3961_s1 + $0x2a8] ss:$12 sps:$4 sm:$0xff]   ;;  %v2806_v60 = vld [vmem:[%s3961_s1 + $0x180] ss:$12 sps:$4 sm:$0xff]   ;;  %v2811_v0 = vld [vmem:[%s3961_s1 + $0x198] ss:$12 sps:$4 sm:$0xff]  }
  0x23   : > { %1254 = vmatpush1.bf16.msra.mxu0 %v2760_v13  ;;  %2568 = vmatpush3.bf16.msra.mxu1 %v2797_v27  ;;  %v2840_v61 = vld [vmem:[%s3961_s1 + $0x1e8] ss:$12 sps:$4 sm:$0xff]   ;;  %v2844_v62 = vld [vmem:[%s3961_s1 + $0x2c0] ss:$12 sps:$4 sm:$0xff]   ;;  %v2849_v2 = vld [vmem:[%s3961_s1 + $0x2d8] ss:$12 sps:$4 sm:$0xff]  }
  0x24   : > { %1255 = vmatprep.subr.bf16.mxu0 %v2761_v16  ;;  %2569 = vmatprep.subr.bf16.mxu1 %v2800_v28  ;;  %v2813_v63 = vld [vmem:[%s3961_s1 + $0x19c] ss:$12 sps:$4 sm:$0xff]   ;;  %v2845_v1 = vld [vmem:[%s3961_s1 + $0x200] ss:$12 sps:$4 sm:$0xff]   ;;  %v2850_v5 = vld [vmem:[%s3961_s1 + $0x218] ss:$12 sps:$4 sm:$0xff]  }
  0x25   : > { %v2818_v3 = vld [vmem:[%s3961_s1 + $0x1b4] ss:$12 sps:$4 sm:$0xff]   ;;  %v2816_v4 = vld [vmem:[%s3961_s1 + $0x1b0] ss:$12 sps:$4 sm:$0xff]   ;;  %v2861_v6 = vld [vmem:[%s3297_s6 + $0xc] ss:$24 sps:$4 sm:$0xff]  }
  0x26   : > { %v2854_v7 = vld [vmem:[%s3961_s1 + $0x2f0] ss:$12 sps:$4 sm:$0xff]   ;;  %v2823_v8 = vld [vmem:[%s3961_s1 + $0x1cc] ss:$12 sps:$4 sm:$0xff]   ;;  %v2821_v9 = vld [vmem:[%s3961_s1 + $0x1c8] ss:$12 sps:$4 sm:$0xff]  }
  0x27   : > { %1256 = vmatpush1.bf16.msra.mxu0 %v2763_v18  ;;  %2570 = vmatpush3.bf16.msra.mxu1 %v2802_v30  ;;  %v2855_v10 = vld [vmem:[%s3961_s1 + $0x230] ss:$12 sps:$4 sm:$0xff]   ;;  %v2862_v11 = vld [vmem:[%s3961_s1 + $0x3c8] ss:$12 sps:$4 sm:$0xff]   ;;  %v2826_v13 = vld [vmem:[%s3961_s1 + $0x1e0] ss:$12 sps:$4 sm:$0xff]  }
  0x28   : > { %1257 = vmatprep.subr.bf16.mxu0 %v2764_v20  ;;  %2571 = vmatprep.subr.bf16.mxu1 %v2809_v34  ;;  %v2828_v12 = vld [vmem:[%s3961_s1 + $0x1e4] ss:$12 sps:$4 sm:$0xff]   ;;  %v3441_v14 = vld [vmem:[%s3297_s6 + $0x8] ss:$24 sps:$4 sm:$0xff]   ;;  %v2843_v25 = vld [vmem:[%s3961_s1 + $0x22c] ss:$12 sps:$4 sm:$0xff]  }
  0x29   : > { %v2863_v15 = vld [vmem:[%s3961_s1 + $0x308] ss:$12 sps:$4 sm:$0xff]   ;;  %v2867_v16 = vld [vmem:[%s3961_s1 + $0x3e0] ss:$12 sps:$4 sm:$0xff]   ;;  %v2831_v19 = vld [vmem:[%s3961_s1 + $0x1f8] ss:$12 sps:$4 sm:$0xff]  }
  0x2a   : > { %v2833_v17 = vld [vmem:[%s3961_s1 + $0x1fc] ss:$12 sps:$4 sm:$0xff]   ;;  %v2868_v18 = vld [vmem:[%s3961_s1 + $0x320] ss:$12 sps:$4 sm:$0xff]   ;;  %v2872_v20 = vld [vmem:[%s3961_s1 + $0x3f8] ss:$12 sps:$4 sm:$0xff]  }
  0x2b   : > { %1258 = vmatpush1.bf16.msra.mxu0 %v2766_v23  ;;  %2572 = vmatpush3.bf16.msra.mxu1 %v2810_v36  ;;  %v2838_v21 = vld [vmem:[%s3961_s1 + $0x214] ss:$12 sps:$4 sm:$0xff]   ;;  %v2836_v22 = vld [vmem:[%s3961_s1 + $0x210] ss:$12 sps:$4 sm:$0xff]   ;;  %v2873_v23 = vld [vmem:[%s3961_s1 + $0x338] ss:$12 sps:$4 sm:$0xff]  }
  0x2c   : > { %1259 = vmatprep.subr.bf16.mxu0 %v2767_v24  ;;  %2573 = vmatprep.subr.bf16.mxu1 %v2814_v38  ;;  %v2877_v24 = vld [vmem:[%s3961_s1 + $0x410] ss:$12 sps:$4 sm:$0xff]   ;;  %v2882_v28 = vld [vmem:[%s3961_s1 + $0x428] ss:$12 sps:$4 sm:$0xff]   ;;  %v2846_v30 = vld [vmem:[%s3961_s1 + $0x240] ss:$12 sps:$4 sm:$0xff]  }
  0x2d   : > { %v2878_v27 = vld [vmem:[%s3961_s1 + $0x350] ss:$12 sps:$4 sm:$0xff]   ;;  %v2883_v31 = vld [vmem:[%s3961_s1 + $0x368] ss:$12 sps:$4 sm:$0xff]   ;;  %v2851_v36 = vld [vmem:[%s3961_s1 + $0x258] ss:$12 sps:$4 sm:$0xff]  }
  0x2e   : > { %v2901_v34 = vld [vmem:[%s3297_s6 + $0x14] ss:$24 sps:$4 sm:$0xff]   ;;  %s2696_s13 = smul.u32 24, %s218_s12  ;;  %s3056_s26 = sshll.u32 %s3119_s25, 4  ;;  %s3057_s26 = int_to_ptr.vmem [resolvable:$false] %s3056_s26 }
  0x2f   : > { %1260 = vmatpush1.bf16.msra.mxu0 %v2769_v26  ;;  %2574 = vmatpush3.bf16.msra.mxu1 %v2815_v40  ;;  %v2841_v26 = vld [vmem:[%s3961_s1 + $0x228] ss:$12 sps:$4 sm:$0xff]   ;;  %v2856_v40 = vld [vmem:[%s3961_s1 + $0x270] ss:$12 sps:$4 sm:$0xff]   ;;  %s2698_s16 = smul.u32 384, %s3173_s22  ;;  %s3919_s22 = scalar_lea.sflag [#allocation3], %s218_s12 }
  0x30   : > { %1261 = vmatprep.subr.bf16.mxu0 %v2770_v29  ;;  %2581 = vmatprep.subr.bf16.mxu1 %v2819_v41  ;;  %v2848_v29 = vld [vmem:[%s3961_s1 + $0x244] ss:$12 sps:$4 sm:$0xff]   ;;  %v2858_v38 = vld [vmem:[%s3961_s1 + $0x274] ss:$12 sps:$4 sm:$0xff]   ;;  %s220_s14 = scalar_lea.vmem [#allocation2], %s2696_s13  ;;  %s3058_s30 = scalar_lea.vmem %s3057_s26, 768 }
  0x31   : > { %v2897_v41 = vld [vmem:[%s3961_s1 + $0x470] ss:$12 sps:$4 sm:$0xff]   ;;  %s3915_s23 = scalar_lea.hbm %s3965_s5, %s2698_s16 }
  0x32   : > { %1405 = vmatmul.mubr.bf16.vlgmr.msra.gmra.mrb[0].mxu1 %v2803_v44 }
  0x33   : > { %1262 = vmatpush1.bf16.msra.mxu0 %v2772_v32  ;;  %2582 = vmatpush3.bf16.msra.mxu1 %v2820_v45  ;;  %v2887_v32 = vld [vmem:[%s3961_s1 + $0x440] ss:$12 sps:$4 sm:$0xff]   ;;  %v2871_v45 = vld [vmem:[%s3961_s1 + $0x2a4] ss:$12 sps:$4 sm:$0xff]  }
  0x34   : > { %1263 = vmatprep.subr.bf16.mxu0 %v2773_v33  ;;  %2583 = vmatprep.subr.bf16.mxu1 %v2824_v46  ;;  %v2853_v33 = vld [vmem:[%s3961_s1 + $0x25c] ss:$12 sps:$4 sm:$0xff]  }
  0x35   : > { %1445 = vmatprep.mubr.bf16.mxu1 %v2861_v6  ;;  %v3536_v46 = vld [vmem:[%s3297_s6 + $0x10] ss:$24 sps:$4 sm:$0xff]   ;;  %s2256_s6 = sshll.u32 %s220_s14, 4  ;;  %s3910_s6 = int_to_ptr.vmem [resolvable:$true] %s2256_s6 }
  0x36   : > { %s3052_s7 = scalar_lea.vmem %s3910_s6, 384  ;;  %p3059_p0 = scmp.lt.s32.totalorder %s3910_s6, %s3057_s26 }
  0x37   : > { %1264 = vmatpush1.bf16.msra.mxu0 %v2776_v35  ;;  %2584 = vmatpush3.bf16.msra.mxu1 %v2825_v49  ;;  %v2888_v35 = vld [vmem:[%s3961_s1 + $0x380] ss:$12 sps:$4 sm:$0xff]   ;;  %v2874_v49 = vld [vmem:[%s3961_s1 + $0x2b8] ss:$12 sps:$4 sm:$0xff]   ;;  %p3053_p11 = scmp.ne.s32.totalorder %s3910_s6, %s3052_s7  ;;  %p3060_p1 = scmp.lt.s32.totalorder %s3058_s30, %s3052_s7 }
  0x38   : > { %1265 = vmatprep.subr.bf16.mxu0 %v2778_v37  ;;  %2585 = vmatprep.subr.bf16.mxu1 %v2829_v50  ;;  %v2892_v37 = vld [vmem:[%s3961_s1 + $0x458] ss:$12 sps:$4 sm:$0xff]   ;;  %v2881_v50 = vld [vmem:[%s3961_s1 + $0x2d4] ss:$12 sps:$4 sm:$0xff]  }
  0x39   : > { %p3054_p12 = pnand %p3053_p11, %p3190_p5  ;;  %p3061_p2 = por %p3060_p1, %p3059_p0 }
  0x3b   : > { %1266 = vmatpush1.bf16.msra.mxu0 %v2781_v39  ;;  %2586 = vmatpush3.bf16.msra.mxu1 %v2830_v52  ;;  %v2893_v39 = vld [vmem:[%s3961_s1 + $0x398] ss:$12 sps:$4 sm:$0xff]   ;;  %p3055_p13 = pneg %p3054_p12 }
  0x3c   : > { %1267 = vmatprep.subr.bf16.mxu0 %v2783_v42  ;;  %2587 = vmatprep.subr.bf16.mxu1 %v2834_v54  ;;  %v2866_v42 = vld [vmem:[%s3961_s1 + $0x28c] ss:$12 sps:$4 sm:$0xff]   ;;  %v2891_v54 = vld [vmem:[%s3961_s1 + $0x304] ss:$12 sps:$4 sm:$0xff]  }
  0x3d   : > { %v2886_v52 = vld [vmem:[%s3961_s1 + $0x2ec] ss:$12 sps:$4 sm:$0xff]   ;;  %p3062_p3 = pnand %p3061_p2, %p3055_p13 }
  0x3f   : > { %1268 = vmatpush1.bf16.msra.mxu0 %v2786_v43  ;;  %2588 = vmatpush3.bf16.msra.mxu1 %v2835_v57  ;;  %v2898_v43 = vld [vmem:[%s3961_s1 + $0x3b0] ss:$12 sps:$4 sm:$0xff]   ;;  %v2894_v57 = vld [vmem:[%s3961_s1 + $0x318] ss:$12 sps:$4 sm:$0xff]  }
  0x40   : > { %1269 = vmatprep.subr.bf16.mxu0 %v2788_v47  ;;  %2589 = vmatprep.subr.bf16.mxu1 %v2839_v58  ;;  %v2869_v47 = vld [vmem:[%s3961_s1 + $0x2a0] ss:$12 sps:$4 sm:$0xff]  }
  0x41   : > { %v2904_v58 = vld [vmem:[%s3961_s1 + $0x334] ss:$12 sps:$4 sm:$0xff]  }
  0x43   : > { %1270 = vmatpush1.bf16.msra.mxu0 %v2791_v48  ;;  %2590 = vmatpush3.bf16.msra.mxu1 %v2840_v61  ;;  %v2876_v48 = vld [vmem:[%s3961_s1 + $0x2bc] ss:$12 sps:$4 sm:$0xff]  }
  0x44   : > { %1271 = vmatprep.subr.bf16.mxu0 %v2793_v51  ;;  %2591 = vmatprep.subr.bf16.mxu1 %v2844_v62  ;;  %v2879_v51 = vld [vmem:[%s3961_s1 + $0x2d0] ss:$12 sps:$4 sm:$0xff]   ;;  %v2905_v61 = vld [vmem:[%s3961_s1 + $0x348] ss:$12 sps:$4 sm:$0xff]  }
  0x45   : > { %v2910_v62 = vld [vmem:[%s3961_s1 + $0x364] ss:$12 sps:$4 sm:$0xff]  }
  0x47   : > { %1272 = vmatpush1.bf16.msra.mxu0 %v2796_v53  ;;  %2592 = vmatpush3.bf16.msra.mxu1 %v2845_v1  ;;  %v2884_v53 = vld [vmem:[%s3961_s1 + $0x2e8] ss:$12 sps:$4 sm:$0xff]   ;;  %v2911_v1 = vld [vmem:[%s3961_s1 + $0x378] ss:$12 sps:$4 sm:$0xff]  }
  0x48   : > { %1273 = vmatprep.subr.bf16.mxu0 %v2798_v55  ;;  %2593 = vmatprep.subr.bf16.mxu1 %v2849_v2  ;;  %v2889_v55 = vld [vmem:[%s3961_s1 + $0x300] ss:$12 sps:$4 sm:$0xff]  }
  0x49   : > { %v2916_v2 = vld [vmem:[%s3961_s1 + $0x394] ss:$12 sps:$4 sm:$0xff]  }
  0x4b   : > { %1274 = vmatpush1.bf16.msra.mxu0 %v2801_v56  ;;  %2594 = vmatpush3.bf16.msra.mxu1 %v2850_v5  ;;  %v2896_v56 = vld [vmem:[%s3961_s1 + $0x31c] ss:$12 sps:$4 sm:$0xff]  }
  0x4c   : > { %1286 = vmatprep.subr.bf16.mxu0 %v2808_v59  ;;  %2595 = vmatprep.subr.bf16.mxu1 %v2854_v7  ;;  %v2902_v59 = vld [vmem:[%s3961_s1 + $0x330] ss:$12 sps:$4 sm:$0xff]   ;;  %v2917_v5 = vld [vmem:[%s3961_s1 + $0x3a8] ss:$12 sps:$4 sm:$0xff]   ;;  %v2920_v7 = vld [vmem:[%s3961_s1 + $0x3c0] ss:$12 sps:$4 sm:$0xff]  }
  0x4e   : > { %1276 = vmatmul.mubr.bf16.vlgmr.msra.gmra.mrb[0].mxu0 %v2803_v44  ;;  %v2864_v44 = vld [vmem:[%s3961_s1 + $0x288] ss:$12 sps:$4 sm:$0xff]  }
  0x4f   : > { %1287 = vmatpush1.bf16.msra.mxu0 %v2806_v60  ;;  %1318 = vmatprep.mubr.bf16.mxu0 %v2861_v6  ;;  %v2907_v60 = vld [vmem:[%s3961_s1 + $0x34c] ss:$12 sps:$4 sm:$0xff]   ;;  %v2922_v6 = vld [vmem:[%s3961_s1 + $0x3c4] ss:$12 sps:$4 sm:$0xff]  }
  0x50   : > { %1288 = vmatprep.subr.bf16.mxu0 %v2813_v63  ;;  %2596 = vmatpush3.bf16.msra.mxu1 %v2855_v10  ;;  %v2908_v63 = vld [vmem:[%s3961_s1 + $0x360] ss:$12 sps:$4 sm:$0xff]  }
  0x51   : > { %2603 = vmatprep.subr.bf16.mxu1 %v2862_v11  ;;  %v2928_v10 = vld [vmem:[%s3961_s1 + $0x3f4] ss:$12 sps:$4 sm:$0xff]   ;;  %v2926_v11 = vld [vmem:[%s3961_s1 + $0x3f0] ss:$12 sps:$4 sm:$0xff]  }
  0x53   : > { %1289 = vmatpush1.bf16.msra.mxu0 %v2811_v0  ;;  %1446 = vmatmul.mubr.bf16.vlgmr.msra.gmra.mrb[4].mxu1 %v3441_v14  ;;  %v2913_v0 = vld [vmem:[%s3961_s1 + $0x37c] ss:$12 sps:$4 sm:$0xff]  }
  0x54   : > { %1290 = vmatprep.subr.bf16.mxu0 %v2818_v3  ;;  %2604 = vmatpush3.bf16.msra.mxu1 %v2863_v15  ;;  %v2914_v3 = vld [vmem:[%s3961_s1 + $0x390] ss:$12 sps:$4 sm:$0xff]   ;;  %v2932_v15 = vld [vmem:[%s3961_s1 + $0x420] ss:$12 sps:$4 sm:$0xff]  }
  0x55   : > { %2605 = vmatprep.subr.bf16.mxu1 %v2867_v16  ;;  %1486 = vmatprep.mubr.bf16.mxu1 %v2901_v34  ;;  %v2937_v16 = vld [vmem:[%s3961_s1 + $0x43c] ss:$12 sps:$4 sm:$0xff]  }
  0x57   : > { %1291 = vmatpush1.bf16.msra.mxu0 %v2816_v4  ;;  %v2919_v4 = vld [vmem:[%s3961_s1 + $0x3ac] ss:$12 sps:$4 sm:$0xff]  }
  0x58   : > { %1292 = vmatprep.subr.bf16.mxu0 %v2823_v8  ;;  %2606 = vmatpush3.bf16.msra.mxu1 %v2868_v18  ;;  %v2925_v8 = vld [vmem:[%s3961_s1 + $0x3dc] ss:$12 sps:$4 sm:$0xff]   ;;  %v2940_v18 = vld [vmem:[%s3961_s1 + $0x454] ss:$12 sps:$4 sm:$0xff]  }
  0x59   : > { %2607 = vmatprep.subr.bf16.mxu1 %v2872_v20  ;;  %v2943_v20 = vld [vmem:[%s3961_s1 + $0x46c] ss:$12 sps:$4 sm:$0xff]  }
  0x5b   : > { %1293 = vmatpush1.bf16.msra.mxu0 %v2821_v9  ;;  %v2923_v9 = vld [vmem:[%s3961_s1 + $0x3d8] ss:$12 sps:$4 sm:$0xff]  }
  0x5c   : > { %1294 = vmatprep.subr.bf16.mxu0 %v2828_v12  ;;  %2608 = vmatpush3.bf16.msra.mxu1 %v2873_v23  ;;  %v2931_v12 = vld [vmem:[%s3961_s1 + $0x40c] ss:$12 sps:$4 sm:$0xff]   ;;  %v2946_v23 = vld [vmem:[%s3963_s3 + $0x4] ss:$12 sps:$4 sm:$0xff]  }
  0x5d   : > { %2609 = vmatprep.subr.bf16.mxu1 %v2877_v24  ;;  %v2949_v24 = vld [vmem:[%s3963_s3 + $0x1c] ss:$12 sps:$4 sm:$0xff]  }
  0x5f   : > { %1295 = vmatpush1.bf16.msra.mxu0 %v2826_v13  ;;  %v2929_v13 = vld [vmem:[%s3961_s1 + $0x408] ss:$12 sps:$4 sm:$0xff]  }
  0x60   : > { %1296 = vmatprep.subr.bf16.mxu0 %v2833_v17  ;;  %2610 = vmatpush3.bf16.msra.mxu1 %v2878_v27  ;;  %v2935_v17 = vld [vmem:[%s3961_s1 + $0x438] ss:$12 sps:$4 sm:$0xff]   ;;  %v2950_v27 = vld [vmem:[%s3963_s3 + $0x30] ss:$12 sps:$4 sm:$0xff]  }
  0x61   : > { %2611 = vmatprep.subr.bf16.mxu1 %v2882_v28  ;;  %v2955_v28 = vld [vmem:[%s3963_s3 + $0x4c] ss:$12 sps:$4 sm:$0xff]  }
  0x63   : > { %1297 = vmatpush1.bf16.msra.mxu0 %v2831_v19  ;;  %v2938_v19 = vld [vmem:[%s3961_s1 + $0x450] ss:$12 sps:$4 sm:$0xff]  }
  0x64   : > { %1298 = vmatprep.subr.bf16.mxu0 %v2838_v21  ;;  %2612 = vmatpush3.bf16.msra.mxu1 %v2883_v31  ;;  %v2941_v21 = vld [vmem:[%s3961_s1 + $0x468] ss:$12 sps:$4 sm:$0xff]   ;;  %v2956_v31 = vld [vmem:[%s3963_s3 + $0x60] ss:$12 sps:$4 sm:$0xff]  }
  0x65   : > { %2613 = vmatprep.subr.bf16.mxu1 %v2887_v32  ;;  %v2961_v32 = vld [vmem:[%s3963_s3 + $0x7c] ss:$12 sps:$4 sm:$0xff]  }
  0x67   : > { %1299 = vmatpush1.bf16.msra.mxu0 %v2836_v22  ;;  %v2944_v22 = vld [vmem:[%s3963_s3] ss:$12 sps:$4 sm:$0xff]  }
  0x68   : > { %1300 = vmatprep.subr.bf16.mxu0 %v2843_v25  ;;  %2614 = vmatpush3.bf16.msra.mxu1 %v2888_v35  ;;  %v2947_v25 = vld [vmem:[%s3963_s3 + $0x18] ss:$12 sps:$4 sm:$0xff]   ;;  %v2962_v35 = vld [vmem:[%s3963_s3 + $0x90] ss:$12 sps:$4 sm:$0xff]  }
  0x69   : > { %2615 = vmatprep.subr.bf16.mxu1 %v2892_v37  ;;  %v2965_v37 = vld [vmem:[%s3963_s3 + $0xa8] ss:$12 sps:$4 sm:$0xff]  }
  0x6b   : > { %1301 = vmatpush1.bf16.msra.mxu0 %v2841_v26  ;;  %v2952_v26 = vld [vmem:[%s3963_s3 + $0x34] ss:$12 sps:$4 sm:$0xff]  }
  0x6c   : > { %1302 = vmatprep.subr.bf16.mxu0 %v2848_v29  ;;  %2616 = vmatpush3.bf16.msra.mxu1 %v2893_v39  ;;  %v2953_v29 = vld [vmem:[%s3963_s3 + $0x48] ss:$12 sps:$4 sm:$0xff]  }
  0x6d   : > { %2617 = vmatprep.subr.bf16.mxu1 %v2897_v41 }
  0x6f   : > { %1303 = vmatpush1.bf16.msra.mxu0 %v2846_v30  ;;  %v2958_v30 = vld [vmem:[%s3963_s3 + $0x64] ss:$12 sps:$4 sm:$0xff]  }
  0x70   : > { %1304 = vmatprep.subr.bf16.mxu0 %v2853_v33  ;;  %2618 = vmatpush3.bf16.msra.mxu1 %v2898_v43  ;;  %v2959_v33 = vld [vmem:[%s3963_s3 + $0x78] ss:$12 sps:$4 sm:$0xff]  }
  0x71   : > { %2049 = vmatprep.subr.bf16.mxu1 %v2946_v23  ;;  %v3005_v23 = vld [vmem:[%s3963_s3 + $0x16c] ss:$12 sps:$4 sm:$0xff]  }
  0x73   : > { %1305 = vmatpush1.bf16.msra.mxu0 %v2851_v36  ;;  %1487 = vmatmul.mubr.bf16.vlgmr.msra.gmra.mrb[8].mxu1 %v3536_v46  ;;  %v2967_v36 = vld [vmem:[%s3963_s3 + $0xac] ss:$12 sps:$4 sm:$0xff]  }
  0x74   : > { %1306 = vmatprep.subr.bf16.mxu0 %v2858_v38  ;;  %2050 = vmatpush1.bf16.msra.mxu1 %v2944_v22  ;;  %v3002_v22 = vld [vmem:[%s3963_s3 + $0x98] ss:$12 sps:$4 sm:$0xff]  }
  0x75   : > { %2051 = vmatprep.subr.bf16.mxu1 %v2949_v24  ;;  %v3003_v24 = vld [vmem:[%s3963_s3 + $0x168] ss:$12 sps:$4 sm:$0xff]  }
  0x77   : > { %1307 = vmatpush1.bf16.msra.mxu0 %v2856_v40 }
  0x78   : > { %1308 = vmatprep.subr.bf16.mxu0 %v2866_v42  ;;  %2052 = vmatpush1.bf16.msra.mxu1 %v2947_v25  ;;  %v3006_v25 = vld [vmem:[%s3963_s3 + $0x170] ss:$12 sps:$4 sm:$0xff]  }
  0x79   : > { %2053 = vmatprep.subr.bf16.mxu1 %v2952_v26  ;;  %v3007_v26 = vld [vmem:[%s3963_s3 + $0xb0] ss:$12 sps:$4 sm:$0xff]  }
  0x7b   : > { %1309 = vmatpush1.bf16.msra.mxu0 %v2864_v44  ;;  %v430_v44 = vlaneseq }
  0x7c   : > { %1310 = vmatprep.subr.bf16.mxu0 %v2871_v45  ;;  %2054 = vmatpush1.bf16.msra.mxu1 %v2950_v27  ;;  %v2970_v45 = vld [vmem:[%s3963_s3 + $0xc4] ss:$12 sps:$4 sm:$0xff]  }
  0x7d   : > { %2055 = vmatprep.subr.bf16.mxu1 %v2955_v28  ;;  %v3010_v27 = vld [vmem:[%s3963_s3 + $0x184] ss:$12 sps:$4 sm:$0xff]  }
  0x7f   : > { %1311 = vmatpush1.bf16.msra.mxu0 %v2869_v47  ;;  %v2971_v47 = vld [vmem:[%s3963_s3 + $0xc8] ss:$12 sps:$4 sm:$0xff]  }
  0x80   : > { %1312 = vmatprep.subr.bf16.mxu0 %v2876_v48  ;;  %2056 = vmatpush1.bf16.msra.mxu1 %v2953_v29  ;;  %v3715_v48 = vshrl.u32 %v430_v44, 7 }
  0x81   : > { %2057 = vmatprep.subr.bf16.mxu1 %v2958_v30 }
  0x83   : > { %1313 = vmatpush1.bf16.msra.mxu0 %v2874_v49  ;;  %v2972_v49 = vld [vmem:[%s3963_s3 + $0x8] ss:$12 sps:$4 sm:$0xff]  }
  0x84   : > { %1314 = vmatprep.subr.bf16.mxu0 %v2881_v50  ;;  %2058 = vmatpush1.bf16.msra.mxu1 %v2956_v31  ;;  %v2975_v50 = vld [vmem:[%s3963_s3 + $0xdc] ss:$12 sps:$4 sm:$0xff]  }
  0x85   : > { %2059 = vmatprep.subr.bf16.mxu1 %v2961_v32 }
  0x87   : > { %1315 = vmatpush1.bf16.msra.mxu0 %v2879_v51  ;;  %v2973_v51 = vld [vmem:[%s3963_s3 + $0xd8] ss:$12 sps:$4 sm:$0xff]  }
  0x88   : > { %1316 = vmatprep.subr.bf16.mxu0 %v2886_v52  ;;  %2060 = vmatpush1.bf16.msra.mxu1 %v2959_v33  ;;  %v2976_v52 = vld [vmem:[%s3963_s3 + $0xe0] ss:$12 sps:$4 sm:$0xff]  }
  0x8b   : > { %1317 = vmatpush1.bf16.msra.mxu0 %v2884_v53  ;;  %v440_v53 = vsub.s32 2, %v3715_v48 }
  0x8c   : > { %1329 = vmatprep.subr.bf16.mxu0 %v2891_v54  ;;  %v2977_v54 = vld [vmem:[%s3963_s3 + $0x20] ss:$12 sps:$4 sm:$0xff]  }
  0x8e   : > { %1319 = vmatmul.mubr.bf16.vlgmr.msra.gmra.mrb[0].mxu0 %v3441_v14  ;;  %v2934_v14 = vld [vmem:[%s3961_s1 + $0x424] ss:$12 sps:$4 sm:$0xff]  }
  0x8f   : > { %1330 = vmatpush1.bf16.msra.mxu0 %v2889_v55  ;;  %1361 = vmatprep.mubr.bf16.mxu0 %v2901_v34  ;;  %v2964_v34 = vld [vmem:[%s3963_s3 + $0x94] ss:$12 sps:$4 sm:$0xff]  }
  0x90   : > { %1331 = vmatprep.subr.bf16.mxu0 %v2896_v56  ;;  %2061 = vmatprep.subr.bf16.mxu1 %v2964_v34  ;;  %v3736_v55 = vld [vmem:[%s3962_s2] sm:$0x7] }
  0x91   : > { %2062 = vmatpush1.bf16.msra.mxu1 %v2962_v35  ;;  %v2980_v56 = vld [vmem:[%s3963_s3 + $0xf4] ss:$12 sps:$4 sm:$0xff]  }
  0x92   : > { %2063 = vmatprep.subr.bf16.mxu1 %v2967_v36 }
  0x93   : > { %1332 = vmatpush1.bf16.msra.mxu0 %v2894_v57  ;;  %v2978_v57 = vld [vmem:[%s3963_s3 + $0xf0] ss:$12 sps:$4 sm:$0xff]  }
  0x94   : > { %1333 = vmatprep.subr.bf16.mxu0 %v2904_v58  ;;  %v2981_v58 = vld [vmem:[%s3963_s3 + $0xf8] ss:$12 sps:$4 sm:$0xff]  }
  0x95   : > { %2064 = vmatpush1.bf16.msra.mxu1 %v2965_v37 }
  0x96   : > { %2065 = vmatprep.subr.bf16.mxu1 %v2970_v45 }
  0x97   : > { %1334 = vmatpush1.bf16.msra.mxu0 %v2902_v59  ;;  %v441_v59 = vrot.slane %v3736_v55, %v440_v53 }
  0x98   : > { %1335 = vmatprep.subr.bf16.mxu0 %v2907_v60  ;;  %v2982_v60 = vld [vmem:[%s3963_s3 + $0x38] ss:$12 sps:$4 sm:$0xff]  }
  0x9b   : > { %1336 = vmatpush1.bf16.msra.mxu0 %v2905_v61  ;;  %v2985_v61 = vld [vmem:[%s3963_s3 + $0x10c] ss:$12 sps:$4 sm:$0xff]  }
  0x9c   : > { %1337 = vmatprep.subr.bf16.mxu0 %v2910_v62  ;;  %v2983_v62 = vld [vmem:[%s3963_s3 + $0x108] ss:$12 sps:$4 sm:$0xff]  }
  0x9f   : > { %1338 = vmatpush1.bf16.msra.mxu0 %v2908_v63  ;;  %v2986_v63 = vld [vmem:[%s3963_s3 + $0x110] ss:$12 sps:$4 sm:$0xff]  }
  0xa0   : > { %1339 = vmatprep.subr.bf16.mxu0 %v2913_v0 }
  0xa3   : > { %1340 = vmatpush1.bf16.msra.mxu0 %v2911_v1 }
  0xa4   : > { %1341 = vmatprep.subr.bf16.mxu0 %v2916_v2  ;;  %v2987_v2 = vld [vmem:[%s3963_s3 + $0x50] ss:$12 sps:$4 sm:$0xff]  }
  0xa7   : > { %1342 = vmatpush1.bf16.msra.mxu0 %v2914_v3 }
  0xa8   : > { %1343 = vmatprep.subr.bf16.mxu0 %v2919_v4 }
  0xab   : > { %1344 = vmatpush1.bf16.msra.mxu0 %v2917_v5 }
  0xac   : > { %1345 = vmatprep.subr.bf16.mxu0 %v2922_v6 }
  0xaf   : > { %1346 = vmatpush1.bf16.msra.mxu0 %v2920_v7  ;;  %v2990_v7 = vld [vmem:[%s3963_s3 + $0x124] ss:$12 sps:$4 sm:$0xff]  }
  0xb0   : > { %1347 = vmatprep.subr.bf16.mxu0 %v2925_v8 }
  0xb3   : > { %1348 = vmatpush1.bf16.msra.mxu0 %v2923_v9  ;;  %v2988_v9 = vld [vmem:[%s3963_s3 + $0x120] ss:$12 sps:$4 sm:$0xff]  }
  0xb4   : > { %1349 = vmatprep.subr.bf16.mxu0 %v2928_v10  ;;  %v2991_v10 = vld [vmem:[%s3963_s3 + $0x128] ss:$12 sps:$4 sm:$0xff]  }
  0xb7   : > { %1350 = vmatpush1.bf16.msra.mxu0 %v2926_v11 }
  0xb8   : > { %1351 = vmatprep.subr.bf16.mxu0 %v2931_v12 }
  0xbb   : > { %1352 = vmatpush1.bf16.msra.mxu0 %v2929_v13  ;;  %v2992_v13 = vld [vmem:[%s3963_s3 + $0x68] ss:$12 sps:$4 sm:$0xff]  }
  0xbc   : > { %1353 = vmatprep.subr.bf16.mxu0 %v2934_v14 }
  0xbf   : > { %1354 = vmatpush1.bf16.msra.mxu0 %v2932_v15  ;;  %v2995_v15 = vld [vmem:[%s3963_s3 + $0x13c] ss:$12 sps:$4 sm:$0xff]  }
  0xc0   : > { %1355 = vmatprep.subr.bf16.mxu0 %v2937_v16  ;;  %v2993_v16 = vld [vmem:[%s3963_s3 + $0x138] ss:$12 sps:$4 sm:$0xff]  }
  0xc3   : > { %1356 = vmatpush1.bf16.msra.mxu0 %v2935_v17  ;;  %v2996_v17 = vld [vmem:[%s3963_s3 + $0x140] ss:$12 sps:$4 sm:$0xff]  }
  0xc4   : > { %1357 = vmatprep.subr.bf16.mxu0 %v2940_v18  ;;  %v2997_v18 = vld [vmem:[%s3963_s3 + $0x80] ss:$12 sps:$4 sm:$0xff]  }
  0xc7   : > { %1358 = vmatpush1.bf16.msra.mxu0 %v2938_v19  ;;  %v3000_v19 = vld [vmem:[%s3963_s3 + $0x154] ss:$12 sps:$4 sm:$0xff]  }
  0xc8   : > { %1359 = vmatprep.subr.bf16.mxu0 %v2943_v20  ;;  %v2998_v20 = vld [vmem:[%s3963_s3 + $0x150] ss:$12 sps:$4 sm:$0xff]  }
  0xcb   : > { %1360 = vmatpush1.bf16.msra.mxu0 %v2941_v21  ;;  %v3001_v21 = vld [vmem:[%s3963_s3 + $0x158] ss:$12 sps:$4 sm:$0xff]  }
  0xcc   : > { %2625 = vmatprep.subr.bf16.mxu0 %v2971_v47 }
  0xce   : > { %1362 = vmatmul.mubr.bf16.vlgmr.msra.gmra.mrb[0].mxu0 %v3536_v46  ;;  %v2968_v46 = vld [vmem:[%s3963_s3 + $0xc0] ss:$12 sps:$4 sm:$0xff]  }
  0xcf   : > { %2066 = vmatpush1.bf16.msra.mxu1 %v2968_v46  ;;  %2626 = vmatpush3.bf16.msra.mxu0 %v2972_v49 }
  0xd0   : > { %2067 = vmatprep.subr.bf16.mxu1 %v2975_v50  ;;  %2627 = vmatprep.subr.bf16.mxu0 %v2976_v52 }
  0xd3   : > { %2068 = vmatpush1.bf16.msra.mxu1 %v2973_v51  ;;  %2628 = vmatpush3.bf16.msra.mxu0 %v2977_v54 }
  0xd4   : > { %2069 = vmatprep.subr.bf16.mxu1 %v2980_v56  ;;  %2629 = vmatprep.subr.bf16.mxu0 %v2981_v58  ;;  %v432_v58 = vsub.s32 0, %v3715_v48 }
  0xd7   : > { %2070 = vmatpush1.bf16.msra.mxu1 %v2978_v57  ;;  %2630 = vmatpush3.bf16.msra.mxu0 %v2982_v60  ;;  %v433_v60 = vrot.slane %v3736_v55, %v432_v58 }
  0xd8   : > { %2071 = vmatprep.subr.bf16.mxu1 %v2985_v61  ;;  %2631 = vmatprep.subr.bf16.mxu0 %v2986_v63 }
  0xdb   : > { %2072 = vmatpush1.bf16.msra.mxu1 %v2983_v62  ;;  %2632 = vmatpush3.bf16.msra.mxu0 %v2987_v2 }
  0xdc   : > { %2073 = vmatprep.subr.bf16.mxu1 %v2990_v7  ;;  %2633 = vmatprep.subr.bf16.mxu0 %v2991_v10 }
  0xdf   : > { %2074 = vmatpush1.bf16.msra.mxu1 %v2988_v9  ;;  %2634 = vmatpush3.bf16.msra.mxu0 %v2992_v13 }
  0xe0   : > { %2075 = vmatprep.subr.bf16.mxu1 %v2995_v15  ;;  %2635 = vmatprep.subr.bf16.mxu0 %v2996_v17 }
  0xe3   : > { %2076 = vmatpush1.bf16.msra.mxu1 %v2993_v16  ;;  %2636 = vmatpush3.bf16.msra.mxu0 %v2997_v18 }
  0xe4   : > { %2077 = vmatprep.subr.bf16.mxu1 %v3000_v19  ;;  %2637 = vmatprep.subr.bf16.mxu0 %v3001_v21 }
  0xe7   : > { %2078 = vmatpush1.bf16.msra.mxu1 %v2998_v20  ;;  %2638 = vmatpush3.bf16.msra.mxu0 %v3002_v22 }
  0xe8   : > { %2079 = vmatprep.subr.bf16.mxu1 %v3005_v23  ;;  %2639 = vmatprep.subr.bf16.mxu0 %v3006_v25 }
  0xeb   : > { %2080 = vmatpush1.bf16.msra.mxu1 %v3003_v24  ;;  %2640 = vmatpush3.bf16.msra.mxu0 %v3007_v26 }
  0xec   : > { %2092 = vmatprep.subr.bf16.mxu1 %v3010_v27 }
 0x105   : > { %v2575_v38 = vpop.f32.mrb[0].mxu1 }
 0x106   : > { %v2576_v39 = vpop.f32.mrb[1].mxu1 }
 0x107   : > { %v2577_v40 = vadd.f32 %v2576_v39, %v2575_v38  ;;  %v2578_v41 = vpop.f32.mrb[2].mxu1 }
 0x108   : > { %v2579_v42 = vpop.f32.mrb[3].mxu1 }
 0x109   : > { %v2580_v43 = vadd.f32 %v2579_v42, %v2578_v41  ;;  %v1407_v0 = vadd.f32 %v2577_v40, %v441_v59 }
 0x10b   : > { %v1410_v4 = vadd.f32 %v2580_v43, %v441_v59  ;;  %v436_v59 = vsub.s32 1, %v3715_v48 }
 0x10d   : > { %v437_v61 = vrot.slane %v3736_v55, %v436_v59 }
 0x126   : > { %v2597_v1 = vpop.f32.mrb[4].mxu1 }
 0x127   : > { %v2598_v3 = vpop.f32.mrb[5].mxu1 }
 0x128   : > { %v2599_v5 = vadd.f32 %v2598_v3, %v2597_v1  ;;  %v2600_v6 = vpop.f32.mrb[6].mxu1 }
 0x129   : > { %v2601_v8 = vpop.f32.mrb[7].mxu1 }
 0x12a   : > { %v1448_v11 = vadd.f32 %v2599_v5, %v1407_v0  ;;  %v2602_v12 = vadd.f32 %v2601_v8, %v2600_v6 }
 0x12c   : > { %v1451_v14 = vadd.f32 %v2602_v12, %v1410_v4 }
 0x146   : > { %v2619_v28 = vpop.f32.mrb[8].mxu1 }
 0x147   : > { %v2620_v29 = vpop.f32.mrb[9].mxu1 }
 0x148   : > { %v2621_v30 = vadd.f32 %v2620_v29, %v2619_v28  ;;  %v2622_v31 = vpop.f32.mrb[10].mxu1 }
 0x149   : > { %v2623_v32 = vpop.f32.mrb[11].mxu1 }
 0x14a   : > { %v1489_v33 = vadd.f32 %v2621_v30, %v1448_v11  ;;  %v2624_v34 = vadd.f32 %v2623_v32, %v2622_v31 }
 0x14c   : > { %v1497_v35 = vmul.f32 %v1489_v33, %v1489_v33  ;;  %v1492_v36 = vadd.f32 %v2624_v34, %v1451_v14 }
 0x14e   : > { %v1503_v37 = vmul.f32 %v1497_v35, %v1489_v33  ;;  %v1500_v38 = vmul.f32 %v1492_v36, %v1492_v36 }
 0x150   : > { %v1509_v39 = vmul.f32 0.044715, %v1503_v37  ;;  %v1506_v40 = vmul.f32 %v1500_v38, %v1492_v36 }
 0x152   : > { %v1515_v41 = vadd.f32 %v1509_v39, %v1489_v33  ;;  %v1512_v42 = vmul.f32 0.044715, %v1506_v40 }
 0x154   : > { %v1521_v43 = vmul.f32 0.7978846, %v1515_v41  ;;  %v1518_v44 = vadd.f32 %v1512_v42, %v1492_v36 }
 0x156   : > { %3040 = vtanh.f32 %v1521_v43  ;;  %v1524_v45 = vmul.f32 0.7978846, %v1518_v44  ;;  %v3008_v43 = vld [vmem:[%s3963_s3 + $0x180] ss:$12 sps:$4 sm:$0xff]   ;;  %v3013_v44 = vld [vmem:[%s3963_s3 + $0x19c] ss:$12 sps:$4 sm:$0xff]  }
 0x158   : > { %3042 = vtanh.f32 %v1524_v45  ;;  %v3011_v45 = vld [vmem:[%s3963_s3 + $0x198] ss:$12 sps:$4 sm:$0xff]  }
 0x160   : > { %v3041_v46 = vpop.eup %3040 }
 0x161   : > { %v1533_v47 = vadd.f32 1.0, %v3041_v46  ;;  %v3116_v46 = vmov 0  }
 0x162   : > { %v3043_v49 = vpop.eup %3042 }
 0x163   : > { %v1536_v50 = vadd.f32 1.0, %v3043_v49  ;;  %v1539_v51 = vmul.f32 0.5, %v1533_v47  ;;  %v3016_v47 = vld [vmem:[%s3963_s3 + $0x1b4] ss:$12 sps:$4 sm:$0xff]   ;;  %v3014_v49 = vld [vmem:[%s3963_s3 + $0x1b0] ss:$12 sps:$4 sm:$0xff]  }
 0x165   : > { %v1542_v52 = vmul.f32 0.5, %v1536_v50  ;;  %v1545_v54 = vmul.f32 %v1539_v51, %v1489_v33  ;;  %v3019_v50 = vld [vmem:[%s3963_s3 + $0x1cc] ss:$12 sps:$4 sm:$0xff]   ;;  %v3017_v51 = vld [vmem:[%s3963_s3 + $0x1c8] ss:$12 sps:$4 sm:$0xff]  }
 0x167   : > { %v1548_v56 = vmul.f32 %v1542_v52, %v1492_v36  ;;  %v3022_v52 = vld [vmem:[%s3963_s3 + $0x1e4] ss:$12 sps:$4 sm:$0xff]  }
 0x169   : > { %v3816_v57 = vpack.c.bf16 %v1548_v56, %v1545_v54  ;;  %v3020_v54 = vld [vmem:[%s3963_s3 + $0x1e0] ss:$12 sps:$4 sm:$0xff]   ;;  %v3025_v56 = vld [vmem:[%s3963_s3 + $0x1fc] ss:$12 sps:$4 sm:$0xff]  }
 0x1a1   : > { %v1363_v62 = vpop.f32.mrb[0].mxu0 }
 0x1a2   : > { %v2676_v63 = vadd.f32 %v1363_v62, %v433_v60  ;;  %v1365_v0 = vpop.f32.mrb[1].mxu0  ;;  %v3026_v62 = vld [vmem:[%s3963_s3 + $0x210] ss:$12 sps:$4 sm:$0xff]  }
 0x1a3   : > { %v2677_v1 = vadd.f32 %v1365_v0, %v437_v61  ;;  %v1367_v2 = vpop.f32.mrb[2].mxu0  ;;  %v3029_v0 = vld [vmem:[%s3963_s3 + $0x228] ss:$12 sps:$4 sm:$0xff]  }
 0x1a4   : > { %v1495_v3 = vmul.f32 %v2676_v63, %v2676_v63  ;;  %v2678_v4 = vadd.f32 %v1367_v2, %v433_v60  ;;  %v1369_v5 = vpop.f32.mrb[3].mxu0  ;;  %v3023_v60 = vld [vmem:[%s3963_s3 + $0x1f8] ss:$12 sps:$4 sm:$0xff]   ;;  %v3117_v2 = vmov 0.0  }
 0x1a5   : > { %v1496_v6 = vmul.f32 %v2677_v1, %v2677_v1  ;;  %v2679_v7 = vadd.f32 %v1369_v5, %v437_v61  ;;  %v3028_v61 = vld [vmem:[%s3963_s3 + $0x214] ss:$12 sps:$4 sm:$0xff]   ;;  %v3035_v5 = vld [vmem:[%s3963_s3 + $0x1d0] ss:$12 sps:$4 sm:$0xff]  }
 0x1a6   : > { %v1501_v8 = vmul.f32 %v2676_v63, %v1495_v3  ;;  %v1498_v9 = vmul.f32 %v2678_v4, %v2678_v4  ;;  %v3033_v3 = vld [vmem:[%s3963_s3 + $0x1a0] ss:$12 sps:$4 sm:$0xff]  }
 0x1a7   : > { %v1502_v10 = vmul.f32 %v2677_v1, %v1496_v6  ;;  %v1499_v11 = vmul.f32 %v2679_v7, %v2679_v7  ;;  %v3036_v6 = vld [vmem:[%s3963_s3 + $0x1e8] ss:$12 sps:$4 sm:$0xff]  }
 0x1a8   : > { %v1507_v12 = vmul.f32 0.044715, %v1501_v8  ;;  %v1504_v13 = vmul.f32 %v2678_v4, %v1498_v9  ;;  %v3038_v8 = vld [vmem:[%s3963_s3 + $0x218] ss:$12 sps:$4 sm:$0xff]   ;;  %v3039_v9 = vld [vmem:[%s3963_s3 + $0x230] ss:$12 sps:$4 sm:$0xff]  }
 0x1a9   : > { %v1508_v14 = vmul.f32 0.044715, %v1502_v10  ;;  %v1505_v15 = vmul.f32 %v2679_v7, %v1499_v11 }
 0x1aa   : > { %v1513_v16 = vadd.f32 %v2676_v63, %v1507_v12  ;;  %v1510_v55 = vmul.f32 0.044715, %v1504_v13 }
 0x1ab   : > { %v1514_v17 = vadd.f32 %v2677_v1, %v1508_v14  ;;  %v1511_v18 = vmul.f32 0.044715, %v1505_v15 }
 0x1ac   : > { %v1519_v19 = vmul.f32 0.7978846, %v1513_v16  ;;  %v1516_v20 = vadd.f32 %v2678_v4, %v1510_v55  ;;  %v1648_v16 = vld [vmem:[%s3964_s4] sm:$0x7] }
 0x1ad   : > { %v1520_v21 = vmul.f32 0.7978846, %v1514_v17  ;;  %v1517_v22 = vadd.f32 %v2679_v7, %v1511_v18  ;;  %v1653_v55 = vrot.slane %v1648_v16, %v432_v58  ;;  %v1657_v17 = vrot.slane %v1648_v16, %v436_v59 }
 0x1ae   : > { %3044 = vtanh.f32 %v1519_v19  ;;  %v1522_v23 = vmul.f32 0.7978846, %v1516_v20  ;;  %v1661_v58 = vrot.slane %v1648_v16, %v440_v53 }
 0x1af   : > { %3046 = vtanh.f32 %v1520_v21  ;;  %v1523_v24 = vmul.f32 0.7978846, %v1517_v22 }
 0x1b0   : > { %3048 = vtanh.f32 %v1522_v23 }
 0x1b1   : > { %3050 = vtanh.f32 %v1523_v24 }
 0x1b8   : > { %v3045_v25 = vpop.eup %3044 }
 0x1b9   : > { %v3047_v26 = vpop.eup %3046  ;;  %v1531_v27 = vadd.f32 1.0, %v3045_v25 }
 0x1ba   : > { %v3049_v28 = vpop.eup %3048  ;;  %v1532_v29 = vadd.f32 1.0, %v3047_v26 }
 0x1bb   : > { %v3051_v30 = vpop.eup %3050  ;;  %v1537_v31 = vmul.f32 0.5, %v1531_v27  ;;  %v1534_v32 = vadd.f32 1.0, %v3049_v28 }
 0x1bc   : > { %v1535_v33 = vadd.f32 1.0, %v3051_v30  ;;  %v1538_v34 = vmul.f32 0.5, %v1532_v29 }
 0x1bd   : > { %v1540_v35 = vmul.f32 0.5, %v1534_v32  ;;  %v1543_v37 = vmul.f32 %v2676_v63, %v1537_v31  ;;  %v3031_v63 = vld [vmem:[%s3963_s3 + $0x22c] ss:$12 sps:$4 sm:$0xff]  }
 0x1be   : > { %v1541_v36 = vmul.f32 0.5, %v1535_v33  ;;  %v1544_v39 = vmul.f32 %v2677_v1, %v1538_v34  ;;  %v3032_v1 = vld [vmem:[%s3963_s3 + $0x188] ss:$12 sps:$4 sm:$0xff]  }
 0x1bf   : > { %v1546_v38 = vmul.f32 %v2678_v4, %v1540_v35  ;;  %v3034_v4 = vld [vmem:[%s3963_s3 + $0x1b8] ss:$12 sps:$4 sm:$0xff]  }
 0x1c0   : > { %v1547_v40 = vmul.f32 %v2679_v7, %v1541_v36  ;;  %v3037_v7 = vld [vmem:[%s3963_s3 + $0x200] ss:$12 sps:$4 sm:$0xff]  }
 0x1c1   : > { %v1549_v41 = vpack.c.bf16 %v1546_v38, %v1543_v37 }
 0x1c2   : > { %v1550_v42 = vpack.c.bf16 %v1547_v40, %v1544_v39 }
 0x1c4   : > { %2081 = vmatprep.mubr.bf16.mxu1 %v1550_v42  ;;  %2167 = vmatprep.mubr.bf16.mxu0 %v1550_v42 }
 0x1c5   : > { %2082 = vmatmul.mubr.bf16.vlgmr.msra.gmra.mrb[12].mxu1 %v1549_v41  ;;  %2168 = vmatmul.mubr.bf16.vlgmr.msra.gmra.mrb[4].mxu0 %v1549_v41 }
 0x1c6   : > { %2093 = vmatpush1.bf16.msra.mxu1 %v3008_v43  ;;  %2124 = vmatprep.mubr.bf16.mxu1 %v3116_v46 }
 0x1c7   : > { %2094 = vmatprep.subr.bf16.mxu1 %v3013_v44 }
 0x1ca   : > { %2095 = vmatpush1.bf16.msra.mxu1 %v3011_v45 }
 0x1cb   : > { %2096 = vmatprep.subr.bf16.mxu1 %v3016_v47 }
 0x1ce   : > { %2097 = vmatpush1.bf16.msra.mxu1 %v3014_v49 }
 0x1cf   : > { %2098 = vmatprep.subr.bf16.mxu1 %v3019_v50 }
 0x1d2   : > { %2099 = vmatpush1.bf16.msra.mxu1 %v3017_v51 }
 0x1d3   : > { %2100 = vmatprep.subr.bf16.mxu1 %v3022_v52 }
 0x1d6   : > { %2101 = vmatpush1.bf16.msra.mxu1 %v3020_v54 }
 0x1d7   : > { %2102 = vmatprep.subr.bf16.mxu1 %v3025_v56 }
 0x1da   : > { %2103 = vmatpush1.bf16.msra.mxu1 %v3023_v60 }
 0x1db   : > { %2104 = vmatprep.subr.bf16.mxu1 %v3028_v61 }
 0x1de   : > { %2105 = vmatpush1.bf16.msra.mxu1 %v3026_v62 }
 0x1df   : > { %2106 = vmatprep.subr.bf16.mxu1 %v3031_v63 }
 0x1e2   : > { %2107 = vmatpush1.bf16.msra.mxu1 %v3029_v0 }
 0x1e3   : > { %2656 = vmatprep.subr.bf16.mxu1 %v3117_v2 }
 0x1e5   : > { %2125 = vmatmul.mubr.bf16.vlgmr.msra.gmra.mrb[12].mxu1 %v3816_v57 }
 0x1e6   : > { %2657 = vmatpush3.bf16.msra.mxu1 %v3032_v1  ;;  %2672 = vmatprep.mubr.msk.bf16.mxu1 %vm3118_vm0, %v3117_v2 }
 0x1e7   : > { %2658 = vmatprep.subr.bf16.mxu1 %v3117_v2 }
 0x1ea   : > { %2659 = vmatpush3.bf16.msra.mxu1 %v3033_v3 }
 0x1eb   : > { %2660 = vmatprep.subr.bf16.mxu1 %v3117_v2 }
 0x1ee   : > { %2661 = vmatpush3.bf16.msra.mxu1 %v3034_v4 }
 0x1ef   : > { %2662 = vmatprep.subr.bf16.mxu1 %v3117_v2 }
 0x1f2   : > { %2663 = vmatpush3.bf16.msra.mxu1 %v3035_v5 }
 0x1f3   : > { %2664 = vmatprep.subr.bf16.mxu1 %v3117_v2 }
 0x1f6   : > { %2665 = vmatpush3.bf16.msra.mxu1 %v3036_v6 }
 0x1f7   : > { %2666 = vmatprep.subr.bf16.mxu1 %v3117_v2 }
 0x1fa   : > { %2667 = vmatpush3.bf16.msra.mxu1 %v3037_v7 }
 0x1fb   : > { %2668 = vmatprep.subr.bf16.mxu1 %v3117_v2 }
 0x1fe   : > { %2669 = vmatpush3.bf16.msra.mxu1 %v3038_v8 }
 0x1ff   : > { %2670 = vmatprep.subr.bf16.mxu1 %v3117_v2 }
 0x202   : > { %2671 = vmatpush3.bf16.msra.mxu1 %v3039_v9 }
 0x205   : > { %2673 = vmatmul.mubr.bf16.vlgmr.msra.gmra.mrb[16].mxu1 %v3816_v57 }
 0x298   : > { %v2641_v10 = vpop.f32.mrb[4].mxu0 }
 0x299   : > { %v2642_v11 = vpop.f32.mrb[5].mxu0 }
 0x29a   : > { %v2643_v12 = vadd.f32 %v2642_v11, %v2641_v10  ;;  %v2644_v13 = vpop.f32.mrb[6].mxu0 }
 0x29b   : > { %v2645_v14 = vpop.f32.mrb[7].mxu0 }
 0x29c   : > { %v2646_v15 = vadd.f32 %v2645_v14, %v2644_v13  ;;  %v2170_v59 = vadd.f32 %v2643_v12, %v1661_v58 }
 0x29e   : > { %v2173_v30 = vadd.f32 %v2646_v15, %v1661_v58 }
 0x2b8   : > { %v2126_v57 = vpop.f32.mrb[12].mxu1 }
 0x2b9   : > { %v2680_v18 = vadd.f32 %v2126_v57, %v1653_v55  ;;  %v2128_v19 = vpop.f32.mrb[13].mxu1 }
 0x2ba   : > { %v2681_v20 = vadd.f32 %v2128_v19, %v1657_v17  ;;  %v2130_v21 = vpop.f32.mrb[14].mxu1 }
 0x2bb   : > { %v2682_v22 = vadd.f32 %v2130_v21, %v1653_v55  ;;  %v2132_v23 = vpop.f32.mrb[15].mxu1 }
 0x2bc   : > { %v2555_v24 = vpack.c.bf16 %v2681_v20, %v2680_v18  ;;  %v2683_v25 = vadd.f32 %v2132_v23, %v1657_v17 }
 0x2be   : > { %2237 = vst [vmem:[%s220_s14] sm:$0xff] %v2555_v24  ;;  %v2557_v26 = vpack.c.bf16 %v2683_v25, %v2682_v22 }
 0x2c0   : > { %2239 = vst [vmem:[%s220_s14 + $0xc] sm:$0xff] %v2557_v26 }
 0x2d8   : > { %v2210_v27 = vpop.f32.mrb[16].mxu1 }
 0x2d9   : > { %v2211_v28 = vadd.f32 %v2210_v27, %v2170_v59  ;;  %v2674_v29 = vpop.f32.mrb[17].mxu1 }
 0x2da   : > { %v2213_v31 = vpop.f32.mrb[18].mxu1 }
 0x2db   : > { %v2556_v32 = vpack.c.bf16 %v2211_v28, %v2211_v28  ;;  %v2214_v33 = vadd.f32 %v2213_v31, %v2173_v30  ;;  %v2675_v34 = vpop.f32.mrb[19].mxu1 }
 0x2dd   : > { %2238 = vst [vmem:[%s220_s14 + $0x8] sm:$0xf] %v2556_v32  ;;  %v2558_v48 = vpack.c.bf16 %v2214_v33, %v2214_v33 }
 0x2df   : > { %2240 = vst [vmem:[%s220_s14 + $0x14] sm:$0xf] %v2558_v48 }
 0x2e0   : > { %3065 = shalt.err (!%p3062_p3)
}
 0x2e1   : > { %s3066_s8 = scalar_lea.hbm %s3915_s23, 384  ;;  %s3070_s11 = scalar_lea.hbm %s3965_s5, 768 }
 0x2e2   : > { %p3067_p4 = scmp.ne.s32.totalorder %s3915_s23, %s3066_s8  ;;  %p3071_p9 = scmp.lt.u32.totalorder %s3915_s23, %s3965_s5 }
 0x2e3   : > { %p3072_p10 = scmp.lt.u32.totalorder %s3070_s11, %s3066_s8  ;;  %p3074_p12 = scmp.lt.u32.totalorder %s3066_s8, %s3915_s23 }
 0x2e4   : > { %p3068_p7 = pnand %p3067_p4, %p3190_p5 }
 0x2e5   : > { %p3073_p11 = por %p3072_p10, %p3071_p9 }
 0x2e6   : > { %p3069_p8 = pneg %p3068_p7 }
 0x2e7   : > { %p3075_p13 = por %p3074_p12, %p3073_p11 }
 0x2e9   : > { %p3076_p0 = pnand %p3075_p13, %p3069_p8 }
 0x2eb   : > { %3079 = shalt.err (!%p3076_p0)
}
 0x2ec   : > { %s3120_s14 = smov 192   ;;  %s3121_s16 = smov 12  }
 0x2ed   : > { %2699 = dma.vmem_to_hbm [thread:$0]  (%p3190_p5), %s3910_s6, 384, %s3915_s23, %s3919_s22, %s3120_s14, %s3120_s14, %s3121_s16  }
 0x2ee PF: > { %p2705_p1 = scmp.ge.s32.totalorder %s3114_s21, 2  ;;  %s2271_s15 = sand.u32 1, %s3102_s18  }
 0x2ef   : > { %s2272_s17 = scalar_lea.sflag [#allocation3], %s2271_s15 }
 0x2f0   : > { %p2702_p2 = pnand %p2705_p1, %p3194_p6 }
 0x2f2   : > { %3097 = dma.done.wait (!%p2702_p2), %s2272_s17, 384  }
 0x2f3   : > { %3099 = vsyncadd (!%p2702_p2), %s2272_s17, 4294966912  ;;  %p15_p3 = scmp.ge.s32.totalorder %s3177_s24, 4   ;;  %s3969_s18 = smov %s3106_s19 }
 0x2f4   : > { %s3970_s19 = smov %s3110_s20  ;;  %s3971_s20 = smov %s3188_s27 }
 0x2f5   : > { %s3972_s21 = smov %s3177_s24  ;;  %17 = sbr.rel (!%p15_p3) target bundleno = 3 (0x3), region = 75 }
 0x2fc   :  { %2277 = vsyncpa [#allocation3], 1 }
 0x2fd   :  { %2279 = vsyncpa [#allocation3 + $0x1], 1 }

// kernel: image_depth_net2_forward.9
= control target key start
LH: loop header
LB: loop body
LE: loop exit
PB: predicated region body
PF: predicated region fallthrough
CT: control target
= control target key end

     0   :  { %s1058_s18 = smov 0   ;;  %s1217_s0 = inlined_call_operand.vmem [shape: bf16[128,192], index: 0, kind: input, shape index: {}]   ;;  %s1218_s1 = inlined_call_operand.vmem [shape: bf16[128,192], index: 1, kind: input, shape index: {}]   ;;  %s1219_s2 = inlined_call_operand.vmem [shape: bf16[192,64], index: 2, kind: input, shape index: {}]   ;;  %s1220_s3 = inlined_call_operand.vmem [shape: bf16[192,64], index: 3, kind: input, shape index: {}]   ;;  %s1221_s4 = inlined_call_operand.vmem [shape: f32[1,128], index: 4, kind: input, shape index: {}]   ;;  %s1222_s5 = inlined_call_operand.vmem [shape: bf16[128,128], index: 5, kind: output, shape index: {}]  }
   0x1 LB: > { %s855_s19 = sadd.s32 4294967295, %s1024_s18   ;;  %p859_p0 = scmp.ge.s32.totalorder %s1024_s18, 1  ;;  %s1024_s18 = sphi %s1058_s18, %s15_s18  }
   0x2   : > { %p201_p1 = scmp.lt.s32.totalorder %s1024_s18, 3 }
   0x4   : > { %p202_p2 = pnand %p859_p0, %p201_p1 }
   0x5   : > { %v970_v0 = vld [vmem:[%s1220_s3] sm:$0xff] (!%p202_p2)   ;;  %v1026_v1 = vmov (!%p202_p2), 0   ;;  %s860_s22 = sshll.u32 (!%p202_p2), %s855_s19, 3  ;;  %v971_v2 = vld [vmem:[%s1220_s3 + $0x8] sm:$0xff] (!%p202_p2)   ;;  %v972_v3 = vld [vmem:[%s1220_s3 + $0x10] sm:$0xff] (!%p202_p2)   ;;  %vm397_vm0 = vcmask (!%p202_p2), 523264  }
   0x6   : > { %205 = sbr.rel (%p202_p2) target bundleno = 413 (0x19d), region = 40  ;;  %627 = vmatprep.subr.bf16.mxu1 (!%p202_p2), %v1026_v1  ;;  %410 = vmatprep.subr.bf16.mxu0 (!%p202_p2), %v1026_v1  ;;  %p237_p3 = scmp.lt.s32.totalorder (!%p202_p2), %s860_s22, 15  ;;  %v973_v4 = vld [vmem:[%s1220_s3 + $0x18] sm:$0xff] (!%p202_p2)   ;;  %v974_v6 = vld [vmem:[%s1220_s3 + $0x20] sm:$0xff] (!%p202_p2)   ;;  %v975_v7 = vld [vmem:[%s1220_s3 + $0x28] sm:$0xff] (!%p202_p2)  }
   0x7   : > { %628 = vmatpush1.bf16.msra.mxu1 (!%p202_p2), %v970_v0  ;;  %v994_v8 = vld [vmem:[%s1219_s2] sm:$0xff] (!%p202_p2)   ;;  %v995_v9 = vld [vmem:[%s1219_s2 + $0x8] sm:$0xff] (!%p202_p2)   ;;  %v976_v10 = vld [vmem:[%s1220_s3 + $0x30] sm:$0xff] (!%p202_p2)  }
   0x8   : > { %629 = vmatprep.subr.bf16.mxu1 (!%p202_p2), %v1026_v1  ;;  %411 = vmatpush1.bf16.msra.mxu0 (!%p202_p2), %v994_v8  ;;  %v996_v11 = vld [vmem:[%s1219_s2 + $0x10] sm:$0xff] (!%p202_p2)   ;;  %v977_v12 = vld [vmem:[%s1220_s3 + $0x38] sm:$0xff] (!%p202_p2)   ;;  %v978_v14 = vld [vmem:[%s1220_s3 + $0x40] sm:$0xff] (!%p202_p2)  }
   0x9   : > { %412 = vmatprep.subr.bf16.mxu0 (!%p202_p2), %v1026_v1  ;;  %v997_v13 = vld [vmem:[%s1219_s2 + $0x18] sm:$0xff] (!%p202_p2)   ;;  %v998_v16 = vld [vmem:[%s1219_s2 + $0x20] sm:$0xff] (!%p202_p2)   ;;  %v979_v17 = vld [vmem:[%s1220_s3 + $0x48] sm:$0xff] (!%p202_p2)  }
   0xa   : > { %v999_v18 = vld [vmem:[%s1219_s2 + $0x28] sm:$0xff] (!%p202_p2)   ;;  %v980_v19 = vld [vmem:[%s1220_s3 + $0x50] sm:$0xff] (!%p202_p2)   ;;  %v981_v21 = vld [vmem:[%s1220_s3 + $0x58] sm:$0xff] (!%p202_p2)  }
   0xb   : > { %630 = vmatpush1.bf16.msra.mxu1 (!%p202_p2), %v971_v2  ;;  %v1000_v20 = vld [vmem:[%s1219_s2 + $0x30] sm:$0xff] (!%p202_p2)   ;;  %v1001_v22 = vld [vmem:[%s1219_s2 + $0x38] sm:$0xff] (!%p202_p2)   ;;  %v1002_v25 = vld [vmem:[%s1219_s2 + $0x40] sm:$0xff] (!%p202_p2)  }
   0xc   : > { %631 = vmatprep.subr.bf16.mxu1 (!%p202_p2), %v1026_v1  ;;  %413 = vmatpush1.bf16.msra.mxu0 (!%p202_p2), %v995_v9  ;;  %v1003_v26 = vld [vmem:[%s1219_s2 + $0x48] sm:$0xff] (!%p202_p2)   ;;  %v1004_v29 = vld [vmem:[%s1219_s2 + $0x50] sm:$0xff] (!%p202_p2)   ;;  %v1005_v30 = vld [vmem:[%s1219_s2 + $0x58] sm:$0xff] (!%p202_p2)  }
   0xd   : > { %s1224_s22 = smov (!%p237_p3, %s860_s22), 15  ;;  %414 = vmatprep.subr.bf16.mxu0 %v1026_v1 }
   0xe   : > { %s927_s27 = sshll.u32 %s1224_s22, 3  ;;  %s867_s9 = sshll.u32 %s1224_s22, 2 }
   0xf   : > { %632 = vmatpush1.bf16.msra.mxu1 %v972_v3  ;;  %s1088_s7 = scalar_lea.vmem %s1218_s1, %s927_s27  ;;  %s1123_s26 = scalar_lea.vmem %s1217_s0, %s927_s27 }
  0x10   : > { %633 = vmatprep.subr.bf16.mxu1 %v1026_v1  ;;  %v984_v5 = vld [vmem:[%s1088_s7 + $0x4] ss:$8 sps:$4 sm:$0xff]   ;;  %415 = vmatpush1.bf16.msra.mxu0 %v996_v11  ;;  %v982_v23 = vld [vmem:[%s1088_s7] ss:$8 sps:$4 sm:$0xff]   ;;  %v985_v24 = vld [vmem:[%s1088_s7 + $0x14] ss:$8 sps:$4 sm:$0xff]   ;;  %s254_s12 = scalar_lea.vmem %s1222_s5, %s867_s9 }
  0x11   : > { %912 = vmatprep.mubr.msk.bf16.mxu1 %vm397_vm0, %v984_v5  ;;  %416 = vmatprep.subr.bf16.mxu0 %v1026_v1  ;;  %v1008_v15 = vld [vmem:[%s1123_s26 + $0x4] ss:$8 sps:$4 sm:$0xff]   ;;  %v987_v27 = vld [vmem:[%s1088_s7 + $0x10] ss:$8 sps:$4 sm:$0xff]   ;;  %v990_v31 = vld [vmem:[%s1088_s7 + $0x20] ss:$8 sps:$4 sm:$0xff]  }
  0x12   : > { %888 = vmatprep.mubr.msk.bf16.mxu0 %vm397_vm0, %v1008_v15  ;;  %v988_v28 = vld [vmem:[%s1088_s7 + $0x24] ss:$8 sps:$4 sm:$0xff]   ;;  %v991_v32 = vld [vmem:[%s1088_s7 + $0x34] ss:$8 sps:$4 sm:$0xff]   ;;  %v1006_v33 = vld [vmem:[%s1123_s26] ss:$8 sps:$4 sm:$0xff]  }
  0x13   : > { %634 = vmatpush1.bf16.msra.mxu1 %v973_v4  ;;  %v1009_v34 = vld [vmem:[%s1123_s26 + $0x14] ss:$8 sps:$4 sm:$0xff]   ;;  %v993_v35 = vld [vmem:[%s1088_s7 + $0x30] ss:$8 sps:$4 sm:$0xff]   ;;  %v1012_v37 = vld [vmem:[%s1123_s26 + $0x24] ss:$8 sps:$4 sm:$0xff]  }
  0x14   : > { %635 = vmatprep.subr.bf16.mxu1 %v1026_v1  ;;  %417 = vmatpush1.bf16.msra.mxu0 %v997_v13  ;;  %v1011_v36 = vld [vmem:[%s1123_s26 + $0x10] ss:$8 sps:$4 sm:$0xff]   ;;  %v1014_v38 = vld [vmem:[%s1123_s26 + $0x20] ss:$8 sps:$4 sm:$0xff]   ;;  %v1015_v39 = vld [vmem:[%s1123_s26 + $0x34] ss:$8 sps:$4 sm:$0xff]  }
  0x15   : > { %418 = vmatprep.subr.bf16.mxu0 %v1026_v1  ;;  %v1017_v40 = vld [vmem:[%s1123_s26 + $0x30] ss:$8 sps:$4 sm:$0xff]   ;;  %s1027_s27 = smov 64  }
  0x17   : > { %636 = vmatpush1.bf16.msra.mxu1 %v974_v6 }
  0x18   : > { %637 = vmatprep.subr.bf16.mxu1 %v1026_v1  ;;  %419 = vmatpush1.bf16.msra.mxu0 %v998_v16 }
  0x19   : > { %420 = vmatprep.subr.bf16.mxu0 %v1026_v1 }
  0x1b   : > { %638 = vmatpush1.bf16.msra.mxu1 %v975_v7 }
  0x1c   : > { %639 = vmatprep.subr.bf16.mxu1 %v1026_v1  ;;  %421 = vmatpush1.bf16.msra.mxu0 %v999_v18 }
  0x1d   : > { %422 = vmatprep.subr.bf16.mxu0 %v1026_v1 }
  0x1f   : > { %640 = vmatpush1.bf16.msra.mxu1 %v976_v10  ;;  %v916_v10 = vld [vmem:[%s1221_s4] ss:$0 sm:$0xff] }
  0x20   : > { %641 = vmatprep.subr.bf16.mxu1 %v1026_v1  ;;  %423 = vmatpush1.bf16.msra.mxu0 %v1000_v20 }
  0x21   : > { %424 = vmatprep.subr.bf16.mxu0 %v1026_v1 }
  0x23   : > { %642 = vmatpush1.bf16.msra.mxu1 %v977_v12 }
  0x24   : > { %643 = vmatprep.subr.bf16.mxu1 %v1026_v1  ;;  %425 = vmatpush1.bf16.msra.mxu0 %v1001_v22 }
  0x25   : > { %426 = vmatprep.subr.bf16.mxu0 %v1026_v1 }
  0x27   : > { %644 = vmatpush1.bf16.msra.mxu1 %v978_v14 }
  0x28   : > { %645 = vmatprep.subr.bf16.mxu1 %v1026_v1  ;;  %427 = vmatpush1.bf16.msra.mxu0 %v1002_v25 }
  0x29   : > { %428 = vmatprep.subr.bf16.mxu0 %v1026_v1 }
  0x2b   : > { %646 = vmatpush1.bf16.msra.mxu1 %v979_v17 }
  0x2c   : > { %647 = vmatprep.subr.bf16.mxu1 %v1026_v1  ;;  %429 = vmatpush1.bf16.msra.mxu0 %v1003_v26 }
  0x2d   : > { %430 = vmatprep.subr.bf16.mxu0 %v1026_v1 }
  0x2f   : > { %648 = vmatpush1.bf16.msra.mxu1 %v980_v19 }
  0x30   : > { %649 = vmatprep.subr.bf16.mxu1 %v1026_v1  ;;  %431 = vmatpush1.bf16.msra.mxu0 %v1004_v29 }
  0x31   : > { %432 = vmatprep.subr.bf16.mxu0 %v1026_v1 }
  0x33   : > { %650 = vmatpush1.bf16.msra.mxu1 %v981_v21 }
  0x34   : > { %433 = vmatpush1.bf16.msra.mxu0 %v1005_v30 }
  0x36   : > { %660 = vmatmul.mubr.bf16.vlgmr.msra.gmra.mrb[0].mxu1 %v982_v23 }
  0x37   : > { %913 = vmatprep.mubr.msk.bf16.mxu1 %vm397_vm0, %v985_v24  ;;  %443 = vmatmul.mubr.bf16.vlgmr.msra.gmra.mrb[0].mxu0 %v1006_v33 }
  0x38   : > { %889 = vmatprep.mubr.msk.bf16.mxu0 %vm397_vm0, %v1009_v34 }
  0x3e   : > { %668 = vmatmul.mubr.bf16.gmra.mrb[4].mxu1 %v987_v27 }
  0x3f   : > { %914 = vmatprep.mubr.msk.bf16.mxu1 %vm397_vm0, %v988_v28  ;;  %451 = vmatmul.mubr.bf16.gmra.mrb[4].mxu0 %v1011_v36 }
  0x40   : > { %890 = vmatprep.mubr.msk.bf16.mxu0 %vm397_vm0, %v1012_v37 }
  0x46   : > { %676 = vmatmul.mubr.bf16.gmra.mrb[8].mxu1 %v990_v31 }
  0x47   : > { %915 = vmatprep.mubr.msk.bf16.mxu1 %vm397_vm0, %v991_v32  ;;  %459 = vmatmul.mubr.bf16.gmra.mrb[8].mxu0 %v1014_v38 }
  0x48   : > { %891 = vmatprep.mubr.msk.bf16.mxu0 %vm397_vm0, %v1015_v39 }
  0x4e   : > { %684 = vmatmul.mubr.bf16.gmra.mrb[12].mxu1 %v993_v35 }
  0x4f   : > { %467 = vmatmul.mubr.bf16.gmra.mrb[12].mxu0 %v1017_v40 }
 0x109   : > { %v661_v41 = vpop.f32.mrb[0].mxu1 }
 0x10a   : > { %700 = vrot.lane.b32.xlu0 %v661_v41, %s1027_s27  ;;  %v663_v42 = vpop.f32.mrb[1].mxu1  ;;  %v444_v52 = vpop.f32.mrb[0].mxu0 }
 0x10b   : > { %v664_v43 = vpop.f32.mrb[2].mxu1  ;;  %v446_v54 = vpop.f32.mrb[1].mxu0 }
 0x10c   : > { %v666_v44 = vpop.f32.mrb[3].mxu1  ;;  %v447_v55 = vpop.f32.mrb[2].mxu0 }
 0x10d   : > { %v449_v56 = vpop.f32.mrb[3].mxu0 }
 0x10e   : > { %702 = vrot.lane.b32.xlu0 %v664_v43, %s1027_s27 }
 0x111   : > { %v669_v45 = vpop.f32.mrb[4].mxu1 }
 0x112   : > { %704 = vrot.lane.b32.xlu1 %v669_v45, %s1027_s27  ;;  %v671_v46 = vpop.f32.mrb[5].mxu1  ;;  %v452_v60 = vpop.f32.mrb[4].mxu0 }
 0x113   : > { %v672_v47 = vpop.f32.mrb[6].mxu1  ;;  %v454_v62 = vpop.f32.mrb[5].mxu0 }
 0x114   : > { %v674_v48 = vpop.f32.mrb[7].mxu1  ;;  %v455_v63 = vpop.f32.mrb[6].mxu0 }
 0x115   : > { %v457_v0 = vpop.f32.mrb[7].mxu0 }
 0x116   : > { %706 = vrot.lane.b32.xlu1 %v672_v47, %s1027_s27 }
 0x119   : > { %v677_v49 = vpop.f32.mrb[8].mxu1 }
 0x11a   : > { %708 = vrot.lane.b32.xlu0 %v677_v49, %s1027_s27  ;;  %v679_v50 = vpop.f32.mrb[9].mxu1  ;;  %v460_v1 = vpop.f32.mrb[8].mxu0 }
 0x11b   : > { %v680_v51 = vpop.f32.mrb[10].mxu1  ;;  %v462_v2 = vpop.f32.mrb[9].mxu0 }
 0x11c   : > { %710 = vrot.lane.b32.xlu1 %v680_v51, %s1027_s27  ;;  %v682_v53 = vpop.f32.mrb[11].mxu1  ;;  %v463_v3 = vpop.f32.mrb[10].mxu0 }
 0x11d   : > { %v465_v4 = vpop.f32.mrb[11].mxu0 }
 0x121   : > { %v685_v57 = vpop.f32.mrb[12].mxu1 }
 0x122   : > { %712 = vrot.lane.b32.xlu0 %v685_v57, %s1027_s27  ;;  %v687_v58 = vpop.f32.mrb[13].mxu1  ;;  %v468_v5 = vpop.f32.mrb[12].mxu0 }
 0x123   : > { %v688_v59 = vpop.f32.mrb[14].mxu1  ;;  %v470_v6 = vpop.f32.mrb[13].mxu0 }
 0x124   : > { %714 = vrot.lane.b32.xlu1 %v688_v59, %s1027_s27  ;;  %v690_v61 = vpop.f32.mrb[15].mxu1  ;;  %v471_v7 = vpop.f32.mrb[14].mxu0 }
 0x125   : > { %v473_v8 = vpop.f32.mrb[15].mxu0 }
 0x17c   : > { %v701_v9 = vpop.permute.xlu0 %700 }
 0x17d   : > { %v724_v11 = vsel %vm397_vm0, %v444_v52, %v701_v9 }
 0x17e   : > { %v739_v14 = vadd.f32 %v916_v10, %v724_v11 }
 0x180   : > { %v703_v12 = vpop.permute.xlu0 %702 }
 0x181   : > { %v725_v13 = vsel %vm397_vm0, %v447_v55, %v703_v12 }
 0x182   : > { %v740_v15 = vadd.f32 %v916_v10, %v725_v13 }
 0x184   : > { %v940_v16 = vpack.c.bf16 %v740_v15, %v739_v14  ;;  %v705_v17 = vpop.permute.xlu1 %704 }
 0x185   : > { %v726_v18 = vsel %vm397_vm0, %v452_v60, %v705_v17 }
 0x186   : > { %941 = vst [vmem:[%s254_s12] sm:$0xff] %v940_v16   ;;  %v741_v21 = vadd.f32 %v916_v10, %v726_v18 }
 0x188   : > { %v707_v19 = vpop.permute.xlu1 %706 }
 0x189   : > { %v727_v20 = vsel %vm397_vm0, %v455_v63, %v707_v19 }
 0x18a   : > { %v742_v22 = vadd.f32 %v916_v10, %v727_v20 }
 0x18c   : > { %v945_v23 = vpack.c.bf16 %v742_v22, %v741_v21  ;;  %v709_v24 = vpop.permute.xlu0 %708 }
 0x18d   : > { %v728_v25 = vsel %vm397_vm0, %v460_v1, %v709_v24 }
 0x18e   : > { %957 = vst [vmem:[%s254_s12 + $0x8] sm:$0xff] %v945_v23   ;;  %v711_v26 = vpop.permute.xlu1 %710  ;;  %v743_v28 = vadd.f32 %v916_v10, %v728_v25 }
 0x18f   : > { %v729_v27 = vsel %vm397_vm0, %v463_v3, %v711_v26 }
 0x190   : > { %v744_v29 = vadd.f32 %v916_v10, %v729_v27 }
 0x192   : > { %v950_v30 = vpack.c.bf16 %v744_v29, %v743_v28 }
 0x194   : > { %958 = vst [vmem:[%s254_s12 + $0x10] sm:$0xff] %v950_v30   ;;  %v713_v31 = vpop.permute.xlu0 %712 }
 0x195   : > { %v730_v32 = vsel %vm397_vm0, %v468_v5, %v713_v31 }
 0x196   : > { %v715_v33 = vpop.permute.xlu1 %714  ;;  %v745_v35 = vadd.f32 %v916_v10, %v730_v32 }
 0x197   : > { %v731_v34 = vsel %vm397_vm0, %v471_v7, %v715_v33 }
 0x198   : > { %v746_v36 = vadd.f32 %v916_v10, %v731_v34 }
 0x19a   : > { %v955_v37 = vpack.c.bf16 %v746_v36, %v745_v35 }
 0x19c   : > { %959 = vst [vmem:[%s254_s12 + $0x18] sm:$0xff] %v955_v37  }
 0x19d PF: > { %s15_s18 = sadd.s32 1, %s1024_s18  }
 0x19e   : > { %p12_p4 = scmp.ge.s32.totalorder %s15_s18, 4  }
 0x1a0   :  { %14 = sbr.rel (!%p12_p4) target bundleno = 1 (0x1), region = 73 }

// kernel: image_depth_net2_forward.12
= control target key start
LH: loop header
LB: loop body
LE: loop exit
PB: predicated region body
PF: predicated region fallthrough
CT: control target
= control target key end

     0   :  { %10 = vsyncpa [#allocation3], 0  ;;  %s1202_s0 = inlined_call_operand.vmem [shape: bf16[128,128], index: 0, kind: input, shape index: {}]   ;;  %s1203_s1 = inlined_call_operand.vmem [shape: bf16[128,64], index: 1, kind: input, shape index: {}]   ;;  %s1204_s2 = inlined_call_operand.vmem [shape: f32[1,64], index: 2, kind: input, shape index: {}]   ;;  %s1205_s3 = inlined_call_operand.vmem [shape: bf16[64,64], index: 3, kind: input, shape index: {}]   ;;  %s1206_s4 = inlined_call_operand.vmem [shape: f32[1,64], index: 4, kind: input, shape index: {}]   ;;  %s1207_s5 = inlined_call_operand.hbm [shape: bf16[128,64], index: 5, kind: output, shape index: {}]  }
   0x1   :  { %12 = vsyncpa [#allocation3 + $0x1], 0  ;;  %s986_s18 = smov 0   ;;  %s988_s19 = smov 0  }
   0x2   :  { %s990_s20 = smov 0   ;;  %s992_s21 = smov 0  }
   0x3 LB: > { %s1007_s22 = sadd.s32 4294967295, %s951_s21   ;;  %s705_s23 = sadd.s32 4294967294, %s951_s21   ;;  %s951_s21 = sphi %s992_s21, %s1213_s21   ;;  %s947_s20 = sphi %s990_s20, %s1212_s20   ;;  %s943_s19 = sphi %s988_s19, %s1211_s19   ;;  %s939_s18 = sphi %s986_s18, %s1210_s18  }
   0x4   : > { %s1011_s24 = sadd.s32 1, %s951_s21   ;;  %s135_s25 = sadd.s32 1, %s947_s20 }
   0x5   : > { %s132_s26 = ssub.s32 %s951_s21, %s1011_s24  ;;  %p145_p0 = scmp.ne.s32.totalorder %s947_s20, %s943_s19 }
   0x6   : > { %p133_p1 = scmp.eq.s32.totalorder %s132_s26, 0  ;;  %p146_p2 = scmp.eq.s32.totalorder %s1007_s22, 1 }
   0x7   : > { %p151_p3 = scmp.ne.s32.totalorder %s943_s19, %s939_s18  ;;  %p152_p4 = scmp.eq.s32.totalorder %s705_s23, 1 }
   0x8   : > { %s1022_s27 = scalar_select %p133_p1, %s947_s20, %s135_s25  }
   0x9   : > { %p1024_p5 = por %p146_p2, %p145_p0  ;;  %p1028_p6 = por %p152_p4, %p151_p3 }
   0xa   : > { %p708_p7 = scmp.ge.s32.totalorder %s951_s21, 1  ;;  %p191_p8 = scmp.lt.s32.totalorder %s951_s21, 3 }
   0xc   : > { %p192_p9 = pnand %p708_p7, %p191_p8 }
   0xd   : > { %v857_v0 = vld [vmem:[%s1203_s1] sm:$0xff] (!%p192_p9)   ;;  %s710_s7 = sshll.u32 (!%p192_p9), %s1007_s22, 3  ;;  %v858_v1 = vld [vmem:[%s1203_s1 + $0x8] sm:$0xff] (!%p192_p9)   ;;  %v859_v2 = vld [vmem:[%s1203_s1 + $0x10] sm:$0xff] (!%p192_p9)   ;;  %vm510_vm0 = vcmask (!%p192_p9), 523264   ;;  %s216_s26 = sand.u32 (!%p192_p9), 1, %s943_s19  }
   0xe   : > { %195 = sbr.rel (%p192_p9) target bundleno = 535 (0x217), region = 40  ;;  %p220_p10 = scmp.lt.s32.totalorder (!%p192_p9), %s710_s7, 15  ;;  %776 = vmatprep.subr.bf16.mxu0 (!%p192_p9), %v857_v0  ;;  %v860_v3 = vld [vmem:[%s1203_s1 + $0x18] sm:$0xff] (!%p192_p9)   ;;  %v861_v5 = vld [vmem:[%s1203_s1 + $0x20] sm:$0xff] (!%p192_p9)   ;;  %v862_v6 = vld [vmem:[%s1203_s1 + $0x28] sm:$0xff] (!%p192_p9)   ;;  %vm620_vm1 = vcmask (!%p192_p9), 519168  }
   0xf   : > { %777 = vmatpush3.bf16.msra.mxu0 (!%p192_p9), %v857_v0  ;;  %v863_v7 = vld [vmem:[%s1203_s1 + $0x30] sm:$0xff] (!%p192_p9)   ;;  %v864_v8 = vld [vmem:[%s1203_s1 + $0x38] sm:$0xff] (!%p192_p9)   ;;  %v869_v12 = vld [vmem:[%s1205_s3] sm:$0xff] (!%p192_p9)   ;;  %s755_s9 = sshll.u32 (!%p192_p9), %s1007_s22, 9  ;;  %s1161_s22 = scalar_lea.sflag (!%p192_p9), [#allocation3], %s216_s26 }
  0x10   : > { %778 = vmatprep.subr.bf16.mxu0 (!%p192_p9), %v858_v1  ;;  %800 = vmatprep.subr.bf16.mxu1 (!%p192_p9), %v869_v12  ;;  %v870_v13 = vld [vmem:[%s1205_s3 + $0x8] sm:$0xff] (!%p192_p9)   ;;  %v871_v14 = vld [vmem:[%s1205_s3 + $0x10] sm:$0xff] (!%p192_p9)   ;;  %v872_v15 = vld [vmem:[%s1205_s3 + $0x18] sm:$0xff] (!%p192_p9)   ;;  %s1152_s13 = scalar_lea.hbm (!%p192_p9), %s1207_s5, %s755_s9  ;;  %s953_s16 = smov (!%p192_p9), [#allocation2]  }
  0x11   : > { %801 = vmatpush3.bf16.msra.mxu1 (!%p192_p9), %v869_v12  ;;  %v712_v16 = vld [vmem:[%s1204_s2] ss:$0 sm:$0xff] (!%p192_p9) }
  0x12   : > { %802 = vmatprep.subr.bf16.mxu1 (!%p192_p9), %v870_v13 }
  0x13   : > { %779 = vmatpush3.bf16.msra.mxu0 (!%p192_p9), %v858_v1 }
  0x14   : > { %780 = vmatprep.subr.bf16.mxu0 (!%p192_p9), %v859_v2 }
  0x15   : > { %s1215_s7 = smov (!%p220_p10, %s710_s7), 15  ;;  %803 = vmatpush3.bf16.msra.mxu1 %v870_v13 }
  0x16   : > { %s711_s12 = sshll.u32 %s1215_s7, 2  ;;  %804 = vmatprep.subr.bf16.mxu1 %v871_v14  ;;  %s709_s7 = sshll.u32 %s216_s26, 5 }
  0x17   : > { %s223_s15 = scalar_lea.vmem %s1202_s0, %s711_s12  ;;  %781 = vmatpush3.bf16.msra.mxu0 %v859_v2  ;;  %s218_s8 = scalar_lea.vmem [#allocation2], %s709_s7 }
  0x18   : > { %v865_v4 = vld [vmem:[%s223_s15] sm:$0xff]   ;;  %782 = vmatprep.subr.bf16.mxu0 %v860_v3  ;;  %v866_v9 = vld [vmem:[%s223_s15 + $0x8] sm:$0xff]   ;;  %v867_v10 = vld [vmem:[%s223_s15 + $0x10] sm:$0xff]   ;;  %s643_s10 = sshll.u32 %s218_s8, 4  ;;  %s1154_s10 = int_to_ptr.vmem [resolvable:$true] %s643_s10 }
  0x19   : > { %792 = vmatprep.mubr.bf16.mxu0 %v865_v4  ;;  %v868_v11 = vld [vmem:[%s223_s15 + $0x18] sm:$0xff]   ;;  %805 = vmatpush3.bf16.msra.mxu1 %v871_v14  ;;  %s889_s14 = scalar_lea.vmem %s1154_s10, 512  ;;  %s893_s15 = sshll.u32 %s953_s16, 4  ;;  %s894_s15 = int_to_ptr.vmem [resolvable:$false] %s893_s15 }
  0x1a   : > { %806 = vmatprep.subr.bf16.mxu1 %v872_v15  ;;  %p890_p11 = scmp.ne.s32.totalorder %s1154_s10, %s889_s14  ;;  %s895_s17 = scalar_lea.vmem %s894_s15, 1024 }
  0x1b   : > { %783 = vmatpush3.bf16.msra.mxu0 %v860_v3  ;;  %p896_p0 = scmp.lt.s32.totalorder %s1154_s10, %s894_s15  ;;  %p897_p1 = scmp.lt.s32.totalorder %s895_s17, %s889_s14 }
  0x1c   : > { %784 = vmatprep.subr.bf16.mxu0 %v861_v5  ;;  %p891_p12 = pnand %p890_p11, %p1024_p5 }
  0x1d   : > { %807 = vmatpush3.bf16.msra.mxu1 %v872_v15  ;;  %p898_p2 = por %p897_p1, %p896_p0 }
  0x1e   : > { %p892_p13 = pneg %p891_p12 }
  0x1f   : > { %785 = vmatpush3.bf16.msra.mxu0 %v861_v5 }
  0x20   : > { %786 = vmatprep.subr.bf16.mxu0 %v862_v6  ;;  %p899_p3 = pnand %p898_p2, %p892_p13 }
  0x23   : > { %787 = vmatpush3.bf16.msra.mxu0 %v862_v6 }
  0x24   : > { %788 = vmatprep.subr.bf16.mxu0 %v863_v7 }
  0x27   : > { %789 = vmatpush3.bf16.msra.mxu0 %v863_v7 }
  0x28   : > { %790 = vmatprep.subr.bf16.mxu0 %v864_v8 }
  0x2b   : > { %791 = vmatpush3.bf16.msra.mxu0 %v864_v8 }
  0x2e   : > { %793 = vmatmul.mubr.bf16.vlgmr.msra.gmra.mrb[0].mxu0 %v866_v9 }
  0x2f   : > { %796 = vmatprep.mubr.bf16.mxu0 %v867_v10 }
  0x36   : > { %797 = vmatmul.mubr.bf16.gmra.mrb[4].mxu0 %v868_v11 }
 0x101   : > { %v794_v17 = vpop.f32.mrb[0].mxu0 }
 0x102   : > { %v1077_v18 = vadd.f32 %v794_v17, %v712_v16  ;;  %v364_v19 = vpop.f32.mrb[1].mxu0 }
 0x103   : > { %v1079_v20 = vadd.f32 %v712_v16, %v364_v19  ;;  %v795_v21 = vpop.f32.mrb[2].mxu0 }
 0x104   : > { %v397_v22 = vmul.f32 %v1077_v18, %v1077_v18  ;;  %v1083_v23 = vadd.f32 %v795_v21, %v712_v16  ;;  %v367_v24 = vpop.f32.mrb[3].mxu0 }
 0x105   : > { %v395_v25 = vmul.f32 %v1079_v20, %v1079_v20  ;;  %v1087_v26 = vadd.f32 %v712_v16, %v367_v24 }
 0x106   : > { %v405_v27 = vmul.f32 %v397_v22, %v1077_v18  ;;  %v398_v28 = vmul.f32 %v1083_v23, %v1083_v23 }
 0x107   : > { %v403_v29 = vmul.f32 %v395_v25, %v1079_v20  ;;  %v396_v30 = vmul.f32 %v1087_v26, %v1087_v26 }
 0x108   : > { %v413_v31 = vmul.f32 0.044715, %v405_v27  ;;  %v406_v32 = vmul.f32 %v398_v28, %v1083_v23 }
 0x109   : > { %v411_v33 = vmul.f32 0.044715, %v403_v29  ;;  %v404_v34 = vmul.f32 %v396_v30, %v1087_v26  ;;  %v798_v35 = vpop.f32.mrb[4].mxu0 }
 0x10a   : > { %v421_v36 = vadd.f32 %v413_v31, %v1077_v18  ;;  %v414_v37 = vmul.f32 0.044715, %v406_v32  ;;  %v1098_v38 = vadd.f32 %v798_v35, %v712_v16  ;;  %v380_v39 = vpop.f32.mrb[5].mxu0 }
 0x10b   : > { %v419_v40 = vadd.f32 %v411_v33, %v1079_v20  ;;  %v412_v41 = vmul.f32 0.044715, %v404_v34  ;;  %v1101_v42 = vadd.f32 %v712_v16, %v380_v39  ;;  %v799_v43 = vpop.f32.mrb[6].mxu0 }
 0x10c   : > { %v429_v44 = vmul.f32 0.7978846, %v421_v36  ;;  %v422_v45 = vadd.f32 %v414_v37, %v1083_v23  ;;  %v401_v46 = vmul.f32 %v1098_v38, %v1098_v38  ;;  %v1106_v47 = vadd.f32 %v799_v43, %v712_v16  ;;  %v383_v48 = vpop.f32.mrb[7].mxu0 }
 0x10d   : > { %v427_v49 = vmul.f32 0.7978846, %v419_v40  ;;  %v420_v50 = vadd.f32 %v412_v41, %v1087_v26  ;;  %v399_v51 = vmul.f32 %v1101_v42, %v1101_v42  ;;  %v1111_v52 = vadd.f32 %v712_v16, %v383_v48  ;;  %v725_v48 = vld [vmem:[%s1206_s4] ss:$0 sm:$0xff] }
 0x10e   : > { %873 = vtanh.f32 %v429_v44  ;;  %v430_v53 = vmul.f32 0.7978846, %v422_v45  ;;  %v409_v54 = vmul.f32 %v401_v46, %v1098_v38  ;;  %v402_v55 = vmul.f32 %v1106_v47, %v1106_v47 }
 0x10f   : > { %v428_v56 = vmul.f32 0.7978846, %v420_v50  ;;  %v407_v57 = vmul.f32 %v399_v51, %v1101_v42  ;;  %v400_v58 = vmul.f32 %v1111_v52, %v1111_v52  ;;  %875 = vtanh.f32 %v427_v49 }
 0x110   : > { %877 = vtanh.f32 %v430_v53  ;;  %v417_v59 = vmul.f32 0.044715, %v409_v54  ;;  %v410_v60 = vmul.f32 %v402_v55, %v1106_v47 }
 0x111   : > { %v415_v61 = vmul.f32 0.044715, %v407_v57  ;;  %v408_v62 = vmul.f32 %v400_v58, %v1111_v52  ;;  %879 = vtanh.f32 %v428_v56 }
 0x112   : > { %v425_v63 = vadd.f32 %v417_v59, %v1098_v38  ;;  %v418_v0 = vmul.f32 0.044715, %v410_v60 }
 0x113   : > { %v423_v1 = vadd.f32 %v415_v61, %v1101_v42  ;;  %v416_v2 = vmul.f32 0.044715, %v408_v62 }
 0x114   : > { %v433_v3 = vmul.f32 0.7978846, %v425_v63  ;;  %v426_v4 = vadd.f32 %v418_v0, %v1106_v47 }
 0x115   : > { %v431_v5 = vmul.f32 0.7978846, %v423_v1  ;;  %v424_v6 = vadd.f32 %v416_v2, %v1111_v52 }
 0x116   : > { %881 = vtanh.f32 %v433_v3  ;;  %v434_v7 = vmul.f32 0.7978846, %v426_v4 }
 0x117   : > { %883 = vtanh.f32 %v431_v5  ;;  %v432_v8 = vmul.f32 0.7978846, %v424_v6 }
 0x118   : > { %v874_v9 = vpop.eup %873  ;;  %885 = vtanh.f32 %v434_v7 }
 0x119   : > { %v876_v10 = vpop.eup %875  ;;  %v445_v11 = vadd.f32 1.0, %v874_v9  ;;  %887 = vtanh.f32 %v432_v8 }
 0x11a   : > { %v878_v12 = vpop.eup %877  ;;  %v443_v13 = vadd.f32 1.0, %v876_v10 }
 0x11b   : > { %v880_v14 = vpop.eup %879  ;;  %v453_v15 = vmul.f32 0.5, %v445_v11  ;;  %v446_v16 = vadd.f32 1.0, %v878_v12 }
 0x11c   : > { %v444_v17 = vadd.f32 1.0, %v880_v14  ;;  %v451_v19 = vmul.f32 0.5, %v443_v13 }
 0x11d   : > { %v454_v21 = vmul.f32 0.5, %v446_v16  ;;  %v461_v24 = vmul.f32 %v453_v15, %v1077_v18 }
 0x11e   : > { %v452_v22 = vmul.f32 0.5, %v444_v17  ;;  %v459_v28 = vmul.f32 %v451_v19, %v1079_v20 }
 0x11f   : > { %v462_v25 = vmul.f32 %v454_v21, %v1083_v23 }
 0x120   : > { %v882_v27 = vpop.eup %881  ;;  %v460_v29 = vmul.f32 %v452_v22, %v1087_v26 }
 0x121   : > { %v884_v30 = vpop.eup %883  ;;  %v449_v31 = vadd.f32 1.0, %v882_v27  ;;  %v468_v32 = vpack.c.bf16 %v462_v25, %v461_v24 }
 0x122   : > { %v886_v33 = vpop.eup %885  ;;  %v447_v34 = vadd.f32 1.0, %v884_v30  ;;  %v467_v35 = vpack.c.bf16 %v460_v29, %v459_v28 }
 0x123   : > { %v888_v36 = vpop.eup %887  ;;  %v457_v37 = vmul.f32 0.5, %v449_v31  ;;  %v450_v39 = vadd.f32 1.0, %v886_v33 }
 0x124   : > { %v455_v40 = vmul.f32 0.5, %v447_v34  ;;  %v448_v18 = vadd.f32 1.0, %v888_v36  ;;  %808 = vmatprep.mubr.msk.bf16.mxu1 %vm510_vm0, %v467_v35 }
 0x125   : > { %v458_v23 = vmul.f32 0.5, %v450_v39  ;;  %809 = vmatmul.mubr.msk.bf16.vlgmr.msra.gmra.mrb[0].mxu1 %vm510_vm0, %v468_v32  ;;  %v465_v26 = vmul.f32 %v457_v37, %v1098_v38 }
 0x126   : > { %v456_v20 = vmul.f32 0.5, %v448_v18  ;;  %v463_v43 = vmul.f32 %v455_v40, %v1101_v42 }
 0x127   : > { %v466_v41 = vmul.f32 %v458_v23, %v1106_v47 }
 0x128   : > { %v464_v44 = vmul.f32 %v456_v20, %v1111_v52 }
 0x129   : > { %v470_v45 = vpack.c.bf16 %v466_v41, %v465_v26 }
 0x12a   : > { %v469_v46 = vpack.c.bf16 %v464_v44, %v463_v43 }
 0x12c   : > { %812 = vmatprep.mubr.msk.bf16.mxu1 %vm510_vm0, %v469_v46 }
 0x12d   : > { %813 = vmatmul.mubr.msk.bf16.gmra.mrb[4].mxu1 %vm510_vm0, %v470_v45 }
 0x1f8   : > { %v810_v38 = vpop.f32.mrb[0].mxu1 }
 0x1f9   : > { %v566_v49 = vadd.f32 %v810_v38, %v725_v48  ;;  %v557_v47 = vpop.f32.mrb[1].mxu1 }
 0x1fa   : > { %v558_v42 = vadd.f32 %v725_v48, %v557_v47  ;;  %v811_v50 = vpop.f32.mrb[2].mxu1 }
 0x1fb   : > { %v749_v51 = vpack.c.bf16 %v566_v49, %v566_v49  ;;  %v569_v52 = vadd.f32 %v811_v50, %v725_v48  ;;  %v560_v53 = vpop.f32.mrb[3].mxu1 }
 0x1fc   : > { %v747_v54 = vpack.c.bf16 %v558_v42, %v558_v42  ;;  %v561_v55 = vadd.f32 %v725_v48, %v560_v53 }
 0x1fd   : > { %623 = vst.msk [vmem:[%s218_s8 + $0x8] sm:$0xf] %vm620_vm1, %v749_v51  ;;  %v750_v56 = vpack.c.bf16 %v569_v52, %v569_v52 }
 0x1fe   : > { %621 = vst.msk [vmem:[%s218_s8] sm:$0xf] %vm620_vm1, %v747_v54  ;;  %v748_v57 = vpack.c.bf16 %v561_v55, %v561_v55 }
 0x1ff   : > { %624 = vst.msk [vmem:[%s218_s8 + $0xc] sm:$0xf] %vm620_vm1, %v750_v56 }
 0x200   : > { %622 = vst.msk [vmem:[%s218_s8 + $0x4] sm:$0xf] %vm620_vm1, %v748_v57  ;;  %v814_v58 = vpop.f32.mrb[4].mxu1 }
 0x201   : > { %v582_v59 = vadd.f32 %v814_v58, %v725_v48  ;;  %v573_v60 = vpop.f32.mrb[5].mxu1 }
 0x202   : > { %v574_v61 = vadd.f32 %v725_v48, %v573_v60  ;;  %v815_v62 = vpop.f32.mrb[6].mxu1 }
 0x203   : > { %v753_v63 = vpack.c.bf16 %v582_v59, %v582_v59  ;;  %v585_v0 = vadd.f32 %v815_v62, %v725_v48  ;;  %v576_v1 = vpop.f32.mrb[7].mxu1 }
 0x204   : > { %v751_v2 = vpack.c.bf16 %v574_v61, %v574_v61  ;;  %v577_v3 = vadd.f32 %v725_v48, %v576_v1 }
 0x205   : > { %627 = vst.msk [vmem:[%s218_s8 + $0x18] sm:$0xf] %vm620_vm1, %v753_v63  ;;  %v754_v4 = vpack.c.bf16 %v585_v0, %v585_v0 }
 0x206   : > { %625 = vst.msk [vmem:[%s218_s8 + $0x10] sm:$0xf] %vm620_vm1, %v751_v2  ;;  %v752_v5 = vpack.c.bf16 %v577_v3, %v577_v3 }
 0x207   : > { %628 = vst.msk [vmem:[%s218_s8 + $0x1c] sm:$0xf] %vm620_vm1, %v754_v4 }
 0x208   : > { %626 = vst.msk [vmem:[%s218_s8 + $0x14] sm:$0xf] %vm620_vm1, %v752_v5 }
 0x209   : > { %902 = shalt.err (!%p899_p3)
}
 0x20a   : > { %s903_s23 = scalar_lea.hbm %s1152_s13, 512  ;;  %s907_s30 = scalar_lea.hbm %s1207_s5, 1024 }
 0x20b   : > { %p904_p4 = scmp.ne.s32.totalorder %s1152_s13, %s903_s23  ;;  %p908_p9 = scmp.lt.u32.totalorder %s1152_s13, %s1207_s5 }
 0x20c   : > { %p909_p10 = scmp.lt.u32.totalorder %s907_s30, %s903_s23  ;;  %p911_p12 = scmp.lt.u32.totalorder %s903_s23, %s1152_s13 }
 0x20d   : > { %p905_p7 = pnand %p904_p4, %p1024_p5 }
 0x20e   : > { %p910_p11 = por %p909_p10, %p908_p9 }
 0x20f   : > { %p906_p8 = pneg %p905_p7 }
 0x210   : > { %p912_p13 = por %p911_p12, %p910_p11 }
 0x212   : > { %p913_p0 = pnand %p912_p13, %p906_p8 }
 0x214   : > { %916 = shalt.err (!%p913_p0)
}
 0x215   : > { %s954_s8 = smov 64   ;;  %s955_s9 = smov 4  }
 0x216   : > { %816 = dma.vmem_to_hbm [thread:$0]  (%p1024_p5), %s1154_s10, 512, %s1152_s13, %s1161_s22, %s954_s8, %s954_s8, %s955_s9  }
 0x217 PF: > { %p822_p1 = scmp.ge.s32.totalorder %s951_s21, 2  ;;  %s658_s11 = sand.u32 1, %s939_s18  }
 0x218   : > { %s659_s12 = scalar_lea.sflag [#allocation3], %s658_s11 }
 0x219   : > { %p819_p2 = pnand %p822_p1, %p1028_p6 }
 0x21b   : > { %934 = dma.done.wait (!%p819_p2), %s659_s12, 512  }
 0x21c   : > { %936 = vsyncadd (!%p819_p2), %s659_s12, 4294966784  ;;  %p15_p3 = scmp.ge.s32.totalorder %s1011_s24, 4   ;;  %s1210_s18 = smov %s943_s19 }
 0x21d   : > { %s1211_s19 = smov %s947_s20  ;;  %s1212_s20 = smov %s1022_s27 }
 0x21e   : > { %s1213_s21 = smov %s1011_s24  ;;  %17 = sbr.rel (!%p15_p3) target bundleno = 3 (0x3), region = 75 }
 0x225   :  { %664 = vsyncpa [#allocation3], 1 }
 0x226   :  { %666 = vsyncpa [#allocation3 + $0x1], 1 }

// kernel: image_depth_net2_forward.10
= control target key start
LH: loop header
LB: loop body
LE: loop exit
PB: predicated region body
PF: predicated region fallthrough
CT: control target
= control target key end

     0   :  { %s1813_s18 = smov 0   ;;  %s2139_s0 = inlined_call_operand.vmem [shape: bf16[512,48], index: 0, kind: input, shape index: {}]   ;;  %s2140_s1 = inlined_call_operand.vmem [shape: bf16[512,48], index: 1, kind: input, shape index: {}]   ;;  %s2141_s2 = inlined_call_operand.vmem [shape: bf16[48,64], index: 2, kind: input, shape index: {}]   ;;  %s2142_s3 = inlined_call_operand.vmem [shape: bf16[48,64], index: 3, kind: input, shape index: {}]   ;;  %s2143_s4 = inlined_call_operand.vmem [shape: f32[1,128], index: 4, kind: input, shape index: {}]   ;;  %s2144_s5 = inlined_call_operand.vmem [shape: bf16[512,128], index: 5, kind: output, shape index: {}]  }
   0x1 LB: > { %s1370_s19 = sadd.s32 4294967295, %s1780_s18   ;;  %p1374_p0 = scmp.ge.s32.totalorder %s1780_s18, 1  ;;  %s1780_s18 = sphi %s1813_s18, %s15_s18  }
   0x2   : > { %p199_p1 = scmp.lt.s32.totalorder %s1780_s18, 3 }
   0x4   : > { %p200_p2 = pnand %p1374_p0, %p199_p1 }
   0x5   : > { %v1736_v0 = vld [vmem:[%s2142_s3] sm:$0xff] (!%p200_p2)   ;;  %s1375_s22 = sshll.u32 (!%p200_p2), %s1370_s19, 5  ;;  %v1737_v1 = vld [vmem:[%s2142_s3 + $0x8] sm:$0xff] (!%p200_p2)   ;;  %v1738_v2 = vld [vmem:[%s2142_s3 + $0x10] sm:$0xff] (!%p200_p2)   ;;  %vm387_vm0 = vcmask (!%p200_p2), 392192   ;;  %s1782_s15 = smov (!%p200_p2), 64  }
   0x6   : > { %203 = sbr.rel (%p200_p2) target bundleno = 414 (0x19e), region = 40  ;;  %p233_p3 = scmp.lt.s32.totalorder (!%p200_p2), %s1375_s22, 63  ;;  %1689 = vmatprep.subr.bf16.mxu1 (!%p200_p2), %v1736_v0  ;;  %v1755_v3 = vld [vmem:[%s2141_s2] sm:$0xff] (!%p200_p2)   ;;  %v1756_v4 = vld [vmem:[%s2141_s2 + $0x8] sm:$0xff] (!%p200_p2)   ;;  %v1757_v5 = vld [vmem:[%s2141_s2 + $0x10] sm:$0xff] (!%p200_p2)   ;;  %vm1070_vm1 = vcmask (!%p200_p2), 523264  }
   0x7   : > { %1690 = vmatpush3.bf16.msra.mxu1 (!%p200_p2), %v1736_v0  ;;  %1651 = vmatprep.subr.bf16.mxu0 (!%p200_p2), %v1755_v3 }
   0x8   : > { %1691 = vmatprep.subr.bf16.mxu1 (!%p200_p2), %v1737_v1  ;;  %1652 = vmatpush3.bf16.msra.mxu0 (!%p200_p2), %v1755_v3 }
   0x9   : > { %1653 = vmatprep.subr.bf16.mxu0 (!%p200_p2), %v1756_v4 }
   0xb   : > { %1692 = vmatpush3.bf16.msra.mxu1 (!%p200_p2), %v1737_v1 }
   0xc   : > { %1693 = vmatprep.subr.bf16.mxu1 (!%p200_p2), %v1738_v2  ;;  %1654 = vmatpush3.bf16.msra.mxu0 (!%p200_p2), %v1756_v4 }
   0xd   : > { %s2146_s22 = smov (!%p233_p3, %s1375_s22), 63  ;;  %1655 = vmatprep.subr.bf16.mxu0 %v1757_v5 }
   0xe   : > { %s1836_s6 = sshll.u32 %s2146_s22, 2 }
   0xf   : > { %s1842_s9 = scalar_lea.vmem %s2140_s1, %s1836_s6  ;;  %1694 = vmatpush3.bf16.msra.mxu1 %v1738_v2  ;;  %s1859_s14 = scalar_lea.vmem %s2139_s0, %s1836_s6 }
  0x10   : > { %v1739_v6 = vld [vmem:[%s1842_s9] sm:$0xff]   ;;  %v1740_v7 = vld [vmem:[%s1842_s9 + $0x8] sm:$0xff]   ;;  %v1741_v8 = vld [vmem:[%s1842_s9 + $0x10] sm:$0xff]   ;;  %1656 = vmatpush3.bf16.msra.mxu0 %v1757_v5  ;;  %s2033_s21 = scalar_lea.vmem %s2144_s5, %s1836_s6 }
  0x11   : > { %1695 = vmatprep.mubr.msk.bf16.mxu1 %vm387_vm0, %v1739_v6  ;;  %v1742_v9 = vld [vmem:[%s1842_s9 + $0x18] sm:$0xff]   ;;  %v1743_v10 = vld [vmem:[%s1842_s9 + $0x20] sm:$0xff]   ;;  %v1759_v12 = vld [vmem:[%s1859_s14 + $0x8] sm:$0xff]  }
  0x12   : > { %1696 = vmatmul.mubr.msk.bf16.vlgmr.msra.gmra.mrb[0].mxu1 %vm387_vm0, %v1740_v7  ;;  %v1758_v11 = vld [vmem:[%s1859_s14] sm:$0xff]   ;;  %v1760_v13 = vld [vmem:[%s1859_s14 + $0x10] sm:$0xff]   ;;  %v1744_v14 = vld [vmem:[%s1842_s9 + $0x28] sm:$0xff]  }
  0x13   : > { %1699 = vmatprep.mubr.msk.bf16.mxu1 %vm387_vm0, %v1741_v8  ;;  %1657 = vmatprep.mubr.msk.bf16.mxu0 %vm387_vm0, %v1758_v11  ;;  %v1745_v15 = vld [vmem:[%s1842_s9 + $0x30] sm:$0xff]   ;;  %v1761_v16 = vld [vmem:[%s1859_s14 + $0x18] sm:$0xff]   ;;  %v1762_v17 = vld [vmem:[%s1859_s14 + $0x20] sm:$0xff]  }
  0x14   : > { %1658 = vmatmul.mubr.msk.bf16.vlgmr.msra.gmra.mrb[0].mxu0 %vm387_vm0, %v1759_v12  ;;  %v1746_v18 = vld [vmem:[%s1842_s9 + $0x38] sm:$0xff]   ;;  %v1747_v19 = vld [vmem:[%s1842_s9 + $0x40] sm:$0xff]   ;;  %v1763_v20 = vld [vmem:[%s1859_s14 + $0x28] sm:$0xff]  }
  0x15   : > { %1661 = vmatprep.mubr.msk.bf16.mxu0 %vm387_vm0, %v1760_v13  ;;  %v1764_v21 = vld [vmem:[%s1859_s14 + $0x30] sm:$0xff]   ;;  %v1748_v22 = vld [vmem:[%s1842_s9 + $0x48] sm:$0xff]   ;;  %v1765_v24 = vld [vmem:[%s1859_s14 + $0x38] sm:$0xff]  }
  0x16   : > { %v1749_v23 = vld [vmem:[%s1842_s9 + $0x50] sm:$0xff]   ;;  %v1766_v25 = vld [vmem:[%s1859_s14 + $0x40] sm:$0xff]   ;;  %v1750_v26 = vld [vmem:[%s1842_s9 + $0x58] sm:$0xff]  }
  0x17   : > { %v1751_v27 = vld [vmem:[%s1842_s9 + $0x60] sm:$0xff]   ;;  %v1767_v28 = vld [vmem:[%s1859_s14 + $0x48] sm:$0xff]   ;;  %v1768_v29 = vld [vmem:[%s1859_s14 + $0x50] sm:$0xff]  }
  0x18   : > { %v1752_v30 = vld [vmem:[%s1842_s9 + $0x68] sm:$0xff]   ;;  %v1753_v31 = vld [vmem:[%s1842_s9 + $0x70] sm:$0xff]   ;;  %v1769_v32 = vld [vmem:[%s1859_s14 + $0x58] sm:$0xff]  }
  0x19   : > { %v1770_v33 = vld [vmem:[%s1859_s14 + $0x60] sm:$0xff]   ;;  %v1754_v34 = vld [vmem:[%s1842_s9 + $0x78] sm:$0xff]   ;;  %v1771_v35 = vld [vmem:[%s1859_s14 + $0x68] sm:$0xff]  }
  0x1a   : > { %1700 = vmatmul.mubr.msk.bf16.gmra.mrb[4].mxu1 %vm387_vm0, %v1742_v9  ;;  %v1772_v36 = vld [vmem:[%s1859_s14 + $0x70] sm:$0xff]   ;;  %v1773_v37 = vld [vmem:[%s1859_s14 + $0x78] sm:$0xff]  }
  0x1b   : > { %1703 = vmatprep.mubr.msk.bf16.mxu1 %vm387_vm0, %v1743_v10 }
  0x1c   : > { %1662 = vmatmul.mubr.msk.bf16.gmra.mrb[4].mxu0 %vm387_vm0, %v1761_v16 }
  0x1d   : > { %1665 = vmatprep.mubr.msk.bf16.mxu0 %vm387_vm0, %v1762_v17 }
  0x22   : > { %1704 = vmatmul.mubr.msk.bf16.gmra.mrb[8].mxu1 %vm387_vm0, %v1744_v14 }
  0x23   : > { %1707 = vmatprep.mubr.msk.bf16.mxu1 %vm387_vm0, %v1745_v15 }
  0x24   : > { %1666 = vmatmul.mubr.msk.bf16.gmra.mrb[8].mxu0 %vm387_vm0, %v1763_v20 }
  0x25   : > { %1669 = vmatprep.mubr.msk.bf16.mxu0 %vm387_vm0, %v1764_v21 }
  0x2a   : > { %1708 = vmatmul.mubr.msk.bf16.gmra.mrb[12].mxu1 %vm387_vm0, %v1746_v18 }
  0x2b   : > { %1711 = vmatprep.mubr.msk.bf16.mxu1 %vm387_vm0, %v1747_v19 }
  0x2c   : > { %1670 = vmatmul.mubr.msk.bf16.gmra.mrb[12].mxu0 %vm387_vm0, %v1765_v24 }
  0x2d   : > { %1673 = vmatprep.mubr.msk.bf16.mxu0 %vm387_vm0, %v1766_v25 }
  0x32   : > { %1712 = vmatmul.mubr.msk.bf16.gmra.mrb[16].mxu1 %vm387_vm0, %v1748_v22 }
  0x33   : > { %1715 = vmatprep.mubr.msk.bf16.mxu1 %vm387_vm0, %v1749_v23 }
  0x34   : > { %1674 = vmatmul.mubr.msk.bf16.gmra.mrb[16].mxu0 %vm387_vm0, %v1767_v28 }
  0x35   : > { %1677 = vmatprep.mubr.msk.bf16.mxu0 %vm387_vm0, %v1768_v29 }
  0x3a   : > { %1716 = vmatmul.mubr.msk.bf16.gmra.mrb[20].mxu1 %vm387_vm0, %v1750_v26 }
  0x3b   : > { %1719 = vmatprep.mubr.msk.bf16.mxu1 %vm387_vm0, %v1751_v27 }
  0x3c   : > { %1678 = vmatmul.mubr.msk.bf16.gmra.mrb[20].mxu0 %vm387_vm0, %v1769_v32 }
  0x3d   : > { %1681 = vmatprep.mubr.msk.bf16.mxu0 %vm387_vm0, %v1770_v33 }
  0x42   : > { %1720 = vmatmul.mubr.msk.bf16.gmra.mrb[24].mxu1 %vm387_vm0, %v1752_v30 }
  0x43   : > { %1723 = vmatprep.mubr.msk.bf16.mxu1 %vm387_vm0, %v1753_v31 }
  0x44   : > { %1682 = vmatmul.mubr.msk.bf16.gmra.mrb[24].mxu0 %vm387_vm0, %v1771_v35 }
  0x45   : > { %1685 = vmatprep.mubr.msk.bf16.mxu0 %vm387_vm0, %v1772_v36 }
  0x4a   : > { %1724 = vmatmul.mubr.msk.bf16.gmra.mrb[28].mxu1 %vm387_vm0, %v1754_v34 }
  0x4c   : > { %1686 = vmatmul.mubr.msk.bf16.gmra.mrb[28].mxu0 %vm387_vm0, %v1773_v37 }
  0xe5   : > { %v1697_v38 = vpop.f32.mrb[0].mxu1 }
  0xe6   : > { %978 = vrot.lane.b32.xlu1 %v1697_v38, %s1782_s15  ;;  %v815_v39 = vpop.f32.mrb[1].mxu1 }
  0xe7   : > { %974 = vrot.lane.b32.xlu0 %v815_v39, %s1782_s15  ;;  %v1698_v40 = vpop.f32.mrb[2].mxu1  ;;  %v1923_v46 = vpop.f32.mrb[0].mxu0 }
  0xe8   : > { %v818_v41 = vpop.f32.mrb[3].mxu1  ;;  %v1925_v47 = vpop.f32.mrb[1].mxu0 }
  0xe9   : > { %v1928_v48 = vpop.f32.mrb[2].mxu0 }
  0xea   : > { %980 = vrot.lane.b32.xlu1 %v1698_v40, %s1782_s15  ;;  %v1931_v49 = vpop.f32.mrb[3].mxu0 }
  0xeb   : > { %976 = vrot.lane.b32.xlu0 %v818_v41, %s1782_s15  ;;  %v2018_v41 = vld [vmem:[%s2143_s4] ss:$0 sm:$0xff] }
  0xed   : > { %v1701_v42 = vpop.f32.mrb[4].mxu1 }
  0xee   : > { %v831_v43 = vpop.f32.mrb[5].mxu1 }
  0xef   : > { %986 = vrot.lane.b32.xlu0 %v1701_v42, %s1782_s15  ;;  %v1702_v44 = vpop.f32.mrb[6].mxu1  ;;  %v1935_v54 = vpop.f32.mrb[4].mxu0 }
  0xf0   : > { %988 = vrot.lane.b32.xlu1 %v1702_v44, %s1782_s15  ;;  %v834_v45 = vpop.f32.mrb[7].mxu1  ;;  %v1937_v55 = vpop.f32.mrb[5].mxu0 }
  0xf1   : > { %v1940_v56 = vpop.f32.mrb[6].mxu0 }
  0xf2   : > { %v1943_v57 = vpop.f32.mrb[7].mxu0 }
  0xf3   : > { %982 = vrot.lane.b32.xlu0 %v831_v43, %s1782_s15 }
  0xf4   : > { %984 = vrot.lane.b32.xlu1 %v834_v45, %s1782_s15 }
  0xf5   : > { %v1705_v50 = vpop.f32.mrb[8].mxu1 }
  0xf6   : > { %v847_v51 = vpop.f32.mrb[9].mxu1 }
  0xf7   : > { %994 = vrot.lane.b32.xlu0 %v1705_v50, %s1782_s15  ;;  %v1706_v52 = vpop.f32.mrb[10].mxu1  ;;  %v1947_v62 = vpop.f32.mrb[8].mxu0 }
  0xf8   : > { %996 = vrot.lane.b32.xlu1 %v1706_v52, %s1782_s15  ;;  %v850_v53 = vpop.f32.mrb[11].mxu1  ;;  %v1949_v63 = vpop.f32.mrb[9].mxu0 }
  0xf9   : > { %v1952_v0 = vpop.f32.mrb[10].mxu0 }
  0xfa   : > { %v1955_v1 = vpop.f32.mrb[11].mxu0 }
  0xfb   : > { %990 = vrot.lane.b32.xlu0 %v847_v51, %s1782_s15 }
  0xfc   : > { %992 = vrot.lane.b32.xlu1 %v850_v53, %s1782_s15 }
  0xfd   : > { %v1709_v58 = vpop.f32.mrb[12].mxu1 }
  0xfe   : > { %v863_v59 = vpop.f32.mrb[13].mxu1 }
  0xff   : > { %1002 = vrot.lane.b32.xlu0 %v1709_v58, %s1782_s15  ;;  %v1710_v60 = vpop.f32.mrb[14].mxu1  ;;  %v1959_v6 = vpop.f32.mrb[12].mxu0 }
 0x100   : > { %1004 = vrot.lane.b32.xlu1 %v1710_v60, %s1782_s15  ;;  %v866_v61 = vpop.f32.mrb[15].mxu1  ;;  %v1961_v7 = vpop.f32.mrb[13].mxu0 }
 0x101   : > { %v1964_v8 = vpop.f32.mrb[14].mxu0 }
 0x102   : > { %v1967_v9 = vpop.f32.mrb[15].mxu0 }
 0x103   : > { %998 = vrot.lane.b32.xlu0 %v863_v59, %s1782_s15 }
 0x104   : > { %1000 = vrot.lane.b32.xlu1 %v866_v61, %s1782_s15 }
 0x105   : > { %v1713_v2 = vpop.f32.mrb[16].mxu1 }
 0x106   : > { %v879_v3 = vpop.f32.mrb[17].mxu1 }
 0x107   : > { %1010 = vrot.lane.b32.xlu0 %v1713_v2, %s1782_s15  ;;  %v1714_v4 = vpop.f32.mrb[18].mxu1  ;;  %v1971_v14 = vpop.f32.mrb[16].mxu0 }
 0x108   : > { %1012 = vrot.lane.b32.xlu1 %v1714_v4, %s1782_s15  ;;  %v882_v5 = vpop.f32.mrb[19].mxu1  ;;  %v1973_v15 = vpop.f32.mrb[17].mxu0 }
 0x109   : > { %v1976_v16 = vpop.f32.mrb[18].mxu0 }
 0x10a   : > { %v1979_v17 = vpop.f32.mrb[19].mxu0 }
 0x10b   : > { %1006 = vrot.lane.b32.xlu0 %v879_v3, %s1782_s15 }
 0x10c   : > { %1008 = vrot.lane.b32.xlu1 %v882_v5, %s1782_s15 }
 0x10d   : > { %v1717_v10 = vpop.f32.mrb[20].mxu1 }
 0x10e   : > { %v895_v11 = vpop.f32.mrb[21].mxu1 }
 0x10f   : > { %1018 = vrot.lane.b32.xlu0 %v1717_v10, %s1782_s15  ;;  %v1718_v12 = vpop.f32.mrb[22].mxu1  ;;  %v1983_v22 = vpop.f32.mrb[20].mxu0 }
 0x110   : > { %1020 = vrot.lane.b32.xlu1 %v1718_v12, %s1782_s15  ;;  %v898_v13 = vpop.f32.mrb[23].mxu1  ;;  %v1985_v23 = vpop.f32.mrb[21].mxu0 }
 0x111   : > { %v1988_v24 = vpop.f32.mrb[22].mxu0 }
 0x112   : > { %v1991_v25 = vpop.f32.mrb[23].mxu0 }
 0x113   : > { %1014 = vrot.lane.b32.xlu0 %v895_v11, %s1782_s15 }
 0x114   : > { %1016 = vrot.lane.b32.xlu1 %v898_v13, %s1782_s15 }
 0x115   : > { %v1721_v18 = vpop.f32.mrb[24].mxu1 }
 0x116   : > { %v911_v19 = vpop.f32.mrb[25].mxu1 }
 0x117   : > { %1026 = vrot.lane.b32.xlu0 %v1721_v18, %s1782_s15  ;;  %v1722_v20 = vpop.f32.mrb[26].mxu1  ;;  %v1995_v30 = vpop.f32.mrb[24].mxu0 }
 0x118   : > { %1028 = vrot.lane.b32.xlu1 %v1722_v20, %s1782_s15  ;;  %v914_v21 = vpop.f32.mrb[27].mxu1  ;;  %v1997_v31 = vpop.f32.mrb[25].mxu0 }
 0x119   : > { %v2000_v32 = vpop.f32.mrb[26].mxu0 }
 0x11a   : > { %v2002_v33 = vpop.f32.mrb[27].mxu0 }
 0x11b   : > { %1022 = vrot.lane.b32.xlu0 %v911_v19, %s1782_s15 }
 0x11c   : > { %1024 = vrot.lane.b32.xlu1 %v914_v21, %s1782_s15 }
 0x11d   : > { %v1725_v26 = vpop.f32.mrb[28].mxu1 }
 0x11e   : > { %v927_v27 = vpop.f32.mrb[29].mxu1 }
 0x11f   : > { %1030 = vrot.lane.b32.xlu0 %v927_v27, %s1782_s15  ;;  %v1726_v28 = vpop.f32.mrb[30].mxu1  ;;  %v2005_v34 = vpop.f32.mrb[28].mxu0 }
 0x120   : > { %v930_v29 = vpop.f32.mrb[31].mxu1  ;;  %v2007_v35 = vpop.f32.mrb[29].mxu0 }
 0x121   : > { %1032 = vrot.lane.b32.xlu1 %v930_v29, %s1782_s15  ;;  %v2009_v36 = vpop.f32.mrb[30].mxu0 }
 0x122   : > { %v2011_v37 = vpop.f32.mrb[31].mxu0 }
 0x123   : > { %1034 = vrot.lane.b32.xlu0 %v1725_v26, %s1782_s15 }
 0x125   : > { %1036 = vrot.lane.b32.xlu1 %v1726_v28, %s1782_s15 }
 0x158   : > { %v979_v38 = vpop.permute.xlu1 %978 }
 0x159   : > { %v975_v39 = vpop.permute.xlu0 %974  ;;  %v1073_v40 = vsel %vm1070_vm1, %v1923_v46, %v979_v38 }
 0x15a   : > { %v1071_v42 = vsel %vm1070_vm1, %v1925_v47, %v975_v39  ;;  %v1112_v50 = vadd.f32 %v2018_v41, %v1073_v40 }
 0x15b   : > { %v1110_v52 = vadd.f32 %v2018_v41, %v1071_v42 }
 0x15c   : > { %v981_v43 = vpop.permute.xlu1 %980 }
 0x15d   : > { %v1074_v44 = vsel %vm1070_vm1, %v1928_v48, %v981_v43  ;;  %v977_v45 = vpop.permute.xlu0 %976 }
 0x15e   : > { %v1113_v51 = vadd.f32 %v2018_v41, %v1074_v44  ;;  %v1072_v46 = vsel %vm1070_vm1, %v1931_v49, %v977_v45 }
 0x15f   : > { %v1111_v47 = vadd.f32 %v2018_v41, %v1072_v46 }
 0x160   : > { %v1526_v48 = vpack.c.bf16 %v1113_v51, %v1112_v50 }
 0x161   : > { %v1521_v53 = vpack.c.bf16 %v1111_v47, %v1110_v52  ;;  %v987_v58 = vpop.permute.xlu0 %986 }
 0x162   : > { %1598 = vst [vmem:[%s2033_s21 + $0x8] sm:$0xff] %v1526_v48   ;;  %v1077_v59 = vsel %vm1070_vm1, %v1935_v54, %v987_v58  ;;  %v989_v49 = vpop.permute.xlu1 %988 }
 0x163   : > { %1522 = vst [vmem:[%s2033_s21] sm:$0xff] %v1521_v53   ;;  %v1116_v60 = vadd.f32 %v2018_v41, %v1077_v59  ;;  %v1078_v61 = vsel %vm1070_vm1, %v1940_v56, %v989_v49 }
 0x164   : > { %v1117_v2 = vadd.f32 %v2018_v41, %v1078_v61 }
 0x165   : > { %v983_v3 = vpop.permute.xlu0 %982 }
 0x166   : > { %v1536_v4 = vpack.c.bf16 %v1117_v2, %v1116_v60  ;;  %v1075_v5 = vsel %vm1070_vm1, %v1937_v55, %v983_v3  ;;  %v985_v10 = vpop.permute.xlu1 %984 }
 0x167   : > { %v1114_v11 = vadd.f32 %v2018_v41, %v1075_v5  ;;  %v1076_v54 = vsel %vm1070_vm1, %v1943_v57, %v985_v10 }
 0x168   : > { %1600 = vst [vmem:[%s2033_s21 + $0x18] sm:$0xff] %v1536_v4   ;;  %v1115_v12 = vadd.f32 %v2018_v41, %v1076_v54 }
 0x169   : > { %v995_v13 = vpop.permute.xlu0 %994 }
 0x16a   : > { %v1531_v56 = vpack.c.bf16 %v1115_v12, %v1114_v11  ;;  %v1081_v18 = vsel %vm1070_vm1, %v1947_v62, %v995_v13  ;;  %v997_v19 = vpop.permute.xlu1 %996 }
 0x16b   : > { %v1120_v20 = vadd.f32 %v2018_v41, %v1081_v18  ;;  %v1082_v55 = vsel %vm1070_vm1, %v1952_v0, %v997_v19 }
 0x16c   : > { %1599 = vst [vmem:[%s2033_s21 + $0x10] sm:$0xff] %v1531_v56   ;;  %v1121_v21 = vadd.f32 %v2018_v41, %v1082_v55 }
 0x16d   : > { %v991_v57 = vpop.permute.xlu0 %990 }
 0x16e   : > { %v1546_v26 = vpack.c.bf16 %v1121_v21, %v1120_v20  ;;  %v1079_v27 = vsel %vm1070_vm1, %v1949_v63, %v991_v57  ;;  %v993_v28 = vpop.permute.xlu1 %992 }
 0x16f   : > { %v1118_v29 = vadd.f32 %v2018_v41, %v1079_v27  ;;  %v1080_v62 = vsel %vm1070_vm1, %v1955_v1, %v993_v28 }
 0x170   : > { %1602 = vst [vmem:[%s2033_s21 + $0x28] sm:$0xff] %v1546_v26   ;;  %v1119_v38 = vadd.f32 %v2018_v41, %v1080_v62 }
 0x171   : > { %v1003_v0 = vpop.permute.xlu0 %1002 }
 0x172   : > { %v1541_v39 = vpack.c.bf16 %v1119_v38, %v1118_v29  ;;  %v1085_v40 = vsel %vm1070_vm1, %v1959_v6, %v1003_v0  ;;  %v1005_v42 = vpop.permute.xlu1 %1004 }
 0x173   : > { %v1124_v43 = vadd.f32 %v2018_v41, %v1085_v40  ;;  %v1086_v63 = vsel %vm1070_vm1, %v1964_v8, %v1005_v42 }
 0x174   : > { %1601 = vst [vmem:[%s2033_s21 + $0x20] sm:$0xff] %v1541_v39   ;;  %v1125_v44 = vadd.f32 %v2018_v41, %v1086_v63 }
 0x175   : > { %v999_v1 = vpop.permute.xlu0 %998 }
 0x176   : > { %v1556_v45 = vpack.c.bf16 %v1125_v44, %v1124_v43  ;;  %v1083_v50 = vsel %vm1070_vm1, %v1961_v7, %v999_v1  ;;  %v1001_v51 = vpop.permute.xlu1 %1000 }
 0x177   : > { %v1122_v46 = vadd.f32 %v2018_v41, %v1083_v50  ;;  %v1084_v6 = vsel %vm1070_vm1, %v1967_v9, %v1001_v51 }
 0x178   : > { %1604 = vst [vmem:[%s2033_s21 + $0x38] sm:$0xff] %v1556_v45   ;;  %v1123_v52 = vadd.f32 %v2018_v41, %v1084_v6 }
 0x179   : > { %v1011_v8 = vpop.permute.xlu0 %1010 }
 0x17a   : > { %v1551_v47 = vpack.c.bf16 %v1123_v52, %v1122_v46  ;;  %v1089_v48 = vsel %vm1070_vm1, %v1971_v14, %v1011_v8  ;;  %v1013_v53 = vpop.permute.xlu1 %1012 }
 0x17b   : > { %v1128_v58 = vadd.f32 %v2018_v41, %v1089_v48  ;;  %v1090_v7 = vsel %vm1070_vm1, %v1976_v16, %v1013_v53 }
 0x17c   : > { %1603 = vst [vmem:[%s2033_s21 + $0x30] sm:$0xff] %v1551_v47   ;;  %v1129_v59 = vadd.f32 %v2018_v41, %v1090_v7 }
 0x17d   : > { %v1007_v9 = vpop.permute.xlu0 %1006 }
 0x17e   : > { %v1566_v49 = vpack.c.bf16 %v1129_v59, %v1128_v58  ;;  %v1087_v60 = vsel %vm1070_vm1, %v1973_v15, %v1007_v9  ;;  %v1009_v61 = vpop.permute.xlu1 %1008 }
 0x17f   : > { %v1126_v2 = vadd.f32 %v2018_v41, %v1087_v60  ;;  %v1088_v14 = vsel %vm1070_vm1, %v1979_v17, %v1009_v61 }
 0x180   : > { %1606 = vst [vmem:[%s2033_s21 + $0x48] sm:$0xff] %v1566_v49   ;;  %v1127_v3 = vadd.f32 %v2018_v41, %v1088_v14 }
 0x181   : > { %v1019_v16 = vpop.permute.xlu0 %1018 }
 0x182   : > { %v1561_v4 = vpack.c.bf16 %v1127_v3, %v1126_v2  ;;  %v1093_v5 = vsel %vm1070_vm1, %v1983_v22, %v1019_v16  ;;  %v1021_v10 = vpop.permute.xlu1 %1020 }
 0x183   : > { %v1132_v11 = vadd.f32 %v2018_v41, %v1093_v5  ;;  %v1094_v15 = vsel %vm1070_vm1, %v1988_v24, %v1021_v10 }
 0x184   : > { %1605 = vst [vmem:[%s2033_s21 + $0x40] sm:$0xff] %v1561_v4   ;;  %v1133_v54 = vadd.f32 %v2018_v41, %v1094_v15 }
 0x185   : > { %v1015_v17 = vpop.permute.xlu0 %1014 }
 0x186   : > { %v1576_v12 = vpack.c.bf16 %v1133_v54, %v1132_v11  ;;  %v1091_v13 = vsel %vm1070_vm1, %v1985_v23, %v1015_v17  ;;  %v1017_v56 = vpop.permute.xlu1 %1016 }
 0x187   : > { %v1130_v18 = vadd.f32 %v2018_v41, %v1091_v13  ;;  %v1092_v22 = vsel %vm1070_vm1, %v1991_v25, %v1017_v56 }
 0x188   : > { %1608 = vst [vmem:[%s2033_s21 + $0x58] sm:$0xff] %v1576_v12   ;;  %v1131_v19 = vadd.f32 %v2018_v41, %v1092_v22 }
 0x189   : > { %v1027_v24 = vpop.permute.xlu0 %1026 }
 0x18a   : > { %v1571_v20 = vpack.c.bf16 %v1131_v19, %v1130_v18  ;;  %v1097_v55 = vsel %vm1070_vm1, %v1995_v30, %v1027_v24  ;;  %v1029_v21 = vpop.permute.xlu1 %1028 }
 0x18b   : > { %v1136_v57 = vadd.f32 %v2018_v41, %v1097_v55  ;;  %v1098_v23 = vsel %vm1070_vm1, %v2000_v32, %v1029_v21 }
 0x18c   : > { %1607 = vst [vmem:[%s2033_s21 + $0x50] sm:$0xff] %v1571_v20   ;;  %v1137_v26 = vadd.f32 %v2018_v41, %v1098_v23 }
 0x18d   : > { %v1023_v25 = vpop.permute.xlu0 %1022 }
 0x18e   : > { %v1586_v27 = vpack.c.bf16 %v1137_v26, %v1136_v57  ;;  %v1095_v28 = vsel %vm1070_vm1, %v1997_v31, %v1023_v25  ;;  %v1025_v29 = vpop.permute.xlu1 %1024 }
 0x18f   : > { %v1134_v62 = vadd.f32 %v2018_v41, %v1095_v28  ;;  %v1096_v30 = vsel %vm1070_vm1, %v2002_v33, %v1025_v29 }
 0x190   : > { %1610 = vst [vmem:[%s2033_s21 + $0x68] sm:$0xff] %v1586_v27   ;;  %v1135_v38 = vadd.f32 %v2018_v41, %v1096_v30 }
 0x191   : > { %v1031_v0 = vpop.permute.xlu0 %1030 }
 0x192   : > { %v1581_v32 = vpack.c.bf16 %v1135_v38, %v1134_v62  ;;  %v1099_v39 = vsel %vm1070_vm1, %v2007_v35, %v1031_v0 }
 0x193   : > { %v1033_v40 = vpop.permute.xlu1 %1032  ;;  %v1138_v42 = vadd.f32 %v2018_v41, %v1099_v39 }
 0x194   : > { %1609 = vst [vmem:[%s2033_s21 + $0x60] sm:$0xff] %v1581_v32   ;;  %v1100_v31 = vsel %vm1070_vm1, %v2011_v37, %v1033_v40 }
 0x195   : > { %v1139_v43 = vadd.f32 %v2018_v41, %v1100_v31  ;;  %v1035_v33 = vpop.permute.xlu0 %1034 }
 0x196   : > { %v1101_v63 = vsel %vm1070_vm1, %v2005_v34, %v1035_v33 }
 0x197   : > { %v1591_v44 = vpack.c.bf16 %v1139_v43, %v1138_v42  ;;  %v1037_v1 = vpop.permute.xlu1 %1036  ;;  %v1140_v35 = vadd.f32 %v2018_v41, %v1101_v63 }
 0x198   : > { %v1102_v45 = vsel %vm1070_vm1, %v2009_v36, %v1037_v1 }
 0x199   : > { %1611 = vst [vmem:[%s2033_s21 + $0x70] sm:$0xff] %v1591_v44   ;;  %v1141_v50 = vadd.f32 %v2018_v41, %v1102_v45 }
 0x19b   : > { %v1596_v51 = vpack.c.bf16 %v1141_v50, %v1140_v35 }
 0x19d   : > { %1612 = vst [vmem:[%s2033_s21 + $0x78] sm:$0xff] %v1596_v51  }
 0x19e PF: > { %s15_s18 = sadd.s32 1, %s1780_s18  }
 0x19f   : > { %p12_p4 = scmp.ge.s32.totalorder %s15_s18, 4  }
 0x1a1   :  { %14 = sbr.rel (!%p12_p4) target bundleno = 1 (0x1), region = 73 }

// kernel: image_depth_net2_forward.13
= control target key start
LH: loop header
LB: loop body
LE: loop exit
PB: predicated region body
PF: predicated region fallthrough
CT: control target
= control target key end

     0   :  { %s1750_s18 = smov 0   ;;  %s2268_s0 = inlined_call_operand.vmem [shape: bf16[512,128], index: 0, kind: input, shape index: {}]   ;;  %s2269_s1 = inlined_call_operand.vmem [shape: bf16[128,64], index: 1, kind: input, shape index: {}]   ;;  %s2270_s2 = inlined_call_operand.vmem [shape: f32[1,64], index: 2, kind: input, shape index: {}]   ;;  %s2271_s3 = inlined_call_operand.vmem [shape: bf16[64,64], index: 3, kind: input, shape index: {}]   ;;  %s2272_s4 = inlined_call_operand.vmem [shape: f32[1,64], index: 4, kind: input, shape index: {}]   ;;  %s2273_s5 = inlined_call_operand.vmem [shape: bf16[512,64], index: 5, kind: output, shape index: {}]  }
   0x1 LB: > { %s1359_s19 = sadd.s32 4294967295, %s1718_s18   ;;  %p1363_p0 = scmp.ge.s32.totalorder %s1718_s18, 1  ;;  %s1718_s18 = sphi %s1750_s18, %s15_s18  }
   0x2   : > { %p188_p1 = scmp.lt.s32.totalorder %s1718_s18, 3 }
   0x4   : > { %p189_p2 = pnand %p1363_p0, %p188_p1 }
   0x5   : > { %v1620_v0 = vld [vmem:[%s2269_s1] sm:$0xff] (!%p189_p2)   ;;  %s1364_s22 = sshll.u32 (!%p189_p2), %s1359_s19, 5  ;;  %v1621_v1 = vld [vmem:[%s2269_s1 + $0x8] sm:$0xff] (!%p189_p2)   ;;  %v1622_v2 = vld [vmem:[%s2269_s1 + $0x10] sm:$0xff] (!%p189_p2)   ;;  %vm932_vm0 = vcmask (!%p189_p2), 523264   ;;  %vm1270_vm1 = vcmask (!%p189_p2), 519168  }
   0x6   : > { %192 = sbr.rel (%p189_p2) target bundleno = 580 (0x244), region = 40  ;;  %p217_p3 = scmp.lt.s32.totalorder (!%p189_p2), %s1364_s22, 63  ;;  %1524 = vmatprep.subr.bf16.mxu0 (!%p189_p2), %v1620_v0  ;;  %v1623_v3 = vld [vmem:[%s2269_s1 + $0x18] sm:$0xff] (!%p189_p2)   ;;  %v1624_v5 = vld [vmem:[%s2269_s1 + $0x20] sm:$0xff] (!%p189_p2)   ;;  %v1625_v6 = vld [vmem:[%s2269_s1 + $0x28] sm:$0xff] (!%p189_p2)  }
   0x7   : > { %1525 = vmatpush3.bf16.msra.mxu0 (!%p189_p2), %v1620_v0  ;;  %v1626_v7 = vld [vmem:[%s2269_s1 + $0x30] sm:$0xff] (!%p189_p2)   ;;  %v1627_v8 = vld [vmem:[%s2269_s1 + $0x38] sm:$0xff] (!%p189_p2)   ;;  %v1644_v24 = vld [vmem:[%s2271_s3] sm:$0xff] (!%p189_p2)  }
   0x8   : > { %1526 = vmatprep.subr.bf16.mxu0 (!%p189_p2), %v1621_v1  ;;  %1572 = vmatprep.subr.bf16.mxu1 (!%p189_p2), %v1644_v24  ;;  %v1645_v25 = vld [vmem:[%s2271_s3 + $0x8] sm:$0xff] (!%p189_p2)   ;;  %v1646_v26 = vld [vmem:[%s2271_s3 + $0x10] sm:$0xff] (!%p189_p2)   ;;  %v1647_v27 = vld [vmem:[%s2271_s3 + $0x18] sm:$0xff] (!%p189_p2)  }
   0x9   : > { %1573 = vmatpush3.bf16.msra.mxu1 (!%p189_p2), %v1644_v24  ;;  %v1823_v28 = vld [vmem:[%s2270_s2] ss:$0 sm:$0xff] (!%p189_p2) }
   0xa   : > { %1574 = vmatprep.subr.bf16.mxu1 (!%p189_p2), %v1645_v25 }
   0xb   : > { %1527 = vmatpush3.bf16.msra.mxu0 (!%p189_p2), %v1621_v1 }
   0xc   : > { %1528 = vmatprep.subr.bf16.mxu0 (!%p189_p2), %v1622_v2 }
   0xd   : > { %s2275_s22 = smov (!%p217_p3, %s1364_s22), 63  ;;  %1575 = vmatpush3.bf16.msra.mxu1 %v1645_v25 }
   0xe   : > { %s1365_s27 = sshll.u32 %s2275_s22, 2  ;;  %1576 = vmatprep.subr.bf16.mxu1 %v1646_v26 }
   0xf   : > { %s1775_s30 = scalar_lea.vmem %s2268_s0, %s1365_s27  ;;  %1529 = vmatpush3.bf16.msra.mxu0 %v1622_v2  ;;  %s2168_s8 = scalar_lea.vmem %s2273_s5, %s1365_s27 }
  0x10   : > { %v1628_v4 = vld [vmem:[%s1775_s30] sm:$0xff]   ;;  %1530 = vmatprep.subr.bf16.mxu0 %v1623_v3  ;;  %v1629_v9 = vld [vmem:[%s1775_s30 + $0x8] sm:$0xff]   ;;  %v1630_v10 = vld [vmem:[%s1775_s30 + $0x10] sm:$0xff]  }
  0x11   : > { %1540 = vmatprep.mubr.bf16.mxu0 %v1628_v4  ;;  %v1631_v11 = vld [vmem:[%s1775_s30 + $0x18] sm:$0xff]   ;;  %v1632_v12 = vld [vmem:[%s1775_s30 + $0x20] sm:$0xff]   ;;  %v1633_v13 = vld [vmem:[%s1775_s30 + $0x28] sm:$0xff]   ;;  %1577 = vmatpush3.bf16.msra.mxu1 %v1646_v26 }
  0x12   : > { %v1634_v14 = vld [vmem:[%s1775_s30 + $0x30] sm:$0xff]   ;;  %v1635_v15 = vld [vmem:[%s1775_s30 + $0x38] sm:$0xff]   ;;  %v1636_v16 = vld [vmem:[%s1775_s30 + $0x40] sm:$0xff]   ;;  %1578 = vmatprep.subr.bf16.mxu1 %v1647_v27 }
  0x13   : > { %1531 = vmatpush3.bf16.msra.mxu0 %v1623_v3  ;;  %v1637_v17 = vld [vmem:[%s1775_s30 + $0x48] sm:$0xff]   ;;  %v1638_v18 = vld [vmem:[%s1775_s30 + $0x50] sm:$0xff]   ;;  %v1639_v19 = vld [vmem:[%s1775_s30 + $0x58] sm:$0xff]  }
  0x14   : > { %1532 = vmatprep.subr.bf16.mxu0 %v1624_v5  ;;  %v1640_v20 = vld [vmem:[%s1775_s30 + $0x60] sm:$0xff]   ;;  %v1641_v21 = vld [vmem:[%s1775_s30 + $0x68] sm:$0xff]   ;;  %v1642_v22 = vld [vmem:[%s1775_s30 + $0x70] sm:$0xff]  }
  0x15   : > { %v1643_v23 = vld [vmem:[%s1775_s30 + $0x78] sm:$0xff]   ;;  %1579 = vmatpush3.bf16.msra.mxu1 %v1647_v27 }
  0x17   : > { %1533 = vmatpush3.bf16.msra.mxu0 %v1624_v5 }
  0x18   : > { %1534 = vmatprep.subr.bf16.mxu0 %v1625_v6 }
  0x1b   : > { %1535 = vmatpush3.bf16.msra.mxu0 %v1625_v6 }
  0x1c   : > { %1536 = vmatprep.subr.bf16.mxu0 %v1626_v7 }
  0x1f   : > { %1537 = vmatpush3.bf16.msra.mxu0 %v1626_v7 }
  0x20   : > { %1538 = vmatprep.subr.bf16.mxu0 %v1627_v8 }
  0x23   : > { %1539 = vmatpush3.bf16.msra.mxu0 %v1627_v8 }
  0x26   : > { %1541 = vmatmul.mubr.bf16.vlgmr.msra.gmra.mrb[0].mxu0 %v1629_v9 }
  0x27   : > { %1544 = vmatprep.mubr.bf16.mxu0 %v1630_v10 }
  0x2e   : > { %1545 = vmatmul.mubr.bf16.gmra.mrb[4].mxu0 %v1631_v11 }
  0x2f   : > { %1548 = vmatprep.mubr.bf16.mxu0 %v1632_v12 }
  0x36   : > { %1549 = vmatmul.mubr.bf16.gmra.mrb[8].mxu0 %v1633_v13 }
  0x37   : > { %1552 = vmatprep.mubr.bf16.mxu0 %v1634_v14 }
  0x3e   : > { %1553 = vmatmul.mubr.bf16.gmra.mrb[12].mxu0 %v1635_v15 }
  0x3f   : > { %1556 = vmatprep.mubr.bf16.mxu0 %v1636_v16 }
  0x46   : > { %1557 = vmatmul.mubr.bf16.gmra.mrb[16].mxu0 %v1637_v17 }
  0x47   : > { %1560 = vmatprep.mubr.bf16.mxu0 %v1638_v18 }
  0x4e   : > { %1561 = vmatmul.mubr.bf16.gmra.mrb[20].mxu0 %v1639_v19 }
  0x4f   : > { %1564 = vmatprep.mubr.bf16.mxu0 %v1640_v20 }
  0x56   : > { %1565 = vmatmul.mubr.bf16.gmra.mrb[24].mxu0 %v1641_v21 }
  0x57   : > { %1568 = vmatprep.mubr.bf16.mxu0 %v1642_v22 }
  0x5e   : > { %1569 = vmatmul.mubr.bf16.gmra.mrb[28].mxu0 %v1643_v23 }
  0xf9   : > { %v1542_v29 = vpop.f32.mrb[0].mxu0 }
  0xfa   : > { %v1826_v30 = vadd.f32 %v1542_v29, %v1823_v28  ;;  %v462_v31 = vpop.f32.mrb[1].mxu0 }
  0xfb   : > { %v1829_v32 = vadd.f32 %v1823_v28, %v462_v31  ;;  %v1543_v33 = vpop.f32.mrb[2].mxu0 }
  0xfc   : > { %v591_v34 = vmul.f32 %v1826_v30, %v1826_v30  ;;  %v1834_v35 = vadd.f32 %v1543_v33, %v1823_v28  ;;  %v465_v36 = vpop.f32.mrb[3].mxu0 }
  0xfd   : > { %v589_v37 = vmul.f32 %v1829_v32, %v1829_v32  ;;  %v1839_v38 = vadd.f32 %v1823_v28, %v465_v36 }
  0xfe   : > { %v623_v39 = vmul.f32 %v591_v34, %v1826_v30  ;;  %v592_v40 = vmul.f32 %v1834_v35, %v1834_v35 }
  0xff   : > { %v621_v41 = vmul.f32 %v589_v37, %v1829_v32  ;;  %v590_v42 = vmul.f32 %v1839_v38, %v1839_v38 }
 0x100   : > { %v655_v43 = vmul.f32 0.044715, %v623_v39  ;;  %v624_v44 = vmul.f32 %v592_v40, %v1834_v35 }
 0x101   : > { %v653_v45 = vmul.f32 0.044715, %v621_v41  ;;  %v622_v46 = vmul.f32 %v590_v42, %v1839_v38  ;;  %v1546_v47 = vpop.f32.mrb[4].mxu0 }
 0x102   : > { %v687_v48 = vadd.f32 %v655_v43, %v1826_v30  ;;  %v656_v49 = vmul.f32 0.044715, %v624_v44  ;;  %v1851_v50 = vadd.f32 %v1546_v47, %v1823_v28  ;;  %v478_v51 = vpop.f32.mrb[5].mxu0 }
 0x103   : > { %v685_v52 = vadd.f32 %v653_v45, %v1829_v32  ;;  %v654_v53 = vmul.f32 0.044715, %v622_v46  ;;  %v1855_v54 = vadd.f32 %v1823_v28, %v478_v51  ;;  %v1547_v55 = vpop.f32.mrb[6].mxu0 }
 0x104   : > { %v719_v56 = vmul.f32 0.7978846, %v687_v48  ;;  %v688_v57 = vadd.f32 %v656_v49, %v1834_v35  ;;  %v595_v58 = vmul.f32 %v1851_v50, %v1851_v50  ;;  %v1861_v59 = vadd.f32 %v1547_v55, %v1823_v28  ;;  %v481_v60 = vpop.f32.mrb[7].mxu0 }
 0x105   : > { %v717_v61 = vmul.f32 0.7978846, %v685_v52  ;;  %v686_v62 = vadd.f32 %v654_v53, %v1839_v38  ;;  %v593_v63 = vmul.f32 %v1855_v54, %v1855_v54  ;;  %v1867_v0 = vadd.f32 %v1823_v28, %v481_v60 }
 0x106   : > { %1648 = vtanh.f32 %v719_v56  ;;  %v720_v1 = vmul.f32 0.7978846, %v688_v57  ;;  %v627_v2 = vmul.f32 %v595_v58, %v1851_v50  ;;  %v596_v3 = vmul.f32 %v1861_v59, %v1861_v59 }
 0x107   : > { %v718_v4 = vmul.f32 0.7978846, %v686_v62  ;;  %v625_v5 = vmul.f32 %v593_v63, %v1855_v54  ;;  %v594_v6 = vmul.f32 %v1867_v0, %v1867_v0  ;;  %1650 = vtanh.f32 %v717_v61 }
 0x108   : > { %1652 = vtanh.f32 %v720_v1  ;;  %v659_v7 = vmul.f32 0.044715, %v627_v2  ;;  %v628_v8 = vmul.f32 %v596_v3, %v1861_v59 }
 0x109   : > { %v657_v9 = vmul.f32 0.044715, %v625_v5  ;;  %v626_v10 = vmul.f32 %v594_v6, %v1867_v0  ;;  %v1550_v11 = vpop.f32.mrb[8].mxu0  ;;  %1654 = vtanh.f32 %v718_v4 }
 0x10a   : > { %v691_v12 = vadd.f32 %v659_v7, %v1851_v50  ;;  %v660_v13 = vmul.f32 0.044715, %v628_v8  ;;  %v1879_v14 = vadd.f32 %v1550_v11, %v1823_v28  ;;  %v494_v15 = vpop.f32.mrb[9].mxu0 }
 0x10b   : > { %v689_v16 = vadd.f32 %v657_v9, %v1855_v54  ;;  %v658_v17 = vmul.f32 0.044715, %v626_v10  ;;  %v1883_v18 = vadd.f32 %v1823_v28, %v494_v15  ;;  %v1551_v19 = vpop.f32.mrb[10].mxu0 }
 0x10c   : > { %v723_v20 = vmul.f32 0.7978846, %v691_v12  ;;  %v692_v21 = vadd.f32 %v660_v13, %v1861_v59  ;;  %v599_v22 = vmul.f32 %v1879_v14, %v1879_v14  ;;  %v1889_v23 = vadd.f32 %v1551_v19, %v1823_v28  ;;  %v497_v24 = vpop.f32.mrb[11].mxu0 }
 0x10d   : > { %v721_v25 = vmul.f32 0.7978846, %v689_v16  ;;  %v690_v26 = vadd.f32 %v658_v17, %v1867_v0  ;;  %v597_v27 = vmul.f32 %v1883_v18, %v1883_v18  ;;  %v1895_v29 = vadd.f32 %v1823_v28, %v497_v24 }
 0x10e   : > { %1656 = vtanh.f32 %v723_v20  ;;  %v724_v31 = vmul.f32 0.7978846, %v692_v21  ;;  %v631_v33 = vmul.f32 %v599_v22, %v1879_v14  ;;  %v600_v34 = vmul.f32 %v1889_v23, %v1889_v23 }
 0x10f   : > { %1658 = vtanh.f32 %v721_v25  ;;  %v722_v36 = vmul.f32 0.7978846, %v690_v26  ;;  %v629_v37 = vmul.f32 %v597_v27, %v1883_v18  ;;  %v598_v39 = vmul.f32 %v1895_v29, %v1895_v29 }
 0x110   : > { %v1649_v40 = vpop.eup %1648  ;;  %1660 = vtanh.f32 %v724_v31  ;;  %v663_v41 = vmul.f32 0.044715, %v631_v33  ;;  %v632_v42 = vmul.f32 %v600_v34, %v1889_v23 }
 0x111   : > { %v1651_v43 = vpop.eup %1650  ;;  %v783_v44 = vadd.f32 1.0, %v1649_v40  ;;  %1662 = vtanh.f32 %v722_v36  ;;  %v661_v45 = vmul.f32 0.044715, %v629_v37  ;;  %v630_v46 = vmul.f32 %v598_v39, %v1895_v29  ;;  %v1554_v47 = vpop.f32.mrb[12].mxu0 }
 0x112   : > { %v1653_v48 = vpop.eup %1652  ;;  %v695_v49 = vadd.f32 %v663_v41, %v1879_v14  ;;  %v664_v51 = vmul.f32 0.044715, %v632_v42  ;;  %v1907_v52 = vadd.f32 %v1554_v47, %v1823_v28  ;;  %v510_v53 = vpop.f32.mrb[13].mxu0  ;;  %v1909_v55 = vadd.f32 1.0, %v1651_v43 }
 0x113   : > { %v815_v56 = vmul.f32 0.5, %v783_v44  ;;  %v784_v57 = vadd.f32 1.0, %v1653_v48  ;;  %v693_v58 = vadd.f32 %v661_v45, %v1883_v18  ;;  %v662_v60 = vmul.f32 0.044715, %v630_v46  ;;  %v1555_v61 = vpop.f32.mrb[14].mxu0  ;;  %v1655_v4 = vpop.eup %1654 }
 0x114   : > { %v727_v62 = vmul.f32 0.7978846, %v695_v49  ;;  %v696_v63 = vadd.f32 %v664_v51, %v1889_v23  ;;  %v603_v1 = vmul.f32 %v1907_v52, %v1907_v52  ;;  %v1916_v2 = vadd.f32 %v1823_v28, %v510_v53  ;;  %v513_v3 = vpop.f32.mrb[15].mxu0 }
 0x115   : > { %v1919_v5 = vmul.f32 %v815_v56, %v1826_v30  ;;  %v816_v6 = vmul.f32 0.5, %v784_v57  ;;  %v725_v7 = vmul.f32 0.7978846, %v693_v58  ;;  %v694_v8 = vadd.f32 %v662_v60, %v1895_v29 }
 0x116   : > { %1664 = vtanh.f32 %v727_v62  ;;  %v728_v9 = vmul.f32 0.7978846, %v696_v63  ;;  %v635_v10 = vmul.f32 %v603_v1, %v1907_v52  ;;  %v601_v11 = vmul.f32 %v1916_v2, %v1916_v2 }
 0x117   : > { %v1926_v12 = vmul.f32 %v816_v6, %v1834_v35  ;;  %1666 = vtanh.f32 %v725_v7  ;;  %v726_v13 = vmul.f32 0.7978846, %v694_v8  ;;  %v1929_v15 = vadd.f32 %v1555_v61, %v1823_v28 }
 0x118   : > { %v1657_v30 = vpop.eup %1656  ;;  %1668 = vtanh.f32 %v728_v9  ;;  %v667_v16 = vmul.f32 0.044715, %v635_v10  ;;  %v633_v17 = vmul.f32 %v601_v11, %v1916_v2  ;;  %v1933_v19 = vadd.f32 %v1823_v28, %v513_v3 }
 0x119   : > { %v1659_v20 = vpop.eup %1658  ;;  %v787_v21 = vadd.f32 1.0, %v1657_v30  ;;  %1670 = vtanh.f32 %v726_v13  ;;  %v604_v35 = vmul.f32 %v1929_v15, %v1929_v15  ;;  %v1558_v22 = vpop.f32.mrb[16].mxu0  ;;  %v1937_v24 = vadd.f32 1.0, %v1655_v4 }
 0x11a   : > { %v1661_v25 = vpop.eup %1660  ;;  %v785_v26 = vadd.f32 1.0, %v1659_v20  ;;  %v699_v27 = vadd.f32 %v667_v16, %v1907_v52  ;;  %v665_v31 = vmul.f32 0.044715, %v633_v17  ;;  %v602_v33 = vmul.f32 %v1933_v19, %v1933_v19  ;;  %v526_v34 = vpop.f32.mrb[17].mxu0 }
 0x11b   : > { %v1663_v36 = vpop.eup %1662  ;;  %v819_v37 = vmul.f32 0.5, %v787_v21  ;;  %v788_v39 = vadd.f32 1.0, %v1661_v25  ;;  %v636_v40 = vmul.f32 %v604_v35, %v1929_v15  ;;  %v1944_v41 = vadd.f32 %v1558_v22, %v1823_v28  ;;  %v1559_v42 = vpop.f32.mrb[18].mxu0 }
 0x11c   : > { %v817_v43 = vmul.f32 0.5, %v785_v26  ;;  %v786_v44 = vadd.f32 1.0, %v1663_v36  ;;  %v731_v45 = vmul.f32 0.7978846, %v699_v27  ;;  %v697_v46 = vadd.f32 %v665_v31, %v1916_v2  ;;  %v529_v47 = vpop.f32.mrb[19].mxu0 }
 0x11d   : > { %v1948_v48 = vmul.f32 %v819_v37, %v1851_v50  ;;  %v820_v49 = vmul.f32 0.5, %v788_v39  ;;  %v668_v51 = vmul.f32 0.044715, %v636_v40  ;;  %v634_v53 = vmul.f32 %v602_v33, %v1933_v19 }
 0x11e   : > { %v1952_v56 = vmul.f32 %v817_v43, %v1855_v54  ;;  %v818_v57 = vmul.f32 0.5, %v786_v44  ;;  %1672 = vtanh.f32 %v731_v45  ;;  %v729_v58 = vmul.f32 0.7978846, %v697_v46 }
 0x11f   : > { %v1955_v60 = vmul.f32 %v820_v49, %v1861_v59  ;;  %v700_v61 = vadd.f32 %v668_v51, %v1929_v15  ;;  %v666_v62 = vmul.f32 0.044715, %v634_v53  ;;  %v607_v50 = vmul.f32 %v1944_v41, %v1944_v41 }
 0x120   : > { %v1665_v63 = vpop.eup %1664  ;;  %v1961_v1 = vmul.f32 %v818_v57, %v1867_v0  ;;  %1674 = vtanh.f32 %v729_v58  ;;  %v1964_v54 = vadd.f32 %v1823_v28, %v526_v34  ;;  %v1967_v3 = vadd.f32 %v1559_v42, %v1823_v28 }
 0x121   : > { %v1667_v4 = vpop.eup %1666  ;;  %v791_v59 = vadd.f32 1.0, %v1665_v63  ;;  %v732_v6 = vmul.f32 0.7978846, %v700_v61  ;;  %v698_v7 = vadd.f32 %v666_v62, %v1933_v19  ;;  %v639_v8 = vmul.f32 %v607_v50, %v1944_v41  ;;  %v1562_v9 = vpop.f32.mrb[20].mxu0 }
 0x122   : > { %v1669_v10 = vpop.eup %1668  ;;  %v789_v11 = vadd.f32 1.0, %v1667_v4  ;;  %v605_v0 = vmul.f32 %v1964_v54, %v1964_v54  ;;  %v608_v13 = vmul.f32 %v1967_v3, %v1967_v3  ;;  %v1976_v30 = vadd.f32 %v1823_v28, %v529_v47  ;;  %v542_v16 = vpop.f32.mrb[21].mxu0 }
 0x123   : > { %v1671_v17 = vpop.eup %1670  ;;  %v823_v20 = vmul.f32 0.5, %v791_v59  ;;  %v792_v21 = vadd.f32 1.0, %v1669_v10  ;;  %1676 = vtanh.f32 %v732_v6  ;;  %v730_v35 = vmul.f32 0.7978846, %v698_v7  ;;  %v1563_v22 = vpop.f32.mrb[22].mxu0 }
 0x124   : > { %v821_v25 = vmul.f32 0.5, %v789_v11  ;;  %v790_v26 = vadd.f32 1.0, %v1671_v17  ;;  %v671_v27 = vmul.f32 0.044715, %v639_v8  ;;  %v637_v31 = vmul.f32 %v605_v0, %v1964_v54  ;;  %v545_v33 = vpop.f32.mrb[23].mxu0 }
 0x125   : > { %v1980_v34 = vmul.f32 %v823_v20, %v1879_v14  ;;  %v824_v36 = vmul.f32 0.5, %v792_v21  ;;  %1678 = vtanh.f32 %v730_v35  ;;  %v640_v37 = vmul.f32 %v608_v13, %v1967_v3 }
 0x126   : > { %v1984_v39 = vmul.f32 %v821_v25, %v1883_v18  ;;  %v822_v40 = vmul.f32 0.5, %v790_v26  ;;  %v703_v42 = vadd.f32 %v671_v27, %v1944_v41  ;;  %v669_v43 = vmul.f32 0.044715, %v637_v31 }
 0x127   : > { %v1988_v44 = vmul.f32 %v824_v36, %v1889_v23  ;;  %v672_v45 = vmul.f32 0.044715, %v640_v37  ;;  %v606_v46 = vmul.f32 %v1976_v30, %v1976_v30  ;;  %v813_v14 = vmul.f32 0.5, %v1909_v55 }
 0x128   : > { %v1673_v47 = vpop.eup %1672  ;;  %v1994_v49 = vmul.f32 %v822_v40, %v1895_v29  ;;  %v735_v51 = vmul.f32 0.7978846, %v703_v42  ;;  %v701_v18 = vadd.f32 %v669_v43, %v1964_v54  ;;  %v814_v53 = vmul.f32 0.5, %v1937_v24 }
 0x129   : > { %v795_v57 = vadd.f32 1.0, %v1673_v47  ;;  %v704_v58 = vadd.f32 %v672_v45, %v1967_v3  ;;  %v638_v23 = vmul.f32 %v606_v46, %v1976_v30  ;;  %v845_v61 = vmul.f32 %v813_v14, %v1829_v32  ;;  %v1566_v62 = vpop.f32.mrb[24].mxu0 }
 0x12a   : > { %v1675_v50 = vpop.eup %1674  ;;  %1680 = vtanh.f32 %v735_v51  ;;  %v733_v55 = vmul.f32 0.7978846, %v701_v18  ;;  %v846_v63 = vmul.f32 %v814_v53, %v1839_v38  ;;  %v878_v29 = vpack.c.bf16 %v1926_v12, %v1919_v5  ;;  %v558_v4 = vpop.f32.mrb[25].mxu0 }
 0x12b   : > { %v827_v59 = vmul.f32 0.5, %v795_v57  ;;  %v793_v6 = vadd.f32 1.0, %v1675_v50  ;;  %v736_v24 = vmul.f32 0.7978846, %v704_v58  ;;  %v670_v7 = vmul.f32 0.044715, %v638_v23 }
 0x12c   : > { %1682 = vtanh.f32 %v733_v55  ;;  %v877_v8 = vpack.c.bf16 %v846_v63, %v845_v61  ;;  %v2005_v10 = vadd.f32 %v1562_v9, %v1823_v28  ;;  %v2008_v32 = vadd.f32 %v1823_v28, %v542_v16  ;;  %v1567_v11 = vpop.f32.mrb[26].mxu0 }
 0x12d   : > { %v1677_v0 = vpop.eup %1676  ;;  %v2011_v38 = vmul.f32 %v827_v59, %v1907_v52  ;;  %v825_v13 = vmul.f32 0.5, %v793_v6  ;;  %1684 = vtanh.f32 %v736_v24  ;;  %v702_v5 = vadd.f32 %v670_v7, %v1976_v30  ;;  %v2014_v12 = vpop.f32.mrb[27].mxu0 }
 0x12e   : > { %v796_v17 = vadd.f32 1.0, %v1677_v0  ;;  %1580 = vmatprep.mubr.msk.bf16.mxu1 %vm932_vm0, %v877_v8  ;;  %v611_v9 = vmul.f32 %v2005_v10, %v2005_v10  ;;  %v609_v16 = vmul.f32 %v2008_v32, %v2008_v32  ;;  %v2022_v20 = vadd.f32 %v1563_v22, %v1823_v28 }
 0x12f   : > { %v1679_v52 = vpop.eup %1678  ;;  %v2025_v21 = vmul.f32 %v825_v13, %v1916_v2  ;;  %v734_v35 = vmul.f32 0.7978846, %v702_v5  ;;  %1581 = vmatmul.mubr.msk.bf16.vlgmr.msra.gmra.mrb[0].mxu1 %vm932_vm0, %v878_v29  ;;  %v2029_v25 = vadd.f32 %v1823_v28, %v545_v33  ;;  %v879_v26 = vpack.c.bf16 %v1961_v1, %v1952_v56 }
 0x130   : > { %v828_v27 = vmul.f32 0.5, %v796_v17  ;;  %v794_v31 = vadd.f32 1.0, %v1679_v52  ;;  %v643_v36 = vmul.f32 %v611_v9, %v2005_v10  ;;  %v641_v22 = vmul.f32 %v609_v16, %v2008_v32 }
 0x131   : > { %1686 = vtanh.f32 %v734_v35  ;;  %v612_v2 = vmul.f32 %v2022_v20, %v2022_v20  ;;  %v610_v37 = vmul.f32 %v2029_v25, %v2029_v25  ;;  %1584 = vmatprep.mubr.msk.bf16.mxu1 %vm932_vm0, %v879_v26  ;;  %v880_v33 = vpack.c.bf16 %v1955_v60, %v1948_v48  ;;  %v1570_v40 = vpop.f32.mrb[28].mxu0 }
 0x132   : > { %v2043_v56 = vmul.f32 %v828_v27, %v1929_v15  ;;  %v826_v1 = vmul.f32 0.5, %v794_v31  ;;  %v675_v42 = vmul.f32 0.044715, %v643_v36  ;;  %v673_v43 = vmul.f32 0.044715, %v641_v22  ;;  %v574_v45 = vpop.f32.mrb[29].mxu0 }
 0x133   : > { %v644_v46 = vmul.f32 %v612_v2, %v2022_v20  ;;  %v642_v14 = vmul.f32 %v610_v37, %v2029_v25  ;;  %v2048_v47 = vadd.f32 %v1566_v62, %v1823_v28  ;;  %v2051_v51 = vadd.f32 %v1823_v28, %v558_v4  ;;  %v1571_v18 = vpop.f32.mrb[30].mxu0 }
 0x134   : > { %v1681_v48 = vpop.eup %1680  ;;  %v2054_v60 = vmul.f32 %v826_v1, %v1933_v19  ;;  %v707_v15 = vadd.f32 %v675_v42, %v2005_v10  ;;  %v705_v53 = vadd.f32 %v673_v43, %v2008_v32  ;;  %v2059_v57 = vadd.f32 %v1567_v11, %v1823_v28  ;;  %v577_v58 = vpop.f32.mrb[31].mxu0 }
 0x135   : > { %v799_v23 = vadd.f32 1.0, %v1681_v48  ;;  %v676_v61 = vmul.f32 0.044715, %v644_v46  ;;  %v674_v62 = vmul.f32 0.044715, %v642_v14  ;;  %v615_v50 = vmul.f32 %v2048_v47, %v2048_v47 }
 0x136   : > { %v1683_v55 = vpop.eup %1682  ;;  %v739_v63 = vmul.f32 0.7978846, %v707_v15  ;;  %v737_v29 = vmul.f32 0.7978846, %v705_v53  ;;  %v613_v19 = vmul.f32 %v2051_v51, %v2051_v51  ;;  %v616_v4 = vmul.f32 %v2059_v57, %v2059_v57 }
 0x137   : > { %v1685_v59 = vpop.eup %1684  ;;  %v831_v6 = vmul.f32 0.5, %v799_v23  ;;  %v797_v24 = vadd.f32 1.0, %v1683_v55  ;;  %v708_v7 = vadd.f32 %v676_v61, %v2022_v20  ;;  %v706_v8 = vadd.f32 %v674_v62, %v2029_v25  ;;  %1585 = vmatmul.mubr.msk.bf16.gmra.mrb[4].mxu1 %vm932_vm0, %v880_v33 }
 0x138   : > { %v800_v11 = vadd.f32 1.0, %v1685_v59  ;;  %1688 = vtanh.f32 %v739_v63  ;;  %v647_v0 = vmul.f32 %v615_v50, %v2048_v47  ;;  %v645_v13 = vmul.f32 %v613_v19, %v2051_v51 }
 0x139   : > { %v2073_v5 = vmul.f32 %v831_v6, %v1944_v41  ;;  %v829_v17 = vmul.f32 0.5, %v797_v24  ;;  %1690 = vtanh.f32 %v737_v29  ;;  %v740_v9 = vmul.f32 0.7978846, %v708_v7 }
 0x13a   : > { %v832_v16 = vmul.f32 0.5, %v800_v11  ;;  %v738_v52 = vmul.f32 0.7978846, %v706_v8  ;;  %v679_v35 = vmul.f32 0.044715, %v647_v0  ;;  %v648_v26 = vmul.f32 %v616_v4, %v2059_v57 }
 0x13b   : > { %v1687_v27 = vpop.eup %1686  ;;  %v2077_v31 = vmul.f32 %v829_v17, %v1964_v54  ;;  %1692 = vtanh.f32 %v740_v9  ;;  %v677_v36 = vmul.f32 0.044715, %v645_v13  ;;  %v2081_v22 = vadd.f32 %v1823_v28, %v2014_v12 }
 0x13c   : > { %v2084_v41 = vmul.f32 %v832_v16, %v1967_v3  ;;  %v798_v2 = vadd.f32 1.0, %v1687_v27  ;;  %1694 = vtanh.f32 %v738_v52  ;;  %v711_v37 = vadd.f32 %v679_v35, %v2048_v47 }
 0x13d   : > { %v709_v33 = vadd.f32 %v677_v36, %v2051_v51  ;;  %v680_v1 = vmul.f32 0.044715, %v648_v26  ;;  %v614_v54 = vmul.f32 %v2081_v22, %v2081_v22  ;;  %v881_v42 = vpack.c.bf16 %v1994_v49, %v1984_v39 }
 0x13e   : > { %v830_v43 = vmul.f32 0.5, %v798_v2  ;;  %v743_v46 = vmul.f32 0.7978846, %v711_v37  ;;  %v882_v12 = vpack.c.bf16 %v1988_v44, %v1980_v34  ;;  %v2095_v3 = vadd.f32 %v1570_v40, %v1823_v28 }
 0x13f   : > { %v741_v14 = vmul.f32 0.7978846, %v709_v33  ;;  %v712_v48 = vadd.f32 %v680_v1, %v2059_v57  ;;  %v646_v15 = vmul.f32 %v614_v54, %v2081_v22  ;;  %1588 = vmatprep.mubr.msk.bf16.mxu1 %vm932_vm0, %v881_v42  ;;  %v2101_v53 = vadd.f32 %v1823_v28, %v574_v45 }
 0x140   : > { %v862_v39 = vmul.f32 %v830_v43, %v1976_v30  ;;  %1696 = vtanh.f32 %v743_v46  ;;  %1589 = vmatmul.mubr.msk.bf16.gmra.mrb[8].mxu1 %vm932_vm0, %v882_v12  ;;  %v619_v34 = vmul.f32 %v2095_v3, %v2095_v3  ;;  %v2108_v44 = vadd.f32 %v1571_v18, %v1823_v28 }
 0x141   : > { %1698 = vtanh.f32 %v741_v14  ;;  %v744_v49 = vmul.f32 0.7978846, %v712_v48  ;;  %v678_v40 = vmul.f32 0.044715, %v646_v15  ;;  %v617_v23 = vmul.f32 %v2101_v53, %v2101_v53 }
 0x142   : > { %v1689_v61 = vpop.eup %1688  ;;  %v651_v45 = vmul.f32 %v619_v34, %v2095_v3  ;;  %v620_v30 = vmul.f32 %v2108_v44, %v2108_v44  ;;  %v2116_v62 = vadd.f32 %v1823_v28, %v577_v58  ;;  %v883_v50 = vpack.c.bf16 %v2054_v60, %v2025_v21 }
 0x143   : > { %v1691_v18 = vpop.eup %1690  ;;  %v803_v55 = vadd.f32 1.0, %v1689_v61  ;;  %1700 = vtanh.f32 %v744_v49  ;;  %v710_v63 = vadd.f32 %v678_v40, %v2081_v22  ;;  %v649_v29 = vmul.f32 %v617_v23, %v2101_v53 }
 0x144   : > { %v801_v19 = vadd.f32 1.0, %v1691_v18  ;;  %v683_v4 = vmul.f32 0.044715, %v651_v45  ;;  %v652_v59 = vmul.f32 %v620_v30, %v2108_v44  ;;  %v618_v6 = vmul.f32 %v2116_v62, %v2116_v62  ;;  %1592 = vmatprep.mubr.msk.bf16.mxu1 %vm932_vm0, %v883_v50 }
 0x145   : > { %v1693_v28 = vpop.eup %1692  ;;  %v835_v58 = vmul.f32 0.5, %v803_v55  ;;  %v742_v24 = vmul.f32 0.7978846, %v710_v63  ;;  %v681_v21 = vmul.f32 0.044715, %v649_v29  ;;  %v884_v60 = vpack.c.bf16 %v2043_v56, %v2011_v38 }
 0x146   : > { %v1695_v7 = vpop.eup %1694  ;;  %v833_v8 = vmul.f32 0.5, %v801_v19  ;;  %v804_v11 = vadd.f32 1.0, %v1693_v28  ;;  %v715_v0 = vadd.f32 %v683_v4, %v2095_v3  ;;  %v684_v13 = vmul.f32 0.044715, %v652_v59 }
 0x147   : > { %v867_v17 = vmul.f32 %v835_v58, %v2005_v10  ;;  %v802_v9 = vadd.f32 1.0, %v1695_v7  ;;  %1702 = vtanh.f32 %v742_v24  ;;  %v713_v16 = vadd.f32 %v681_v21, %v2101_v53 }
 0x148   : > { %v865_v52 = vmul.f32 %v833_v8, %v2008_v32  ;;  %v836_v35 = vmul.f32 0.5, %v804_v11  ;;  %v747_v26 = vmul.f32 0.7978846, %v715_v0  ;;  %v716_v27 = vadd.f32 %v684_v13, %v2108_v44  ;;  %1593 = vmatmul.mubr.msk.bf16.gmra.mrb[12].mxu1 %vm932_vm0, %v884_v60 }
 0x149   : > { %v834_v38 = vmul.f32 0.5, %v802_v9  ;;  %v745_v56 = vmul.f32 0.7978846, %v713_v16  ;;  %v650_v36 = vmul.f32 %v618_v6, %v2116_v62  ;;  %v885_v2 = vpack.c.bf16 %v862_v39, %v2077_v31 }
 0x14a   : > { %v1697_v37 = vpop.eup %1696  ;;  %v868_v10 = vmul.f32 %v836_v35, %v2022_v20  ;;  %1704 = vtanh.f32 %v747_v26  ;;  %v748_v33 = vmul.f32 0.7978846, %v716_v27  ;;  %v886_v32 = vpack.c.bf16 %v2084_v41, %v2073_v5 }
 0x14b   : > { %v1699_v1 = vpop.eup %1698  ;;  %v866_v54 = vmul.f32 %v834_v38, %v2029_v25  ;;  %v807_v42 = vadd.f32 1.0, %v1697_v37  ;;  %1706 = vtanh.f32 %v745_v56  ;;  %v682_v43 = vmul.f32 0.044715, %v650_v36  ;;  %1596 = vmatprep.mubr.msk.bf16.mxu1 %vm932_vm0, %v885_v2 }
 0x14c   : > { %1708 = vtanh.f32 %v748_v33  ;;  %v888_v46 = vpack.c.bf16 %v868_v10, %v867_v17  ;;  %v805_v48 = vadd.f32 1.0, %v1699_v1 }
 0x14d   : > { %v1701_v12 = vpop.eup %1700  ;;  %v714_v31 = vadd.f32 %v682_v43, %v2116_v62  ;;  %v887_v14 = vpack.c.bf16 %v866_v54, %v865_v52  ;;  %v839_v20 = vmul.f32 0.5, %v807_v42 }
 0x14e   : > { %v808_v15 = vadd.f32 1.0, %v1701_v12  ;;  %v837_v41 = vmul.f32 0.5, %v805_v48 }
 0x14f   : > { %v746_v39 = vmul.f32 0.7978846, %v714_v31  ;;  %v871_v25 = vmul.f32 %v839_v20, %v2048_v47 }
 0x150   : > { %v840_v34 = vmul.f32 0.5, %v808_v15  ;;  %1597 = vmatmul.mubr.msk.bf16.gmra.mrb[16].mxu1 %vm932_vm0, %v886_v32  ;;  %v869_v55 = vmul.f32 %v837_v41, %v2051_v51 }
 0x151   : > { %v1703_v5 = vpop.eup %1702  ;;  %1710 = vtanh.f32 %v746_v39  ;;  %1600 = vmatprep.mubr.msk.bf16.mxu1 %vm932_vm0, %v887_v14 }
 0x152   : > { %v872_v49 = vmul.f32 %v840_v34, %v2059_v57  ;;  %v806_v40 = vadd.f32 1.0, %v1703_v5 }
 0x154   : > { %v1705_v23 = vpop.eup %1704  ;;  %v838_v61 = vmul.f32 0.5, %v806_v40  ;;  %v890_v45 = vpack.c.bf16 %v872_v49, %v871_v25 }
 0x155   : > { %v1707_v30 = vpop.eup %1706  ;;  %v811_v50 = vadd.f32 1.0, %v1705_v23 }
 0x156   : > { %v1709_v18 = vpop.eup %1708  ;;  %v870_v63 = vmul.f32 %v838_v61, %v2081_v22  ;;  %v809_v4 = vadd.f32 1.0, %v1707_v30 }
 0x157   : > { %v843_v29 = vmul.f32 0.5, %v811_v50  ;;  %v812_v19 = vadd.f32 1.0, %v1709_v18 }
 0x158   : > { %1601 = vmatmul.mubr.msk.bf16.gmra.mrb[20].mxu1 %vm932_vm0, %v888_v46  ;;  %v889_v47 = vpack.c.bf16 %v870_v63, %v869_v55  ;;  %v841_v58 = vmul.f32 0.5, %v809_v4 }
 0x159   : > { %v844_v59 = vmul.f32 0.5, %v812_v19  ;;  %v875_v6 = vmul.f32 %v843_v29, %v2095_v3  ;;  %v2160_v3 = vld [vmem:[%s2272_s4] ss:$0 sm:$0xff] }
 0x15a   : > { %1604 = vmatprep.mubr.msk.bf16.mxu1 %vm932_vm0, %v889_v47  ;;  %v873_v22 = vmul.f32 %v841_v58, %v2101_v53 }
 0x15b   : > { %v1711_v57 = vpop.eup %1710  ;;  %v876_v28 = vmul.f32 %v844_v59, %v2108_v44 }
 0x15c   : > { %v810_v24 = vadd.f32 1.0, %v1711_v57 }
 0x15d   : > { %v892_v51 = vpack.c.bf16 %v876_v28, %v875_v6 }
 0x15e   : > { %v842_v21 = vmul.f32 0.5, %v810_v24 }
 0x160   : > { %v874_v60 = vmul.f32 %v842_v21, %v2116_v62  ;;  %1605 = vmatmul.mubr.msk.bf16.gmra.mrb[24].mxu1 %vm932_vm0, %v890_v45 }
 0x162   : > { %v891_v7 = vpack.c.bf16 %v874_v60, %v873_v22 }
 0x164   : > { %1608 = vmatprep.mubr.msk.bf16.mxu1 %vm932_vm0, %v891_v7 }
 0x168   : > { %1609 = vmatmul.mubr.msk.bf16.gmra.mrb[28].mxu1 %vm932_vm0, %v892_v51 }
 0x202   : > { %v1582_v44 = vpop.f32.mrb[0].mxu1 }
 0x203   : > { %v1024_v8 = vadd.f32 %v1582_v44, %v2160_v3  ;;  %v1015_v11 = vpop.f32.mrb[1].mxu1 }
 0x204   : > { %v1016_v53 = vadd.f32 %v2160_v3, %v1015_v11  ;;  %v1583_v62 = vpop.f32.mrb[2].mxu1 }
 0x205   : > { %v1450_v0 = vpack.c.bf16 %v1024_v8, %v1024_v8  ;;  %v1027_v13 = vadd.f32 %v1583_v62, %v2160_v3  ;;  %v1018_v17 = vpop.f32.mrb[3].mxu1 }
 0x206   : > { %v1448_v9 = vpack.c.bf16 %v1016_v53, %v1016_v53  ;;  %v1019_v16 = vadd.f32 %v2160_v3, %v1018_v17 }
 0x207   : > { %1273 = vst.msk [vmem:[%s2168_s8 + $0x8] sm:$0xf] %vm1270_vm1, %v1450_v0  ;;  %v1451_v52 = vpack.c.bf16 %v1027_v13, %v1027_v13 }
 0x208   : > { %1271 = vst.msk [vmem:[%s2168_s8] sm:$0xf] %vm1270_vm1, %v1448_v9  ;;  %v1449_v35 = vpack.c.bf16 %v1019_v16, %v1019_v16 }
 0x209   : > { %1274 = vst.msk [vmem:[%s2168_s8 + $0xc] sm:$0xf] %vm1270_vm1, %v1451_v52 }
 0x20a   : > { %1272 = vst.msk [vmem:[%s2168_s8 + $0x4] sm:$0xf] %vm1270_vm1, %v1449_v35  ;;  %v1586_v26 = vpop.f32.mrb[4].mxu1 }
 0x20b   : > { %v1040_v27 = vadd.f32 %v1586_v26, %v2160_v3  ;;  %v1031_v38 = vpop.f32.mrb[5].mxu1 }
 0x20c   : > { %v1032_v56 = vadd.f32 %v2160_v3, %v1031_v38  ;;  %v1587_v36 = vpop.f32.mrb[6].mxu1 }
 0x20d   : > { %v1454_v2 = vpack.c.bf16 %v1040_v27, %v1040_v27  ;;  %v1043_v37 = vadd.f32 %v1587_v36, %v2160_v3  ;;  %v1034_v10 = vpop.f32.mrb[7].mxu1 }
 0x20e   : > { %v1452_v33 = vpack.c.bf16 %v1032_v56, %v1032_v56  ;;  %v1035_v32 = vadd.f32 %v2160_v3, %v1034_v10 }
 0x20f   : > { %1277 = vst.msk [vmem:[%s2168_s8 + $0x18] sm:$0xf] %vm1270_vm1, %v1454_v2  ;;  %v1455_v1 = vpack.c.bf16 %v1043_v37, %v1043_v37 }
 0x210   : > { %1275 = vst.msk [vmem:[%s2168_s8 + $0x10] sm:$0xf] %vm1270_vm1, %v1452_v33  ;;  %v1453_v54 = vpack.c.bf16 %v1035_v32, %v1035_v32 }
 0x211   : > { %1278 = vst.msk [vmem:[%s2168_s8 + $0x1c] sm:$0xf] %vm1270_vm1, %v1455_v1 }
 0x212   : > { %1276 = vst.msk [vmem:[%s2168_s8 + $0x14] sm:$0xf] %vm1270_vm1, %v1453_v54 }
 0x213   : > { %v1590_v42 = vpop.f32.mrb[8].mxu1 }
 0x214   : > { %v1056_v43 = vadd.f32 %v1590_v42, %v2160_v3  ;;  %v1047_v46 = vpop.f32.mrb[9].mxu1 }
 0x215   : > { %v1048_v12 = vadd.f32 %v2160_v3, %v1047_v46  ;;  %v1591_v31 = vpop.f32.mrb[10].mxu1 }
 0x216   : > { %v1458_v14 = vpack.c.bf16 %v1056_v43, %v1056_v43  ;;  %v1059_v20 = vadd.f32 %v1591_v31, %v2160_v3  ;;  %v1050_v48 = vpop.f32.mrb[11].mxu1 }
 0x217   : > { %v1456_v15 = vpack.c.bf16 %v1048_v12, %v1048_v12  ;;  %v1051_v39 = vadd.f32 %v2160_v3, %v1050_v48 }
 0x218   : > { %1281 = vst.msk [vmem:[%s2168_s8 + $0x28] sm:$0xf] %vm1270_vm1, %v1458_v14  ;;  %v1459_v34 = vpack.c.bf16 %v1059_v20, %v1059_v20 }
 0x219   : > { %1279 = vst.msk [vmem:[%s2168_s8 + $0x20] sm:$0xf] %vm1270_vm1, %v1456_v15  ;;  %v1457_v5 = vpack.c.bf16 %v1051_v39, %v1051_v39 }
 0x21a   : > { %1282 = vst.msk [vmem:[%s2168_s8 + $0x2c] sm:$0xf] %vm1270_vm1, %v1459_v34 }
 0x21b   : > { %1280 = vst.msk [vmem:[%s2168_s8 + $0x24] sm:$0xf] %vm1270_vm1, %v1457_v5  ;;  %v1594_v25 = vpop.f32.mrb[12].mxu1 }
 0x21c   : > { %v1072_v41 = vadd.f32 %v1594_v25, %v2160_v3  ;;  %v1063_v49 = vpop.f32.mrb[13].mxu1 }
 0x21d   : > { %v1064_v40 = vadd.f32 %v2160_v3, %v1063_v49  ;;  %v1595_v23 = vpop.f32.mrb[14].mxu1 }
 0x21e   : > { %v1462_v61 = vpack.c.bf16 %v1072_v41, %v1072_v41  ;;  %v1075_v45 = vadd.f32 %v1595_v23, %v2160_v3  ;;  %v1066_v30 = vpop.f32.mrb[15].mxu1 }
 0x21f   : > { %v1460_v50 = vpack.c.bf16 %v1064_v40, %v1064_v40  ;;  %v1067_v18 = vadd.f32 %v2160_v3, %v1066_v30 }
 0x220   : > { %1285 = vst.msk [vmem:[%s2168_s8 + $0x38] sm:$0xf] %vm1270_vm1, %v1462_v61  ;;  %v1463_v55 = vpack.c.bf16 %v1075_v45, %v1075_v45 }
 0x221   : > { %1283 = vst.msk [vmem:[%s2168_s8 + $0x30] sm:$0xf] %vm1270_vm1, %v1460_v50  ;;  %v1461_v63 = vpack.c.bf16 %v1067_v18, %v1067_v18 }
 0x222   : > { %1286 = vst.msk [vmem:[%s2168_s8 + $0x3c] sm:$0xf] %vm1270_vm1, %v1463_v55 }
 0x223   : > { %1284 = vst.msk [vmem:[%s2168_s8 + $0x34] sm:$0xf] %vm1270_vm1, %v1461_v63  ;;  %v1598_v29 = vpop.f32.mrb[16].mxu1 }
 0x224   : > { %v1088_v19 = vadd.f32 %v1598_v29, %v2160_v3  ;;  %v1079_v4 = vpop.f32.mrb[17].mxu1 }
 0x225   : > { %v1080_v47 = vadd.f32 %v2160_v3, %v1079_v4  ;;  %v1599_v59 = vpop.f32.mrb[18].mxu1 }
 0x226   : > { %v1466_v57 = vpack.c.bf16 %v1088_v19, %v1088_v19  ;;  %v1091_v6 = vadd.f32 %v1599_v59, %v2160_v3  ;;  %v1082_v28 = vpop.f32.mrb[19].mxu1 }
 0x227   : > { %v1464_v58 = vpack.c.bf16 %v1080_v47, %v1080_v47  ;;  %v1083_v24 = vadd.f32 %v2160_v3, %v1082_v28 }
 0x228   : > { %1289 = vst.msk [vmem:[%s2168_s8 + $0x48] sm:$0xf] %vm1270_vm1, %v1466_v57  ;;  %v1467_v51 = vpack.c.bf16 %v1091_v6, %v1091_v6 }
 0x229   : > { %1287 = vst.msk [vmem:[%s2168_s8 + $0x40] sm:$0xf] %vm1270_vm1, %v1464_v58  ;;  %v1465_v21 = vpack.c.bf16 %v1083_v24, %v1083_v24 }
 0x22a   : > { %1290 = vst.msk [vmem:[%s2168_s8 + $0x4c] sm:$0xf] %vm1270_vm1, %v1467_v51 }
 0x22b   : > { %1288 = vst.msk [vmem:[%s2168_s8 + $0x44] sm:$0xf] %vm1270_vm1, %v1465_v21  ;;  %v1602_v22 = vpop.f32.mrb[20].mxu1 }
 0x22c   : > { %v1104_v60 = vadd.f32 %v1602_v22, %v2160_v3  ;;  %v1095_v7 = vpop.f32.mrb[21].mxu1 }
 0x22d   : > { %v1096_v44 = vadd.f32 %v2160_v3, %v1095_v7  ;;  %v1603_v8 = vpop.f32.mrb[22].mxu1 }
 0x22e   : > { %v1470_v11 = vpack.c.bf16 %v1104_v60, %v1104_v60  ;;  %v1107_v53 = vadd.f32 %v1603_v8, %v2160_v3  ;;  %v1098_v62 = vpop.f32.mrb[23].mxu1 }
 0x22f   : > { %v1468_v0 = vpack.c.bf16 %v1096_v44, %v1096_v44  ;;  %v1099_v13 = vadd.f32 %v2160_v3, %v1098_v62 }
 0x230   : > { %1293 = vst.msk [vmem:[%s2168_s8 + $0x58] sm:$0xf] %vm1270_vm1, %v1470_v11  ;;  %v1471_v17 = vpack.c.bf16 %v1107_v53, %v1107_v53 }
 0x231   : > { %1291 = vst.msk [vmem:[%s2168_s8 + $0x50] sm:$0xf] %vm1270_vm1, %v1468_v0  ;;  %v1469_v9 = vpack.c.bf16 %v1099_v13, %v1099_v13 }
 0x232   : > { %1294 = vst.msk [vmem:[%s2168_s8 + $0x5c] sm:$0xf] %vm1270_vm1, %v1471_v17 }
 0x233   : > { %1292 = vst.msk [vmem:[%s2168_s8 + $0x54] sm:$0xf] %vm1270_vm1, %v1469_v9  ;;  %v1606_v16 = vpop.f32.mrb[24].mxu1 }
 0x234   : > { %v1120_v52 = vadd.f32 %v1606_v16, %v2160_v3  ;;  %v1111_v35 = vpop.f32.mrb[25].mxu1 }
 0x235   : > { %v1112_v26 = vadd.f32 %v2160_v3, %v1111_v35  ;;  %v1607_v27 = vpop.f32.mrb[26].mxu1 }
 0x236   : > { %v1474_v38 = vpack.c.bf16 %v1120_v52, %v1120_v52  ;;  %v1123_v56 = vadd.f32 %v1607_v27, %v2160_v3  ;;  %v1114_v36 = vpop.f32.mrb[27].mxu1 }
 0x237   : > { %v1472_v2 = vpack.c.bf16 %v1112_v26, %v1112_v26  ;;  %v1115_v37 = vadd.f32 %v2160_v3, %v1114_v36 }
 0x238   : > { %1297 = vst.msk [vmem:[%s2168_s8 + $0x68] sm:$0xf] %vm1270_vm1, %v1474_v38  ;;  %v1475_v10 = vpack.c.bf16 %v1123_v56, %v1123_v56 }
 0x239   : > { %1295 = vst.msk [vmem:[%s2168_s8 + $0x60] sm:$0xf] %vm1270_vm1, %v1472_v2  ;;  %v1473_v33 = vpack.c.bf16 %v1115_v37, %v1115_v37 }
 0x23a   : > { %1298 = vst.msk [vmem:[%s2168_s8 + $0x6c] sm:$0xf] %vm1270_vm1, %v1475_v10 }
 0x23b   : > { %1296 = vst.msk [vmem:[%s2168_s8 + $0x64] sm:$0xf] %vm1270_vm1, %v1473_v33  ;;  %v1610_v32 = vpop.f32.mrb[28].mxu1 }
 0x23c   : > { %v1136_v1 = vadd.f32 %v1610_v32, %v2160_v3  ;;  %v1127_v54 = vpop.f32.mrb[29].mxu1 }
 0x23d   : > { %v1128_v42 = vadd.f32 %v2160_v3, %v1127_v54  ;;  %v1611_v43 = vpop.f32.mrb[30].mxu1 }
 0x23e   : > { %v1478_v46 = vpack.c.bf16 %v1136_v1, %v1136_v1  ;;  %v1139_v12 = vadd.f32 %v1611_v43, %v2160_v3  ;;  %v1130_v31 = vpop.f32.mrb[31].mxu1 }
 0x23f   : > { %v1476_v14 = vpack.c.bf16 %v1128_v42, %v1128_v42  ;;  %v1131_v20 = vadd.f32 %v2160_v3, %v1130_v31 }
 0x240   : > { %1301 = vst.msk [vmem:[%s2168_s8 + $0x78] sm:$0xf] %vm1270_vm1, %v1478_v46  ;;  %v1479_v48 = vpack.c.bf16 %v1139_v12, %v1139_v12 }
 0x241   : > { %1299 = vst.msk [vmem:[%s2168_s8 + $0x70] sm:$0xf] %vm1270_vm1, %v1476_v14  ;;  %v1477_v15 = vpack.c.bf16 %v1131_v20, %v1131_v20 }
 0x242   : > { %1302 = vst.msk [vmem:[%s2168_s8 + $0x7c] sm:$0xf] %vm1270_vm1, %v1479_v48 }
 0x243   : > { %1300 = vst.msk [vmem:[%s2168_s8 + $0x74] sm:$0xf] %vm1270_vm1, %v1477_v15 }
 0x244 PF: > { %s15_s18 = sadd.s32 1, %s1718_s18  }
 0x245   : > { %p12_p4 = scmp.ge.s32.totalorder %s15_s18, 4  }
 0x247   :  { %14 = sbr.rel (!%p12_p4) target bundleno = 1 (0x1), region = 70 }

</bundles_post_ra>
